<compile_context>
chip_gen: v7x
topology: tpu7x:2x2x1
jax: 0.10.0
libtpu: 0.0.40
codegen_flags: <defaults>
</compile_context>

<pallas_src>
import jax
import jax.numpy as jnp
from jax.experimental import pallas as pl
from jax.experimental.pallas import tpu as pltpu


# ----------------------------------------------------------------------------
# Fused forward kernel
# ----------------------------------------------------------------------------
def _fused_cnn_kernel(
    xpad_ref,                   # (N, H+2, W+2, 1)   host-padded input, NHWC
    cw2_ref,                    # (9, 16, 16)        conv2 weight [tap, c_in, c_out]
    f0w_ref,                    # (H4*W4*16, L)      fc0 weight, spatial-major rows
    fcw_ref,                    # (4, L, PW)         fc1..fc3 (LxL) and fc4 (LxO, padded)
    pt_ref,                     # (18, PW)           rows: cs1,ct1,cs2,ct2,b0..b4,cw1[0..8]
    out_ref,                    # (N, O)             logits
    a1p_ref,                    # (N, H2+2, W2+2, 16) scratch: padded pool1 (conv2 input)
    rowbuf_ref,                 # (N, W, 16)          scratch: row-maxed conv1 strip
    rbuf_ref,                   # (N, H4, W2, 16)     scratch: row-maxed conv2 output
    p2f_ref,                    # (N, H4*W4*16)       scratch: lane-dense pool2 (fc0 input)
):
    N = xpad_ref.shape[0]
    H = xpad_ref.shape[1] - 2
    W = xpad_ref.shape[2] - 2
    C = 16
    H2, W2 = H // 2, W // 2
    H4, W4 = H // 4, W // 4
    L = f0w_ref.shape[1]
    O = out_ref.shape[1]
    taps = [(ky, kx) for ky in range(3) for kx in range(3)]

    # Folded BN affines (conv bias included) and conv1 tap rows, read once.
    cs1 = pt_ref[0:1, 0:C]
    ct1 = pt_ref[1:2, 0:C]
    cs2 = pt_ref[2:3, 0:C]
    ct2 = pt_ref[3:4, 0:C]
    w1row = [pt_ref[9 + t:10 + t, 0:C] for t in range(9)]      # each (1, 16)

    # conv2 input buffer: zero once so the 1-pixel halo is zero; interior rows
    # are overwritten by the strip loop below.
    a1p_ref[...] = jnp.zeros(a1p_ref.shape, jnp.float32)

    # ---- conv1 (1->16, 3x3, pad 1) + BN + ReLU + maxpool1, strip-mined over
    #      output row pairs (accumulator per strip = 8 vregs, never spills) ----
    for r in range(H2):
        acc = jnp.zeros((N, 2, W, C), jnp.float32)
        for t, (ky, kx) in enumerate(taps):
            s = xpad_ref[:, 2 * r + ky:2 * r + ky + 2, kx:kx + W, :]   # (N,2,W,1)
            acc = acc + s * w1row[t]                                    # (N,2,W,16)
        z = jnp.maximum(acc * cs1 + ct1, 0.0)
        # pool rows on the live value, pool columns via a tiny strided-read buf
        rowbuf_ref[...] = jnp.maximum(z[:, 0], z[:, 1])                 # (N,W,16)
        pooled = jnp.maximum(rowbuf_ref[:, pl.ds(0, W2, 2), :],
                             rowbuf_ref[:, pl.ds(1, W2, 2), :])         # (N,W2,16)
        a1p_ref[:, r + 1, 1:W2 + 1, :] = pooled

    # ---- conv2 (16->16, 3x3, pad 1): 9 accumulated channel matmuls + BN + ReLU ----
    M2 = N * H2 * W2
    acc2 = jnp.zeros((M2, C), jnp.float32)
    for t, (ky, kx) in enumerate(taps):
        s2 = a1p_ref[:, ky:ky + H2, kx:kx + W2, :].reshape(M2, C)
        acc2 = acc2 + jnp.dot(s2, cw2_ref[t], preferred_element_type=jnp.float32)
    a2 = jnp.maximum(acc2 * cs2 + ct2, 0.0).reshape(N, H2, W2, C)

    # ---- maxpool2: rows on the value, columns per (i,j) while scattering the
    #      result into a lane-dense (N, H4*W4*16) buffer for fc0 ----
    rbuf_ref[...] = a2.reshape(N, H4, 2, W2, C).max(axis=2)             # (N,H4,W2,16)
    for i in range(H4):
        for j in range(W4):
            v = jnp.maximum(rbuf_ref[:, i, 2 * j, :],
                            rbuf_ref[:, i, 2 * j + 1, :])               # (N,16)
            col = (i * W4 + j) * C
            p2f_ref[:, col:col + C] = v

    # ---- MLP head: fc0 (single K=256 matmul) + fc1..fc3 (+ReLU) + fc4 logits ----
    h = jnp.dot(p2f_ref[...], f0w_ref[...], preferred_element_type=jnp.float32)
    h = jnp.maximum(h + pt_ref[4:5, 0:L], 0.0)
    for k in range(3):
        h = jnp.dot(h, fcw_ref[k, :, 0:L], preferred_element_type=jnp.float32)
        h = jnp.maximum(h + pt_ref[5 + k:6 + k, 0:L], 0.0)
    out_ref[...] = (jnp.dot(h, fcw_ref[3, :, 0:O], preferred_element_type=jnp.float32)
                    + pt_ref[8:9, 0:O])


# ----------------------------------------------------------------------------
# Host wrapper: fold BN, pack weights into 5 arrays, launch the fused kernel
# ----------------------------------------------------------------------------
def cnn_forward(p, x):
    N, Cin, H, W = x.shape
    assert Cin == 1 and H % 4 == 0 and W % 4 == 0
    C = 16
    H2, W2 = H // 2, W // 2
    H4, W4 = H // 4, W // 4
    L = p["w_fc1"].shape[0]
    O = p["w_fc4"].shape[0]
    assert p["w_fc0"].shape[1] == C * H4 * W4, "num_pixels mismatch"
    eps = 1e-5
    PW = max(C, L, O)

    # Fold conv bias + eval-mode BatchNorm into one per-channel affine.
    def fold(bias, gamma, beta, mean, var):
        scale = gamma / jnp.sqrt(var + eps)
        shift = beta - mean * scale + bias * scale
        return scale, shift

    cs1, ct1 = fold(p["b_conv1"], p["bn1_gamma"], p["bn1_beta"],
                    p["bn1_mean"], p["bn1_var"])
    cs2, ct2 = fold(p["b_conv2"], p["bn2_gamma"], p["bn2_beta"],
                    p["bn2_mean"], p["bn2_var"])

    # Conv weights in (tap, [c_in,] c_out) form, tap = ky*3 + kx.
    cw1 = p["w_conv1"].reshape(C, 9).T                              # (9, 16)
    cw2 = p["w_conv2"].transpose(2, 3, 1, 0).reshape(9, C, C)       # (9, 16, 16)

    # One small parameter table: BN affines, fc biases, conv1 tap rows.
    def row(v):
        return jnp.pad(v, (0, PW - v.shape[0]))
    ptable = jnp.stack(
        [row(cs1), row(ct1), row(cs2), row(ct2),
         row(p["b_fc0"]), row(p["b_fc1"]), row(p["b_fc2"]), row(p["b_fc3"]),
         row(p["b_fc4"])] + [row(cw1[t]) for t in range(9)], axis=0)    # (18, PW)

    # fc0 columns are ordered (c, h, w) by torch's view(N,-1) on NCHW; the
    # kernel consumes them spatial-major with rows ordered ((i*W4 + j)*16 + c).
    f0w = (p["w_fc0"].reshape(L, C, H4, W4).transpose(2, 3, 1, 0)
           .reshape(H4 * W4 * C, L))                                    # (256, L)

    # Stack fc1..fc3 (LxL) and fc4 (LxO, zero-padded to L x PW) weights.
    def padw(w):
        return jnp.pad(w, ((0, 0), (0, PW - w.shape[1])))
    fcw = jnp.stack([padw(p["w_fc1"].T), padw(p["w_fc2"].T),
                     padw(p["w_fc3"].T), padw(p["w_fc4"].T)], axis=0)   # (4, L, PW)

    # Host-side padding: the halo comes for free with the input DMA.
    xpad = jnp.pad(x.reshape(N, H, W, 1), ((0, 0), (1, 1), (1, 1), (0, 0)))

    vmem = pl.BlockSpec(memory_space=pltpu.MemorySpace.VMEM)
    return pl.pallas_call(
        _fused_cnn_kernel,
        out_shape=jax.ShapeDtypeStruct((N, O), jnp.float32),
        in_specs=[vmem] * 5,
        out_specs=vmem,
        scratch_shapes=[
            pltpu.VMEM((N, H2 + 2, W2 + 2, C), jnp.float32),   # padded pool1 / conv2 input
            pltpu.VMEM((N, W, C), jnp.float32),                # conv1 strip row-max buffer
            pltpu.VMEM((N, H4, W2, C), jnp.float32),           # conv2 row-max buffer
            pltpu.VMEM((N, H4 * W4 * C), jnp.float32),         # lane-dense pool2 (fc0 in)
        ],
    )(xpad, cw2, f0w, fcw, ptable)


# ----------------------------------------------------------------------------
# Parameters (PyTorch-default init) and a pure-JAX reference for verification
# ----------------------------------------------------------------------------
def init_params(key, output_size, num_pixels, layer_dim):
    def uniform(k, shape, fan_in):
        bound = 1.0 / (fan_in ** 0.5)
        return jax.random.uniform(k, shape, jnp.float32, -bound, bound)

    ks = jax.random.split(key, 14)
    p = {}
    p["w_conv1"] = uniform(ks[0], (16, 1, 3, 3), 1 * 9)
    p["b_conv1"] = uniform(ks[1], (16,), 1 * 9)
    p["w_conv2"] = uniform(ks[2], (16, 16, 3, 3), 16 * 9)
    p["b_conv2"] = uniform(ks[3], (16,), 16 * 9)
    for i in (1, 2):   # BatchNorm2d(16), eval mode with default running stats
        p[f"bn{i}_gamma"] = jnp.ones((16,), jnp.float32)
        p[f"bn{i}_beta"] = jnp.zeros((16,), jnp.float32)
        p[f"bn{i}_mean"] = jnp.zeros((16,), jnp.float32)
        p[f"bn{i}_var"] = jnp.ones((16,), jnp.float32)
    dims = [num_pixels, layer_dim, layer_dim, layer_dim, layer_dim, output_size]
    for li in range(5):
        fan_in, fan_out = dims[li], dims[li + 1]
        p[f"w_fc{li}"] = uniform(ks[4 + 2 * li], (fan_out, fan_in), fan_in)
        p[f"b_fc{li}"] = uniform(ks[5 + 2 * li], (fan_out,), fan_in)
    return p


def cnn_forward_ref(p, x):
    """Pure-JAX/XLA reference implementing the PyTorch module (eval mode)."""
    eps = 1e-5

    def conv_bn_relu(x, w, b, g, beta, mean, var):
        y = jax.lax.conv_general_dilated(
            x, w, window_strides=(1, 1), padding=((1, 1), (1, 1)),
            dimension_numbers=("NCHW", "OIHW", "NCHW"),
            precision=jax.lax.Precision.HIGHEST)
        y = y + b[None, :, None, None]
        y = (y - mean[None, :, None, None]) * (
            g[None, :, None, None] / jnp.sqrt(var[None, :, None, None] + eps))
        y = y + beta[None, :, None, None]
        return jnp.maximum(y, 0.0)

    def pool(x):
        N, C, H, W = x.shape
        return x.reshape(N, C, H // 2, 2, W // 2, 2).max(axis=(3, 5))

    x = pool(conv_bn_relu(x, p["w_conv1"], p["b_conv1"], p["bn1_gamma"],
                          p["bn1_beta"], p["bn1_mean"], p["bn1_var"]))
    x = pool(conv_bn_relu(x, p["w_conv2"], p["b_conv2"], p["bn2_gamma"],
                          p["bn2_beta"], p["bn2_mean"], p["bn2_var"]))
    x = x.reshape(x.shape[0], -1)
    for li in range(4):
        x = jnp.maximum(
            jnp.dot(x, p[f"w_fc{li}"].T, precision=jax.lax.Precision.HIGHEST)
            + p[f"b_fc{li}"], 0.0)
    return jnp.dot(x, p["w_fc4"].T, precision=jax.lax.Precision.HIGHEST) + p["b_fc4"]


# ----------------------------------------------------------------------------
if __name__ == "__main__":
    batch, H, W = 2, 16, 16
    output_size, layer_dim = 10, 32
    num_pixels = 16 * (H // 4) * (W // 4)          # 16 channels * 4 * 4 = 256

    key = jax.random.PRNGKey(0)
    k_params, k_x = jax.random.split(key)
    params = init_params(k_params, output_size, num_pixels, layer_dim)
    x = jax.random.normal(k_x, (batch, 1, H, W), jnp.float32)   # NCHW like PyTorch

    out = jax.block_until_ready(jax.jit(cnn_forward)(params, x))
    assert out.shape == (batch, output_size), out.shape
    assert bool(jnp.all(jnp.isfinite(out)))

    ref = jax.block_until_ready(cnn_forward_ref(params, x))
    max_err = float(jnp.max(jnp.abs(out - ref)))
    assert max_err < 1e-2, f"mismatch vs reference: max abs err = {max_err}"

    print("KERNEL_OK")
</pallas_src>

<mosaic_0001>
module attributes {stable_mosaic.version = 11 : i64} {
  func.func @_fused_cnn_kernel(%arg0: memref<2x18x18x1xf32, #tpu.memory_space<vmem>>, %arg1: memref<9x16x16xf32, #tpu.memory_space<vmem>>, %arg2: memref<256x32xf32, #tpu.memory_space<vmem>>, %arg3: memref<4x32x32xf32, #tpu.memory_space<vmem>>, %arg4: memref<18x32xf32, #tpu.memory_space<vmem>>, %arg5: memref<2x10xf32, #tpu.memory_space<vmem>>, %arg6: memref<2x10x10x16xf32, #tpu.memory_space<vmem>>, %arg7: memref<2x16x16xf32, #tpu.memory_space<vmem>>, %arg8: memref<2x4x8x16xf32, #tpu.memory_space<vmem>>, %arg9: memref<2x256xf32, #tpu.memory_space<vmem>>) attributes {dimension_semantics = [], scalar_prefetch = 0 : i64, scratch_operands = 4 : i64, tpu.core_type = #tpu.core_type<tc>} {
    %c0 = arith.constant 0 : index
    %c0_0 = arith.constant 0 : index
    %0 = vector.load %arg4[%c0, %c0_0] : memref<18x32xf32, #tpu.memory_space<vmem>>, vector<1x16xf32>
    %c1 = arith.constant 1 : index
    %c0_1 = arith.constant 0 : index
    %1 = vector.load %arg4[%c1, %c0_1] : memref<18x32xf32, #tpu.memory_space<vmem>>, vector<1x16xf32>
    %c2 = arith.constant 2 : index
    %c0_2 = arith.constant 0 : index
    %2 = vector.load %arg4[%c2, %c0_2] : memref<18x32xf32, #tpu.memory_space<vmem>>, vector<1x16xf32>
    %c3 = arith.constant 3 : index
    %c0_3 = arith.constant 0 : index
    %3 = vector.load %arg4[%c3, %c0_3] : memref<18x32xf32, #tpu.memory_space<vmem>>, vector<1x16xf32>
    %c9 = arith.constant 9 : index
    %c0_4 = arith.constant 0 : index
    %4 = vector.load %arg4[%c9, %c0_4] : memref<18x32xf32, #tpu.memory_space<vmem>>, vector<1x16xf32>
    %c10 = arith.constant 10 : index
    %c0_5 = arith.constant 0 : index
    %5 = vector.load %arg4[%c10, %c0_5] : memref<18x32xf32, #tpu.memory_space<vmem>>, vector<1x16xf32>
    %c11 = arith.constant 11 : index
    %c0_6 = arith.constant 0 : index
    %6 = vector.load %arg4[%c11, %c0_6] : memref<18x32xf32, #tpu.memory_space<vmem>>, vector<1x16xf32>
    %c12 = arith.constant 12 : index
    %c0_7 = arith.constant 0 : index
    %7 = vector.load %arg4[%c12, %c0_7] : memref<18x32xf32, #tpu.memory_space<vmem>>, vector<1x16xf32>
    %c13 = arith.constant 13 : index
    %c0_8 = arith.constant 0 : index
    %8 = vector.load %arg4[%c13, %c0_8] : memref<18x32xf32, #tpu.memory_space<vmem>>, vector<1x16xf32>
    %c14 = arith.constant 14 : index
    %c0_9 = arith.constant 0 : index
    %9 = vector.load %arg4[%c14, %c0_9] : memref<18x32xf32, #tpu.memory_space<vmem>>, vector<1x16xf32>
    %c15 = arith.constant 15 : index
    %c0_10 = arith.constant 0 : index
    %10 = vector.load %arg4[%c15, %c0_10] : memref<18x32xf32, #tpu.memory_space<vmem>>, vector<1x16xf32>
    %c16 = arith.constant 16 : index
    %c0_11 = arith.constant 0 : index
    %11 = vector.load %arg4[%c16, %c0_11] : memref<18x32xf32, #tpu.memory_space<vmem>>, vector<1x16xf32>
    %c17 = arith.constant 17 : index
    %c0_12 = arith.constant 0 : index
    %12 = vector.load %arg4[%c17, %c0_12] : memref<18x32xf32, #tpu.memory_space<vmem>>, vector<1x16xf32>
    %cst = arith.constant 0.000000e+00 : f32
    %13 = vector.broadcast %cst : f32 to vector<2x10x10x16xf32>
    %c0_13 = arith.constant 0 : index
    %c0_14 = arith.constant 0 : index
    %c0_15 = arith.constant 0 : index
    %c0_16 = arith.constant 0 : index
    %14 = vector.load %arg6[%c0_13, %c0_14, %c0_15, %c0_16] : memref<2x10x10x16xf32, #tpu.memory_space<vmem>>, vector<2x10x10x16xf32>
    tpu.vector_store %arg6[%c0_13, %c0_14, %c0_15, %c0_16], %13 {strides = array<i32>} : memref<2x10x10x16xf32, #tpu.memory_space<vmem>>, vector<2x10x10x16xf32>,
    %cst_17 = arith.constant 0.000000e+00 : f32
    %15 = vector.broadcast %cst_17 : f32 to vector<2x2x16x16xf32>
    %c0_18 = arith.constant 0 : index
    %c0_19 = arith.constant 0 : index
    %c0_20 = arith.constant 0 : index
    %c0_21 = arith.constant 0 : index
    %16 = vector.load %arg0[%c0_18, %c0_19, %c0_20, %c0_21] : memref<2x18x18x1xf32, #tpu.memory_space<vmem>>, vector<2x2x16x1xf32>
    %17 = vector.shape_cast %4 : vector<1x16xf32> to vector<1x1x1x16xf32>
    %18 = vector.broadcast %16 : vector<2x2x16x1xf32> to vector<2x2x16x16xf32>
    %19 = vector.broadcast %17 : vector<1x1x1x16xf32> to vector<2x2x16x16xf32>
    %20 = arith.mulf %18, %19 : vector<2x2x16x16xf32>
    %21 = arith.addf %15, %20 : vector<2x2x16x16xf32>
    %c0_22 = arith.constant 0 : index
    %c0_23 = arith.constant 0 : index
    %c1_24 = arith.constant 1 : index
    %c0_25 = arith.constant 0 : index
    %22 = vector.load %arg0[%c0_22, %c0_23, %c1_24, %c0_25] : memref<2x18x18x1xf32, #tpu.memory_space<vmem>>, vector<2x2x16x1xf32>
    %23 = vector.shape_cast %5 : vector<1x16xf32> to vector<1x1x1x16xf32>
    %24 = vector.broadcast %22 : vector<2x2x16x1xf32> to vector<2x2x16x16xf32>
    %25 = vector.broadcast %23 : vector<1x1x1x16xf32> to vector<2x2x16x16xf32>
    %26 = arith.mulf %24, %25 : vector<2x2x16x16xf32>
    %27 = arith.addf %21, %26 : vector<2x2x16x16xf32>
    %c0_26 = arith.constant 0 : index
    %c0_27 = arith.constant 0 : index
    %c2_28 = arith.constant 2 : index
    %c0_29 = arith.constant 0 : index
    %28 = vector.load %arg0[%c0_26, %c0_27, %c2_28, %c0_29] : memref<2x18x18x1xf32, #tpu.memory_space<vmem>>, vector<2x2x16x1xf32>
    %29 = vector.shape_cast %6 : vector<1x16xf32> to vector<1x1x1x16xf32>
    %30 = vector.broadcast %28 : vector<2x2x16x1xf32> to vector<2x2x16x16xf32>
    %31 = vector.broadcast %29 : vector<1x1x1x16xf32> to vector<2x2x16x16xf32>
    %32 = arith.mulf %30, %31 : vector<2x2x16x16xf32>
    %33 = arith.addf %27, %32 : vector<2x2x16x16xf32>
    %c0_30 = arith.constant 0 : index
    %c1_31 = arith.constant 1 : index
    %c0_32 = arith.constant 0 : index
    %c0_33 = arith.constant 0 : index
    %34 = vector.load %arg0[%c0_30, %c1_31, %c0_32, %c0_33] : memref<2x18x18x1xf32, #tpu.memory_space<vmem>>, vector<2x2x16x1xf32>
    %35 = vector.shape_cast %7 : vector<1x16xf32> to vector<1x1x1x16xf32>
    %36 = vector.broadcast %34 : vector<2x2x16x1xf32> to vector<2x2x16x16xf32>
    %37 = vector.broadcast %35 : vector<1x1x1x16xf32> to vector<2x2x16x16xf32>
    %38 = arith.mulf %36, %37 : vector<2x2x16x16xf32>
    %39 = arith.addf %33, %38 : vector<2x2x16x16xf32>
    %c0_34 = arith.constant 0 : index
    %c1_35 = arith.constant 1 : index
    %c1_36 = arith.constant 1 : index
    %c0_37 = arith.constant 0 : index
    %40 = vector.load %arg0[%c0_34, %c1_35, %c1_36, %c0_37] : memref<2x18x18x1xf32, #tpu.memory_space<vmem>>, vector<2x2x16x1xf32>
    %41 = vector.shape_cast %8 : vector<1x16xf32> to vector<1x1x1x16xf32>
    %42 = vector.broadcast %40 : vector<2x2x16x1xf32> to vector<2x2x16x16xf32>
    %43 = vector.broadcast %41 : vector<1x1x1x16xf32> to vector<2x2x16x16xf32>
    %44 = arith.mulf %42, %43 : vector<2x2x16x16xf32>
    %45 = arith.addf %39, %44 : vector<2x2x16x16xf32>
    %c0_38 = arith.constant 0 : index
    %c1_39 = arith.constant 1 : index
    %c2_40 = arith.constant 2 : index
    %c0_41 = arith.constant 0 : index
    %46 = vector.load %arg0[%c0_38, %c1_39, %c2_40, %c0_41] : memref<2x18x18x1xf32, #tpu.memory_space<vmem>>, vector<2x2x16x1xf32>
    %47 = vector.shape_cast %9 : vector<1x16xf32> to vector<1x1x1x16xf32>
    %48 = vector.broadcast %46 : vector<2x2x16x1xf32> to vector<2x2x16x16xf32>
    %49 = vector.broadcast %47 : vector<1x1x1x16xf32> to vector<2x2x16x16xf32>
    %50 = arith.mulf %48, %49 : vector<2x2x16x16xf32>
    %51 = arith.addf %45, %50 : vector<2x2x16x16xf32>
    %c0_42 = arith.constant 0 : index
    %c2_43 = arith.constant 2 : index
    %c0_44 = arith.constant 0 : index
    %c0_45 = arith.constant 0 : index
    %52 = vector.load %arg0[%c0_42, %c2_43, %c0_44, %c0_45] : memref<2x18x18x1xf32, #tpu.memory_space<vmem>>, vector<2x2x16x1xf32>
    %53 = vector.shape_cast %10 : vector<1x16xf32> to vector<1x1x1x16xf32>
    %54 = vector.broadcast %52 : vector<2x2x16x1xf32> to vector<2x2x16x16xf32>
    %55 = vector.broadcast %53 : vector<1x1x1x16xf32> to vector<2x2x16x16xf32>
    %56 = arith.mulf %54, %55 : vector<2x2x16x16xf32>
    %57 = arith.addf %51, %56 : vector<2x2x16x16xf32>
    %c0_46 = arith.constant 0 : index
    %c2_47 = arith.constant 2 : index
    %c1_48 = arith.constant 1 : index
    %c0_49 = arith.constant 0 : index
    %58 = vector.load %arg0[%c0_46, %c2_47, %c1_48, %c0_49] : memref<2x18x18x1xf32, #tpu.memory_space<vmem>>, vector<2x2x16x1xf32>
    %59 = vector.shape_cast %11 : vector<1x16xf32> to vector<1x1x1x16xf32>
    %60 = vector.broadcast %58 : vector<2x2x16x1xf32> to vector<2x2x16x16xf32>
    %61 = vector.broadcast %59 : vector<1x1x1x16xf32> to vector<2x2x16x16xf32>
    %62 = arith.mulf %60, %61 : vector<2x2x16x16xf32>
    %63 = arith.addf %57, %62 : vector<2x2x16x16xf32>
    %c0_50 = arith.constant 0 : index
    %c2_51 = arith.constant 2 : index
    %c2_52 = arith.constant 2 : index
    %c0_53 = arith.constant 0 : index
    %64 = vector.load %arg0[%c0_50, %c2_51, %c2_52, %c0_53] : memref<2x18x18x1xf32, #tpu.memory_space<vmem>>, vector<2x2x16x1xf32>
    %65 = vector.shape_cast %12 : vector<1x16xf32> to vector<1x1x1x16xf32>
    %66 = vector.broadcast %64 : vector<2x2x16x1xf32> to vector<2x2x16x16xf32>
    %67 = vector.broadcast %65 : vector<1x1x1x16xf32> to vector<2x2x16x16xf32>
    %68 = arith.mulf %66, %67 : vector<2x2x16x16xf32>
    %69 = arith.addf %63, %68 : vector<2x2x16x16xf32>
    %70 = vector.shape_cast %0 : vector<1x16xf32> to vector<1x1x1x16xf32>
    %71 = vector.broadcast %70 : vector<1x1x1x16xf32> to vector<2x2x16x16xf32>
    %72 = arith.mulf %69, %71 : vector<2x2x16x16xf32>
    %73 = vector.shape_cast %1 : vector<1x16xf32> to vector<1x1x1x16xf32>
    %74 = vector.broadcast %73 : vector<1x1x1x16xf32> to vector<2x2x16x16xf32>
    %75 = arith.addf %72, %74 : vector<2x2x16x16xf32>
    %cst_54 = arith.constant 0.000000e+00 : f32
    %76 = vector.broadcast %cst_54 : f32 to vector<2x2x16x16xf32>
    %77 = arith.maximumf %75, %76 : vector<2x2x16x16xf32>
    %78 = vector.extract_strided_slice %77 {offsets = [0, 0, 0, 0], sizes = [2, 1, 16, 16], strides = [1, 1, 1, 1]} : vector<2x2x16x16xf32> to vector<2x1x16x16xf32>
    %79 = vector.shape_cast %78 : vector<2x1x16x16xf32> to vector<2x16x16xf32>
    %80 = vector.extract_strided_slice %77 {offsets = [0, 1, 0, 0], sizes = [2, 1, 16, 16], strides = [1, 1, 1, 1]} : vector<2x2x16x16xf32> to vector<2x1x16x16xf32>
    %81 = vector.shape_cast %80 : vector<2x1x16x16xf32> to vector<2x16x16xf32>
    %82 = arith.maximumf %79, %81 : vector<2x16x16xf32>
    %c0_55 = arith.constant 0 : index
    %c0_56 = arith.constant 0 : index
    %c0_57 = arith.constant 0 : index
    %83 = vector.load %arg7[%c0_55, %c0_56, %c0_57] : memref<2x16x16xf32, #tpu.memory_space<vmem>>, vector<2x16x16xf32>
    tpu.vector_store %arg7[%c0_55, %c0_56, %c0_57], %82 {strides = array<i32>} : memref<2x16x16xf32, #tpu.memory_space<vmem>>, vector<2x16x16xf32>,
    %c0_58 = arith.constant 0 : index
    %c0_59 = arith.constant 0 : index
    %c0_60 = arith.constant 0 : index
    %84 = tpu.strided_load %arg7[%c0_58, %c0_59, %c0_60] {strides = array<i32: 1, 2, 1>} : memref<2x16x16xf32, #tpu.memory_space<vmem>>, vector<2x8x16xf32>
    %c0_61 = arith.constant 0 : index
    %c1_62 = arith.constant 1 : index
    %c0_63 = arith.constant 0 : index
    %85 = tpu.strided_load %arg7[%c0_61, %c1_62, %c0_63] {strides = array<i32: 1, 2, 1>} : memref<2x16x16xf32, #tpu.memory_space<vmem>>, vector<2x8x16xf32>
    %86 = arith.maximumf %84, %85 : vector<2x8x16xf32>
    %c0_64 = arith.constant 0 : index
    %c1_65 = arith.constant 1 : index
    %c1_66 = arith.constant 1 : index
    %c0_67 = arith.constant 0 : index
    %87 = vector.load %arg6[%c0_64, %c1_65, %c1_66, %c0_67] : memref<2x10x10x16xf32, #tpu.memory_space<vmem>>, vector<2x1x8x16xf32>
    %88 = vector.shape_cast %87 : vector<2x1x8x16xf32> to vector<2x8x16xf32>
    %89 = vector.shape_cast %86 : vector<2x8x16xf32> to vector<2x1x8x16xf32>
    tpu.vector_store %arg6[%c0_64, %c1_65, %c1_66, %c0_67], %89 {strides = array<i32>} : memref<2x10x10x16xf32, #tpu.memory_space<vmem>>, vector<2x1x8x16xf32>,
    %cst_68 = arith.constant 0.000000e+00 : f32
    %90 = vector.broadcast %cst_68 : f32 to vector<2x2x16x16xf32>
    %c0_69 = arith.constant 0 : index
    %c2_70 = arith.constant 2 : index
    %c0_71 = arith.constant 0 : index
    %c0_72 = arith.constant 0 : index
    %91 = vector.load %arg0[%c0_69, %c2_70, %c0_71, %c0_72] : memref<2x18x18x1xf32, #tpu.memory_space<vmem>>, vector<2x2x16x1xf32>
    %92 = vector.shape_cast %4 : vector<1x16xf32> to vector<1x1x1x16xf32>
    %93 = vector.broadcast %91 : vector<2x2x16x1xf32> to vector<2x2x16x16xf32>
    %94 = vector.broadcast %92 : vector<1x1x1x16xf32> to vector<2x2x16x16xf32>
    %95 = arith.mulf %93, %94 : vector<2x2x16x16xf32>
    %96 = arith.addf %90, %95 : vector<2x2x16x16xf32>
    %c0_73 = arith.constant 0 : index
    %c2_74 = arith.constant 2 : index
    %c1_75 = arith.constant 1 : index
    %c0_76 = arith.constant 0 : index
    %97 = vector.load %arg0[%c0_73, %c2_74, %c1_75, %c0_76] : memref<2x18x18x1xf32, #tpu.memory_space<vmem>>, vector<2x2x16x1xf32>
    %98 = vector.shape_cast %5 : vector<1x16xf32> to vector<1x1x1x16xf32>
    %99 = vector.broadcast %97 : vector<2x2x16x1xf32> to vector<2x2x16x16xf32>
    %100 = vector.broadcast %98 : vector<1x1x1x16xf32> to vector<2x2x16x16xf32>
    %101 = arith.mulf %99, %100 : vector<2x2x16x16xf32>
    %102 = arith.addf %96, %101 : vector<2x2x16x16xf32>
    %c0_77 = arith.constant 0 : index
    %c2_78 = arith.constant 2 : index
    %c2_79 = arith.constant 2 : index
    %c0_80 = arith.constant 0 : index
    %103 = vector.load %arg0[%c0_77, %c2_78, %c2_79, %c0_80] : memref<2x18x18x1xf32, #tpu.memory_space<vmem>>, vector<2x2x16x1xf32>
    %104 = vector.shape_cast %6 : vector<1x16xf32> to vector<1x1x1x16xf32>
    %105 = vector.broadcast %103 : vector<2x2x16x1xf32> to vector<2x2x16x16xf32>
    %106 = vector.broadcast %104 : vector<1x1x1x16xf32> to vector<2x2x16x16xf32>
    %107 = arith.mulf %105, %106 : vector<2x2x16x16xf32>
    %108 = arith.addf %102, %107 : vector<2x2x16x16xf32>
    %c0_81 = arith.constant 0 : index
    %c3_82 = arith.constant 3 : index
    %c0_83 = arith.constant 0 : index
    %c0_84 = arith.constant 0 : index
    %109 = vector.load %arg0[%c0_81, %c3_82, %c0_83, %c0_84] : memref<2x18x18x1xf32, #tpu.memory_space<vmem>>, vector<2x2x16x1xf32>
    %110 = vector.shape_cast %7 : vector<1x16xf32> to vector<1x1x1x16xf32>
    %111 = vector.broadcast %109 : vector<2x2x16x1xf32> to vector<2x2x16x16xf32>
    %112 = vector.broadcast %110 : vector<1x1x1x16xf32> to vector<2x2x16x16xf32>
    %113 = arith.mulf %111, %112 : vector<2x2x16x16xf32>
    %114 = arith.addf %108, %113 : vector<2x2x16x16xf32>
    %c0_85 = arith.constant 0 : index
    %c3_86 = arith.constant 3 : index
    %c1_87 = arith.constant 1 : index
    %c0_88 = arith.constant 0 : index
    %115 = vector.load %arg0[%c0_85, %c3_86, %c1_87, %c0_88] : memref<2x18x18x1xf32, #tpu.memory_space<vmem>>, vector<2x2x16x1xf32>
    %116 = vector.shape_cast %8 : vector<1x16xf32> to vector<1x1x1x16xf32>
    %117 = vector.broadcast %115 : vector<2x2x16x1xf32> to vector<2x2x16x16xf32>
    %118 = vector.broadcast %116 : vector<1x1x1x16xf32> to vector<2x2x16x16xf32>
    %119 = arith.mulf %117, %118 : vector<2x2x16x16xf32>
    %120 = arith.addf %114, %119 : vector<2x2x16x16xf32>
    %c0_89 = arith.constant 0 : index
    %c3_90 = arith.constant 3 : index
    %c2_91 = arith.constant 2 : index
    %c0_92 = arith.constant 0 : index
    %121 = vector.load %arg0[%c0_89, %c3_90, %c2_91, %c0_92] : memref<2x18x18x1xf32, #tpu.memory_space<vmem>>, vector<2x2x16x1xf32>
    %122 = vector.shape_cast %9 : vector<1x16xf32> to vector<1x1x1x16xf32>
    %123 = vector.broadcast %121 : vector<2x2x16x1xf32> to vector<2x2x16x16xf32>
    %124 = vector.broadcast %122 : vector<1x1x1x16xf32> to vector<2x2x16x16xf32>
    %125 = arith.mulf %123, %124 : vector<2x2x16x16xf32>
    %126 = arith.addf %120, %125 : vector<2x2x16x16xf32>
    %c0_93 = arith.constant 0 : index
    %c4 = arith.constant 4 : index
    %c0_94 = arith.constant 0 : index
    %c0_95 = arith.constant 0 : index
    %127 = vector.load %arg0[%c0_93, %c4, %c0_94, %c0_95] : memref<2x18x18x1xf32, #tpu.memory_space<vmem>>, vector<2x2x16x1xf32>
    %128 = vector.shape_cast %10 : vector<1x16xf32> to vector<1x1x1x16xf32>
    %129 = vector.broadcast %127 : vector<2x2x16x1xf32> to vector<2x2x16x16xf32>
    %130 = vector.broadcast %128 : vector<1x1x1x16xf32> to vector<2x2x16x16xf32>
    %131 = arith.mulf %129, %130 : vector<2x2x16x16xf32>
    %132 = arith.addf %126, %131 : vector<2x2x16x16xf32>
    %c0_96 = arith.constant 0 : index
    %c4_97 = arith.constant 4 : index
    %c1_98 = arith.constant 1 : index
    %c0_99 = arith.constant 0 : index
    %133 = vector.load %arg0[%c0_96, %c4_97, %c1_98, %c0_99] : memref<2x18x18x1xf32, #tpu.memory_space<vmem>>, vector<2x2x16x1xf32>
    %134 = vector.shape_cast %11 : vector<1x16xf32> to vector<1x1x1x16xf32>
    %135 = vector.broadcast %133 : vector<2x2x16x1xf32> to vector<2x2x16x16xf32>
    %136 = vector.broadcast %134 : vector<1x1x1x16xf32> to vector<2x2x16x16xf32>
    %137 = arith.mulf %135, %136 : vector<2x2x16x16xf32>
    %138 = arith.addf %132, %137 : vector<2x2x16x16xf32>
    %c0_100 = arith.constant 0 : index
    %c4_101 = arith.constant 4 : index
    %c2_102 = arith.constant 2 : index
    %c0_103 = arith.constant 0 : index
    %139 = vector.load %arg0[%c0_100, %c4_101, %c2_102, %c0_103] : memref<2x18x18x1xf32, #tpu.memory_space<vmem>>, vector<2x2x16x1xf32>
    %140 = vector.shape_cast %12 : vector<1x16xf32> to vector<1x1x1x16xf32>
    %141 = vector.broadcast %139 : vector<2x2x16x1xf32> to vector<2x2x16x16xf32>
    %142 = vector.broadcast %140 : vector<1x1x1x16xf32> to vector<2x2x16x16xf32>
    %143 = arith.mulf %141, %142 : vector<2x2x16x16xf32>
    %144 = arith.addf %138, %143 : vector<2x2x16x16xf32>
    %145 = vector.shape_cast %0 : vector<1x16xf32> to vector<1x1x1x16xf32>
    %146 = vector.broadcast %145 : vector<1x1x1x16xf32> to vector<2x2x16x16xf32>
    %147 = arith.mulf %144, %146 : vector<2x2x16x16xf32>
    %148 = vector.shape_cast %1 : vector<1x16xf32> to vector<1x1x1x16xf32>
    %149 = vector.broadcast %148 : vector<1x1x1x16xf32> to vector<2x2x16x16xf32>
    %150 = arith.addf %147, %149 : vector<2x2x16x16xf32>
    %cst_104 = arith.constant 0.000000e+00 : f32
    %151 = vector.broadcast %cst_104 : f32 to vector<2x2x16x16xf32>
    %152 = arith.maximumf %150, %151 : vector<2x2x16x16xf32>
    %153 = vector.extract_strided_slice %152 {offsets = [0, 0, 0, 0], sizes = [2, 1, 16, 16], strides = [1, 1, 1, 1]} : vector<2x2x16x16xf32> to vector<2x1x16x16xf32>
    %154 = vector.shape_cast %153 : vector<2x1x16x16xf32> to vector<2x16x16xf32>
    %155 = vector.extract_strided_slice %152 {offsets = [0, 1, 0, 0], sizes = [2, 1, 16, 16], strides = [1, 1, 1, 1]} : vector<2x2x16x16xf32> to vector<2x1x16x16xf32>
    %156 = vector.shape_cast %155 : vector<2x1x16x16xf32> to vector<2x16x16xf32>
    %157 = arith.maximumf %154, %156 : vector<2x16x16xf32>
    %c0_105 = arith.constant 0 : index
    %c0_106 = arith.constant 0 : index
    %c0_107 = arith.constant 0 : index
    %158 = vector.load %arg7[%c0_105, %c0_106, %c0_107] : memref<2x16x16xf32, #tpu.memory_space<vmem>>, vector<2x16x16xf32>
    tpu.vector_store %arg7[%c0_105, %c0_106, %c0_107], %157 {strides = array<i32>} : memref<2x16x16xf32, #tpu.memory_space<vmem>>, vector<2x16x16xf32>,
    %c0_108 = arith.constant 0 : index
    %c0_109 = arith.constant 0 : index
    %c0_110 = arith.constant 0 : index
    %159 = tpu.strided_load %arg7[%c0_108, %c0_109, %c0_110] {strides = array<i32: 1, 2, 1>} : memref<2x16x16xf32, #tpu.memory_space<vmem>>, vector<2x8x16xf32>
    %c0_111 = arith.constant 0 : index
    %c1_112 = arith.constant 1 : index
    %c0_113 = arith.constant 0 : index
    %160 = tpu.strided_load %arg7[%c0_111, %c1_112, %c0_113] {strides = array<i32: 1, 2, 1>} : memref<2x16x16xf32, #tpu.memory_space<vmem>>, vector<2x8x16xf32>
    %161 = arith.maximumf %159, %160 : vector<2x8x16xf32>
    %c0_114 = arith.constant 0 : index
    %c2_115 = arith.constant 2 : index
    %c1_116 = arith.constant 1 : index
    %c0_117 = arith.constant 0 : index
    %162 = vector.load %arg6[%c0_114, %c2_115, %c1_116, %c0_117] : memref<2x10x10x16xf32, #tpu.memory_space<vmem>>, vector<2x1x8x16xf32>
    %163 = vector.shape_cast %162 : vector<2x1x8x16xf32> to vector<2x8x16xf32>
    %164 = vector.shape_cast %161 : vector<2x8x16xf32> to vector<2x1x8x16xf32>
    tpu.vector_store %arg6[%c0_114, %c2_115, %c1_116, %c0_117], %164 {strides = array<i32>} : memref<2x10x10x16xf32, #tpu.memory_space<vmem>>, vector<2x1x8x16xf32>,
    %cst_118 = arith.constant 0.000000e+00 : f32
    %165 = vector.broadcast %cst_118 : f32 to vector<2x2x16x16xf32>
    %c0_119 = arith.constant 0 : index
    %c4_120 = arith.constant 4 : index
    %c0_121 = arith.constant 0 : index
    %c0_122 = arith.constant 0 : index
    %166 = vector.load %arg0[%c0_119, %c4_120, %c0_121, %c0_122] : memref<2x18x18x1xf32, #tpu.memory_space<vmem>>, vector<2x2x16x1xf32>
    %167 = vector.shape_cast %4 : vector<1x16xf32> to vector<1x1x1x16xf32>
    %168 = vector.broadcast %166 : vector<2x2x16x1xf32> to vector<2x2x16x16xf32>
    %169 = vector.broadcast %167 : vector<1x1x1x16xf32> to vector<2x2x16x16xf32>
    %170 = arith.mulf %168, %169 : vector<2x2x16x16xf32>
    %171 = arith.addf %165, %170 : vector<2x2x16x16xf32>
    %c0_123 = arith.constant 0 : index
    %c4_124 = arith.constant 4 : index
    %c1_125 = arith.constant 1 : index
    %c0_126 = arith.constant 0 : index
    %172 = vector.load %arg0[%c0_123, %c4_124, %c1_125, %c0_126] : memref<2x18x18x1xf32, #tpu.memory_space<vmem>>, vector<2x2x16x1xf32>
    %173 = vector.shape_cast %5 : vector<1x16xf32> to vector<1x1x1x16xf32>
    %174 = vector.broadcast %172 : vector<2x2x16x1xf32> to vector<2x2x16x16xf32>
    %175 = vector.broadcast %173 : vector<1x1x1x16xf32> to vector<2x2x16x16xf32>
    %176 = arith.mulf %174, %175 : vector<2x2x16x16xf32>
    %177 = arith.addf %171, %176 : vector<2x2x16x16xf32>
    %c0_127 = arith.constant 0 : index
    %c4_128 = arith.constant 4 : index
    %c2_129 = arith.constant 2 : index
    %c0_130 = arith.constant 0 : index
    %178 = vector.load %arg0[%c0_127, %c4_128, %c2_129, %c0_130] : memref<2x18x18x1xf32, #tpu.memory_space<vmem>>, vector<2x2x16x1xf32>
    %179 = vector.shape_cast %6 : vector<1x16xf32> to vector<1x1x1x16xf32>
    %180 = vector.broadcast %178 : vector<2x2x16x1xf32> to vector<2x2x16x16xf32>
    %181 = vector.broadcast %179 : vector<1x1x1x16xf32> to vector<2x2x16x16xf32>
    %182 = arith.mulf %180, %181 : vector<2x2x16x16xf32>
    %183 = arith.addf %177, %182 : vector<2x2x16x16xf32>
    %c0_131 = arith.constant 0 : index
    %c5 = arith.constant 5 : index
    %c0_132 = arith.constant 0 : index
    %c0_133 = arith.constant 0 : index
    %184 = vector.load %arg0[%c0_131, %c5, %c0_132, %c0_133] : memref<2x18x18x1xf32, #tpu.memory_space<vmem>>, vector<2x2x16x1xf32>
    %185 = vector.shape_cast %7 : vector<1x16xf32> to vector<1x1x1x16xf32>
    %186 = vector.broadcast %184 : vector<2x2x16x1xf32> to vector<2x2x16x16xf32>
    %187 = vector.broadcast %185 : vector<1x1x1x16xf32> to vector<2x2x16x16xf32>
    %188 = arith.mulf %186, %187 : vector<2x2x16x16xf32>
    %189 = arith.addf %183, %188 : vector<2x2x16x16xf32>
    %c0_134 = arith.constant 0 : index
    %c5_135 = arith.constant 5 : index
    %c1_136 = arith.constant 1 : index
    %c0_137 = arith.constant 0 : index
    %190 = vector.load %arg0[%c0_134, %c5_135, %c1_136, %c0_137] : memref<2x18x18x1xf32, #tpu.memory_space<vmem>>, vector<2x2x16x1xf32>
    %191 = vector.shape_cast %8 : vector<1x16xf32> to vector<1x1x1x16xf32>
    %192 = vector.broadcast %190 : vector<2x2x16x1xf32> to vector<2x2x16x16xf32>
    %193 = vector.broadcast %191 : vector<1x1x1x16xf32> to vector<2x2x16x16xf32>
    %194 = arith.mulf %192, %193 : vector<2x2x16x16xf32>
    %195 = arith.addf %189, %194 : vector<2x2x16x16xf32>
    %c0_138 = arith.constant 0 : index
    %c5_139 = arith.constant 5 : index
    %c2_140 = arith.constant 2 : index
    %c0_141 = arith.constant 0 : index
    %196 = vector.load %arg0[%c0_138, %c5_139, %c2_140, %c0_141] : memref<2x18x18x1xf32, #tpu.memory_space<vmem>>, vector<2x2x16x1xf32>
    %197 = vector.shape_cast %9 : vector<1x16xf32> to vector<1x1x1x16xf32>
    %198 = vector.broadcast %196 : vector<2x2x16x1xf32> to vector<2x2x16x16xf32>
    %199 = vector.broadcast %197 : vector<1x1x1x16xf32> to vector<2x2x16x16xf32>
    %200 = arith.mulf %198, %199 : vector<2x2x16x16xf32>
    %201 = arith.addf %195, %200 : vector<2x2x16x16xf32>
    %c0_142 = arith.constant 0 : index
    %c6 = arith.constant 6 : index
    %c0_143 = arith.constant 0 : index
    %c0_144 = arith.constant 0 : index
    %202 = vector.load %arg0[%c0_142, %c6, %c0_143, %c0_144] : memref<2x18x18x1xf32, #tpu.memory_space<vmem>>, vector<2x2x16x1xf32>
    %203 = vector.shape_cast %10 : vector<1x16xf32> to vector<1x1x1x16xf32>
    %204 = vector.broadcast %202 : vector<2x2x16x1xf32> to vector<2x2x16x16xf32>
    %205 = vector.broadcast %203 : vector<1x1x1x16xf32> to vector<2x2x16x16xf32>
    %206 = arith.mulf %204, %205 : vector<2x2x16x16xf32>
    %207 = arith.addf %201, %206 : vector<2x2x16x16xf32>
    %c0_145 = arith.constant 0 : index
    %c6_146 = arith.constant 6 : index
    %c1_147 = arith.constant 1 : index
    %c0_148 = arith.constant 0 : index
    %208 = vector.load %arg0[%c0_145, %c6_146, %c1_147, %c0_148] : memref<2x18x18x1xf32, #tpu.memory_space<vmem>>, vector<2x2x16x1xf32>
    %209 = vector.shape_cast %11 : vector<1x16xf32> to vector<1x1x1x16xf32>
    %210 = vector.broadcast %208 : vector<2x2x16x1xf32> to vector<2x2x16x16xf32>
    %211 = vector.broadcast %209 : vector<1x1x1x16xf32> to vector<2x2x16x16xf32>
    %212 = arith.mulf %210, %211 : vector<2x2x16x16xf32>
    %213 = arith.addf %207, %212 : vector<2x2x16x16xf32>
    %c0_149 = arith.constant 0 : index
    %c6_150 = arith.constant 6 : index
    %c2_151 = arith.constant 2 : index
    %c0_152 = arith.constant 0 : index
    %214 = vector.load %arg0[%c0_149, %c6_150, %c2_151, %c0_152] : memref<2x18x18x1xf32, #tpu.memory_space<vmem>>, vector<2x2x16x1xf32>
    %215 = vector.shape_cast %12 : vector<1x16xf32> to vector<1x1x1x16xf32>
    %216 = vector.broadcast %214 : vector<2x2x16x1xf32> to vector<2x2x16x16xf32>
    %217 = vector.broadcast %215 : vector<1x1x1x16xf32> to vector<2x2x16x16xf32>
    %218 = arith.mulf %216, %217 : vector<2x2x16x16xf32>
    %219 = arith.addf %213, %218 : vector<2x2x16x16xf32>
    %220 = vector.shape_cast %0 : vector<1x16xf32> to vector<1x1x1x16xf32>
    %221 = vector.broadcast %220 : vector<1x1x1x16xf32> to vector<2x2x16x16xf32>
    %222 = arith.mulf %219, %221 : vector<2x2x16x16xf32>
    %223 = vector.shape_cast %1 : vector<1x16xf32> to vector<1x1x1x16xf32>
    %224 = vector.broadcast %223 : vector<1x1x1x16xf32> to vector<2x2x16x16xf32>
    %225 = arith.addf %222, %224 : vector<2x2x16x16xf32>
    %cst_153 = arith.constant 0.000000e+00 : f32
    %226 = vector.broadcast %cst_153 : f32 to vector<2x2x16x16xf32>
    %227 = arith.maximumf %225, %226 : vector<2x2x16x16xf32>
    %228 = vector.extract_strided_slice %227 {offsets = [0, 0, 0, 0], sizes = [2, 1, 16, 16], strides = [1, 1, 1, 1]} : vector<2x2x16x16xf32> to vector<2x1x16x16xf32>
    %229 = vector.shape_cast %228 : vector<2x1x16x16xf32> to vector<2x16x16xf32>
    %230 = vector.extract_strided_slice %227 {offsets = [0, 1, 0, 0], sizes = [2, 1, 16, 16], strides = [1, 1, 1, 1]} : vector<2x2x16x16xf32> to vector<2x1x16x16xf32>
    %231 = vector.shape_cast %230 : vector<2x1x16x16xf32> to vector<2x16x16xf32>
    %232 = arith.maximumf %229, %231 : vector<2x16x16xf32>
    %c0_154 = arith.constant 0 : index
    %c0_155 = arith.constant 0 : index
    %c0_156 = arith.constant 0 : index
    %233 = vector.load %arg7[%c0_154, %c0_155, %c0_156] : memref<2x16x16xf32, #tpu.memory_space<vmem>>, vector<2x16x16xf32>
    tpu.vector_store %arg7[%c0_154, %c0_155, %c0_156], %232 {strides = array<i32>} : memref<2x16x16xf32, #tpu.memory_space<vmem>>, vector<2x16x16xf32>,
    %c0_157 = arith.constant 0 : index
    %c0_158 = arith.constant 0 : index
    %c0_159 = arith.constant 0 : index
    %234 = tpu.strided_load %arg7[%c0_157, %c0_158, %c0_159] {strides = array<i32: 1, 2, 1>} : memref<2x16x16xf32, #tpu.memory_space<vmem>>, vector<2x8x16xf32>
    %c0_160 = arith.constant 0 : index
    %c1_161 = arith.constant 1 : index
    %c0_162 = arith.constant 0 : index
    %235 = tpu.strided_load %arg7[%c0_160, %c1_161, %c0_162] {strides = array<i32: 1, 2, 1>} : memref<2x16x16xf32, #tpu.memory_space<vmem>>, vector<2x8x16xf32>
    %236 = arith.maximumf %234, %235 : vector<2x8x16xf32>
    %c0_163 = arith.constant 0 : index
    %c3_164 = arith.constant 3 : index
    %c1_165 = arith.constant 1 : index
    %c0_166 = arith.constant 0 : index
    %237 = vector.load %arg6[%c0_163, %c3_164, %c1_165, %c0_166] : memref<2x10x10x16xf32, #tpu.memory_space<vmem>>, vector<2x1x8x16xf32>
    %238 = vector.shape_cast %237 : vector<2x1x8x16xf32> to vector<2x8x16xf32>
    %239 = vector.shape_cast %236 : vector<2x8x16xf32> to vector<2x1x8x16xf32>
    tpu.vector_store %arg6[%c0_163, %c3_164, %c1_165, %c0_166], %239 {strides = array<i32>} : memref<2x10x10x16xf32, #tpu.memory_space<vmem>>, vector<2x1x8x16xf32>,
    %cst_167 = arith.constant 0.000000e+00 : f32
    %240 = vector.broadcast %cst_167 : f32 to vector<2x2x16x16xf32>
    %c0_168 = arith.constant 0 : index
    %c6_169 = arith.constant 6 : index
    %c0_170 = arith.constant 0 : index
    %c0_171 = arith.constant 0 : index
    %241 = vector.load %arg0[%c0_168, %c6_169, %c0_170, %c0_171] : memref<2x18x18x1xf32, #tpu.memory_space<vmem>>, vector<2x2x16x1xf32>
    %242 = vector.shape_cast %4 : vector<1x16xf32> to vector<1x1x1x16xf32>
    %243 = vector.broadcast %241 : vector<2x2x16x1xf32> to vector<2x2x16x16xf32>
    %244 = vector.broadcast %242 : vector<1x1x1x16xf32> to vector<2x2x16x16xf32>
    %245 = arith.mulf %243, %244 : vector<2x2x16x16xf32>
    %246 = arith.addf %240, %245 : vector<2x2x16x16xf32>
    %c0_172 = arith.constant 0 : index
    %c6_173 = arith.constant 6 : index
    %c1_174 = arith.constant 1 : index
    %c0_175 = arith.constant 0 : index
    %247 = vector.load %arg0[%c0_172, %c6_173, %c1_174, %c0_175] : memref<2x18x18x1xf32, #tpu.memory_space<vmem>>, vector<2x2x16x1xf32>
    %248 = vector.shape_cast %5 : vector<1x16xf32> to vector<1x1x1x16xf32>
    %249 = vector.broadcast %247 : vector<2x2x16x1xf32> to vector<2x2x16x16xf32>
    %250 = vector.broadcast %248 : vector<1x1x1x16xf32> to vector<2x2x16x16xf32>
    %251 = arith.mulf %249, %250 : vector<2x2x16x16xf32>
    %252 = arith.addf %246, %251 : vector<2x2x16x16xf32>
    %c0_176 = arith.constant 0 : index
    %c6_177 = arith.constant 6 : index
    %c2_178 = arith.constant 2 : index
    %c0_179 = arith.constant 0 : index
    %253 = vector.load %arg0[%c0_176, %c6_177, %c2_178, %c0_179] : memref<2x18x18x1xf32, #tpu.memory_space<vmem>>, vector<2x2x16x1xf32>
    %254 = vector.shape_cast %6 : vector<1x16xf32> to vector<1x1x1x16xf32>
    %255 = vector.broadcast %253 : vector<2x2x16x1xf32> to vector<2x2x16x16xf32>
    %256 = vector.broadcast %254 : vector<1x1x1x16xf32> to vector<2x2x16x16xf32>
    %257 = arith.mulf %255, %256 : vector<2x2x16x16xf32>
    %258 = arith.addf %252, %257 : vector<2x2x16x16xf32>
    %c0_180 = arith.constant 0 : index
    %c7 = arith.constant 7 : index
    %c0_181 = arith.constant 0 : index
    %c0_182 = arith.constant 0 : index
    %259 = vector.load %arg0[%c0_180, %c7, %c0_181, %c0_182] : memref<2x18x18x1xf32, #tpu.memory_space<vmem>>, vector<2x2x16x1xf32>
    %260 = vector.shape_cast %7 : vector<1x16xf32> to vector<1x1x1x16xf32>
    %261 = vector.broadcast %259 : vector<2x2x16x1xf32> to vector<2x2x16x16xf32>
    %262 = vector.broadcast %260 : vector<1x1x1x16xf32> to vector<2x2x16x16xf32>
    %263 = arith.mulf %261, %262 : vector<2x2x16x16xf32>
    %264 = arith.addf %258, %263 : vector<2x2x16x16xf32>
    %c0_183 = arith.constant 0 : index
    %c7_184 = arith.constant 7 : index
    %c1_185 = arith.constant 1 : index
    %c0_186 = arith.constant 0 : index
    %265 = vector.load %arg0[%c0_183, %c7_184, %c1_185, %c0_186] : memref<2x18x18x1xf32, #tpu.memory_space<vmem>>, vector<2x2x16x1xf32>
    %266 = vector.shape_cast %8 : vector<1x16xf32> to vector<1x1x1x16xf32>
    %267 = vector.broadcast %265 : vector<2x2x16x1xf32> to vector<2x2x16x16xf32>
    %268 = vector.broadcast %266 : vector<1x1x1x16xf32> to vector<2x2x16x16xf32>
    %269 = arith.mulf %267, %268 : vector<2x2x16x16xf32>
    %270 = arith.addf %264, %269 : vector<2x2x16x16xf32>
    %c0_187 = arith.constant 0 : index
    %c7_188 = arith.constant 7 : index
    %c2_189 = arith.constant 2 : index
    %c0_190 = arith.constant 0 : index
    %271 = vector.load %arg0[%c0_187, %c7_188, %c2_189, %c0_190] : memref<2x18x18x1xf32, #tpu.memory_space<vmem>>, vector<2x2x16x1xf32>
    %272 = vector.shape_cast %9 : vector<1x16xf32> to vector<1x1x1x16xf32>
    %273 = vector.broadcast %271 : vector<2x2x16x1xf32> to vector<2x2x16x16xf32>
    %274 = vector.broadcast %272 : vector<1x1x1x16xf32> to vector<2x2x16x16xf32>
    %275 = arith.mulf %273, %274 : vector<2x2x16x16xf32>
    %276 = arith.addf %270, %275 : vector<2x2x16x16xf32>
    %c0_191 = arith.constant 0 : index
    %c8 = arith.constant 8 : index
    %c0_192 = arith.constant 0 : index
    %c0_193 = arith.constant 0 : index
    %277 = vector.load %arg0[%c0_191, %c8, %c0_192, %c0_193] : memref<2x18x18x1xf32, #tpu.memory_space<vmem>>, vector<2x2x16x1xf32>
    %278 = vector.shape_cast %10 : vector<1x16xf32> to vector<1x1x1x16xf32>
    %279 = vector.broadcast %277 : vector<2x2x16x1xf32> to vector<2x2x16x16xf32>
    %280 = vector.broadcast %278 : vector<1x1x1x16xf32> to vector<2x2x16x16xf32>
    %281 = arith.mulf %279, %280 : vector<2x2x16x16xf32>
    %282 = arith.addf %276, %281 : vector<2x2x16x16xf32>
    %c0_194 = arith.constant 0 : index
    %c8_195 = arith.constant 8 : index
    %c1_196 = arith.constant 1 : index
    %c0_197 = arith.constant 0 : index
    %283 = vector.load %arg0[%c0_194, %c8_195, %c1_196, %c0_197] : memref<2x18x18x1xf32, #tpu.memory_space<vmem>>, vector<2x2x16x1xf32>
    %284 = vector.shape_cast %11 : vector<1x16xf32> to vector<1x1x1x16xf32>
    %285 = vector.broadcast %283 : vector<2x2x16x1xf32> to vector<2x2x16x16xf32>
    %286 = vector.broadcast %284 : vector<1x1x1x16xf32> to vector<2x2x16x16xf32>
    %287 = arith.mulf %285, %286 : vector<2x2x16x16xf32>
    %288 = arith.addf %282, %287 : vector<2x2x16x16xf32>
    %c0_198 = arith.constant 0 : index
    %c8_199 = arith.constant 8 : index
    %c2_200 = arith.constant 2 : index
    %c0_201 = arith.constant 0 : index
    %289 = vector.load %arg0[%c0_198, %c8_199, %c2_200, %c0_201] : memref<2x18x18x1xf32, #tpu.memory_space<vmem>>, vector<2x2x16x1xf32>
    %290 = vector.shape_cast %12 : vector<1x16xf32> to vector<1x1x1x16xf32>
    %291 = vector.broadcast %289 : vector<2x2x16x1xf32> to vector<2x2x16x16xf32>
    %292 = vector.broadcast %290 : vector<1x1x1x16xf32> to vector<2x2x16x16xf32>
    %293 = arith.mulf %291, %292 : vector<2x2x16x16xf32>
    %294 = arith.addf %288, %293 : vector<2x2x16x16xf32>
    %295 = vector.shape_cast %0 : vector<1x16xf32> to vector<1x1x1x16xf32>
    %296 = vector.broadcast %295 : vector<1x1x1x16xf32> to vector<2x2x16x16xf32>
    %297 = arith.mulf %294, %296 : vector<2x2x16x16xf32>
    %298 = vector.shape_cast %1 : vector<1x16xf32> to vector<1x1x1x16xf32>
    %299 = vector.broadcast %298 : vector<1x1x1x16xf32> to vector<2x2x16x16xf32>
    %300 = arith.addf %297, %299 : vector<2x2x16x16xf32>
    %cst_202 = arith.constant 0.000000e+00 : f32
    %301 = vector.broadcast %cst_202 : f32 to vector<2x2x16x16xf32>
    %302 = arith.maximumf %300, %301 : vector<2x2x16x16xf32>
    %303 = vector.extract_strided_slice %302 {offsets = [0, 0, 0, 0], sizes = [2, 1, 16, 16], strides = [1, 1, 1, 1]} : vector<2x2x16x16xf32> to vector<2x1x16x16xf32>
    %304 = vector.shape_cast %303 : vector<2x1x16x16xf32> to vector<2x16x16xf32>
    %305 = vector.extract_strided_slice %302 {offsets = [0, 1, 0, 0], sizes = [2, 1, 16, 16], strides = [1, 1, 1, 1]} : vector<2x2x16x16xf32> to vector<2x1x16x16xf32>
    %306 = vector.shape_cast %305 : vector<2x1x16x16xf32> to vector<2x16x16xf32>
    %307 = arith.maximumf %304, %306 : vector<2x16x16xf32>
    %c0_203 = arith.constant 0 : index
    %c0_204 = arith.constant 0 : index
    %c0_205 = arith.constant 0 : index
    %308 = vector.load %arg7[%c0_203, %c0_204, %c0_205] : memref<2x16x16xf32, #tpu.memory_space<vmem>>, vector<2x16x16xf32>
    tpu.vector_store %arg7[%c0_203, %c0_204, %c0_205], %307 {strides = array<i32>} : memref<2x16x16xf32, #tpu.memory_space<vmem>>, vector<2x16x16xf32>,
    %c0_206 = arith.constant 0 : index
    %c0_207 = arith.constant 0 : index
    %c0_208 = arith.constant 0 : index
    %309 = tpu.strided_load %arg7[%c0_206, %c0_207, %c0_208] {strides = array<i32: 1, 2, 1>} : memref<2x16x16xf32, #tpu.memory_space<vmem>>, vector<2x8x16xf32>
    %c0_209 = arith.constant 0 : index
    %c1_210 = arith.constant 1 : index
    %c0_211 = arith.constant 0 : index
    %310 = tpu.strided_load %arg7[%c0_209, %c1_210, %c0_211] {strides = array<i32: 1, 2, 1>} : memref<2x16x16xf32, #tpu.memory_space<vmem>>, vector<2x8x16xf32>
    %311 = arith.maximumf %309, %310 : vector<2x8x16xf32>
    %c0_212 = arith.constant 0 : index
    %c4_213 = arith.constant 4 : index
    %c1_214 = arith.constant 1 : index
    %c0_215 = arith.constant 0 : index
    %312 = vector.load %arg6[%c0_212, %c4_213, %c1_214, %c0_215] : memref<2x10x10x16xf32, #tpu.memory_space<vmem>>, vector<2x1x8x16xf32>
    %313 = vector.shape_cast %312 : vector<2x1x8x16xf32> to vector<2x8x16xf32>
    %314 = vector.shape_cast %311 : vector<2x8x16xf32> to vector<2x1x8x16xf32>
    tpu.vector_store %arg6[%c0_212, %c4_213, %c1_214, %c0_215], %314 {strides = array<i32>} : memref<2x10x10x16xf32, #tpu.memory_space<vmem>>, vector<2x1x8x16xf32>,
    %cst_216 = arith.constant 0.000000e+00 : f32
    %315 = vector.broadcast %cst_216 : f32 to vector<2x2x16x16xf32>
    %c0_217 = arith.constant 0 : index
    %c8_218 = arith.constant 8 : index
    %c0_219 = arith.constant 0 : index
    %c0_220 = arith.constant 0 : index
    %316 = vector.load %arg0[%c0_217, %c8_218, %c0_219, %c0_220] : memref<2x18x18x1xf32, #tpu.memory_space<vmem>>, vector<2x2x16x1xf32>
    %317 = vector.shape_cast %4 : vector<1x16xf32> to vector<1x1x1x16xf32>
    %318 = vector.broadcast %316 : vector<2x2x16x1xf32> to vector<2x2x16x16xf32>
    %319 = vector.broadcast %317 : vector<1x1x1x16xf32> to vector<2x2x16x16xf32>
    %320 = arith.mulf %318, %319 : vector<2x2x16x16xf32>
    %321 = arith.addf %315, %320 : vector<2x2x16x16xf32>
    %c0_221 = arith.constant 0 : index
    %c8_222 = arith.constant 8 : index
    %c1_223 = arith.constant 1 : index
    %c0_224 = arith.constant 0 : index
    %322 = vector.load %arg0[%c0_221, %c8_222, %c1_223, %c0_224] : memref<2x18x18x1xf32, #tpu.memory_space<vmem>>, vector<2x2x16x1xf32>
    %323 = vector.shape_cast %5 : vector<1x16xf32> to vector<1x1x1x16xf32>
    %324 = vector.broadcast %322 : vector<2x2x16x1xf32> to vector<2x2x16x16xf32>
    %325 = vector.broadcast %323 : vector<1x1x1x16xf32> to vector<2x2x16x16xf32>
    %326 = arith.mulf %324, %325 : vector<2x2x16x16xf32>
    %327 = arith.addf %321, %326 : vector<2x2x16x16xf32>
    %c0_225 = arith.constant 0 : index
    %c8_226 = arith.constant 8 : index
    %c2_227 = arith.constant 2 : index
    %c0_228 = arith.constant 0 : index
    %328 = vector.load %arg0[%c0_225, %c8_226, %c2_227, %c0_228] : memref<2x18x18x1xf32, #tpu.memory_space<vmem>>, vector<2x2x16x1xf32>
    %329 = vector.shape_cast %6 : vector<1x16xf32> to vector<1x1x1x16xf32>
    %330 = vector.broadcast %328 : vector<2x2x16x1xf32> to vector<2x2x16x16xf32>
    %331 = vector.broadcast %329 : vector<1x1x1x16xf32> to vector<2x2x16x16xf32>
    %332 = arith.mulf %330, %331 : vector<2x2x16x16xf32>
    %333 = arith.addf %327, %332 : vector<2x2x16x16xf32>
    %c0_229 = arith.constant 0 : index
    %c9_230 = arith.constant 9 : index
    %c0_231 = arith.constant 0 : index
    %c0_232 = arith.constant 0 : index
    %334 = vector.load %arg0[%c0_229, %c9_230, %c0_231, %c0_232] : memref<2x18x18x1xf32, #tpu.memory_space<vmem>>, vector<2x2x16x1xf32>
    %335 = vector.shape_cast %7 : vector<1x16xf32> to vector<1x1x1x16xf32>
    %336 = vector.broadcast %334 : vector<2x2x16x1xf32> to vector<2x2x16x16xf32>
    %337 = vector.broadcast %335 : vector<1x1x1x16xf32> to vector<2x2x16x16xf32>
    %338 = arith.mulf %336, %337 : vector<2x2x16x16xf32>
    %339 = arith.addf %333, %338 : vector<2x2x16x16xf32>
    %c0_233 = arith.constant 0 : index
    %c9_234 = arith.constant 9 : index
    %c1_235 = arith.constant 1 : index
    %c0_236 = arith.constant 0 : index
    %340 = vector.load %arg0[%c0_233, %c9_234, %c1_235, %c0_236] : memref<2x18x18x1xf32, #tpu.memory_space<vmem>>, vector<2x2x16x1xf32>
    %341 = vector.shape_cast %8 : vector<1x16xf32> to vector<1x1x1x16xf32>
    %342 = vector.broadcast %340 : vector<2x2x16x1xf32> to vector<2x2x16x16xf32>
    %343 = vector.broadcast %341 : vector<1x1x1x16xf32> to vector<2x2x16x16xf32>
    %344 = arith.mulf %342, %343 : vector<2x2x16x16xf32>
    %345 = arith.addf %339, %344 : vector<2x2x16x16xf32>
    %c0_237 = arith.constant 0 : index
    %c9_238 = arith.constant 9 : index
    %c2_239 = arith.constant 2 : index
    %c0_240 = arith.constant 0 : index
    %346 = vector.load %arg0[%c0_237, %c9_238, %c2_239, %c0_240] : memref<2x18x18x1xf32, #tpu.memory_space<vmem>>, vector<2x2x16x1xf32>
    %347 = vector.shape_cast %9 : vector<1x16xf32> to vector<1x1x1x16xf32>
    %348 = vector.broadcast %346 : vector<2x2x16x1xf32> to vector<2x2x16x16xf32>
    %349 = vector.broadcast %347 : vector<1x1x1x16xf32> to vector<2x2x16x16xf32>
    %350 = arith.mulf %348, %349 : vector<2x2x16x16xf32>
    %351 = arith.addf %345, %350 : vector<2x2x16x16xf32>
    %c0_241 = arith.constant 0 : index
    %c10_242 = arith.constant 10 : index
    %c0_243 = arith.constant 0 : index
    %c0_244 = arith.constant 0 : index
    %352 = vector.load %arg0[%c0_241, %c10_242, %c0_243, %c0_244] : memref<2x18x18x1xf32, #tpu.memory_space<vmem>>, vector<2x2x16x1xf32>
    %353 = vector.shape_cast %10 : vector<1x16xf32> to vector<1x1x1x16xf32>
    %354 = vector.broadcast %352 : vector<2x2x16x1xf32> to vector<2x2x16x16xf32>
    %355 = vector.broadcast %353 : vector<1x1x1x16xf32> to vector<2x2x16x16xf32>
    %356 = arith.mulf %354, %355 : vector<2x2x16x16xf32>
    %357 = arith.addf %351, %356 : vector<2x2x16x16xf32>
    %c0_245 = arith.constant 0 : index
    %c10_246 = arith.constant 10 : index
    %c1_247 = arith.constant 1 : index
    %c0_248 = arith.constant 0 : index
    %358 = vector.load %arg0[%c0_245, %c10_246, %c1_247, %c0_248] : memref<2x18x18x1xf32, #tpu.memory_space<vmem>>, vector<2x2x16x1xf32>
    %359 = vector.shape_cast %11 : vector<1x16xf32> to vector<1x1x1x16xf32>
    %360 = vector.broadcast %358 : vector<2x2x16x1xf32> to vector<2x2x16x16xf32>
    %361 = vector.broadcast %359 : vector<1x1x1x16xf32> to vector<2x2x16x16xf32>
    %362 = arith.mulf %360, %361 : vector<2x2x16x16xf32>
    %363 = arith.addf %357, %362 : vector<2x2x16x16xf32>
    %c0_249 = arith.constant 0 : index
    %c10_250 = arith.constant 10 : index
    %c2_251 = arith.constant 2 : index
    %c0_252 = arith.constant 0 : index
    %364 = vector.load %arg0[%c0_249, %c10_250, %c2_251, %c0_252] : memref<2x18x18x1xf32, #tpu.memory_space<vmem>>, vector<2x2x16x1xf32>
    %365 = vector.shape_cast %12 : vector<1x16xf32> to vector<1x1x1x16xf32>
    %366 = vector.broadcast %364 : vector<2x2x16x1xf32> to vector<2x2x16x16xf32>
    %367 = vector.broadcast %365 : vector<1x1x1x16xf32> to vector<2x2x16x16xf32>
    %368 = arith.mulf %366, %367 : vector<2x2x16x16xf32>
    %369 = arith.addf %363, %368 : vector<2x2x16x16xf32>
    %370 = vector.shape_cast %0 : vector<1x16xf32> to vector<1x1x1x16xf32>
    %371 = vector.broadcast %370 : vector<1x1x1x16xf32> to vector<2x2x16x16xf32>
    %372 = arith.mulf %369, %371 : vector<2x2x16x16xf32>
    %373 = vector.shape_cast %1 : vector<1x16xf32> to vector<1x1x1x16xf32>
    %374 = vector.broadcast %373 : vector<1x1x1x16xf32> to vector<2x2x16x16xf32>
    %375 = arith.addf %372, %374 : vector<2x2x16x16xf32>
    %cst_253 = arith.constant 0.000000e+00 : f32
    %376 = vector.broadcast %cst_253 : f32 to vector<2x2x16x16xf32>
    %377 = arith.maximumf %375, %376 : vector<2x2x16x16xf32>
    %378 = vector.extract_strided_slice %377 {offsets = [0, 0, 0, 0], sizes = [2, 1, 16, 16], strides = [1, 1, 1, 1]} : vector<2x2x16x16xf32> to vector<2x1x16x16xf32>
    %379 = vector.shape_cast %378 : vector<2x1x16x16xf32> to vector<2x16x16xf32>
    %380 = vector.extract_strided_slice %377 {offsets = [0, 1, 0, 0], sizes = [2, 1, 16, 16], strides = [1, 1, 1, 1]} : vector<2x2x16x16xf32> to vector<2x1x16x16xf32>
    %381 = vector.shape_cast %380 : vector<2x1x16x16xf32> to vector<2x16x16xf32>
    %382 = arith.maximumf %379, %381 : vector<2x16x16xf32>
    %c0_254 = arith.constant 0 : index
    %c0_255 = arith.constant 0 : index
    %c0_256 = arith.constant 0 : index
    %383 = vector.load %arg7[%c0_254, %c0_255, %c0_256] : memref<2x16x16xf32, #tpu.memory_space<vmem>>, vector<2x16x16xf32>
    tpu.vector_store %arg7[%c0_254, %c0_255, %c0_256], %382 {strides = array<i32>} : memref<2x16x16xf32, #tpu.memory_space<vmem>>, vector<2x16x16xf32>,
    %c0_257 = arith.constant 0 : index
    %c0_258 = arith.constant 0 : index
    %c0_259 = arith.constant 0 : index
    %384 = tpu.strided_load %arg7[%c0_257, %c0_258, %c0_259] {strides = array<i32: 1, 2, 1>} : memref<2x16x16xf32, #tpu.memory_space<vmem>>, vector<2x8x16xf32>
    %c0_260 = arith.constant 0 : index
    %c1_261 = arith.constant 1 : index
    %c0_262 = arith.constant 0 : index
    %385 = tpu.strided_load %arg7[%c0_260, %c1_261, %c0_262] {strides = array<i32: 1, 2, 1>} : memref<2x16x16xf32, #tpu.memory_space<vmem>>, vector<2x8x16xf32>
    %386 = arith.maximumf %384, %385 : vector<2x8x16xf32>
    %c0_263 = arith.constant 0 : index
    %c5_264 = arith.constant 5 : index
    %c1_265 = arith.constant 1 : index
    %c0_266 = arith.constant 0 : index
    %387 = vector.load %arg6[%c0_263, %c5_264, %c1_265, %c0_266] : memref<2x10x10x16xf32, #tpu.memory_space<vmem>>, vector<2x1x8x16xf32>
    %388 = vector.shape_cast %387 : vector<2x1x8x16xf32> to vector<2x8x16xf32>
    %389 = vector.shape_cast %386 : vector<2x8x16xf32> to vector<2x1x8x16xf32>
    tpu.vector_store %arg6[%c0_263, %c5_264, %c1_265, %c0_266], %389 {strides = array<i32>} : memref<2x10x10x16xf32, #tpu.memory_space<vmem>>, vector<2x1x8x16xf32>,
    %cst_267 = arith.constant 0.000000e+00 : f32
    %390 = vector.broadcast %cst_267 : f32 to vector<2x2x16x16xf32>
    %c0_268 = arith.constant 0 : index
    %c10_269 = arith.constant 10 : index
    %c0_270 = arith.constant 0 : index
    %c0_271 = arith.constant 0 : index
    %391 = vector.load %arg0[%c0_268, %c10_269, %c0_270, %c0_271] : memref<2x18x18x1xf32, #tpu.memory_space<vmem>>, vector<2x2x16x1xf32>
    %392 = vector.shape_cast %4 : vector<1x16xf32> to vector<1x1x1x16xf32>
    %393 = vector.broadcast %391 : vector<2x2x16x1xf32> to vector<2x2x16x16xf32>
    %394 = vector.broadcast %392 : vector<1x1x1x16xf32> to vector<2x2x16x16xf32>
    %395 = arith.mulf %393, %394 : vector<2x2x16x16xf32>
    %396 = arith.addf %390, %395 : vector<2x2x16x16xf32>
    %c0_272 = arith.constant 0 : index
    %c10_273 = arith.constant 10 : index
    %c1_274 = arith.constant 1 : index
    %c0_275 = arith.constant 0 : index
    %397 = vector.load %arg0[%c0_272, %c10_273, %c1_274, %c0_275] : memref<2x18x18x1xf32, #tpu.memory_space<vmem>>, vector<2x2x16x1xf32>
    %398 = vector.shape_cast %5 : vector<1x16xf32> to vector<1x1x1x16xf32>
    %399 = vector.broadcast %397 : vector<2x2x16x1xf32> to vector<2x2x16x16xf32>
    %400 = vector.broadcast %398 : vector<1x1x1x16xf32> to vector<2x2x16x16xf32>
    %401 = arith.mulf %399, %400 : vector<2x2x16x16xf32>
    %402 = arith.addf %396, %401 : vector<2x2x16x16xf32>
    %c0_276 = arith.constant 0 : index
    %c10_277 = arith.constant 10 : index
    %c2_278 = arith.constant 2 : index
    %c0_279 = arith.constant 0 : index
    %403 = vector.load %arg0[%c0_276, %c10_277, %c2_278, %c0_279] : memref<2x18x18x1xf32, #tpu.memory_space<vmem>>, vector<2x2x16x1xf32>
    %404 = vector.shape_cast %6 : vector<1x16xf32> to vector<1x1x1x16xf32>
    %405 = vector.broadcast %403 : vector<2x2x16x1xf32> to vector<2x2x16x16xf32>
    %406 = vector.broadcast %404 : vector<1x1x1x16xf32> to vector<2x2x16x16xf32>
    %407 = arith.mulf %405, %406 : vector<2x2x16x16xf32>
    %408 = arith.addf %402, %407 : vector<2x2x16x16xf32>
    %c0_280 = arith.constant 0 : index
    %c11_281 = arith.constant 11 : index
    %c0_282 = arith.constant 0 : index
    %c0_283 = arith.constant 0 : index
    %409 = vector.load %arg0[%c0_280, %c11_281, %c0_282, %c0_283] : memref<2x18x18x1xf32, #tpu.memory_space<vmem>>, vector<2x2x16x1xf32>
    %410 = vector.shape_cast %7 : vector<1x16xf32> to vector<1x1x1x16xf32>
    %411 = vector.broadcast %409 : vector<2x2x16x1xf32> to vector<2x2x16x16xf32>
    %412 = vector.broadcast %410 : vector<1x1x1x16xf32> to vector<2x2x16x16xf32>
    %413 = arith.mulf %411, %412 : vector<2x2x16x16xf32>
    %414 = arith.addf %408, %413 : vector<2x2x16x16xf32>
    %c0_284 = arith.constant 0 : index
    %c11_285 = arith.constant 11 : index
    %c1_286 = arith.constant 1 : index
    %c0_287 = arith.constant 0 : index
    %415 = vector.load %arg0[%c0_284, %c11_285, %c1_286, %c0_287] : memref<2x18x18x1xf32, #tpu.memory_space<vmem>>, vector<2x2x16x1xf32>
    %416 = vector.shape_cast %8 : vector<1x16xf32> to vector<1x1x1x16xf32>
    %417 = vector.broadcast %415 : vector<2x2x16x1xf32> to vector<2x2x16x16xf32>
    %418 = vector.broadcast %416 : vector<1x1x1x16xf32> to vector<2x2x16x16xf32>
    %419 = arith.mulf %417, %418 : vector<2x2x16x16xf32>
    %420 = arith.addf %414, %419 : vector<2x2x16x16xf32>
    %c0_288 = arith.constant 0 : index
    %c11_289 = arith.constant 11 : index
    %c2_290 = arith.constant 2 : index
    %c0_291 = arith.constant 0 : index
    %421 = vector.load %arg0[%c0_288, %c11_289, %c2_290, %c0_291] : memref<2x18x18x1xf32, #tpu.memory_space<vmem>>, vector<2x2x16x1xf32>
    %422 = vector.shape_cast %9 : vector<1x16xf32> to vector<1x1x1x16xf32>
    %423 = vector.broadcast %421 : vector<2x2x16x1xf32> to vector<2x2x16x16xf32>
    %424 = vector.broadcast %422 : vector<1x1x1x16xf32> to vector<2x2x16x16xf32>
    %425 = arith.mulf %423, %424 : vector<2x2x16x16xf32>
    %426 = arith.addf %420, %425 : vector<2x2x16x16xf32>
    %c0_292 = arith.constant 0 : index
    %c12_293 = arith.constant 12 : index
    %c0_294 = arith.constant 0 : index
    %c0_295 = arith.constant 0 : index
    %427 = vector.load %arg0[%c0_292, %c12_293, %c0_294, %c0_295] : memref<2x18x18x1xf32, #tpu.memory_space<vmem>>, vector<2x2x16x1xf32>
    %428 = vector.shape_cast %10 : vector<1x16xf32> to vector<1x1x1x16xf32>
    %429 = vector.broadcast %427 : vector<2x2x16x1xf32> to vector<2x2x16x16xf32>
    %430 = vector.broadcast %428 : vector<1x1x1x16xf32> to vector<2x2x16x16xf32>
    %431 = arith.mulf %429, %430 : vector<2x2x16x16xf32>
    %432 = arith.addf %426, %431 : vector<2x2x16x16xf32>
    %c0_296 = arith.constant 0 : index
    %c12_297 = arith.constant 12 : index
    %c1_298 = arith.constant 1 : index
    %c0_299 = arith.constant 0 : index
    %433 = vector.load %arg0[%c0_296, %c12_297, %c1_298, %c0_299] : memref<2x18x18x1xf32, #tpu.memory_space<vmem>>, vector<2x2x16x1xf32>
    %434 = vector.shape_cast %11 : vector<1x16xf32> to vector<1x1x1x16xf32>
    %435 = vector.broadcast %433 : vector<2x2x16x1xf32> to vector<2x2x16x16xf32>
    %436 = vector.broadcast %434 : vector<1x1x1x16xf32> to vector<2x2x16x16xf32>
    %437 = arith.mulf %435, %436 : vector<2x2x16x16xf32>
    %438 = arith.addf %432, %437 : vector<2x2x16x16xf32>
    %c0_300 = arith.constant 0 : index
    %c12_301 = arith.constant 12 : index
    %c2_302 = arith.constant 2 : index
    %c0_303 = arith.constant 0 : index
    %439 = vector.load %arg0[%c0_300, %c12_301, %c2_302, %c0_303] : memref<2x18x18x1xf32, #tpu.memory_space<vmem>>, vector<2x2x16x1xf32>
    %440 = vector.shape_cast %12 : vector<1x16xf32> to vector<1x1x1x16xf32>
    %441 = vector.broadcast %439 : vector<2x2x16x1xf32> to vector<2x2x16x16xf32>
    %442 = vector.broadcast %440 : vector<1x1x1x16xf32> to vector<2x2x16x16xf32>
    %443 = arith.mulf %441, %442 : vector<2x2x16x16xf32>
    %444 = arith.addf %438, %443 : vector<2x2x16x16xf32>
    %445 = vector.shape_cast %0 : vector<1x16xf32> to vector<1x1x1x16xf32>
    %446 = vector.broadcast %445 : vector<1x1x1x16xf32> to vector<2x2x16x16xf32>
    %447 = arith.mulf %444, %446 : vector<2x2x16x16xf32>
    %448 = vector.shape_cast %1 : vector<1x16xf32> to vector<1x1x1x16xf32>
    %449 = vector.broadcast %448 : vector<1x1x1x16xf32> to vector<2x2x16x16xf32>
    %450 = arith.addf %447, %449 : vector<2x2x16x16xf32>
    %cst_304 = arith.constant 0.000000e+00 : f32
    %451 = vector.broadcast %cst_304 : f32 to vector<2x2x16x16xf32>
    %452 = arith.maximumf %450, %451 : vector<2x2x16x16xf32>
    %453 = vector.extract_strided_slice %452 {offsets = [0, 0, 0, 0], sizes = [2, 1, 16, 16], strides = [1, 1, 1, 1]} : vector<2x2x16x16xf32> to vector<2x1x16x16xf32>
    %454 = vector.shape_cast %453 : vector<2x1x16x16xf32> to vector<2x16x16xf32>
    %455 = vector.extract_strided_slice %452 {offsets = [0, 1, 0, 0], sizes = [2, 1, 16, 16], strides = [1, 1, 1, 1]} : vector<2x2x16x16xf32> to vector<2x1x16x16xf32>
    %456 = vector.shape_cast %455 : vector<2x1x16x16xf32> to vector<2x16x16xf32>
    %457 = arith.maximumf %454, %456 : vector<2x16x16xf32>
    %c0_305 = arith.constant 0 : index
    %c0_306 = arith.constant 0 : index
    %c0_307 = arith.constant 0 : index
    %458 = vector.load %arg7[%c0_305, %c0_306, %c0_307] : memref<2x16x16xf32, #tpu.memory_space<vmem>>, vector<2x16x16xf32>
    tpu.vector_store %arg7[%c0_305, %c0_306, %c0_307], %457 {strides = array<i32>} : memref<2x16x16xf32, #tpu.memory_space<vmem>>, vector<2x16x16xf32>,
    %c0_308 = arith.constant 0 : index
    %c0_309 = arith.constant 0 : index
    %c0_310 = arith.constant 0 : index
    %459 = tpu.strided_load %arg7[%c0_308, %c0_309, %c0_310] {strides = array<i32: 1, 2, 1>} : memref<2x16x16xf32, #tpu.memory_space<vmem>>, vector<2x8x16xf32>
    %c0_311 = arith.constant 0 : index
    %c1_312 = arith.constant 1 : index
    %c0_313 = arith.constant 0 : index
    %460 = tpu.strided_load %arg7[%c0_311, %c1_312, %c0_313] {strides = array<i32: 1, 2, 1>} : memref<2x16x16xf32, #tpu.memory_space<vmem>>, vector<2x8x16xf32>
    %461 = arith.maximumf %459, %460 : vector<2x8x16xf32>
    %c0_314 = arith.constant 0 : index
    %c6_315 = arith.constant 6 : index
    %c1_316 = arith.constant 1 : index
    %c0_317 = arith.constant 0 : index
    %462 = vector.load %arg6[%c0_314, %c6_315, %c1_316, %c0_317] : memref<2x10x10x16xf32, #tpu.memory_space<vmem>>, vector<2x1x8x16xf32>
    %463 = vector.shape_cast %462 : vector<2x1x8x16xf32> to vector<2x8x16xf32>
    %464 = vector.shape_cast %461 : vector<2x8x16xf32> to vector<2x1x8x16xf32>
    tpu.vector_store %arg6[%c0_314, %c6_315, %c1_316, %c0_317], %464 {strides = array<i32>} : memref<2x10x10x16xf32, #tpu.memory_space<vmem>>, vector<2x1x8x16xf32>,
    %cst_318 = arith.constant 0.000000e+00 : f32
    %465 = vector.broadcast %cst_318 : f32 to vector<2x2x16x16xf32>
    %c0_319 = arith.constant 0 : index
    %c12_320 = arith.constant 12 : index
    %c0_321 = arith.constant 0 : index
    %c0_322 = arith.constant 0 : index
    %466 = vector.load %arg0[%c0_319, %c12_320, %c0_321, %c0_322] : memref<2x18x18x1xf32, #tpu.memory_space<vmem>>, vector<2x2x16x1xf32>
    %467 = vector.shape_cast %4 : vector<1x16xf32> to vector<1x1x1x16xf32>
    %468 = vector.broadcast %466 : vector<2x2x16x1xf32> to vector<2x2x16x16xf32>
    %469 = vector.broadcast %467 : vector<1x1x1x16xf32> to vector<2x2x16x16xf32>
    %470 = arith.mulf %468, %469 : vector<2x2x16x16xf32>
    %471 = arith.addf %465, %470 : vector<2x2x16x16xf32>
    %c0_323 = arith.constant 0 : index
    %c12_324 = arith.constant 12 : index
    %c1_325 = arith.constant 1 : index
    %c0_326 = arith.constant 0 : index
    %472 = vector.load %arg0[%c0_323, %c12_324, %c1_325, %c0_326] : memref<2x18x18x1xf32, #tpu.memory_space<vmem>>, vector<2x2x16x1xf32>
    %473 = vector.shape_cast %5 : vector<1x16xf32> to vector<1x1x1x16xf32>
    %474 = vector.broadcast %472 : vector<2x2x16x1xf32> to vector<2x2x16x16xf32>
    %475 = vector.broadcast %473 : vector<1x1x1x16xf32> to vector<2x2x16x16xf32>
    %476 = arith.mulf %474, %475 : vector<2x2x16x16xf32>
    %477 = arith.addf %471, %476 : vector<2x2x16x16xf32>
    %c0_327 = arith.constant 0 : index
    %c12_328 = arith.constant 12 : index
    %c2_329 = arith.constant 2 : index
    %c0_330 = arith.constant 0 : index
    %478 = vector.load %arg0[%c0_327, %c12_328, %c2_329, %c0_330] : memref<2x18x18x1xf32, #tpu.memory_space<vmem>>, vector<2x2x16x1xf32>
    %479 = vector.shape_cast %6 : vector<1x16xf32> to vector<1x1x1x16xf32>
    %480 = vector.broadcast %478 : vector<2x2x16x1xf32> to vector<2x2x16x16xf32>
    %481 = vector.broadcast %479 : vector<1x1x1x16xf32> to vector<2x2x16x16xf32>
    %482 = arith.mulf %480, %481 : vector<2x2x16x16xf32>
    %483 = arith.addf %477, %482 : vector<2x2x16x16xf32>
    %c0_331 = arith.constant 0 : index
    %c13_332 = arith.constant 13 : index
    %c0_333 = arith.constant 0 : index
    %c0_334 = arith.constant 0 : index
    %484 = vector.load %arg0[%c0_331, %c13_332, %c0_333, %c0_334] : memref<2x18x18x1xf32, #tpu.memory_space<vmem>>, vector<2x2x16x1xf32>
    %485 = vector.shape_cast %7 : vector<1x16xf32> to vector<1x1x1x16xf32>
    %486 = vector.broadcast %484 : vector<2x2x16x1xf32> to vector<2x2x16x16xf32>
    %487 = vector.broadcast %485 : vector<1x1x1x16xf32> to vector<2x2x16x16xf32>
    %488 = arith.mulf %486, %487 : vector<2x2x16x16xf32>
    %489 = arith.addf %483, %488 : vector<2x2x16x16xf32>
    %c0_335 = arith.constant 0 : index
    %c13_336 = arith.constant 13 : index
    %c1_337 = arith.constant 1 : index
    %c0_338 = arith.constant 0 : index
    %490 = vector.load %arg0[%c0_335, %c13_336, %c1_337, %c0_338] : memref<2x18x18x1xf32, #tpu.memory_space<vmem>>, vector<2x2x16x1xf32>
    %491 = vector.shape_cast %8 : vector<1x16xf32> to vector<1x1x1x16xf32>
    %492 = vector.broadcast %490 : vector<2x2x16x1xf32> to vector<2x2x16x16xf32>
    %493 = vector.broadcast %491 : vector<1x1x1x16xf32> to vector<2x2x16x16xf32>
    %494 = arith.mulf %492, %493 : vector<2x2x16x16xf32>
    %495 = arith.addf %489, %494 : vector<2x2x16x16xf32>
    %c0_339 = arith.constant 0 : index
    %c13_340 = arith.constant 13 : index
    %c2_341 = arith.constant 2 : index
    %c0_342 = arith.constant 0 : index
    %496 = vector.load %arg0[%c0_339, %c13_340, %c2_341, %c0_342] : memref<2x18x18x1xf32, #tpu.memory_space<vmem>>, vector<2x2x16x1xf32>
    %497 = vector.shape_cast %9 : vector<1x16xf32> to vector<1x1x1x16xf32>
    %498 = vector.broadcast %496 : vector<2x2x16x1xf32> to vector<2x2x16x16xf32>
    %499 = vector.broadcast %497 : vector<1x1x1x16xf32> to vector<2x2x16x16xf32>
    %500 = arith.mulf %498, %499 : vector<2x2x16x16xf32>
    %501 = arith.addf %495, %500 : vector<2x2x16x16xf32>
    %c0_343 = arith.constant 0 : index
    %c14_344 = arith.constant 14 : index
    %c0_345 = arith.constant 0 : index
    %c0_346 = arith.constant 0 : index
    %502 = vector.load %arg0[%c0_343, %c14_344, %c0_345, %c0_346] : memref<2x18x18x1xf32, #tpu.memory_space<vmem>>, vector<2x2x16x1xf32>
    %503 = vector.shape_cast %10 : vector<1x16xf32> to vector<1x1x1x16xf32>
    %504 = vector.broadcast %502 : vector<2x2x16x1xf32> to vector<2x2x16x16xf32>
    %505 = vector.broadcast %503 : vector<1x1x1x16xf32> to vector<2x2x16x16xf32>
    %506 = arith.mulf %504, %505 : vector<2x2x16x16xf32>
    %507 = arith.addf %501, %506 : vector<2x2x16x16xf32>
    %c0_347 = arith.constant 0 : index
    %c14_348 = arith.constant 14 : index
    %c1_349 = arith.constant 1 : index
    %c0_350 = arith.constant 0 : index
    %508 = vector.load %arg0[%c0_347, %c14_348, %c1_349, %c0_350] : memref<2x18x18x1xf32, #tpu.memory_space<vmem>>, vector<2x2x16x1xf32>
    %509 = vector.shape_cast %11 : vector<1x16xf32> to vector<1x1x1x16xf32>
    %510 = vector.broadcast %508 : vector<2x2x16x1xf32> to vector<2x2x16x16xf32>
    %511 = vector.broadcast %509 : vector<1x1x1x16xf32> to vector<2x2x16x16xf32>
    %512 = arith.mulf %510, %511 : vector<2x2x16x16xf32>
    %513 = arith.addf %507, %512 : vector<2x2x16x16xf32>
    %c0_351 = arith.constant 0 : index
    %c14_352 = arith.constant 14 : index
    %c2_353 = arith.constant 2 : index
    %c0_354 = arith.constant 0 : index
    %514 = vector.load %arg0[%c0_351, %c14_352, %c2_353, %c0_354] : memref<2x18x18x1xf32, #tpu.memory_space<vmem>>, vector<2x2x16x1xf32>
    %515 = vector.shape_cast %12 : vector<1x16xf32> to vector<1x1x1x16xf32>
    %516 = vector.broadcast %514 : vector<2x2x16x1xf32> to vector<2x2x16x16xf32>
    %517 = vector.broadcast %515 : vector<1x1x1x16xf32> to vector<2x2x16x16xf32>
    %518 = arith.mulf %516, %517 : vector<2x2x16x16xf32>
    %519 = arith.addf %513, %518 : vector<2x2x16x16xf32>
    %520 = vector.shape_cast %0 : vector<1x16xf32> to vector<1x1x1x16xf32>
    %521 = vector.broadcast %520 : vector<1x1x1x16xf32> to vector<2x2x16x16xf32>
    %522 = arith.mulf %519, %521 : vector<2x2x16x16xf32>
    %523 = vector.shape_cast %1 : vector<1x16xf32> to vector<1x1x1x16xf32>
    %524 = vector.broadcast %523 : vector<1x1x1x16xf32> to vector<2x2x16x16xf32>
    %525 = arith.addf %522, %524 : vector<2x2x16x16xf32>
    %cst_355 = arith.constant 0.000000e+00 : f32
    %526 = vector.broadcast %cst_355 : f32 to vector<2x2x16x16xf32>
    %527 = arith.maximumf %525, %526 : vector<2x2x16x16xf32>
    %528 = vector.extract_strided_slice %527 {offsets = [0, 0, 0, 0], sizes = [2, 1, 16, 16], strides = [1, 1, 1, 1]} : vector<2x2x16x16xf32> to vector<2x1x16x16xf32>
    %529 = vector.shape_cast %528 : vector<2x1x16x16xf32> to vector<2x16x16xf32>
    %530 = vector.extract_strided_slice %527 {offsets = [0, 1, 0, 0], sizes = [2, 1, 16, 16], strides = [1, 1, 1, 1]} : vector<2x2x16x16xf32> to vector<2x1x16x16xf32>
    %531 = vector.shape_cast %530 : vector<2x1x16x16xf32> to vector<2x16x16xf32>
    %532 = arith.maximumf %529, %531 : vector<2x16x16xf32>
    %c0_356 = arith.constant 0 : index
    %c0_357 = arith.constant 0 : index
    %c0_358 = arith.constant 0 : index
    %533 = vector.load %arg7[%c0_356, %c0_357, %c0_358] : memref<2x16x16xf32, #tpu.memory_space<vmem>>, vector<2x16x16xf32>
    tpu.vector_store %arg7[%c0_356, %c0_357, %c0_358], %532 {strides = array<i32>} : memref<2x16x16xf32, #tpu.memory_space<vmem>>, vector<2x16x16xf32>,
    %c0_359 = arith.constant 0 : index
    %c0_360 = arith.constant 0 : index
    %c0_361 = arith.constant 0 : index
    %534 = tpu.strided_load %arg7[%c0_359, %c0_360, %c0_361] {strides = array<i32: 1, 2, 1>} : memref<2x16x16xf32, #tpu.memory_space<vmem>>, vector<2x8x16xf32>
    %c0_362 = arith.constant 0 : index
    %c1_363 = arith.constant 1 : index
    %c0_364 = arith.constant 0 : index
    %535 = tpu.strided_load %arg7[%c0_362, %c1_363, %c0_364] {strides = array<i32: 1, 2, 1>} : memref<2x16x16xf32, #tpu.memory_space<vmem>>, vector<2x8x16xf32>
    %536 = arith.maximumf %534, %535 : vector<2x8x16xf32>
    %c0_365 = arith.constant 0 : index
    %c7_366 = arith.constant 7 : index
    %c1_367 = arith.constant 1 : index
    %c0_368 = arith.constant 0 : index
    %537 = vector.load %arg6[%c0_365, %c7_366, %c1_367, %c0_368] : memref<2x10x10x16xf32, #tpu.memory_space<vmem>>, vector<2x1x8x16xf32>
    %538 = vector.shape_cast %537 : vector<2x1x8x16xf32> to vector<2x8x16xf32>
    %539 = vector.shape_cast %536 : vector<2x8x16xf32> to vector<2x1x8x16xf32>
    tpu.vector_store %arg6[%c0_365, %c7_366, %c1_367, %c0_368], %539 {strides = array<i32>} : memref<2x10x10x16xf32, #tpu.memory_space<vmem>>, vector<2x1x8x16xf32>,
    %cst_369 = arith.constant 0.000000e+00 : f32
    %540 = vector.broadcast %cst_369 : f32 to vector<2x2x16x16xf32>
    %c0_370 = arith.constant 0 : index
    %c14_371 = arith.constant 14 : index
    %c0_372 = arith.constant 0 : index
    %c0_373 = arith.constant 0 : index
    %541 = vector.load %arg0[%c0_370, %c14_371, %c0_372, %c0_373] : memref<2x18x18x1xf32, #tpu.memory_space<vmem>>, vector<2x2x16x1xf32>
    %542 = vector.shape_cast %4 : vector<1x16xf32> to vector<1x1x1x16xf32>
    %543 = vector.broadcast %541 : vector<2x2x16x1xf32> to vector<2x2x16x16xf32>
    %544 = vector.broadcast %542 : vector<1x1x1x16xf32> to vector<2x2x16x16xf32>
    %545 = arith.mulf %543, %544 : vector<2x2x16x16xf32>
    %546 = arith.addf %540, %545 : vector<2x2x16x16xf32>
    %c0_374 = arith.constant 0 : index
    %c14_375 = arith.constant 14 : index
    %c1_376 = arith.constant 1 : index
    %c0_377 = arith.constant 0 : index
    %547 = vector.load %arg0[%c0_374, %c14_375, %c1_376, %c0_377] : memref<2x18x18x1xf32, #tpu.memory_space<vmem>>, vector<2x2x16x1xf32>
    %548 = vector.shape_cast %5 : vector<1x16xf32> to vector<1x1x1x16xf32>
    %549 = vector.broadcast %547 : vector<2x2x16x1xf32> to vector<2x2x16x16xf32>
    %550 = vector.broadcast %548 : vector<1x1x1x16xf32> to vector<2x2x16x16xf32>
    %551 = arith.mulf %549, %550 : vector<2x2x16x16xf32>
    %552 = arith.addf %546, %551 : vector<2x2x16x16xf32>
    %c0_378 = arith.constant 0 : index
    %c14_379 = arith.constant 14 : index
    %c2_380 = arith.constant 2 : index
    %c0_381 = arith.constant 0 : index
    %553 = vector.load %arg0[%c0_378, %c14_379, %c2_380, %c0_381] : memref<2x18x18x1xf32, #tpu.memory_space<vmem>>, vector<2x2x16x1xf32>
    %554 = vector.shape_cast %6 : vector<1x16xf32> to vector<1x1x1x16xf32>
    %555 = vector.broadcast %553 : vector<2x2x16x1xf32> to vector<2x2x16x16xf32>
    %556 = vector.broadcast %554 : vector<1x1x1x16xf32> to vector<2x2x16x16xf32>
    %557 = arith.mulf %555, %556 : vector<2x2x16x16xf32>
    %558 = arith.addf %552, %557 : vector<2x2x16x16xf32>
    %c0_382 = arith.constant 0 : index
    %c15_383 = arith.constant 15 : index
    %c0_384 = arith.constant 0 : index
    %c0_385 = arith.constant 0 : index
    %559 = vector.load %arg0[%c0_382, %c15_383, %c0_384, %c0_385] : memref<2x18x18x1xf32, #tpu.memory_space<vmem>>, vector<2x2x16x1xf32>
    %560 = vector.shape_cast %7 : vector<1x16xf32> to vector<1x1x1x16xf32>
    %561 = vector.broadcast %559 : vector<2x2x16x1xf32> to vector<2x2x16x16xf32>
    %562 = vector.broadcast %560 : vector<1x1x1x16xf32> to vector<2x2x16x16xf32>
    %563 = arith.mulf %561, %562 : vector<2x2x16x16xf32>
    %564 = arith.addf %558, %563 : vector<2x2x16x16xf32>
    %c0_386 = arith.constant 0 : index
    %c15_387 = arith.constant 15 : index
    %c1_388 = arith.constant 1 : index
    %c0_389 = arith.constant 0 : index
    %565 = vector.load %arg0[%c0_386, %c15_387, %c1_388, %c0_389] : memref<2x18x18x1xf32, #tpu.memory_space<vmem>>, vector<2x2x16x1xf32>
    %566 = vector.shape_cast %8 : vector<1x16xf32> to vector<1x1x1x16xf32>
    %567 = vector.broadcast %565 : vector<2x2x16x1xf32> to vector<2x2x16x16xf32>
    %568 = vector.broadcast %566 : vector<1x1x1x16xf32> to vector<2x2x16x16xf32>
    %569 = arith.mulf %567, %568 : vector<2x2x16x16xf32>
    %570 = arith.addf %564, %569 : vector<2x2x16x16xf32>
    %c0_390 = arith.constant 0 : index
    %c15_391 = arith.constant 15 : index
    %c2_392 = arith.constant 2 : index
    %c0_393 = arith.constant 0 : index
    %571 = vector.load %arg0[%c0_390, %c15_391, %c2_392, %c0_393] : memref<2x18x18x1xf32, #tpu.memory_space<vmem>>, vector<2x2x16x1xf32>
    %572 = vector.shape_cast %9 : vector<1x16xf32> to vector<1x1x1x16xf32>
    %573 = vector.broadcast %571 : vector<2x2x16x1xf32> to vector<2x2x16x16xf32>
    %574 = vector.broadcast %572 : vector<1x1x1x16xf32> to vector<2x2x16x16xf32>
    %575 = arith.mulf %573, %574 : vector<2x2x16x16xf32>
    %576 = arith.addf %570, %575 : vector<2x2x16x16xf32>
    %c0_394 = arith.constant 0 : index
    %c16_395 = arith.constant 16 : index
    %c0_396 = arith.constant 0 : index
    %c0_397 = arith.constant 0 : index
    %577 = vector.load %arg0[%c0_394, %c16_395, %c0_396, %c0_397] : memref<2x18x18x1xf32, #tpu.memory_space<vmem>>, vector<2x2x16x1xf32>
    %578 = vector.shape_cast %10 : vector<1x16xf32> to vector<1x1x1x16xf32>
    %579 = vector.broadcast %577 : vector<2x2x16x1xf32> to vector<2x2x16x16xf32>
    %580 = vector.broadcast %578 : vector<1x1x1x16xf32> to vector<2x2x16x16xf32>
    %581 = arith.mulf %579, %580 : vector<2x2x16x16xf32>
    %582 = arith.addf %576, %581 : vector<2x2x16x16xf32>
    %c0_398 = arith.constant 0 : index
    %c16_399 = arith.constant 16 : index
    %c1_400 = arith.constant 1 : index
    %c0_401 = arith.constant 0 : index
    %583 = vector.load %arg0[%c0_398, %c16_399, %c1_400, %c0_401] : memref<2x18x18x1xf32, #tpu.memory_space<vmem>>, vector<2x2x16x1xf32>
    %584 = vector.shape_cast %11 : vector<1x16xf32> to vector<1x1x1x16xf32>
    %585 = vector.broadcast %583 : vector<2x2x16x1xf32> to vector<2x2x16x16xf32>
    %586 = vector.broadcast %584 : vector<1x1x1x16xf32> to vector<2x2x16x16xf32>
    %587 = arith.mulf %585, %586 : vector<2x2x16x16xf32>
    %588 = arith.addf %582, %587 : vector<2x2x16x16xf32>
    %c0_402 = arith.constant 0 : index
    %c16_403 = arith.constant 16 : index
    %c2_404 = arith.constant 2 : index
    %c0_405 = arith.constant 0 : index
    %589 = vector.load %arg0[%c0_402, %c16_403, %c2_404, %c0_405] : memref<2x18x18x1xf32, #tpu.memory_space<vmem>>, vector<2x2x16x1xf32>
    %590 = vector.shape_cast %12 : vector<1x16xf32> to vector<1x1x1x16xf32>
    %591 = vector.broadcast %589 : vector<2x2x16x1xf32> to vector<2x2x16x16xf32>
    %592 = vector.broadcast %590 : vector<1x1x1x16xf32> to vector<2x2x16x16xf32>
    %593 = arith.mulf %591, %592 : vector<2x2x16x16xf32>
    %594 = arith.addf %588, %593 : vector<2x2x16x16xf32>
    %595 = vector.shape_cast %0 : vector<1x16xf32> to vector<1x1x1x16xf32>
    %596 = vector.broadcast %595 : vector<1x1x1x16xf32> to vector<2x2x16x16xf32>
    %597 = arith.mulf %594, %596 : vector<2x2x16x16xf32>
    %598 = vector.shape_cast %1 : vector<1x16xf32> to vector<1x1x1x16xf32>
    %599 = vector.broadcast %598 : vector<1x1x1x16xf32> to vector<2x2x16x16xf32>
    %600 = arith.addf %597, %599 : vector<2x2x16x16xf32>
    %cst_406 = arith.constant 0.000000e+00 : f32
    %601 = vector.broadcast %cst_406 : f32 to vector<2x2x16x16xf32>
    %602 = arith.maximumf %600, %601 : vector<2x2x16x16xf32>
    %603 = vector.extract_strided_slice %602 {offsets = [0, 0, 0, 0], sizes = [2, 1, 16, 16], strides = [1, 1, 1, 1]} : vector<2x2x16x16xf32> to vector<2x1x16x16xf32>
    %604 = vector.shape_cast %603 : vector<2x1x16x16xf32> to vector<2x16x16xf32>
    %605 = vector.extract_strided_slice %602 {offsets = [0, 1, 0, 0], sizes = [2, 1, 16, 16], strides = [1, 1, 1, 1]} : vector<2x2x16x16xf32> to vector<2x1x16x16xf32>
    %606 = vector.shape_cast %605 : vector<2x1x16x16xf32> to vector<2x16x16xf32>
    %607 = arith.maximumf %604, %606 : vector<2x16x16xf32>
    %c0_407 = arith.constant 0 : index
    %c0_408 = arith.constant 0 : index
    %c0_409 = arith.constant 0 : index
    %608 = vector.load %arg7[%c0_407, %c0_408, %c0_409] : memref<2x16x16xf32, #tpu.memory_space<vmem>>, vector<2x16x16xf32>
    tpu.vector_store %arg7[%c0_407, %c0_408, %c0_409], %607 {strides = array<i32>} : memref<2x16x16xf32, #tpu.memory_space<vmem>>, vector<2x16x16xf32>,
    %c0_410 = arith.constant 0 : index
    %c0_411 = arith.constant 0 : index
    %c0_412 = arith.constant 0 : index
    %609 = tpu.strided_load %arg7[%c0_410, %c0_411, %c0_412] {strides = array<i32: 1, 2, 1>} : memref<2x16x16xf32, #tpu.memory_space<vmem>>, vector<2x8x16xf32>
    %c0_413 = arith.constant 0 : index
    %c1_414 = arith.constant 1 : index
    %c0_415 = arith.constant 0 : index
    %610 = tpu.strided_load %arg7[%c0_413, %c1_414, %c0_415] {strides = array<i32: 1, 2, 1>} : memref<2x16x16xf32, #tpu.memory_space<vmem>>, vector<2x8x16xf32>
    %611 = arith.maximumf %609, %610 : vector<2x8x16xf32>
    %c0_416 = arith.constant 0 : index
    %c8_417 = arith.constant 8 : index
    %c1_418 = arith.constant 1 : index
    %c0_419 = arith.constant 0 : index
    %612 = vector.load %arg6[%c0_416, %c8_417, %c1_418, %c0_419] : memref<2x10x10x16xf32, #tpu.memory_space<vmem>>, vector<2x1x8x16xf32>
    %613 = vector.shape_cast %612 : vector<2x1x8x16xf32> to vector<2x8x16xf32>
    %614 = vector.shape_cast %611 : vector<2x8x16xf32> to vector<2x1x8x16xf32>
    tpu.vector_store %arg6[%c0_416, %c8_417, %c1_418, %c0_419], %614 {strides = array<i32>} : memref<2x10x10x16xf32, #tpu.memory_space<vmem>>, vector<2x1x8x16xf32>,
    %cst_420 = arith.constant 0.000000e+00 : f32
    %615 = vector.broadcast %cst_420 : f32 to vector<128x16xf32>
    %c0_421 = arith.constant 0 : index
    %c0_422 = arith.constant 0 : index
    %c0_423 = arith.constant 0 : index
    %c0_424 = arith.constant 0 : index
    %616 = vector.load %arg6[%c0_421, %c0_422, %c0_423, %c0_424] : memref<2x10x10x16xf32, #tpu.memory_space<vmem>>, vector<2x8x8x16xf32>
    %617 = vector.shape_cast %616 : vector<2x8x8x16xf32> to vector<128x16xf32>
    %c0_425 = arith.constant 0 : index
    %c0_426 = arith.constant 0 : index
    %c0_427 = arith.constant 0 : index
    %618 = vector.load %arg1[%c0_425, %c0_426, %c0_427] : memref<9x16x16xf32, #tpu.memory_space<vmem>>, vector<1x16x16xf32>
    %619 = vector.shape_cast %618 : vector<1x16x16xf32> to vector<16x16xf32>
    %cst_428 = arith.constant dense<0.000000e+00> : vector<128x16xf32>
    %620 = tpu.matmul %617, %619, %cst_428 {dimension_numbers = #tpu.dot_dimension_numbers<[1], [0], [0], [1], [0, 0, 1, 1], [], []>} : vector<128x16xf32>, vector<16x16xf32>, vector<128x16xf32> -> vector<128x16xf32>
    %621 = arith.addf %615, %620 : vector<128x16xf32>
    %c0_429 = arith.constant 0 : index
    %c0_430 = arith.constant 0 : index
    %c1_431 = arith.constant 1 : index
    %c0_432 = arith.constant 0 : index
    %622 = vector.load %arg6[%c0_429, %c0_430, %c1_431, %c0_432] : memref<2x10x10x16xf32, #tpu.memory_space<vmem>>, vector<2x8x8x16xf32>
    %623 = vector.shape_cast %622 : vector<2x8x8x16xf32> to vector<128x16xf32>
    %c1_433 = arith.constant 1 : index
    %c0_434 = arith.constant 0 : index
    %c0_435 = arith.constant 0 : index
    %624 = vector.load %arg1[%c1_433, %c0_434, %c0_435] : memref<9x16x16xf32, #tpu.memory_space<vmem>>, vector<1x16x16xf32>
    %625 = vector.shape_cast %624 : vector<1x16x16xf32> to vector<16x16xf32>
    %cst_436 = arith.constant dense<0.000000e+00> : vector<128x16xf32>
    %626 = tpu.matmul %623, %625, %cst_436 {dimension_numbers = #tpu.dot_dimension_numbers<[1], [0], [0], [1], [0, 0, 1, 1], [], []>} : vector<128x16xf32>, vector<16x16xf32>, vector<128x16xf32> -> vector<128x16xf32>
    %627 = arith.addf %621, %626 : vector<128x16xf32>
    %c0_437 = arith.constant 0 : index
    %c0_438 = arith.constant 0 : index
    %c2_439 = arith.constant 2 : index
    %c0_440 = arith.constant 0 : index
    %628 = vector.load %arg6[%c0_437, %c0_438, %c2_439, %c0_440] : memref<2x10x10x16xf32, #tpu.memory_space<vmem>>, vector<2x8x8x16xf32>
    %629 = vector.shape_cast %628 : vector<2x8x8x16xf32> to vector<128x16xf32>
    %c2_441 = arith.constant 2 : index
    %c0_442 = arith.constant 0 : index
    %c0_443 = arith.constant 0 : index
    %630 = vector.load %arg1[%c2_441, %c0_442, %c0_443] : memref<9x16x16xf32, #tpu.memory_space<vmem>>, vector<1x16x16xf32>
    %631 = vector.shape_cast %630 : vector<1x16x16xf32> to vector<16x16xf32>
    %cst_444 = arith.constant dense<0.000000e+00> : vector<128x16xf32>
    %632 = tpu.matmul %629, %631, %cst_444 {dimension_numbers = #tpu.dot_dimension_numbers<[1], [0], [0], [1], [0, 0, 1, 1], [], []>} : vector<128x16xf32>, vector<16x16xf32>, vector<128x16xf32> -> vector<128x16xf32>
    %633 = arith.addf %627, %632 : vector<128x16xf32>
    %c0_445 = arith.constant 0 : index
    %c1_446 = arith.constant 1 : index
    %c0_447 = arith.constant 0 : index
    %c0_448 = arith.constant 0 : index
    %634 = vector.load %arg6[%c0_445, %c1_446, %c0_447, %c0_448] : memref<2x10x10x16xf32, #tpu.memory_space<vmem>>, vector<2x8x8x16xf32>
    %635 = vector.shape_cast %634 : vector<2x8x8x16xf32> to vector<128x16xf32>
    %c3_449 = arith.constant 3 : index
    %c0_450 = arith.constant 0 : index
    %c0_451 = arith.constant 0 : index
    %636 = vector.load %arg1[%c3_449, %c0_450, %c0_451] : memref<9x16x16xf32, #tpu.memory_space<vmem>>, vector<1x16x16xf32>
    %637 = vector.shape_cast %636 : vector<1x16x16xf32> to vector<16x16xf32>
    %cst_452 = arith.constant dense<0.000000e+00> : vector<128x16xf32>
    %638 = tpu.matmul %635, %637, %cst_452 {dimension_numbers = #tpu.dot_dimension_numbers<[1], [0], [0], [1], [0, 0, 1, 1], [], []>} : vector<128x16xf32>, vector<16x16xf32>, vector<128x16xf32> -> vector<128x16xf32>
    %639 = arith.addf %633, %638 : vector<128x16xf32>
    %c0_453 = arith.constant 0 : index
    %c1_454 = arith.constant 1 : index
    %c1_455 = arith.constant 1 : index
    %c0_456 = arith.constant 0 : index
    %640 = vector.load %arg6[%c0_453, %c1_454, %c1_455, %c0_456] : memref<2x10x10x16xf32, #tpu.memory_space<vmem>>, vector<2x8x8x16xf32>
    %641 = vector.shape_cast %640 : vector<2x8x8x16xf32> to vector<128x16xf32>
    %c4_457 = arith.constant 4 : index
    %c0_458 = arith.constant 0 : index
    %c0_459 = arith.constant 0 : index
    %642 = vector.load %arg1[%c4_457, %c0_458, %c0_459] : memref<9x16x16xf32, #tpu.memory_space<vmem>>, vector<1x16x16xf32>
    %643 = vector.shape_cast %642 : vector<1x16x16xf32> to vector<16x16xf32>
    %cst_460 = arith.constant dense<0.000000e+00> : vector<128x16xf32>
    %644 = tpu.matmul %641, %643, %cst_460 {dimension_numbers = #tpu.dot_dimension_numbers<[1], [0], [0], [1], [0, 0, 1, 1], [], []>} : vector<128x16xf32>, vector<16x16xf32>, vector<128x16xf32> -> vector<128x16xf32>
    %645 = arith.addf %639, %644 : vector<128x16xf32>
    %c0_461 = arith.constant 0 : index
    %c1_462 = arith.constant 1 : index
    %c2_463 = arith.constant 2 : index
    %c0_464 = arith.constant 0 : index
    %646 = vector.load %arg6[%c0_461, %c1_462, %c2_463, %c0_464] : memref<2x10x10x16xf32, #tpu.memory_space<vmem>>, vector<2x8x8x16xf32>
    %647 = vector.shape_cast %646 : vector<2x8x8x16xf32> to vector<128x16xf32>
    %c5_465 = arith.constant 5 : index
    %c0_466 = arith.constant 0 : index
    %c0_467 = arith.constant 0 : index
    %648 = vector.load %arg1[%c5_465, %c0_466, %c0_467] : memref<9x16x16xf32, #tpu.memory_space<vmem>>, vector<1x16x16xf32>
    %649 = vector.shape_cast %648 : vector<1x16x16xf32> to vector<16x16xf32>
    %cst_468 = arith.constant dense<0.000000e+00> : vector<128x16xf32>
    %650 = tpu.matmul %647, %649, %cst_468 {dimension_numbers = #tpu.dot_dimension_numbers<[1], [0], [0], [1], [0, 0, 1, 1], [], []>} : vector<128x16xf32>, vector<16x16xf32>, vector<128x16xf32> -> vector<128x16xf32>
    %651 = arith.addf %645, %650 : vector<128x16xf32>
    %c0_469 = arith.constant 0 : index
    %c2_470 = arith.constant 2 : index
    %c0_471 = arith.constant 0 : index
    %c0_472 = arith.constant 0 : index
    %652 = vector.load %arg6[%c0_469, %c2_470, %c0_471, %c0_472] : memref<2x10x10x16xf32, #tpu.memory_space<vmem>>, vector<2x8x8x16xf32>
    %653 = vector.shape_cast %652 : vector<2x8x8x16xf32> to vector<128x16xf32>
    %c6_473 = arith.constant 6 : index
    %c0_474 = arith.constant 0 : index
    %c0_475 = arith.constant 0 : index
    %654 = vector.load %arg1[%c6_473, %c0_474, %c0_475] : memref<9x16x16xf32, #tpu.memory_space<vmem>>, vector<1x16x16xf32>
    %655 = vector.shape_cast %654 : vector<1x16x16xf32> to vector<16x16xf32>
    %cst_476 = arith.constant dense<0.000000e+00> : vector<128x16xf32>
    %656 = tpu.matmul %653, %655, %cst_476 {dimension_numbers = #tpu.dot_dimension_numbers<[1], [0], [0], [1], [0, 0, 1, 1], [], []>} : vector<128x16xf32>, vector<16x16xf32>, vector<128x16xf32> -> vector<128x16xf32>
    %657 = arith.addf %651, %656 : vector<128x16xf32>
    %c0_477 = arith.constant 0 : index
    %c2_478 = arith.constant 2 : index
    %c1_479 = arith.constant 1 : index
    %c0_480 = arith.constant 0 : index
    %658 = vector.load %arg6[%c0_477, %c2_478, %c1_479, %c0_480] : memref<2x10x10x16xf32, #tpu.memory_space<vmem>>, vector<2x8x8x16xf32>
    %659 = vector.shape_cast %658 : vector<2x8x8x16xf32> to vector<128x16xf32>
    %c7_481 = arith.constant 7 : index
    %c0_482 = arith.constant 0 : index
    %c0_483 = arith.constant 0 : index
    %660 = vector.load %arg1[%c7_481, %c0_482, %c0_483] : memref<9x16x16xf32, #tpu.memory_space<vmem>>, vector<1x16x16xf32>
    %661 = vector.shape_cast %660 : vector<1x16x16xf32> to vector<16x16xf32>
    %cst_484 = arith.constant dense<0.000000e+00> : vector<128x16xf32>
    %662 = tpu.matmul %659, %661, %cst_484 {dimension_numbers = #tpu.dot_dimension_numbers<[1], [0], [0], [1], [0, 0, 1, 1], [], []>} : vector<128x16xf32>, vector<16x16xf32>, vector<128x16xf32> -> vector<128x16xf32>
    %663 = arith.addf %657, %662 : vector<128x16xf32>
    %c0_485 = arith.constant 0 : index
    %c2_486 = arith.constant 2 : index
    %c2_487 = arith.constant 2 : index
    %c0_488 = arith.constant 0 : index
    %664 = vector.load %arg6[%c0_485, %c2_486, %c2_487, %c0_488] : memref<2x10x10x16xf32, #tpu.memory_space<vmem>>, vector<2x8x8x16xf32>
    %665 = vector.shape_cast %664 : vector<2x8x8x16xf32> to vector<128x16xf32>
    %c8_489 = arith.constant 8 : index
    %c0_490 = arith.constant 0 : index
    %c0_491 = arith.constant 0 : index
    %666 = vector.load %arg1[%c8_489, %c0_490, %c0_491] : memref<9x16x16xf32, #tpu.memory_space<vmem>>, vector<1x16x16xf32>
    %667 = vector.shape_cast %666 : vector<1x16x16xf32> to vector<16x16xf32>
    %cst_492 = arith.constant dense<0.000000e+00> : vector<128x16xf32>
    %668 = tpu.matmul %665, %667, %cst_492 {dimension_numbers = #tpu.dot_dimension_numbers<[1], [0], [0], [1], [0, 0, 1, 1], [], []>} : vector<128x16xf32>, vector<16x16xf32>, vector<128x16xf32> -> vector<128x16xf32>
    %669 = arith.addf %663, %668 : vector<128x16xf32>
    %670 = vector.broadcast %2 : vector<1x16xf32> to vector<128x16xf32>
    %671 = arith.mulf %669, %670 : vector<128x16xf32>
    %672 = vector.broadcast %3 : vector<1x16xf32> to vector<128x16xf32>
    %673 = arith.addf %671, %672 : vector<128x16xf32>
    %cst_493 = arith.constant 0.000000e+00 : f32
    %674 = vector.broadcast %cst_493 : f32 to vector<128x16xf32>
    %675 = arith.maximumf %673, %674 : vector<128x16xf32>
    %676 = vector.shape_cast %675 : vector<128x16xf32> to vector<2x8x8x16xf32>
    %677 = vector.shape_cast %676 : vector<2x8x8x16xf32> to vector<2x4x2x8x16xf32>
    %cst_494 = arith.constant dense<0xFF800000> : vector<2x4x8x16xf32>
    %678 = vector.multi_reduction <maximumf>, %677, %cst_494 [2] : vector<2x4x2x8x16xf32> to vector<2x4x8x16xf32>
    %c0_495 = arith.constant 0 : index
    %c0_496 = arith.constant 0 : index
    %c0_497 = arith.constant 0 : index
    %c0_498 = arith.constant 0 : index
    %679 = vector.load %arg8[%c0_495, %c0_496, %c0_497, %c0_498] : memref<2x4x8x16xf32, #tpu.memory_space<vmem>>, vector<2x4x8x16xf32>
    tpu.vector_store %arg8[%c0_495, %c0_496, %c0_497, %c0_498], %678 {strides = array<i32>} : memref<2x4x8x16xf32, #tpu.memory_space<vmem>>, vector<2x4x8x16xf32>,
    %c0_499 = arith.constant 0 : index
    %c0_500 = arith.constant 0 : index
    %c0_501 = arith.constant 0 : index
    %c0_502 = arith.constant 0 : index
    %680 = vector.load %arg8[%c0_499, %c0_500, %c0_501, %c0_502] : memref<2x4x8x16xf32, #tpu.memory_space<vmem>>, vector<2x1x1x16xf32>
    %681 = vector.shape_cast %680 : vector<2x1x1x16xf32> to vector<2x16xf32>
    %c0_503 = arith.constant 0 : index
    %c0_504 = arith.constant 0 : index
    %c1_505 = arith.constant 1 : index
    %c0_506 = arith.constant 0 : index
    %682 = vector.load %arg8[%c0_503, %c0_504, %c1_505, %c0_506] : memref<2x4x8x16xf32, #tpu.memory_space<vmem>>, vector<2x1x1x16xf32>
    %683 = vector.shape_cast %682 : vector<2x1x1x16xf32> to vector<2x16xf32>
    %684 = arith.maximumf %681, %683 : vector<2x16xf32>
    %c0_507 = arith.constant 0 : index
    %c0_508 = arith.constant 0 : index
    %685 = vector.load %arg9[%c0_507, %c0_508] : memref<2x256xf32, #tpu.memory_space<vmem>>, vector<2x16xf32>
    tpu.vector_store %arg9[%c0_507, %c0_508], %684 {strides = array<i32>} : memref<2x256xf32, #tpu.memory_space<vmem>>, vector<2x16xf32>,
    %c0_509 = arith.constant 0 : index
    %c0_510 = arith.constant 0 : index
    %c2_511 = arith.constant 2 : index
    %c0_512 = arith.constant 0 : index
    %686 = vector.load %arg8[%c0_509, %c0_510, %c2_511, %c0_512] : memref<2x4x8x16xf32, #tpu.memory_space<vmem>>, vector<2x1x1x16xf32>
    %687 = vector.shape_cast %686 : vector<2x1x1x16xf32> to vector<2x16xf32>
    %c0_513 = arith.constant 0 : index
    %c0_514 = arith.constant 0 : index
    %c3_515 = arith.constant 3 : index
    %c0_516 = arith.constant 0 : index
    %688 = vector.load %arg8[%c0_513, %c0_514, %c3_515, %c0_516] : memref<2x4x8x16xf32, #tpu.memory_space<vmem>>, vector<2x1x1x16xf32>
    %689 = vector.shape_cast %688 : vector<2x1x1x16xf32> to vector<2x16xf32>
    %690 = arith.maximumf %687, %689 : vector<2x16xf32>
    %c0_517 = arith.constant 0 : index
    %c16_518 = arith.constant 16 : index
    %691 = vector.load %arg9[%c0_517, %c16_518] : memref<2x256xf32, #tpu.memory_space<vmem>>, vector<2x16xf32>
    tpu.vector_store %arg9[%c0_517, %c16_518], %690 {strides = array<i32>} : memref<2x256xf32, #tpu.memory_space<vmem>>, vector<2x16xf32>,
    %c0_519 = arith.constant 0 : index
    %c0_520 = arith.constant 0 : index
    %c4_521 = arith.constant 4 : index
    %c0_522 = arith.constant 0 : index
    %692 = vector.load %arg8[%c0_519, %c0_520, %c4_521, %c0_522] : memref<2x4x8x16xf32, #tpu.memory_space<vmem>>, vector<2x1x1x16xf32>
    %693 = vector.shape_cast %692 : vector<2x1x1x16xf32> to vector<2x16xf32>
    %c0_523 = arith.constant 0 : index
    %c0_524 = arith.constant 0 : index
    %c5_525 = arith.constant 5 : index
    %c0_526 = arith.constant 0 : index
    %694 = vector.load %arg8[%c0_523, %c0_524, %c5_525, %c0_526] : memref<2x4x8x16xf32, #tpu.memory_space<vmem>>, vector<2x1x1x16xf32>
    %695 = vector.shape_cast %694 : vector<2x1x1x16xf32> to vector<2x16xf32>
    %696 = arith.maximumf %693, %695 : vector<2x16xf32>
    %c0_527 = arith.constant 0 : index
    %c32 = arith.constant 32 : index
    %697 = vector.load %arg9[%c0_527, %c32] : memref<2x256xf32, #tpu.memory_space<vmem>>, vector<2x16xf32>
    tpu.vector_store %arg9[%c0_527, %c32], %696 {strides = array<i32>} : memref<2x256xf32, #tpu.memory_space<vmem>>, vector<2x16xf32>,
    %c0_528 = arith.constant 0 : index
    %c0_529 = arith.constant 0 : index
    %c6_530 = arith.constant 6 : index
    %c0_531 = arith.constant 0 : index
    %698 = vector.load %arg8[%c0_528, %c0_529, %c6_530, %c0_531] : memref<2x4x8x16xf32, #tpu.memory_space<vmem>>, vector<2x1x1x16xf32>
    %699 = vector.shape_cast %698 : vector<2x1x1x16xf32> to vector<2x16xf32>
    %c0_532 = arith.constant 0 : index
    %c0_533 = arith.constant 0 : index
    %c7_534 = arith.constant 7 : index
    %c0_535 = arith.constant 0 : index
    %700 = vector.load %arg8[%c0_532, %c0_533, %c7_534, %c0_535] : memref<2x4x8x16xf32, #tpu.memory_space<vmem>>, vector<2x1x1x16xf32>
    %701 = vector.shape_cast %700 : vector<2x1x1x16xf32> to vector<2x16xf32>
    %702 = arith.maximumf %699, %701 : vector<2x16xf32>
    %c0_536 = arith.constant 0 : index
    %c48 = arith.constant 48 : index
    %703 = vector.load %arg9[%c0_536, %c48] : memref<2x256xf32, #tpu.memory_space<vmem>>, vector<2x16xf32>
    tpu.vector_store %arg9[%c0_536, %c48], %702 {strides = array<i32>} : memref<2x256xf32, #tpu.memory_space<vmem>>, vector<2x16xf32>,
    %c0_537 = arith.constant 0 : index
    %c1_538 = arith.constant 1 : index
    %c0_539 = arith.constant 0 : index
    %c0_540 = arith.constant 0 : index
    %704 = vector.load %arg8[%c0_537, %c1_538, %c0_539, %c0_540] : memref<2x4x8x16xf32, #tpu.memory_space<vmem>>, vector<2x1x1x16xf32>
    %705 = vector.shape_cast %704 : vector<2x1x1x16xf32> to vector<2x16xf32>
    %c0_541 = arith.constant 0 : index
    %c1_542 = arith.constant 1 : index
    %c1_543 = arith.constant 1 : index
    %c0_544 = arith.constant 0 : index
    %706 = vector.load %arg8[%c0_541, %c1_542, %c1_543, %c0_544] : memref<2x4x8x16xf32, #tpu.memory_space<vmem>>, vector<2x1x1x16xf32>
    %707 = vector.shape_cast %706 : vector<2x1x1x16xf32> to vector<2x16xf32>
    %708 = arith.maximumf %705, %707 : vector<2x16xf32>
    %c0_545 = arith.constant 0 : index
    %c64 = arith.constant 64 : index
    %709 = vector.load %arg9[%c0_545, %c64] : memref<2x256xf32, #tpu.memory_space<vmem>>, vector<2x16xf32>
    tpu.vector_store %arg9[%c0_545, %c64], %708 {strides = array<i32>} : memref<2x256xf32, #tpu.memory_space<vmem>>, vector<2x16xf32>,
    %c0_546 = arith.constant 0 : index
    %c1_547 = arith.constant 1 : index
    %c2_548 = arith.constant 2 : index
    %c0_549 = arith.constant 0 : index
    %710 = vector.load %arg8[%c0_546, %c1_547, %c2_548, %c0_549] : memref<2x4x8x16xf32, #tpu.memory_space<vmem>>, vector<2x1x1x16xf32>
    %711 = vector.shape_cast %710 : vector<2x1x1x16xf32> to vector<2x16xf32>
    %c0_550 = arith.constant 0 : index
    %c1_551 = arith.constant 1 : index
    %c3_552 = arith.constant 3 : index
    %c0_553 = arith.constant 0 : index
    %712 = vector.load %arg8[%c0_550, %c1_551, %c3_552, %c0_553] : memref<2x4x8x16xf32, #tpu.memory_space<vmem>>, vector<2x1x1x16xf32>
    %713 = vector.shape_cast %712 : vector<2x1x1x16xf32> to vector<2x16xf32>
    %714 = arith.maximumf %711, %713 : vector<2x16xf32>
    %c0_554 = arith.constant 0 : index
    %c80 = arith.constant 80 : index
    %715 = vector.load %arg9[%c0_554, %c80] : memref<2x256xf32, #tpu.memory_space<vmem>>, vector<2x16xf32>
    tpu.vector_store %arg9[%c0_554, %c80], %714 {strides = array<i32>} : memref<2x256xf32, #tpu.memory_space<vmem>>, vector<2x16xf32>,
    %c0_555 = arith.constant 0 : index
    %c1_556 = arith.constant 1 : index
    %c4_557 = arith.constant 4 : index
    %c0_558 = arith.constant 0 : index
    %716 = vector.load %arg8[%c0_555, %c1_556, %c4_557, %c0_558] : memref<2x4x8x16xf32, #tpu.memory_space<vmem>>, vector<2x1x1x16xf32>
    %717 = vector.shape_cast %716 : vector<2x1x1x16xf32> to vector<2x16xf32>
    %c0_559 = arith.constant 0 : index
    %c1_560 = arith.constant 1 : index
    %c5_561 = arith.constant 5 : index
    %c0_562 = arith.constant 0 : index
    %718 = vector.load %arg8[%c0_559, %c1_560, %c5_561, %c0_562] : memref<2x4x8x16xf32, #tpu.memory_space<vmem>>, vector<2x1x1x16xf32>
    %719 = vector.shape_cast %718 : vector<2x1x1x16xf32> to vector<2x16xf32>
    %720 = arith.maximumf %717, %719 : vector<2x16xf32>
    %c0_563 = arith.constant 0 : index
    %c96 = arith.constant 96 : index
    %721 = vector.load %arg9[%c0_563, %c96] : memref<2x256xf32, #tpu.memory_space<vmem>>, vector<2x16xf32>
    tpu.vector_store %arg9[%c0_563, %c96], %720 {strides = array<i32>} : memref<2x256xf32, #tpu.memory_space<vmem>>, vector<2x16xf32>,
    %c0_564 = arith.constant 0 : index
    %c1_565 = arith.constant 1 : index
    %c6_566 = arith.constant 6 : index
    %c0_567 = arith.constant 0 : index
    %722 = vector.load %arg8[%c0_564, %c1_565, %c6_566, %c0_567] : memref<2x4x8x16xf32, #tpu.memory_space<vmem>>, vector<2x1x1x16xf32>
    %723 = vector.shape_cast %722 : vector<2x1x1x16xf32> to vector<2x16xf32>
    %c0_568 = arith.constant 0 : index
    %c1_569 = arith.constant 1 : index
    %c7_570 = arith.constant 7 : index
    %c0_571 = arith.constant 0 : index
    %724 = vector.load %arg8[%c0_568, %c1_569, %c7_570, %c0_571] : memref<2x4x8x16xf32, #tpu.memory_space<vmem>>, vector<2x1x1x16xf32>
    %725 = vector.shape_cast %724 : vector<2x1x1x16xf32> to vector<2x16xf32>
    %726 = arith.maximumf %723, %725 : vector<2x16xf32>
    %c0_572 = arith.constant 0 : index
    %c112 = arith.constant 112 : index
    %727 = vector.load %arg9[%c0_572, %c112] : memref<2x256xf32, #tpu.memory_space<vmem>>, vector<2x16xf32>
    tpu.vector_store %arg9[%c0_572, %c112], %726 {strides = array<i32>} : memref<2x256xf32, #tpu.memory_space<vmem>>, vector<2x16xf32>,
    %c0_573 = arith.constant 0 : index
    %c2_574 = arith.constant 2 : index
    %c0_575 = arith.constant 0 : index
    %c0_576 = arith.constant 0 : index
    %728 = vector.load %arg8[%c0_573, %c2_574, %c0_575, %c0_576] : memref<2x4x8x16xf32, #tpu.memory_space<vmem>>, vector<2x1x1x16xf32>
    %729 = vector.shape_cast %728 : vector<2x1x1x16xf32> to vector<2x16xf32>
    %c0_577 = arith.constant 0 : index
    %c2_578 = arith.constant 2 : index
    %c1_579 = arith.constant 1 : index
    %c0_580 = arith.constant 0 : index
    %730 = vector.load %arg8[%c0_577, %c2_578, %c1_579, %c0_580] : memref<2x4x8x16xf32, #tpu.memory_space<vmem>>, vector<2x1x1x16xf32>
    %731 = vector.shape_cast %730 : vector<2x1x1x16xf32> to vector<2x16xf32>
    %732 = arith.maximumf %729, %731 : vector<2x16xf32>
    %c0_581 = arith.constant 0 : index
    %c128 = arith.constant 128 : index
    %733 = vector.load %arg9[%c0_581, %c128] : memref<2x256xf32, #tpu.memory_space<vmem>>, vector<2x16xf32>
    tpu.vector_store %arg9[%c0_581, %c128], %732 {strides = array<i32>} : memref<2x256xf32, #tpu.memory_space<vmem>>, vector<2x16xf32>,
    %c0_582 = arith.constant 0 : index
    %c2_583 = arith.constant 2 : index
    %c2_584 = arith.constant 2 : index
    %c0_585 = arith.constant 0 : index
    %734 = vector.load %arg8[%c0_582, %c2_583, %c2_584, %c0_585] : memref<2x4x8x16xf32, #tpu.memory_space<vmem>>, vector<2x1x1x16xf32>
    %735 = vector.shape_cast %734 : vector<2x1x1x16xf32> to vector<2x16xf32>
    %c0_586 = arith.constant 0 : index
    %c2_587 = arith.constant 2 : index
    %c3_588 = arith.constant 3 : index
    %c0_589 = arith.constant 0 : index
    %736 = vector.load %arg8[%c0_586, %c2_587, %c3_588, %c0_589] : memref<2x4x8x16xf32, #tpu.memory_space<vmem>>, vector<2x1x1x16xf32>
    %737 = vector.shape_cast %736 : vector<2x1x1x16xf32> to vector<2x16xf32>
    %738 = arith.maximumf %735, %737 : vector<2x16xf32>
    %c0_590 = arith.constant 0 : index
    %c144 = arith.constant 144 : index
    %739 = vector.load %arg9[%c0_590, %c144] : memref<2x256xf32, #tpu.memory_space<vmem>>, vector<2x16xf32>
    tpu.vector_store %arg9[%c0_590, %c144], %738 {strides = array<i32>} : memref<2x256xf32, #tpu.memory_space<vmem>>, vector<2x16xf32>,
    %c0_591 = arith.constant 0 : index
    %c2_592 = arith.constant 2 : index
    %c4_593 = arith.constant 4 : index
    %c0_594 = arith.constant 0 : index
    %740 = vector.load %arg8[%c0_591, %c2_592, %c4_593, %c0_594] : memref<2x4x8x16xf32, #tpu.memory_space<vmem>>, vector<2x1x1x16xf32>
    %741 = vector.shape_cast %740 : vector<2x1x1x16xf32> to vector<2x16xf32>
    %c0_595 = arith.constant 0 : index
    %c2_596 = arith.constant 2 : index
    %c5_597 = arith.constant 5 : index
    %c0_598 = arith.constant 0 : index
    %742 = vector.load %arg8[%c0_595, %c2_596, %c5_597, %c0_598] : memref<2x4x8x16xf32, #tpu.memory_space<vmem>>, vector<2x1x1x16xf32>
    %743 = vector.shape_cast %742 : vector<2x1x1x16xf32> to vector<2x16xf32>
    %744 = arith.maximumf %741, %743 : vector<2x16xf32>
    %c0_599 = arith.constant 0 : index
    %c160 = arith.constant 160 : index
    %745 = vector.load %arg9[%c0_599, %c160] : memref<2x256xf32, #tpu.memory_space<vmem>>, vector<2x16xf32>
    tpu.vector_store %arg9[%c0_599, %c160], %744 {strides = array<i32>} : memref<2x256xf32, #tpu.memory_space<vmem>>, vector<2x16xf32>,
    %c0_600 = arith.constant 0 : index
    %c2_601 = arith.constant 2 : index
    %c6_602 = arith.constant 6 : index
    %c0_603 = arith.constant 0 : index
    %746 = vector.load %arg8[%c0_600, %c2_601, %c6_602, %c0_603] : memref<2x4x8x16xf32, #tpu.memory_space<vmem>>, vector<2x1x1x16xf32>
    %747 = vector.shape_cast %746 : vector<2x1x1x16xf32> to vector<2x16xf32>
    %c0_604 = arith.constant 0 : index
    %c2_605 = arith.constant 2 : index
    %c7_606 = arith.constant 7 : index
    %c0_607 = arith.constant 0 : index
    %748 = vector.load %arg8[%c0_604, %c2_605, %c7_606, %c0_607] : memref<2x4x8x16xf32, #tpu.memory_space<vmem>>, vector<2x1x1x16xf32>
    %749 = vector.shape_cast %748 : vector<2x1x1x16xf32> to vector<2x16xf32>
    %750 = arith.maximumf %747, %749 : vector<2x16xf32>
    %c0_608 = arith.constant 0 : index
    %c176 = arith.constant 176 : index
    %751 = vector.load %arg9[%c0_608, %c176] : memref<2x256xf32, #tpu.memory_space<vmem>>, vector<2x16xf32>
    tpu.vector_store %arg9[%c0_608, %c176], %750 {strides = array<i32>} : memref<2x256xf32, #tpu.memory_space<vmem>>, vector<2x16xf32>,
    %c0_609 = arith.constant 0 : index
    %c3_610 = arith.constant 3 : index
    %c0_611 = arith.constant 0 : index
    %c0_612 = arith.constant 0 : index
    %752 = vector.load %arg8[%c0_609, %c3_610, %c0_611, %c0_612] : memref<2x4x8x16xf32, #tpu.memory_space<vmem>>, vector<2x1x1x16xf32>
    %753 = vector.shape_cast %752 : vector<2x1x1x16xf32> to vector<2x16xf32>
    %c0_613 = arith.constant 0 : index
    %c3_614 = arith.constant 3 : index
    %c1_615 = arith.constant 1 : index
    %c0_616 = arith.constant 0 : index
    %754 = vector.load %arg8[%c0_613, %c3_614, %c1_615, %c0_616] : memref<2x4x8x16xf32, #tpu.memory_space<vmem>>, vector<2x1x1x16xf32>
    %755 = vector.shape_cast %754 : vector<2x1x1x16xf32> to vector<2x16xf32>
    %756 = arith.maximumf %753, %755 : vector<2x16xf32>
    %c0_617 = arith.constant 0 : index
    %c192 = arith.constant 192 : index
    %757 = vector.load %arg9[%c0_617, %c192] : memref<2x256xf32, #tpu.memory_space<vmem>>, vector<2x16xf32>
    tpu.vector_store %arg9[%c0_617, %c192], %756 {strides = array<i32>} : memref<2x256xf32, #tpu.memory_space<vmem>>, vector<2x16xf32>,
    %c0_618 = arith.constant 0 : index
    %c3_619 = arith.constant 3 : index
    %c2_620 = arith.constant 2 : index
    %c0_621 = arith.constant 0 : index
    %758 = vector.load %arg8[%c0_618, %c3_619, %c2_620, %c0_621] : memref<2x4x8x16xf32, #tpu.memory_space<vmem>>, vector<2x1x1x16xf32>
    %759 = vector.shape_cast %758 : vector<2x1x1x16xf32> to vector<2x16xf32>
    %c0_622 = arith.constant 0 : index
    %c3_623 = arith.constant 3 : index
    %c3_624 = arith.constant 3 : index
    %c0_625 = arith.constant 0 : index
    %760 = vector.load %arg8[%c0_622, %c3_623, %c3_624, %c0_625] : memref<2x4x8x16xf32, #tpu.memory_space<vmem>>, vector<2x1x1x16xf32>
    %761 = vector.shape_cast %760 : vector<2x1x1x16xf32> to vector<2x16xf32>
    %762 = arith.maximumf %759, %761 : vector<2x16xf32>
    %c0_626 = arith.constant 0 : index
    %c208 = arith.constant 208 : index
    %763 = vector.load %arg9[%c0_626, %c208] : memref<2x256xf32, #tpu.memory_space<vmem>>, vector<2x16xf32>
    tpu.vector_store %arg9[%c0_626, %c208], %762 {strides = array<i32>} : memref<2x256xf32, #tpu.memory_space<vmem>>, vector<2x16xf32>,
    %c0_627 = arith.constant 0 : index
    %c3_628 = arith.constant 3 : index
    %c4_629 = arith.constant 4 : index
    %c0_630 = arith.constant 0 : index
    %764 = vector.load %arg8[%c0_627, %c3_628, %c4_629, %c0_630] : memref<2x4x8x16xf32, #tpu.memory_space<vmem>>, vector<2x1x1x16xf32>
    %765 = vector.shape_cast %764 : vector<2x1x1x16xf32> to vector<2x16xf32>
    %c0_631 = arith.constant 0 : index
    %c3_632 = arith.constant 3 : index
    %c5_633 = arith.constant 5 : index
    %c0_634 = arith.constant 0 : index
    %766 = vector.load %arg8[%c0_631, %c3_632, %c5_633, %c0_634] : memref<2x4x8x16xf32, #tpu.memory_space<vmem>>, vector<2x1x1x16xf32>
    %767 = vector.shape_cast %766 : vector<2x1x1x16xf32> to vector<2x16xf32>
    %768 = arith.maximumf %765, %767 : vector<2x16xf32>
    %c0_635 = arith.constant 0 : index
    %c224 = arith.constant 224 : index
    %769 = vector.load %arg9[%c0_635, %c224] : memref<2x256xf32, #tpu.memory_space<vmem>>, vector<2x16xf32>
    tpu.vector_store %arg9[%c0_635, %c224], %768 {strides = array<i32>} : memref<2x256xf32, #tpu.memory_space<vmem>>, vector<2x16xf32>,
    %c0_636 = arith.constant 0 : index
    %c3_637 = arith.constant 3 : index
    %c6_638 = arith.constant 6 : index
    %c0_639 = arith.constant 0 : index
    %770 = vector.load %arg8[%c0_636, %c3_637, %c6_638, %c0_639] : memref<2x4x8x16xf32, #tpu.memory_space<vmem>>, vector<2x1x1x16xf32>
    %771 = vector.shape_cast %770 : vector<2x1x1x16xf32> to vector<2x16xf32>
    %c0_640 = arith.constant 0 : index
    %c3_641 = arith.constant 3 : index
    %c7_642 = arith.constant 7 : index
    %c0_643 = arith.constant 0 : index
    %772 = vector.load %arg8[%c0_640, %c3_641, %c7_642, %c0_643] : memref<2x4x8x16xf32, #tpu.memory_space<vmem>>, vector<2x1x1x16xf32>
    %773 = vector.shape_cast %772 : vector<2x1x1x16xf32> to vector<2x16xf32>
    %774 = arith.maximumf %771, %773 : vector<2x16xf32>
    %c0_644 = arith.constant 0 : index
    %c240 = arith.constant 240 : index
    %775 = vector.load %arg9[%c0_644, %c240] : memref<2x256xf32, #tpu.memory_space<vmem>>, vector<2x16xf32>
    tpu.vector_store %arg9[%c0_644, %c240], %774 {strides = array<i32>} : memref<2x256xf32, #tpu.memory_space<vmem>>, vector<2x16xf32>,
    %c0_645 = arith.constant 0 : index
    %c0_646 = arith.constant 0 : index
    %776 = vector.load %arg9[%c0_645, %c0_646] : memref<2x256xf32, #tpu.memory_space<vmem>>, vector<2x256xf32>
    %c0_647 = arith.constant 0 : index
    %c0_648 = arith.constant 0 : index
    %777 = vector.load %arg2[%c0_647, %c0_648] : memref<256x32xf32, #tpu.memory_space<vmem>>, vector<256x32xf32>
    %cst_649 = arith.constant dense<0.000000e+00> : vector<2x32xf32>
    %778 = tpu.matmul %776, %777, %cst_649 {dimension_numbers = #tpu.dot_dimension_numbers<[1], [0], [0], [1], [0, 0, 1, 1], [], []>} : vector<2x256xf32>, vector<256x32xf32>, vector<2x32xf32> -> vector<2x32xf32>
    %c4_650 = arith.constant 4 : index
    %c0_651 = arith.constant 0 : index
    %779 = vector.load %arg4[%c4_650, %c0_651] : memref<18x32xf32, #tpu.memory_space<vmem>>, vector<1x32xf32>
    %780 = vector.broadcast %779 : vector<1x32xf32> to vector<2x32xf32>
    %781 = arith.addf %778, %780 : vector<2x32xf32>
    %cst_652 = arith.constant 0.000000e+00 : f32
    %782 = vector.broadcast %cst_652 : f32 to vector<2x32xf32>
    %783 = arith.maximumf %781, %782 : vector<2x32xf32>
    %c0_653 = arith.constant 0 : index
    %c0_654 = arith.constant 0 : index
    %c0_655 = arith.constant 0 : index
    %784 = vector.load %arg3[%c0_653, %c0_654, %c0_655] : memref<4x32x32xf32, #tpu.memory_space<vmem>>, vector<1x32x32xf32>
    %785 = vector.shape_cast %784 : vector<1x32x32xf32> to vector<32x32xf32>
    %cst_656 = arith.constant dense<0.000000e+00> : vector<2x32xf32>
    %786 = tpu.matmul %783, %785, %cst_656 {dimension_numbers = #tpu.dot_dimension_numbers<[1], [0], [0], [1], [0, 0, 1, 1], [], []>} : vector<2x32xf32>, vector<32x32xf32>, vector<2x32xf32> -> vector<2x32xf32>
    %c5_657 = arith.constant 5 : index
    %c0_658 = arith.constant 0 : index
    %787 = vector.load %arg4[%c5_657, %c0_658] : memref<18x32xf32, #tpu.memory_space<vmem>>, vector<1x32xf32>
    %788 = vector.broadcast %787 : vector<1x32xf32> to vector<2x32xf32>
    %789 = arith.addf %786, %788 : vector<2x32xf32>
    %cst_659 = arith.constant 0.000000e+00 : f32
    %790 = vector.broadcast %cst_659 : f32 to vector<2x32xf32>
    %791 = arith.maximumf %789, %790 : vector<2x32xf32>
    %c1_660 = arith.constant 1 : index
    %c0_661 = arith.constant 0 : index
    %c0_662 = arith.constant 0 : index
    %792 = vector.load %arg3[%c1_660, %c0_661, %c0_662] : memref<4x32x32xf32, #tpu.memory_space<vmem>>, vector<1x32x32xf32>
    %793 = vector.shape_cast %792 : vector<1x32x32xf32> to vector<32x32xf32>
    %cst_663 = arith.constant dense<0.000000e+00> : vector<2x32xf32>
    %794 = tpu.matmul %791, %793, %cst_663 {dimension_numbers = #tpu.dot_dimension_numbers<[1], [0], [0], [1], [0, 0, 1, 1], [], []>} : vector<2x32xf32>, vector<32x32xf32>, vector<2x32xf32> -> vector<2x32xf32>
    %c6_664 = arith.constant 6 : index
    %c0_665 = arith.constant 0 : index
    %795 = vector.load %arg4[%c6_664, %c0_665] : memref<18x32xf32, #tpu.memory_space<vmem>>, vector<1x32xf32>
    %796 = vector.broadcast %795 : vector<1x32xf32> to vector<2x32xf32>
    %797 = arith.addf %794, %796 : vector<2x32xf32>
    %cst_666 = arith.constant 0.000000e+00 : f32
    %798 = vector.broadcast %cst_666 : f32 to vector<2x32xf32>
    %799 = arith.maximumf %797, %798 : vector<2x32xf32>
    %c2_667 = arith.constant 2 : index
    %c0_668 = arith.constant 0 : index
    %c0_669 = arith.constant 0 : index
    %800 = vector.load %arg3[%c2_667, %c0_668, %c0_669] : memref<4x32x32xf32, #tpu.memory_space<vmem>>, vector<1x32x32xf32>
    %801 = vector.shape_cast %800 : vector<1x32x32xf32> to vector<32x32xf32>
    %cst_670 = arith.constant dense<0.000000e+00> : vector<2x32xf32>
    %802 = tpu.matmul %799, %801, %cst_670 {dimension_numbers = #tpu.dot_dimension_numbers<[1], [0], [0], [1], [0, 0, 1, 1], [], []>} : vector<2x32xf32>, vector<32x32xf32>, vector<2x32xf32> -> vector<2x32xf32>
    %c7_671 = arith.constant 7 : index
    %c0_672 = arith.constant 0 : index
    %803 = vector.load %arg4[%c7_671, %c0_672] : memref<18x32xf32, #tpu.memory_space<vmem>>, vector<1x32xf32>
    %804 = vector.broadcast %803 : vector<1x32xf32> to vector<2x32xf32>
    %805 = arith.addf %802, %804 : vector<2x32xf32>
    %cst_673 = arith.constant 0.000000e+00 : f32
    %806 = vector.broadcast %cst_673 : f32 to vector<2x32xf32>
    %807 = arith.maximumf %805, %806 : vector<2x32xf32>
    %c3_674 = arith.constant 3 : index
    %c0_675 = arith.constant 0 : index
    %c0_676 = arith.constant 0 : index
    %808 = vector.load %arg3[%c3_674, %c0_675, %c0_676] : memref<4x32x32xf32, #tpu.memory_space<vmem>>, vector<1x32x10xf32>
    %809 = vector.shape_cast %808 : vector<1x32x10xf32> to vector<32x10xf32>
    %cst_677 = arith.constant dense<0.000000e+00> : vector<2x10xf32>
    %810 = tpu.matmul %807, %809, %cst_677 {dimension_numbers = #tpu.dot_dimension_numbers<[1], [0], [0], [1], [0, 0, 1, 1], [], []>} : vector<2x32xf32>, vector<32x10xf32>, vector<2x10xf32> -> vector<2x10xf32>
    %c8_678 = arith.constant 8 : index
    %c0_679 = arith.constant 0 : index
    %811 = vector.load %arg4[%c8_678, %c0_679] : memref<18x32xf32, #tpu.memory_space<vmem>>, vector<1x10xf32>
    %812 = vector.broadcast %811 : vector<1x10xf32> to vector<2x10xf32>
    %813 = arith.addf %810, %812 : vector<2x10xf32>
    %c0_680 = arith.constant 0 : index
    %c0_681 = arith.constant 0 : index
    %814 = vector.load %arg5[%c0_680, %c0_681] : memref<2x10xf32, #tpu.memory_space<vmem>>, vector<2x10xf32>
    tpu.vector_store %arg5[%c0_680, %c0_681], %813 {strides = array<i32>} : memref<2x10xf32, #tpu.memory_space<vmem>>, vector<2x10xf32>,
    return
  }
}

</mosaic_0001>

<bundles_post_ra>
// kernel: cnn_forward.1
= control target key start
LH: loop header
LB: loop body
LE: loop exit
PB: predicated region body
PF: predicated region fallthrough
CT: control target
= control target key end

     0   :  { %v9754_v2 = vmov 0   ;;  %s14730_s0 = inlined_call_operand.vmem [shape: f32[2,18,18,1], index: 0, kind: input, shape index: {}]   ;;  %s14731_s1 = inlined_call_operand.vmem [shape: f32[9,16,16], index: 1, kind: input, shape index: {}]   ;;  %s14732_s2 = inlined_call_operand.vmem [shape: f32[256,32], index: 2, kind: input, shape index: {}]   ;;  %s14733_s3 = inlined_call_operand.vmem [shape: f32[4,32,32], index: 3, kind: input, shape index: {}]   ;;  %s14734_s4 = inlined_call_operand.vmem [shape: f32[18,32], index: 4, kind: input, shape index: {}]   ;;  %s14735_s5 = inlined_call_operand.hbm [shape: f32[2,10], index: 5, kind: output, shape index: {}]  }
   0x1   :  { %v78_v0 = vld [vmem:[%s14730_s0 + $0x18] sm:$0xff]  ;;  %v76_v1 = vld [vmem:[%s14730_s0] sm:$0xff]  ;;  %9687 = vset.pattern.permute.xlu1 %v9754_v2  ;;  %9686 = vset.pattern.permute.xlu0 %v9754_v2  ;;  %v77_v4 = vld [vmem:[%s14730_s0 + $0x8] sm:$0xff] }
   0x2   :  { %96 = vperm.xlu1 %9687, %v78_v0   ;;  %86 = vperm.xlu0 %9686, %v76_v1   ;;  %v79_v3 = vld [vmem:[%s14730_s0 + $0x20] sm:$0xff]  ;;  %v81_v5 = vld [vmem:[%s14730_s0 + $0x1b8] sm:$0xff]  ;;  %v80_v6 = vld [vmem:[%s14730_s0 + $0x1b0] sm:$0xff] }
   0x3   :  { %v83_v7 = vld [vmem:[%s14730_s0 + $0x1d0] sm:$0xff]  ;;  %v82_v8 = vld [vmem:[%s14730_s0 + $0x1c8] sm:$0xff] }
   0x4   :  { %v145_v9 = vld [vmem:[%s14730_s0 + $0x9] sm:$0xff]  ;;  %v144_v10 = vld [vmem:[%s14730_s0 + $0x1] sm:$0xff] }
   0x6   :  { %101 = vperm.xlu1 %9687, %v79_v3   ;;  %91 = vperm.xlu0 %9686, %v77_v4  }
   0xa   :  { %111 = vperm.xlu1 %9687, %v81_v5   ;;  %106 = vperm.xlu0 %9686, %v80_v6  }
   0xe   :  { %121 = vperm.xlu1 %9687, %v83_v7   ;;  %116 = vperm.xlu0 %9686, %v82_v8  }
   0xf   :  { %10 = vsyncpa [#allocation7], 0  ;;  %v147_v11 = vld [vmem:[%s14730_s0 + $0x21] sm:$0xff]  ;;  %v146_v12 = vld [vmem:[%s14730_s0 + $0x19] sm:$0xff]  ;;  %vm34_vm0 = vcmask 130048   ;;  %vm36_vm1 = vcmask 123904  }
  0x10   :  { %v149_v13 = vld [vmem:[%s14730_s0 + $0x1b9] sm:$0xff]  ;;  %v148_v14 = vld [vmem:[%s14730_s0 + $0x1b1] sm:$0xff]  ;;  %v150_v16 = vld [vmem:[%s14730_s0 + $0x1c9] sm:$0xff]  ;;  %v14736_v63 = vmov 0.0   ;;  %vm7209_vm2 = vcmask 1041409   ;;  %vm7211_vm3 = vcmask 1043459  }
  0x11   :  { %v151_v15 = vld [vmem:[%s14730_s0 + $0x1d1] sm:$0xff]  ;;  %v212_v18 = vld [vmem:[%s14730_s0 + $0x2] sm:$0xff]  ;;  %v214_v20 = vld [vmem:[%s14730_s0 + $0x1a] sm:$0xff]  ;;  %35 = vst.msk [vmem:[#allocation2] sm:$0xff] %vm34_vm0, %v14736_v63  ;;  %vm7213_vm4 = vcmask 1045509   ;;  %vm7215_vm5 = vcmask 1047559  }
  0x12   :  { %159 = vperm.xlu1 %9687, %v145_v9   ;;  %154 = vperm.xlu0 %9686, %v144_v10   ;;  %v213_v17 = vld [vmem:[%s14730_s0 + $0xa] sm:$0xff]  ;;  %v215_v19 = vld [vmem:[%s14730_s0 + $0x22] sm:$0xff]  ;;  %v217_v21 = vld [vmem:[%s14730_s0 + $0x1ba] sm:$0xff]  ;;  %37 = vst.msk [vmem:[#allocation2 + $0x8] sm:$0x3] %vm36_vm1, %v14736_v63  ;;  %s9757_s9 = smov 16  }
  0x13   :  { %v216_v22 = vld [vmem:[%s14730_s0 + $0x1b2] sm:$0xff]  ;;  %v218_v24 = vld [vmem:[%s14730_s0 + $0x1ca] sm:$0xff]  ;;  %v9889_v28 = vld [vmem:[%s14730_s0 + $0x1e0] sm:$0xff]  ;;  %38 = vst.msk [vmem:[#allocation2 + $0x10] sm:$0xff] %vm34_vm0, %v14736_v63  ;;  %s9758_s10 = smov 32   ;;  %s9759_s11 = smov 48  }
  0x14   :  { %v219_v23 = vld [vmem:[%s14730_s0 + $0x1d2] sm:$0xff]  ;;  %v9884_v27 = vld [vmem:[%s14730_s0 + $0x1e8] sm:$0xff]  ;;  %v9920_v33 = vld [vmem:[%s14730_s0 + $0x3a] sm:$0xff]  ;;  %39 = vst.msk [vmem:[#allocation2 + $0x18] sm:$0x3] %vm36_vm1, %v14736_v63  ;;  %s9760_s12 = smov 64  }
  0x15   :  { %v9872_v25 = vld [vmem:[%s14730_s0 + $0x38] sm:$0xff]  ;;  %v9877_v26 = vld [vmem:[%s14730_s0 + $0x30] sm:$0xff]  ;;  %v9913_v32 = vld [vmem:[%s14730_s0 + $0x1e1] sm:$0xff]  ;;  %40 = vst.msk [vmem:[#allocation2 + $0x20] sm:$0xff] %vm34_vm0, %v14736_v63  ;;  %s9761_s13 = smov 80   ;;  %s9762_s29 = smov 96  }
  0x16   :  { %169 = vperm.xlu1 %9687, %v147_v11   ;;  %164 = vperm.xlu0 %9686, %v146_v12   ;;  %v9896_v29 = vld [vmem:[%s14730_s0 + $0x39] sm:$0xff]  ;;  %v9901_v30 = vld [vmem:[%s14730_s0 + $0x31] sm:$0xff]  ;;  %v9908_v31 = vld [vmem:[%s14730_s0 + $0x1e9] sm:$0xff]  ;;  %41 = vst.msk [vmem:[#allocation2 + $0x28] sm:$0x3] %vm36_vm1, %v14736_v63  ;;  %vm7251_vm6 = vcmask 255104  }
  0x17   :  { %v9925_v34 = vld [vmem:[%s14730_s0 + $0x32] sm:$0xff]  ;;  %v9932_v35 = vld [vmem:[%s14730_s0 + $0x1ea] sm:$0xff]  ;;  %v9937_v36 = vld [vmem:[%s14730_s0 + $0x1e2] sm:$0xff]  ;;  %42 = vst.msk [vmem:[#allocation2 + $0x30] sm:$0xff] %vm34_vm0, %v14736_v63  ;;  %vm7285_vm7 = vcmask 386304   ;;  %vm7319_vm8 = vcmask 517504  }
  0x18   :  { %v9946_v37 = vld [vmem:[%s14730_s0 + $0x50] sm:$0xff]  ;;  %v9951_v38 = vld [vmem:[%s14730_s0 + $0x48] sm:$0xff]  ;;  %v9960_v39 = vld [vmem:[%s14730_s0 + $0x200] sm:$0xff]  ;;  %43 = vst.msk [vmem:[#allocation2 + $0x38] sm:$0x3] %vm36_vm1, %v14736_v63  ;;  %vm7354_vm9 = vcmask 648704  }
  0x19   :  { %v9965_v40 = vld [vmem:[%s14730_s0 + $0x1f8] sm:$0xff]  ;;  %v9979_v42 = vld [vmem:[%s14730_s0 + $0x49] sm:$0xff]  ;;  %v9988_v43 = vld [vmem:[%s14730_s0 + $0x201] sm:$0xff]  ;;  %44 = vst.msk [vmem:[#allocation2 + $0x40] sm:$0xff] %vm34_vm0, %v14736_v63  ;;  %vm7388_vm10 = vcmask 779904   ;;  %vm7422_vm11 = vcmask 911104  }
  0x1a   :  { %179 = vperm.xlu1 %9687, %v149_v13   ;;  %174 = vperm.xlu0 %9686, %v148_v14   ;;  %v9974_v41 = vld [vmem:[%s14730_s0 + $0x51] sm:$0xff]  ;;  %v9993_v44 = vld [vmem:[%s14730_s0 + $0x1f9] sm:$0xff]  ;;  %v10028_v53 = vld [vmem:[%s14730_s0 + $0x202] sm:$0xff]  ;;  %45 = vst.msk [vmem:[#allocation2 + $0x48] sm:$0x3] %vm36_vm1, %v14736_v63  ;;  %vm7456_vm12 = vcmask 1042304  }
  0x1b   :  { %v10006_v47 = vld [vmem:[%s14730_s0 + $0x52] sm:$0xff]  ;;  %v10011_v48 = vld [vmem:[%s14730_s0 + $0x4a] sm:$0xff]  ;;  %v10033_v54 = vld [vmem:[%s14730_s0 + $0x1fa] sm:$0xff]  ;;  %46 = vst.msk [vmem:[#allocation2 + $0x50] sm:$0xff] %vm34_vm0, %v14736_v63  ;;  %vm9765_vm13 = vmmov 0   ;;  %vm7851_vm14 = vcmask 261120  }
  0x1c   :  { %47 = vst.msk [vmem:[#allocation2 + $0x58] sm:$0x3] %vm36_vm1, %v14736_v63  ;;  %49 = vst.msk [vmem:[#allocation2 + $0x68] sm:$0x3] %vm36_vm1, %v14736_v63  ;;  %v8756_v2 = vld [vmem:[%s14731_s1 + $0x10] sm:$0xff]  ;;  %vm8177_vm15 = vcmask 74752  }
  0x1d   :  { %48 = vst.msk [vmem:[#allocation2 + $0x60] sm:$0xff] %vm34_vm0, %v14736_v63  ;;  %50 = vst.msk [vmem:[#allocation2 + $0x70] sm:$0xff] %vm34_vm0, %v14736_v63 }
  0x1e   :  { %189 = vperm.xlu1 %9687, %v151_v15   ;;  %184 = vperm.xlu0 %9686, %v150_v16   ;;  %51 = vst.msk [vmem:[#allocation2 + $0x78] sm:$0x3] %vm36_vm1, %v14736_v63  ;;  %53 = vst.msk [vmem:[#allocation2 + $0x88] sm:$0x3] %vm36_vm1, %v14736_v63 }
  0x1f   :  { %52 = vst.msk [vmem:[#allocation2 + $0x80] sm:$0xff] %vm34_vm0, %v14736_v63  ;;  %54 = vst.msk [vmem:[#allocation2 + $0x90] sm:$0xff] %vm34_vm0, %v14736_v63 }
  0x20   :  { %55 = vst.msk [vmem:[#allocation2 + $0x98] sm:$0x3] %vm36_vm1, %v14736_v63  ;;  %57 = vst.msk [vmem:[#allocation2 + $0xa8] sm:$0x3] %vm36_vm1, %v14736_v63 }
  0x21   :  { %56 = vst.msk [vmem:[#allocation2 + $0xa0] sm:$0xff] %vm34_vm0, %v14736_v63  ;;  %58 = vst.msk [vmem:[#allocation2 + $0xb0] sm:$0xff] %vm34_vm0, %v14736_v63 }
  0x22   :  { %227 = vperm.xlu1 %9687, %v213_v17   ;;  %222 = vperm.xlu0 %9686, %v212_v18   ;;  %59 = vst.msk [vmem:[#allocation2 + $0xb8] sm:$0x3] %vm36_vm1, %v14736_v63  ;;  %61 = vst.msk [vmem:[#allocation2 + $0xc8] sm:$0x3] %vm36_vm1, %v14736_v63 }
  0x23   :  { %60 = vst.msk [vmem:[#allocation2 + $0xc0] sm:$0xff] %vm34_vm0, %v14736_v63  ;;  %62 = vst.msk [vmem:[#allocation2 + $0xd0] sm:$0xff] %vm34_vm0, %v14736_v63 }
  0x24   :  { %63 = vst.msk [vmem:[#allocation2 + $0xd8] sm:$0x3] %vm36_vm1, %v14736_v63  ;;  %65 = vst.msk [vmem:[#allocation2 + $0xe8] sm:$0x3] %vm36_vm1, %v14736_v63 }
  0x25   :  { %64 = vst.msk [vmem:[#allocation2 + $0xe0] sm:$0xff] %vm34_vm0, %v14736_v63  ;;  %66 = vst.msk [vmem:[#allocation2 + $0xf0] sm:$0xff] %vm34_vm0, %v14736_v63 }
  0x26   :  { %237 = vperm.xlu1 %9687, %v215_v19   ;;  %232 = vperm.xlu0 %9686, %v214_v20   ;;  %67 = vst.msk [vmem:[#allocation2 + $0xf8] sm:$0x3] %vm36_vm1, %v14736_v63  ;;  %69 = vst.msk [vmem:[#allocation2 + $0x108] sm:$0x3] %vm36_vm1, %v14736_v63 }
  0x27   :  { %68 = vst.msk [vmem:[#allocation2 + $0x100] sm:$0xff] %vm34_vm0, %v14736_v63  ;;  %70 = vst.msk [vmem:[#allocation2 + $0x110] sm:$0xff] %vm34_vm0, %v14736_v63 }
  0x28   :  { %71 = vst.msk [vmem:[#allocation2 + $0x118] sm:$0x3] %vm36_vm1, %v14736_v63  ;;  %73 = vst.msk [vmem:[#allocation2 + $0x128] sm:$0x3] %vm36_vm1, %v14736_v63 }
  0x29   :  { %72 = vst.msk [vmem:[#allocation2 + $0x120] sm:$0xff] %vm34_vm0, %v14736_v63  ;;  %74 = vst.msk [vmem:[#allocation2 + $0x130] sm:$0xff] %vm34_vm0, %v14736_v63 }
  0x2a   :  { %247 = vperm.xlu1 %9687, %v217_v21   ;;  %242 = vperm.xlu0 %9686, %v216_v22   ;;  %75 = vst.msk [vmem:[#allocation2 + $0x138] sm:$0x3] %vm36_vm1, %v14736_v63  ;;  %v10302_v63 = vld [vmem:[%s14730_s0 + $0x62] sm:$0xff] }
  0x2b   :  { %14833 = vst [vmem:[#allocation19_spill] sm:$0xff] %v10302_v63 }
  0x2e   :  { %257 = vperm.xlu1 %9687, %v219_v23   ;;  %252 = vperm.xlu0 %9686, %v218_v24  }
  0x32   :  { %296 = vperm.xlu1 %9687, %v79_v3   ;;  %291 = vperm.xlu0 %9686, %v78_v0   ;;  %v8757_v3 = vld [vmem:[%s14731_s1 + $0x18] sm:$0xff] }
  0x33   :  { %v9453_v4 = vpack.c.bf16 %v8757_v3, %v8756_v2  ;;  %v10280_v2 = vld [vmem:[%s14730_s0 + $0x211] sm:$0xff] }
  0x34   :  { %14828 = vst [vmem:[#allocation14_spill] sm:$0xff] %v10280_v2 }
  0x35   :  { %9454 = vmatprep.subr.bf16.mxu1 %v9453_v4 }
  0x36   :  { %306 = vperm.xlu1 %9687, %v9872_v25   ;;  %301 = vperm.xlu0 %9686, %v9877_v26  }
  0x37   :  { %9456 = vmatpush3.bf16.msra.mxu1 %v9453_v4 }
  0x3a   :  { %316 = vperm.xlu1 %9687, %v83_v7   ;;  %311 = vperm.xlu0 %9686, %v82_v8   ;;  %v5093_v7 = vld [vmem:[#allocation2 + $0x1] sm:$0xff] }
  0x3b   :  { %9161 = vmatprep.mubr.msk.f32.mxu1 %vm34_vm0, %v5093_v7  ;;  %v10297_v7 = vld [vmem:[%s14730_s0 + $0x6a] sm:$0xff] }
  0x3c   :  { %14832 = vst [vmem:[#allocation18_spill] sm:$0xff] %v10297_v7 }
  0x3e   :  { %326 = vperm.xlu1 %9687, %v9884_v27   ;;  %321 = vperm.xlu0 %9686, %v9889_v28  }
  0x42   :  { %364 = vperm.xlu1 %9687, %v147_v11   ;;  %359 = vperm.xlu0 %9686, %v146_v12  }
  0x46   :  { %374 = vperm.xlu1 %9687, %v9896_v29   ;;  %369 = vperm.xlu0 %9686, %v9901_v30  }
  0x4a   :  { %384 = vperm.xlu1 %9687, %v151_v15   ;;  %379 = vperm.xlu0 %9686, %v150_v16  }
  0x4e   :  { %394 = vperm.xlu1 %9687, %v9908_v31   ;;  %389 = vperm.xlu0 %9686, %v9913_v32  }
  0x52   :  { %432 = vperm.xlu1 %9687, %v215_v19   ;;  %427 = vperm.xlu0 %9686, %v214_v20  }
  0x56   :  { %442 = vperm.xlu1 %9687, %v9920_v33   ;;  %437 = vperm.xlu0 %9686, %v9925_v34  }
  0x5a   :  { %452 = vperm.xlu1 %9687, %v219_v23   ;;  %447 = vperm.xlu0 %9686, %v218_v24   ;;  %v10209_v24 = vld [vmem:[%s14730_s0 + $0x68] sm:$0xff] }
  0x5e   :  { %462 = vperm.xlu1 %9687, %v9932_v35   ;;  %457 = vperm.xlu0 %9686, %v9937_v36  }
  0x62   :  { %501 = vperm.xlu1 %9687, %v9872_v25   ;;  %496 = vperm.xlu0 %9686, %v9877_v26  }
  0x66   :  { %511 = vperm.xlu1 %9687, %v9946_v37   ;;  %506 = vperm.xlu0 %9686, %v9951_v38  }
  0x6a   :  { %521 = vperm.xlu1 %9687, %v9884_v27   ;;  %516 = vperm.xlu0 %9686, %v9889_v28  }
  0x6e   :  { %531 = vperm.xlu1 %9687, %v9960_v39   ;;  %526 = vperm.xlu0 %9686, %v9965_v40  }
  0x72   :  { %569 = vperm.xlu1 %9687, %v9896_v29   ;;  %564 = vperm.xlu0 %9686, %v9901_v30  }
  0x76   :  { %579 = vperm.xlu1 %9687, %v9974_v41   ;;  %574 = vperm.xlu0 %9686, %v9979_v42  }
  0x7a   :  { %589 = vperm.xlu1 %9687, %v9908_v31   ;;  %584 = vperm.xlu0 %9686, %v9913_v32  }
  0x7e   :  { %599 = vperm.xlu1 %9687, %v9988_v43   ;;  %594 = vperm.xlu0 %9686, %v9993_v44  }
  0x81   :  { %v9997_v45 = vpop.permute.xlu1 %96  ;;  %v9999_v46 = vpop.permute.xlu0 %86 }
  0x82   :  { %637 = vperm.xlu1 %9687, %v9920_v33   ;;  %632 = vperm.xlu0 %9686, %v9925_v34  }
  0x85   :  { %v10013_v49 = vpop.permute.xlu1 %101  ;;  %v10015_v50 = vpop.permute.xlu0 %91 }
  0x86   :  { %647 = vperm.xlu1 %9687, %v10006_v47   ;;  %642 = vperm.xlu0 %9686, %v10011_v48  }
  0x89   :  { %v10019_v51 = vpop.permute.xlu1 %111  ;;  %v10021_v52 = vpop.permute.xlu0 %106 }
  0x8a   :  { %657 = vperm.xlu1 %9687, %v9932_v35   ;;  %652 = vperm.xlu0 %9686, %v9937_v36  }
  0x8d   :  { %v10035_v55 = vpop.permute.xlu1 %121  ;;  %v10037_v56 = vpop.permute.xlu0 %116 }
  0x8e   :  { %667 = vperm.xlu1 %9687, %v10028_v53   ;;  %662 = vperm.xlu0 %9686, %v10033_v54  }
  0x91   :  { %v10041_v57 = vpop.permute.xlu1 %159  ;;  %v10043_v58 = vpop.permute.xlu0 %154 }
  0x92   :  { %757 = vperm.xlu1 %9687, %v9872_v25   ;;  %752 = vperm.xlu0 %9686, %v9877_v26   ;;  %v10214_v25 = vld [vmem:[%s14730_s0 + $0x60] sm:$0xff] }
  0x95   :  { %v10047_v59 = vpop.permute.xlu1 %169  ;;  %v10049_v60 = vpop.permute.xlu0 %164 }
  0x96   :  { %767 = vperm.xlu1 %9687, %v9946_v37   ;;  %762 = vperm.xlu0 %9686, %v9951_v38  }
  0x99   :  { %v10053_v61 = vpop.permute.xlu1 %179  ;;  %v10055_v62 = vpop.permute.xlu0 %174 }
  0x9a   :  { %777 = vperm.xlu1 %9687, %v9884_v27   ;;  %772 = vperm.xlu0 %9686, %v9889_v28  }
  0x9d   :  { %v10139_v0 = vpop.permute.xlu1 %189  ;;  %v10141_v1 = vpop.permute.xlu0 %184 }
  0x9e   :  { %787 = vperm.xlu1 %9687, %v9960_v39   ;;  %782 = vperm.xlu0 %9686, %v9965_v40  }
  0xa1   :  { %v10151_v5 = vpop.permute.xlu1 %227  ;;  %v10153_v6 = vpop.permute.xlu0 %222 }
  0xa2   :  { %821 = vperm.xlu1 %9687, %v9896_v29   ;;  %816 = vperm.xlu0 %9686, %v9901_v30   ;;  %v10231_v30 = vld [vmem:[%s14730_s0 + $0x218] sm:$0xff] }
  0xa5   :  { %v10158_v8 = vpop.permute.xlu1 %237  ;;  %v10160_v9 = vpop.permute.xlu0 %232 }
  0xa6   :  { %831 = vperm.xlu1 %9687, %v9974_v41   ;;  %826 = vperm.xlu0 %9686, %v9979_v42  }
  0xa9   :  { %v10164_v10 = vpop.permute.xlu1 %247  ;;  %v10166_v11 = vpop.permute.xlu0 %242 }
  0xaa   :  { %841 = vperm.xlu1 %9687, %v9908_v31   ;;  %836 = vperm.xlu0 %9686, %v9913_v32   ;;  %v10236_v31 = vld [vmem:[%s14730_s0 + $0x210] sm:$0xff] }
  0xad   :  { %v10170_v12 = vpop.permute.xlu1 %257  ;;  %v10172_v13 = vpop.permute.xlu0 %252 }
  0xae   :  { %851 = vperm.xlu1 %9687, %v9988_v43   ;;  %846 = vperm.xlu0 %9686, %v9993_v44  }
  0xb1   :  { %v10176_v14 = vpop.permute.xlu1 %296  ;;  %v10178_v15 = vpop.permute.xlu0 %291 }
  0xb2   :  { %885 = vperm.xlu1 %9687, %v9920_v33   ;;  %880 = vperm.xlu0 %9686, %v9925_v34  }
  0xb5   :  { %v10182_v16 = vpop.permute.xlu1 %306  ;;  %v10184_v17 = vpop.permute.xlu0 %301 }
  0xb6   :  { %895 = vperm.xlu1 %9687, %v10006_v47   ;;  %890 = vperm.xlu0 %9686, %v10011_v48  }
  0xb9   :  { %v10188_v18 = vpop.permute.xlu1 %316  ;;  %v10190_v19 = vpop.permute.xlu0 %311 }
  0xba   :  { %905 = vperm.xlu1 %9687, %v9932_v35   ;;  %900 = vperm.xlu0 %9686, %v9937_v36   ;;  %v10253_v36 = vld [vmem:[%s14730_s0 + $0x69] sm:$0xff] }
  0xbb   :  { %14823 = vst [vmem:[#allocation9_spill] sm:$0xff] %v10253_v36 }
  0xbd   :  { %v10194_v20 = vpop.permute.xlu1 %326  ;;  %v10196_v21 = vpop.permute.xlu0 %321 }
  0xbe   :  { %915 = vperm.xlu1 %9687, %v10028_v53   ;;  %910 = vperm.xlu0 %9686, %v10033_v54  }
  0xc1   :  { %v10200_v22 = vpop.permute.xlu1 %364  ;;  %v10202_v23 = vpop.permute.xlu0 %359 }
  0xc2   :  { %950 = vperm.xlu1 %9687, %v9946_v37   ;;  %945 = vperm.xlu0 %9686, %v9951_v38   ;;  %v10258_v37 = vld [vmem:[%s14730_s0 + $0x61] sm:$0xff] }
  0xc3   :  { %14824 = vst [vmem:[#allocation10_spill] sm:$0xff] %v10258_v37 }
  0xc5   :  { %v10216_v26 = vpop.permute.xlu1 %374  ;;  %v10218_v27 = vpop.permute.xlu0 %369 }
  0xc6   :  { %960 = vperm.xlu1 %9687, %v10209_v24   ;;  %955 = vperm.xlu0 %9686, %v10214_v25  }
  0xc9   :  { %v10222_v28 = vpop.permute.xlu1 %384  ;;  %v10224_v29 = vpop.permute.xlu0 %379 }
  0xca   :  { %970 = vperm.xlu1 %9687, %v9960_v39   ;;  %965 = vperm.xlu0 %9686, %v9965_v40  }
  0xcd   :  { %v10238_v32 = vpop.permute.xlu1 %394  ;;  %v10240_v33 = vpop.permute.xlu0 %389 }
  0xce   :  { %980 = vperm.xlu1 %9687, %v10231_v30   ;;  %975 = vperm.xlu0 %9686, %v10236_v31  }
  0xd1   :  { %v10244_v34 = vpop.permute.xlu1 %432  ;;  %v10246_v35 = vpop.permute.xlu0 %427 }
  0xd2   :  { %1014 = vperm.xlu1 %9687, %v9974_v41   ;;  %1009 = vperm.xlu0 %9686, %v9979_v42   ;;  %v10275_v42 = vld [vmem:[%s14730_s0 + $0x219] sm:$0xff] }
  0xd3   :  { %14827 = vst [vmem:[#allocation13_spill] sm:$0xff] %v10275_v42 }
  0xd5   :  { %v10260_v38 = vpop.permute.xlu1 %442  ;;  %v10262_v39 = vpop.permute.xlu0 %437 }
  0xd6   :  { %1024 = vperm.xlu1 %9687, %v10253_v36   ;;  %1019 = vperm.xlu0 %9686, %v10258_v37  }
  0xd9   :  { %v10266_v40 = vpop.permute.xlu1 %452  ;;  %v10268_v41 = vpop.permute.xlu0 %447 }
  0xda   :  { %14825 = vst [vmem:[#allocation11_spill] sm:$0xff] %v10266_v40  ;;  %14826 = vst [vmem:[#allocation12_spill] sm:$0xff] %v10268_v41  ;;  %1034 = vperm.xlu1 %9687, %v9988_v43   ;;  %1029 = vperm.xlu0 %9686, %v9993_v44  }
  0xdd   :  { %v10282_v3 = vpop.permute.xlu1 %462  ;;  %v10284_v4 = vpop.permute.xlu0 %457 }
  0xde   :  { %14829 = vst [vmem:[#allocation15_spill] sm:$0xff] %v10282_v3  ;;  %14830 = vst [vmem:[#allocation16_spill] sm:$0xff] %v10284_v4  ;;  %1044 = vperm.xlu1 %9687, %v10275_v42   ;;  %1039 = vperm.xlu0 %9686, %v10280_v2   ;;  %v10307_v2 = vld [vmem:[%s14734_s4 + $0x9] ss:$0 sm:$0xff] }
  0xdf   :  { %v130_v4 = vmul.f32 %v10307_v2, %v9997_v45  ;;  %v128_v3 = vmul.f32 %v10307_v2, %v9999_v46  ;;  %v131_v37 = vmul.f32 %v10307_v2, %v10013_v49  ;;  %v129_v36 = vmul.f32 %v10307_v2, %v10015_v50 }
  0xe0   :  { %v133_v46 = vmul.f32 %v10307_v2, %v10019_v51 }
  0xe1   :  { %v10288_v43 = vpop.permute.xlu1 %501  ;;  %v10290_v44 = vpop.permute.xlu0 %496 }
  0xe2   :  { %14831 = vst [vmem:[#allocation17_spill] sm:$0xff] %v10290_v44  ;;  %1078 = vperm.xlu1 %9687, %v10006_v47   ;;  %1073 = vperm.xlu0 %9686, %v10011_v48   ;;  %v10316_v48 = vld [vmem:[%s14734_s4 + $0xa] ss:$0 sm:$0xff] }
  0xe3   :  { %v196_v49 = vmul.f32 %v10316_v48, %v10043_v58  ;;  %v199_v50 = vmul.f32 %v10316_v48, %v10047_v59  ;;  %v201_v51 = vmul.f32 %v10316_v48, %v10053_v61  ;;  %v10358_v58 = vld [vmem:[%s14730_s0 + $0x21a] sm:$0xff] }
  0xe5   :  { %v10309_v42 = vpop.permute.xlu1 %511  ;;  %v10311_v47 = vpop.permute.xlu0 %506  ;;  %v207_v40 = vadd.f32 %v199_v50, %v131_v37 }
  0xe6   :  { %14834 = vst [vmem:[#allocation20_spill] sm:$0xff] %v10309_v42  ;;  %14835 = vst [vmem:[#allocation21_spill] sm:$0xff] %v10311_v47  ;;  %1088 = vperm.xlu1 %9687, %v10297_v7   ;;  %1083 = vperm.xlu0 %9686, %v10302_v63   ;;  %v197_v47 = vmul.f32 %v10316_v48, %v10041_v57  ;;  %v10333_v7 = vld [vmem:[%s14734_s4 + $0xb] ss:$0 sm:$0xff]  ;;  %v132_v57 = vmul.f32 %v10307_v2, %v10021_v52 }
  0xe7   :  { %v200_v52 = vmul.f32 %v10316_v48, %v10055_v62  ;;  %v265_v59 = vmul.f32 %v10333_v7, %v10151_v5  ;;  %v264_v42 = vmul.f32 %v10333_v7, %v10153_v6  ;;  %v267_v41 = vmul.f32 %v10333_v7, %v10158_v8 }
  0xe8   :  { %v205_v61 = vadd.f32 %v197_v47, %v129_v36  ;;  %v209_v5 = vadd.f32 %v201_v51, %v133_v46  ;;  %v269_v6 = vmul.f32 %v10333_v7, %v10164_v10  ;;  %v268_v8 = vmul.f32 %v10333_v7, %v10166_v11  ;;  %v10394_v36 = vld [vmem:[%s14734_s4 + $0xc] ss:$0 sm:$0xff] }
  0xe9   :  { %v10335_v63 = vpop.permute.xlu1 %521  ;;  %v10337_v45 = vpop.permute.xlu0 %516  ;;  %v208_v37 = vadd.f32 %v200_v52, %v132_v57  ;;  %v275_v50 = vadd.f32 %v267_v41, %v207_v40  ;;  %v270_v10 = vmul.f32 %v10333_v7, %v10172_v13  ;;  %v334_v51 = vmul.f32 %v10394_v36, %v10176_v14  ;;  %v10411_v40 = vld [vmem:[%s14734_s4 + $0xd] ss:$0 sm:$0xff] }
  0xea   :  { %14836 = vst [vmem:[#allocation22_spill] sm:$0xff] %v10335_v63  ;;  %14837 = vst [vmem:[#allocation23_spill] sm:$0xff] %v10337_v45  ;;  %1098 = vperm.xlu1 %9687, %v10028_v53   ;;  %1093 = vperm.xlu0 %9686, %v10033_v54   ;;  %v135_v63 = vmul.f32 %v10307_v2, %v10035_v55  ;;  %v198_v45 = vmul.f32 %v10316_v48, %v10049_v60  ;;  %v10363_v53 = vld [vmem:[%s14730_s0 + $0x212] sm:$0xff] }
  0xeb   :  { %v203_v54 = vmul.f32 %v10316_v48, %v10139_v0  ;;  %v202_v55 = vmul.f32 %v10316_v48, %v10141_v1  ;;  %v134_v60 = vmul.f32 %v10307_v2, %v10037_v56  ;;  %v204_v0 = vadd.f32 %v196_v49, %v128_v3 }
  0xec   :  { %v266_v1 = vmul.f32 %v10333_v7, %v10160_v9  ;;  %v206_v56 = vadd.f32 %v198_v45, %v130_v4  ;;  %v273_v47 = vadd.f32 %v265_v59, %v205_v61  ;;  %v271_v4 = vmul.f32 %v10333_v7, %v10170_v12 }
  0xed   :  { %v10379_v62 = vpop.permute.xlu1 %531  ;;  %v10381_v44 = vpop.permute.xlu0 %526  ;;  %v211_v3 = vadd.f32 %v203_v54, %v135_v63  ;;  %v210_v9 = vadd.f32 %v202_v55, %v134_v60  ;;  %v272_v49 = vadd.f32 %v264_v42, %v204_v0  ;;  %v333_v63 = vmul.f32 %v10394_v36, %v10178_v15  ;;  %v10422_v15 = vld [vmem:[%s14730_s0 + $0x80] sm:$0xff]  ;;  %v10427_v42 = vld [vmem:[%s14730_s0 + $0x78] sm:$0xff] }
  0xee   :  { %1108 = vperm.xlu1 %9687, %v10358_v58   ;;  %1103 = vperm.xlu0 %9686, %v10363_v53   ;;  %v274_v46 = vadd.f32 %v266_v1, %v206_v56  ;;  %v277_v12 = vadd.f32 %v269_v6, %v209_v5  ;;  %v276_v13 = vadd.f32 %v268_v8, %v208_v37  ;;  %v10457_v37 = vld [vmem:[%s14734_s4 + $0xf] ss:$0 sm:$0xff] }
  0xef   :  { %v336_v41 = vmul.f32 %v10394_v36, %v10182_v16  ;;  %v335_v14 = vmul.f32 %v10394_v36, %v10184_v17  ;;  %v338_v57 = vmul.f32 %v10394_v36, %v10188_v18  ;;  %v337_v52 = vmul.f32 %v10394_v36, %v10190_v19  ;;  %14838 = vst [vmem:[#allocation24_spill] sm:$0xff] %v10457_v37 }
  0xf0   :  { %v340_v16 = vmul.f32 %v10394_v36, %v10194_v20  ;;  %v339_v17 = vmul.f32 %v10394_v36, %v10196_v21  ;;  %v279_v54 = vadd.f32 %v271_v4, %v211_v3  ;;  %v278_v55 = vadd.f32 %v270_v10, %v210_v9  ;;  %v10446_v20 = vld [vmem:[%s14734_s4 + $0xe] ss:$0 sm:$0xff] }
  0xf1   :  { %v10400_v45 = vpop.permute.xlu1 %569  ;;  %v10402_v11 = vpop.permute.xlu0 %564  ;;  %v402_v59 = vmul.f32 %v10411_v40, %v10200_v22  ;;  %v401_v60 = vmul.f32 %v10411_v40, %v10202_v23  ;;  %v342_v18 = vadd.f32 %v334_v51, %v273_v47  ;;  %v341_v1 = vadd.f32 %v333_v63, %v272_v49  ;;  %v10490_v63 = vld [vmem:[%s14730_s0 + $0x228] sm:$0xff] }
  0xf2   :  { %1143 = vperm.xlu1 %9687, %v10209_v24   ;;  %1138 = vperm.xlu0 %9686, %v10214_v25   ;;  %v404_v19 = vmul.f32 %v10411_v40, %v10216_v26  ;;  %v344_v21 = vadd.f32 %v336_v41, %v275_v50  ;;  %v343_v22 = vadd.f32 %v335_v14, %v274_v46  ;;  %v10474_v46 = vld [vmem:[%s14734_s4 + $0x10] ss:$0 sm:$0xff] }
  0xf3   :  { %v403_v23 = vmul.f32 %v10411_v40, %v10218_v27  ;;  %v406_v56 = vmul.f32 %v10411_v40, %v10222_v28  ;;  %v346_v5 = vadd.f32 %v338_v57, %v277_v12  ;;  %v345_v6 = vadd.f32 %v337_v52, %v276_v13  ;;  %14839 = vst [vmem:[#allocation25_spill] sm:$0xff] %v10474_v46 }
  0xf4   :  { %v348_v26 = vadd.f32 %v340_v16, %v279_v54  ;;  %v347_v8 = vadd.f32 %v339_v17, %v278_v55  ;;  %v410_v3 = vadd.f32 %v402_v59, %v342_v18  ;;  %v409_v9 = vadd.f32 %v401_v60, %v341_v1  ;;  %v14842_v16 = vld [vmem:[#allocation12_spill] sm:$0xff] }
  0xf5   :  { %v580_v61 = vpop.permute.xlu1 %579  ;;  %v575_v0 = vpop.permute.xlu0 %574  ;;  %v405_v47 = vmul.f32 %v10411_v40, %v10224_v29  ;;  %v470_v27 = vmul.f32 %v10446_v20, %v10244_v34  ;;  %v412_v50 = vadd.f32 %v404_v19, %v344_v21  ;;  %v408_v4 = vmul.f32 %v10411_v40, %v10238_v32  ;;  %v14843_v19 = vld [vmem:[#allocation20_spill] sm:$0xff] }
  0xf6   :  { %1153 = vperm.xlu1 %9687, %v10422_v15   ;;  %1148 = vperm.xlu0 %9686, %v10427_v42   ;;  %v469_v10 = vmul.f32 %v10446_v20, %v10246_v35  ;;  %v411_v29 = vadd.f32 %v403_v23, %v343_v22  ;;  %v414_v34 = vadd.f32 %v406_v56, %v346_v5  ;;  %v10485_v35 = vld [vmem:[%s14730_s0 + $0x230] sm:$0xff]  ;;  %v14844_v22 = vld [vmem:[#allocation21_spill] sm:$0xff] }
  0xf7   :  { %v407_v51 = vmul.f32 %v10411_v40, %v10240_v33  ;;  %v539_v32 = vmul.f32 %v10457_v37, %v10288_v43  ;;  %v472_v12 = vmul.f32 %v10446_v20, %v10260_v38  ;;  %v471_v13 = vmul.f32 %v10446_v20, %v10262_v39  ;;  %v14840_v33 = vld [vmem:[#allocation11_spill] sm:$0xff]  ;;  %v14841_v43 = vld [vmem:[#allocation17_spill] sm:$0xff] }
  0xf8   :  { %v474_v41 = vmul.f32 %v10446_v20, %v14840_v33  ;;  %v538_v14 = vmul.f32 %v10457_v37, %v14841_v43  ;;  %v413_v57 = vadd.f32 %v405_v47, %v345_v6  ;;  %v478_v52 = vadd.f32 %v470_v27, %v410_v3  ;;  %v14847_v33 = vld [vmem:[#allocation10_spill] sm:$0xff] }
  0xf9   :  { %v10463_v49 = vpop.permute.xlu1 %589  ;;  %v10465_v28 = vpop.permute.xlu0 %584  ;;  %v473_v17 = vmul.f32 %v10446_v20, %v14842_v16  ;;  %v607_v54 = vmul.f32 %v10474_v46, %v10400_v45  ;;  %v416_v38 = vadd.f32 %v408_v4, %v348_v26  ;;  %v477_v60 = vadd.f32 %v469_v10, %v409_v9  ;;  %v10515_v45 = vld [vmem:[%s14734_s4 + $0x11] ss:$0 sm:$0xff] }
  0xfa   :  { %1163 = vperm.xlu1 %9687, %v10231_v30   ;;  %1158 = vperm.xlu0 %9686, %v10236_v31   ;;  %v606_v39 = vmul.f32 %v10474_v46, %v10402_v11  ;;  %v415_v18 = vadd.f32 %v407_v51, %v347_v8  ;;  %v547_v1 = vadd.f32 %v539_v32, %v478_v52  ;;  %v14846_v32 = vld [vmem:[#allocation9_spill] sm:$0xff]  ;;  %v14851_v43 = vld [vmem:[#allocation22_spill] sm:$0xff] }
  0xfb   :  { %v541_v21 = vmul.f32 %v10457_v37, %v14843_v19  ;;  %v540_v23 = vmul.f32 %v10457_v37, %v14844_v22  ;;  %14845 = vst [vmem:[#allocation11_spill] sm:$0xff] %v10515_v45  ;;  %v480_v56 = vadd.f32 %v472_v12, %v412_v50  ;;  %v479_v5 = vadd.f32 %v471_v13, %v411_v29  ;;  %v14848_v50 = vld [vmem:[#allocation15_spill] sm:$0xff] }
  0xfc   :  { %v482_v11 = vadd.f32 %v474_v41, %v414_v34  ;;  %v546_v6 = vadd.f32 %v538_v14, %v477_v60  ;;  %v481_v26 = vadd.f32 %v473_v17, %v413_v57  ;;  %v615_v3 = vadd.f32 %v607_v54, %v547_v1  ;;  %v14849_v34 = vld [vmem:[#allocation16_spill] sm:$0xff]  ;;  %v14852_v57 = vld [vmem:[#allocation23_spill] sm:$0xff] }
  0xfd   :  { %v600_v55 = vpop.permute.xlu1 %599  ;;  %v595_v59 = vpop.permute.xlu0 %594  ;;  %v609_v8 = vmul.f32 %v10474_v46, %v580_v61  ;;  %v608_v9 = vmul.f32 %v10474_v46, %v575_v0  ;;  %v476_v29 = vmul.f32 %v10446_v20, %v14848_v50  ;;  %v475_v12 = vmul.f32 %v10446_v20, %v14849_v34  ;;  %v10530_v0 = vld [vmem:[%s14734_s4] ss:$0 sm:$0xff]  ;;  %v10535_v41 = vld [vmem:[%s14730_s0 + $0x81] sm:$0xff] }
  0xfe   :  { %1173 = vperm.xlu1 %9687, %v10485_v35   ;;  %1168 = vperm.xlu0 %9686, %v10490_v63   ;;  %v614_v4 = vadd.f32 %v606_v39, %v546_v6  ;;  %v549_v61 = vadd.f32 %v541_v21, %v480_v56  ;;  %v548_v13 = vadd.f32 %v540_v23, %v479_v5  ;;  %v10544_v54 = vld [vmem:[%s14730_s0 + $0x79] sm:$0xff]  ;;  %v10553_v23 = vld [vmem:[%s14734_s4 + $0x1] ss:$0 sm:$0xff] }
  0xff   :  { %14850 = vst [vmem:[#allocation17_spill] sm:$0xff] %v10530_v0  ;;  %v543_v14 = vmul.f32 %v10457_v37, %v14851_v43  ;;  %v542_v52 = vmul.f32 %v10457_v37, %v14852_v57  ;;  %v545_v60 = vmul.f32 %v10457_v37, %v10379_v62  ;;  %v544_v39 = vmul.f32 %v10457_v37, %v10381_v44 }
 0x100   :  { %v617_v1 = vadd.f32 %v609_v8, %v549_v61  ;;  %v616_v19 = vadd.f32 %v608_v9, %v548_v13  ;;  %14853 = vst [vmem:[#allocation12_spill] sm:$0xff] %v10553_v23  ;;  %v484_v44 = vadd.f32 %v476_v29, %v416_v38  ;;  %v611_v8 = vmul.f32 %v10474_v46, %v10463_v49  ;;  %v14854_v13 = vld [vmem:[#allocation13_spill] sm:$0xff] }
 0x101   :  { %v638_v47 = vpop.permute.xlu1 %637  ;;  %v633_v27 = vpop.permute.xlu0 %632  ;;  %v610_v9 = vmul.f32 %v10474_v46, %v10465_v28  ;;  %v550_v50 = vadd.f32 %v542_v52, %v481_v26  ;;  %v14855_v26 = vld [vmem:[#allocation14_spill] sm:$0xff] }
 0x102   :  { %v675_v10 = vmul.f32 %v10515_v45, %v638_v47  ;;  %v674_v51 = vmul.f32 %v10515_v45, %v633_v27  ;;  %1207 = vperm.xlu1 %9687, %v14846_v32   ;;  %1202 = vperm.xlu0 %9686, %v14847_v33   ;;  %v613_v47 = vmul.f32 %v10474_v46, %v600_v55 }
 0x103   :  { %v612_v27 = vmul.f32 %v10474_v46, %v595_v59  ;;  %v553_v49 = vadd.f32 %v545_v60, %v484_v44  ;;  %v618_v59 = vadd.f32 %v610_v9, %v550_v50  ;;  %v10585_v60 = vld [vmem:[%s14730_s0 + $0x229] sm:$0xff] }
 0x104   :  { %v683_v16 = vadd.f32 %v675_v10, %v615_v3  ;;  %v682_v17 = vadd.f32 %v674_v51, %v614_v4  ;;  %v483_v3 = vadd.f32 %v475_v12, %v415_v18  ;;  %v551_v51 = vadd.f32 %v543_v14, %v482_v11  ;;  %v10578_v14 = vld [vmem:[%s14730_s0 + $0x231] sm:$0xff] }
 0x105   :  { %v648_v21 = vpop.permute.xlu1 %647  ;;  %v643_v22 = vpop.permute.xlu0 %642  ;;  %v621_v57 = vadd.f32 %v613_v47, %v553_v49  ;;  %v14857_v49 = vld [vmem:[#allocation19_spill] sm:$0xff] }
 0x106   :  { %v695_v56 = vmul.f32 %v10530_v0, %v683_v16  ;;  %v694_v5 = vmul.f32 %v10530_v0, %v682_v17  ;;  %v677_v6 = vmul.f32 %v10515_v45, %v648_v21  ;;  %v676_v62 = vmul.f32 %v10515_v45, %v643_v22  ;;  %1217 = vperm.xlu1 %9687, %v10535_v41  }
 0x107   :  { %1212 = vperm.xlu0 %9686, %v10544_v54   ;;  %v552_v12 = vadd.f32 %v544_v39, %v483_v3  ;;  %v619_v55 = vadd.f32 %v611_v8, %v551_v51 }
 0x108   :  { %v685_v4 = vadd.f32 %v677_v6, %v617_v1  ;;  %v684_v10 = vadd.f32 %v676_v62, %v616_v19  ;;  %v707_v34 = vadd.f32 %v10553_v23, %v695_v56  ;;  %v706_v38 = vadd.f32 %v10553_v23, %v694_v5 }
 0x109   :  { %v658_v18 = vpop.permute.xlu1 %657  ;;  %v653_v29 = vpop.permute.xlu0 %652  ;;  %v620_v52 = vadd.f32 %v612_v27, %v552_v12  ;;  %v10608_v12 = vld [vmem:[%s14730_s0 + $0x82] sm:$0xff] }
 0x10a   :  { %v697_v28 = vmul.f32 %v10530_v0, %v685_v4  ;;  %v696_v61 = vmul.f32 %v10530_v0, %v684_v10  ;;  %1227 = vperm.xlu1 %9687, %v14854_v13   ;;  %v679_v43 = vmul.f32 %v10515_v45, %v658_v18  ;;  %v678_v11 = vmul.f32 %v10515_v45, %v653_v29  ;;  %v14856_v29 = vld [vmem:[#allocation18_spill] sm:$0xff] }
 0x10b   :  { %1222 = vperm.xlu0 %9686, %v14855_v26   ;;  %v715_v39 = vmax.f32 %v707_v34, 0.0  ;;  %v714_v1 = vmax.f32 %v706_v38, 0.0 }
 0x10c   :  { %v709_v16 = vadd.f32 %v10553_v23, %v697_v28  ;;  %v708_v17 = vadd.f32 %v10553_v23, %v696_v61  ;;  %v687_v19 = vadd.f32 %v679_v43, %v619_v55  ;;  %v686_v21 = vadd.f32 %v678_v11, %v618_v59  ;;  %v10615_v55 = vld [vmem:[%s14730_s0 + $0x7a] sm:$0xff] }
 0x10d   :  { %v668_v22 = vpop.permute.xlu1 %667  ;;  %v663_v56 = vpop.permute.xlu0 %662 }
 0x10e   :  { %v717_v5 = vmax.f32 %v709_v16, 0.0  ;;  %v716_v6 = vmax.f32 %v708_v17, 0.0  ;;  %v681_v62 = vmul.f32 %v10515_v45, %v668_v22  ;;  %v680_v44 = vmul.f32 %v10515_v45, %v663_v56  ;;  %1237 = vperm.xlu1 %9687, %v10578_v14   ;;  %v10811_v45 = vld [vmem:[%s14730_s0 + $0xa9] sm:$0xff] }
 0x10f   :  { %v699_v3 = vmul.f32 %v10530_v0, %v687_v19  ;;  %v698_v8 = vmul.f32 %v10530_v0, %v686_v21  ;;  %1232 = vperm.xlu0 %9686, %v10585_v60  }
 0x110   :  { %v723_v9 = vmax.f32 %v715_v39, %v717_v5  ;;  %v722_v47 = vmax.f32 %v714_v1, %v716_v6  ;;  %v689_v27 = vadd.f32 %v681_v62, %v621_v57  ;;  %v688_v4 = vadd.f32 %v680_v44, %v620_v52  ;;  %v10634_v5 = vld [vmem:[%s14730_s0 + $0x232] sm:$0xff]  ;;  %v10639_v6 = vld [vmem:[%s14730_s0 + $0x22a] sm:$0xff] }
 0x111   :  { %v10593_v10 = vpop.permute.xlu1 %757  ;;  %v10595_v51 = vpop.permute.xlu0 %752  ;;  %v711_v50 = vadd.f32 %v10553_v23, %v699_v3  ;;  %v710_v34 = vadd.f32 %v10553_v23, %v698_v8  ;;  %14858 = vst [vmem:[#allocation20_spill] sm:$0xff] %v10634_v5  ;;  %14859 = vst [vmem:[#allocation21_spill] sm:$0xff] %v10639_v6 }
 0x112   :  { %727 = vst.msk [vmem:[#allocation3 + $0x8] sm:$0xff] %vm34_vm0, %v723_v9  ;;  %726 = vst.msk [vmem:[#allocation3] sm:$0xff] %vm34_vm0, %v722_v47  ;;  %v701_v38 = vmul.f32 %v10530_v0, %v689_v27  ;;  %v700_v18 = vmul.f32 %v10530_v0, %v688_v4  ;;  %1271 = vperm.xlu1 %9687, %v14856_v29   ;;  %v10806_v0 = vld [vmem:[%s14730_s0 + $0xb1] sm:$0xff] }
 0x113   :  { %1266 = vperm.xlu0 %9686, %v14857_v49   ;;  %v719_v11 = vmax.f32 %v711_v50, 0.0  ;;  %v718_v57 = vmax.f32 %v710_v34, 0.0 }
 0x114   :  { %v713_v28 = vadd.f32 %v10553_v23, %v701_v38  ;;  %v712_v61 = vadd.f32 %v10553_v23, %v700_v18  ;;  %v8826_v38 = vld [vmem:[%s14731_s1 + $0x40] sm:$0xff]  ;;  %v8827_v18 = vld [vmem:[%s14731_s1 + $0x48] sm:$0xff] }
 0x115   :  { %v10617_v59 = vpop.permute.xlu1 %767  ;;  %v10619_v43 = vpop.permute.xlu0 %762 }
 0x116   :  { %v721_v52 = vmax.f32 %v713_v28, 0.0  ;;  %v720_v16 = vmax.f32 %v712_v61, 0.0  ;;  %1281 = vperm.xlu1 %9687, %v10608_v12   ;;  %v9469_v28 = vpack.c.bf16 %v8827_v18, %v8826_v38  ;;  %v10784_v38 = vld [vmem:[%s14730_s0 + $0xb0] sm:$0xff]  ;;  %v10789_v18 = vld [vmem:[%s14730_s0 + $0xa8] sm:$0xff] }
 0x117   :  { %1276 = vperm.xlu0 %9686, %v10615_v55  }
 0x118   :  { %v725_v17 = vmax.f32 %v719_v11, %v721_v52  ;;  %v724_v39 = vmax.f32 %v718_v57, %v720_v16  ;;  %9470 = vmatprep.subr.bf16.mxu0 %v9469_v28 }
 0x119   :  { %v730_v1 = vld [vmem:[#allocation3] ss:$2 sm:$0xff]  ;;  %v734_v19 = vld [vmem:[#allocation3 + $0x1] ss:$2 sm:$0xff]  ;;  %v10623_v21 = vpop.permute.xlu1 %777  ;;  %v10625_v22 = vpop.permute.xlu0 %772  ;;  %9472 = vmatpush3.bf16.msra.mxu0 %v9469_v28 }
 0x11a   :  { %729 = vst.msk [vmem:[#allocation3 + $0x18] sm:$0xff] %vm34_vm0, %v725_v17  ;;  %728 = vst.msk [vmem:[#allocation3 + $0x10] sm:$0xff] %vm34_vm0, %v724_v39  ;;  %1291 = vperm.xlu1 %9687, %v10358_v58   ;;  %v737_v56 = vmax.f32 %v730_v1, %v734_v19 }
 0x11b   :  { %1286 = vperm.xlu0 %9686, %v10363_v53  }
 0x11c   :  { %740 = vst.msk [vmem:[#allocation2 + $0x11] sm:$0xff] %vm34_vm0, %v737_v56 }
 0x11d   :  { %v10642_v62 = vpop.permute.xlu1 %787  ;;  %v10644_v44 = vpop.permute.xlu0 %782 }
 0x11e   :  { %1301 = vperm.xlu1 %9687, %v10634_v5  }
 0x11f   :  { %1296 = vperm.xlu0 %9686, %v10639_v6  }
 0x121   :  { %v732_v58 = vld [vmem:[#allocation3 + $0x10] ss:$2 sm:$0xff]  ;;  %v736_v53 = vld [vmem:[#allocation3 + $0x11] ss:$2 sm:$0xff]  ;;  %v10648_v3 = vpop.permute.xlu1 %821  ;;  %v10650_v8 = vpop.permute.xlu0 %816 }
 0x122   :  { %1376 = vperm.xlu1 %9687, %v10209_v24   ;;  %v738_v9 = vmax.f32 %v732_v58, %v736_v53  ;;  %v10764_v58 = vld [vmem:[%s14730_s0 + $0x9a] sm:$0xff]  ;;  %v10769_v53 = vld [vmem:[%s14730_s0 + $0x92] sm:$0xff] }
 0x123   :  { %1371 = vperm.xlu0 %9686, %v10214_v25   ;;  %v5094_v47 = vld [vmem:[#allocation2 + $0x11] sm:$0xff]  ;;  %14860 = vst [vmem:[#allocation9_spill] sm:$0xff] %v10764_v58  ;;  %14861 = vst [vmem:[#allocation10_spill] sm:$0xff] %v10769_v53 }
 0x124   :  { %9162 = vmatmul.mubr.msk.f32.vlgmr.msra.gmra.mrb[0].mxu1 %vm34_vm0, %v5094_v47  ;;  %9273 = vmatprep.mubr.msk.f32.mxu0 %vm34_vm0, %v5094_v47  ;;  %741 = vst.msk [vmem:[#allocation2 + $0xb1] sm:$0xff] %vm34_vm0, %v738_v9 }
 0x125   :  { %v10657_v27 = vpop.permute.xlu1 %831  ;;  %v10659_v4 = vpop.permute.xlu0 %826 }
 0x126   :  { %1386 = vperm.xlu1 %9687, %v10422_v15  }
 0x127   :  { %1381 = vperm.xlu0 %9686, %v10427_v42  }
 0x129   :  { %v10663_v50 = vpop.permute.xlu1 %841  ;;  %v10665_v24 = vpop.permute.xlu0 %836 }
 0x12a   :  { %1396 = vperm.xlu1 %9687, %v10231_v30  }
 0x12b   :  { %1391 = vperm.xlu0 %9686, %v10236_v31  }
 0x12d   :  { %v10669_v25 = vpop.permute.xlu1 %851  ;;  %v10671_v34 = vpop.permute.xlu0 %846 }
 0x12e   :  { %1406 = vperm.xlu1 %9687, %v10485_v35  }
 0x12f   :  { %1401 = vperm.xlu0 %9686, %v10490_v63  }
 0x131   :  { %v10681_v30 = vpop.permute.xlu1 %885  ;;  %v10683_v31 = vpop.permute.xlu0 %880 }
 0x132   :  { %1440 = vperm.xlu1 %9687, %v14846_v32  }
 0x133   :  { %1435 = vperm.xlu0 %9686, %v14847_v33  }
 0x135   :  { %v10687_v35 = vpop.permute.xlu1 %895  ;;  %v10689_v61 = vpop.permute.xlu0 %890 }
 0x136   :  { %1450 = vperm.xlu1 %9687, %v10535_v41  }
 0x137   :  { %1445 = vperm.xlu0 %9686, %v10544_v54  }
 0x139   :  { %v10693_v63 = vpop.permute.xlu1 %905  ;;  %v10695_v11 = vpop.permute.xlu0 %900 }
 0x13a   :  { %1460 = vperm.xlu1 %9687, %v14854_v13  }
 0x13b   :  { %1455 = vperm.xlu0 %9686, %v14855_v26  }
 0x13d   :  { %v10699_v32 = vpop.permute.xlu1 %915  ;;  %v10701_v33 = vpop.permute.xlu0 %910 }
 0x13e   :  { %1470 = vperm.xlu1 %9687, %v10578_v14  }
 0x13f   :  { %1465 = vperm.xlu0 %9686, %v10585_v60   ;;  %v8351_v60 = vld [vmem:[%s14730_s0 + $0x98] sm:$0xff] }
 0x141   :  { %v10705_v57 = vpop.permute.xlu1 %950  ;;  %v10707_v52 = vpop.permute.xlu0 %945 }
 0x142   :  { %1504 = vperm.xlu1 %9687, %v14856_v29   ;;  %v8350_v29 = vld [vmem:[%s14730_s0 + $0x90] sm:$0xff] }
 0x143   :  { %1499 = vperm.xlu0 %9686, %v14857_v49  }
 0x145   :  { %v10711_v16 = vpop.permute.xlu1 %960  ;;  %v10713_v13 = vpop.permute.xlu0 %955 }
 0x146   :  { %1514 = vperm.xlu1 %9687, %v10608_v12  }
 0x147   :  { %1509 = vperm.xlu0 %9686, %v10615_v55  }
 0x149   :  { %v10717_v26 = vpop.permute.xlu1 %970  ;;  %v10719_v14 = vpop.permute.xlu0 %965 }
 0x14a   :  { %1569 = vperm.xlu1 %9687, %v10422_v15   ;;  %v10742_v15 = vld [vmem:[%s14730_s0 + $0x99] sm:$0xff] }
 0x14b   :  { %1564 = vperm.xlu0 %9686, %v10427_v42   ;;  %v10747_v42 = vld [vmem:[%s14730_s0 + $0x91] sm:$0xff] }
 0x14d   :  { %v10729_v49 = vpop.permute.xlu1 %980  ;;  %v10731_v17 = vpop.permute.xlu0 %975 }
 0x14e   :  { %1579 = vperm.xlu1 %9687, %v8351_v60  }
 0x14f   :  { %1574 = vperm.xlu0 %9686, %v8350_v29  }
 0x151   :  { %v10733_v39 = vpop.permute.xlu1 %1014  ;;  %v10735_v1 = vpop.permute.xlu0 %1009 }
 0x152   :  { %1633 = vperm.xlu1 %9687, %v10535_v41  }
 0x153   :  { %1628 = vperm.xlu0 %9686, %v10544_v54  }
 0x155   :  { %v10749_v19 = vpop.permute.xlu1 %1024  ;;  %v10751_v56 = vpop.permute.xlu0 %1019 }
 0x156   :  { %1643 = vperm.xlu1 %9687, %v10742_v15  }
 0x157   :  { %1638 = vperm.xlu0 %9686, %v10747_v42  }
 0x159   :  { %v10755_v41 = vpop.permute.xlu1 %1034  ;;  %v10757_v54 = vpop.permute.xlu0 %1029 }
 0x15a   :  { %1697 = vperm.xlu1 %9687, %v10608_v12  }
 0x15b   :  { %1692 = vperm.xlu0 %9686, %v10615_v55  }
 0x15d   :  { %v10771_v9 = vpop.permute.xlu1 %1044  ;;  %v10773_v47 = vpop.permute.xlu0 %1039 }
 0x15e   :  { %1707 = vperm.xlu1 %9687, %v10764_v58  }
 0x15f   :  { %1702 = vperm.xlu0 %9686, %v10769_v53  }
 0x161   :  { %v10777_v12 = vpop.permute.xlu1 %1078  ;;  %v10779_v55 = vpop.permute.xlu0 %1073 }
 0x162   :  { %14862 = vst [vmem:[#allocation15_spill] sm:$0xff] %v10779_v55  ;;  %1995 = vperm.xlu1 %9687, %v8351_v60   ;;  %v791_v55 = vmul.f32 %v10307_v2, %v10593_v10  ;;  %v10850_v10 = vld [vmem:[%s14730_s0 + $0xb2] sm:$0xff] }
 0x163   :  { %1990 = vperm.xlu0 %9686, %v8350_v29  }
 0x165   :  { %v10791_v28 = vpop.permute.xlu1 %1088  ;;  %v10793_v6 = vpop.permute.xlu0 %1083 }
 0x166   :  { %14863 = vst [vmem:[#allocation16_spill] sm:$0xff] %v10791_v28  ;;  %14864 = vst [vmem:[#allocation22_spill] sm:$0xff] %v10793_v6  ;;  %2005 = vperm.xlu1 %9687, %v10784_v38  }
 0x167   :  { %2000 = vperm.xlu0 %9686, %v10789_v18  }
 0x169   :  { %v10797_v5 = vpop.permute.xlu1 %1098  ;;  %v10799_v23 = vpop.permute.xlu0 %1093 }
 0x16a   :  { %14865 = vst [vmem:[#allocation23_spill] sm:$0xff] %v10797_v5  ;;  %14866 = vst [vmem:[#allocation13_spill] sm:$0xff] %v10799_v23  ;;  %2059 = vperm.xlu1 %9687, %v10742_v15  }
 0x16b   :  { %2054 = vperm.xlu0 %9686, %v10747_v42  }
 0x16d   :  { %v10813_v46 = vpop.permute.xlu1 %1108  ;;  %v10815_v37 = vpop.permute.xlu0 %1103 }
 0x16e   :  { %14867 = vst [vmem:[#allocation14_spill] sm:$0xff] %v10813_v46  ;;  %14868 = vst [vmem:[#allocation18_spill] sm:$0xff] %v10815_v37  ;;  %2069 = vperm.xlu1 %9687, %v10806_v0  }
 0x16f   :  { %2064 = vperm.xlu0 %9686, %v10811_v45  }
 0x171   :  { %v10819_v23 = vpop.permute.xlu1 %1143  ;;  %v10821_v5 = vpop.permute.xlu0 %1138 }
 0x172   :  { %14869 = vst [vmem:[#allocation19_spill] sm:$0xff] %v10819_v23  ;;  %14870 = vst [vmem:[#allocation26_spill] sm:$0xff] %v10821_v5  ;;  %1762 = vperm.xlu1 %9687, %v8351_v60   ;;  %v790_v5 = vmul.f32 %v10307_v2, %v10595_v51  ;;  %v793_v60 = vmul.f32 %v10307_v2, %v10617_v59  ;;  %v857_v51 = vmul.f32 %v10316_v48, %v10657_v27 }
 0x173   :  { %1757 = vperm.xlu0 %9686, %v8350_v29   ;;  %v792_v29 = vmul.f32 %v10307_v2, %v10619_v43  ;;  %v856_v59 = vmul.f32 %v10316_v48, %v10659_v4  ;;  %v859_v43 = vmul.f32 %v10316_v48, %v10663_v50  ;;  %v794_v27 = vmul.f32 %v10307_v2, %v10625_v22 }
 0x174   :  { %v861_v4 = vmul.f32 %v10316_v48, %v10669_v25  ;;  %v860_v50 = vmul.f32 %v10316_v48, %v10671_v34  ;;  %v918_v22 = vmul.f32 %v10333_v7, %v10683_v31  ;;  %v921_v34 = vmul.f32 %v10333_v7, %v10687_v35 }
 0x175   :  { %v10823_v6 = vpop.permute.xlu1 %1153  ;;  %v10825_v28 = vpop.permute.xlu0 %1148  ;;  %v923_v31 = vmul.f32 %v10333_v7, %v10693_v63  ;;  %v984_v63 = vmul.f32 %v10394_v36, %v10705_v57  ;;  %v990_v57 = vmul.f32 %v10394_v36, %v10729_v49  ;;  %v1050_v49 = vmul.f32 %v10411_v40, %v10749_v19 }
 0x176   :  { %14871 = vst [vmem:[#allocation27_spill] sm:$0xff] %v10823_v6  ;;  %14872 = vst [vmem:[#allocation28_spill] sm:$0xff] %v10825_v28  ;;  %1772 = vperm.xlu1 %9687, %v10784_v38   ;;  %v855_v28 = vmul.f32 %v10316_v48, %v10648_v3  ;;  %v858_v3 = vmul.f32 %v10316_v48, %v10665_v24  ;;  %v796_v6 = vmul.f32 %v10307_v2, %v10644_v44 }
 0x177   :  { %1767 = vperm.xlu0 %9686, %v10789_v18  }
 0x178   :  { %v863_v25 = vadd.f32 %v855_v28, %v791_v55  ;;  %v868_v23 = vadd.f32 %v860_v50, %v796_v6  ;;  %v925_v28 = vmul.f32 %v10333_v7, %v10699_v32  ;;  %v985_v32 = vmul.f32 %v10394_v36, %v10713_v13 }
 0x179   :  { %v10829_v46 = vpop.permute.xlu1 %1163  ;;  %v10831_v37 = vpop.permute.xlu0 %1158  ;;  %v1048_v13 = vmul.f32 %v10411_v40, %v10733_v39 }
 0x17a   :  { %14873 = vst [vmem:[#allocation29_spill] sm:$0xff] %v10829_v46  ;;  %14874 = vst [vmem:[#allocation30_spill] sm:$0xff] %v10831_v37  ;;  %2123 = vperm.xlu1 %9687, %v10764_v58   ;;  %v854_v37 = vmul.f32 %v10316_v48, %v10650_v8  ;;  %v10863_v8 = vld [vmem:[%s14730_s0 + $0xaa] sm:$0xff]  ;;  %v795_v46 = vmul.f32 %v10307_v2, %v10623_v21  ;;  %v797_v58 = vmul.f32 %v10307_v2, %v10642_v62 }
 0x17b   :  { %2118 = vperm.xlu0 %9686, %v10769_v53   ;;  %v919_v21 = vmul.f32 %v10333_v7, %v10681_v30  ;;  %v865_v62 = vadd.f32 %v857_v51, %v793_v60  ;;  %v864_v2 = vadd.f32 %v856_v59, %v792_v29  ;;  %v986_v60 = vmul.f32 %v10394_v36, %v10711_v16 }
 0x17c   :  { %v862_v48 = vadd.f32 %v854_v37, %v790_v5  ;;  %v867_v44 = vadd.f32 %v859_v43, %v795_v46  ;;  %v869_v30 = vadd.f32 %v861_v4, %v797_v58  ;;  %v922_v37 = vmul.f32 %v10333_v7, %v10695_v11 }
 0x17d   :  { %v10873_v53 = vpop.permute.xlu1 %1173  ;;  %v10875_v24 = vpop.permute.xlu0 %1168  ;;  %v927_v55 = vadd.f32 %v919_v21, %v863_v25  ;;  %v924_v46 = vmul.f32 %v10333_v7, %v10701_v33  ;;  %v929_v6 = vadd.f32 %v921_v34, %v865_v62  ;;  %v983_v11 = vmul.f32 %v10394_v36, %v10707_v52 }
 0x17e   :  { %14875 = vst [vmem:[#allocation31_spill] sm:$0xff] %v10873_v53  ;;  %14876 = vst [vmem:[#allocation32_spill] sm:$0xff] %v10875_v24  ;;  %2133 = vperm.xlu1 %9687, %v10850_v10   ;;  %v920_v24 = vmul.f32 %v10333_v7, %v10689_v61  ;;  %v866_v53 = vadd.f32 %v858_v3, %v794_v27  ;;  %v926_v61 = vadd.f32 %v918_v22, %v862_v48 }
 0x17f   :  { %2128 = vperm.xlu0 %9686, %v10863_v8   ;;  %v988_v7 = vmul.f32 %v10394_v36, %v10717_v26  ;;  %v987_v33 = vmul.f32 %v10394_v36, %v10719_v14  ;;  %v989_v52 = vmul.f32 %v10394_v36, %v10731_v17  ;;  %v933_v16 = vadd.f32 %v925_v28, %v869_v30 }
 0x180   :  { %v928_v58 = vadd.f32 %v920_v24, %v864_v2  ;;  %v930_v29 = vadd.f32 %v922_v37, %v866_v53  ;;  %v932_v51 = vadd.f32 %v924_v46, %v868_v23  ;;  %v1047_v26 = vmul.f32 %v10411_v40, %v10735_v1  ;;  %v14879_v2 = vld [vmem:[#allocation22_spill] sm:$0xff] }
 0x181   :  { %v10895_v5 = vpop.permute.xlu1 %1207  ;;  %v10897_v35 = vpop.permute.xlu0 %1202  ;;  %v992_v14 = vadd.f32 %v984_v63, %v927_v55  ;;  %v991_v53 = vadd.f32 %v983_v11, %v926_v61  ;;  %v1049_v36 = vmul.f32 %v10411_v40, %v10751_v56  ;;  %v994_v23 = vadd.f32 %v986_v60, %v929_v6  ;;  %v14883_v61 = vld [vmem:[#allocation13_spill] sm:$0xff]  ;;  %v14884_v46 = vld [vmem:[#allocation26_spill] sm:$0xff] }
 0x182   :  { %1826 = vperm.xlu1 %9687, %v10742_v15   ;;  %v931_v15 = vadd.f32 %v923_v31, %v867_v44  ;;  %v993_v17 = vadd.f32 %v985_v32, %v928_v58  ;;  %v995_v43 = vadd.f32 %v987_v33, %v930_v29  ;;  %v998_v3 = vadd.f32 %v990_v57, %v933_v16  ;;  %v14880_v44 = vld [vmem:[#allocation23_spill] sm:$0xff]  ;;  %v14885_v60 = vld [vmem:[#allocation14_spill] sm:$0xff] }
 0x183   :  { %1821 = vperm.xlu0 %9686, %v10747_v42   ;;  %v997_v1 = vadd.f32 %v989_v52, %v932_v51  ;;  %v1052_v27 = vmul.f32 %v10411_v40, %v10755_v41  ;;  %v1051_v4 = vmul.f32 %v10411_v40, %v10757_v54  ;;  %v1056_v19 = vadd.f32 %v1048_v13, %v992_v14  ;;  %v14877_v54 = vld [vmem:[#allocation15_spill] sm:$0xff] }
 0x184   :  { %v996_v39 = vadd.f32 %v988_v7, %v931_v15  ;;  %v1055_v24 = vadd.f32 %v1047_v26, %v991_v53  ;;  %v1054_v56 = vmul.f32 %v10411_v40, %v10771_v9  ;;  %v1112_v21 = vmul.f32 %v10446_v20, %v10777_v12  ;;  %v10956_v9 = vld [vmem:[%s14730_s0 + $0xc8] sm:$0xff]  ;;  %v14878_v12 = vld [vmem:[#allocation16_spill] sm:$0xff]  ;;  %v14887_v52 = vld [vmem:[#allocation27_spill] sm:$0xff] }
 0x185   :  { %v10921_v42 = vpop.permute.xlu1 %1217  ;;  %v1058_v25 = vadd.f32 %v1050_v49, %v994_v23  ;;  %v1057_v48 = vadd.f32 %v1049_v36, %v993_v17  ;;  %v1053_v41 = vmul.f32 %v10411_v40, %v10773_v47  ;;  %v1111_v34 = vmul.f32 %v10446_v20, %v14877_v54  ;;  %v14881_v40 = vld [vmem:[#allocation19_spill] sm:$0xff]  ;;  %v14882_v47 = vld [vmem:[#allocation24_spill] sm:$0xff]  ;;  %v14886_v7 = vld [vmem:[#allocation25_spill] sm:$0xff] }
 0x186   :  { %v10927_v59 = vpop.permute.xlu0 %1212  ;;  %1836 = vperm.xlu1 %9687, %v10806_v0   ;;  %v1114_v62 = vmul.f32 %v10446_v20, %v14878_v12  ;;  %v1116_v30 = vmul.f32 %v10446_v20, %v14880_v44  ;;  %v1177_v31 = vmul.f32 %v14882_v47, %v14881_v40  ;;  %v1060_v37 = vadd.f32 %v1052_v27, %v996_v39  ;;  %v14888_v36 = vld [vmem:[#allocation18_spill] sm:$0xff]  ;;  %v14889_v17 = vld [vmem:[#allocation28_spill] sm:$0xff]  ;;  %v14890_v27 = vld [vmem:[#allocation11_spill] sm:$0xff] }
 0x187   :  { %1831 = vperm.xlu0 %9686, %v10811_v45   ;;  %v1059_v55 = vadd.f32 %v1051_v4, %v995_v43  ;;  %v1115_v28 = vmul.f32 %v10446_v20, %v14883_v61  ;;  %v1176_v6 = vmul.f32 %v14882_v47, %v14884_v46  ;;  %v1062_v63 = vadd.f32 %v1054_v56, %v998_v3  ;;  %v14895_v12 = vld [vmem:[#allocation31_spill] sm:$0xff]  ;;  %v14897_v61 = vld [vmem:[#allocation17_spill] sm:$0xff] }
 0x188   :  { %v1120_v11 = vadd.f32 %v1112_v21, %v1056_v19  ;;  %v1118_v32 = vmul.f32 %v10446_v20, %v14885_v60  ;;  %v1241_v33 = vmul.f32 %v14886_v7, %v10895_v5  ;;  %v1061_v29 = vadd.f32 %v1053_v41, %v997_v1  ;;  %v14893_v41 = vld [vmem:[#allocation29_spill] sm:$0xff] }
 0x189   :  { %v10939_v50 = vpop.permute.xlu1 %1227  ;;  %v1119_v57 = vadd.f32 %v1111_v34, %v1055_v24  ;;  %v1179_v16 = vmul.f32 %v14882_v47, %v14887_v52  ;;  %v1240_v51 = vmul.f32 %v14886_v7, %v10897_v35  ;;  %v1122_v13 = vadd.f32 %v1114_v62, %v1058_v25  ;;  %v14891_v24 = vld [vmem:[#allocation9_spill] sm:$0xff]  ;;  %v14894_v34 = vld [vmem:[#allocation30_spill] sm:$0xff] }
 0x18a   :  { %v10945_v22 = vpop.permute.xlu0 %1222  ;;  %2188 = vperm.xlu1 %9687, %v10784_v38   ;;  %v1113_v38 = vmul.f32 %v10446_v20, %v14879_v2  ;;  %v1124_v14 = vadd.f32 %v1116_v30, %v1060_v37  ;;  %v1185_v53 = vadd.f32 %v1177_v31, %v1120_v11  ;;  %v1123_v49 = vadd.f32 %v1115_v28, %v1059_v55  ;;  %v14896_v30 = vld [vmem:[#allocation32_spill] sm:$0xff] }
 0x18b   :  { %2183 = vperm.xlu0 %9686, %v10789_v18   ;;  %v10969_v18 = vld [vmem:[%s14730_s0 + $0xc0] sm:$0xff]  ;;  %v1117_v5 = vmul.f32 %v10446_v20, %v14888_v36  ;;  %v1184_v23 = vadd.f32 %v1176_v6, %v1119_v57  ;;  %v1178_v39 = vmul.f32 %v14882_v47, %v14889_v17  ;;  %v1126_v3 = vadd.f32 %v1118_v32, %v1062_v63 }
 0x18c   :  { %v1121_v26 = vadd.f32 %v1113_v38, %v1057_v48  ;;  %v1249_v1 = vadd.f32 %v1241_v33, %v1185_v53  ;;  %v1243_v35 = vmul.f32 %v14886_v7, %v10921_v42  ;;  %v1187_v56 = vadd.f32 %v1179_v16, %v1122_v13  ;;  %v14892_v48 = vld [vmem:[#allocation10_spill] sm:$0xff]  ;;  %v14898_v53 = vld [vmem:[#allocation12_spill] sm:$0xff] }
 0x18d   :  { %v1238_v58 = vpop.permute.xlu1 %1237  ;;  %v1248_v21 = vadd.f32 %v1240_v51, %v1184_v23  ;;  %v1242_v20 = vmul.f32 %v14886_v7, %v10927_v59  ;;  %v1181_v54 = vmul.f32 %v14882_v47, %v14893_v41  ;;  %v1180_v42 = vmul.f32 %v14882_v47, %v14894_v34 }
 0x18e   :  { %v1233_v15 = vpop.permute.xlu0 %1232  ;;  %2198 = vperm.xlu1 %9687, %v10956_v9   ;;  %v1183_v62 = vmul.f32 %v14882_v47, %v14895_v12  ;;  %v1125_v38 = vadd.f32 %v1117_v5, %v1061_v29  ;;  %v1186_v44 = vadd.f32 %v1178_v39, %v1121_v26  ;;  %v1182_v40 = vmul.f32 %v14882_v47, %v14896_v30 }
 0x18f   :  { %2193 = vperm.xlu0 %9686, %v10969_v18   ;;  %v1251_v37 = vadd.f32 %v1243_v35, %v1187_v56  ;;  %v1245_v55 = vmul.f32 %v14886_v7, %v10939_v50  ;;  %v1244_v11 = vmul.f32 %v14886_v7, %v10945_v22  ;;  %v1189_v32 = vadd.f32 %v1181_v54, %v1124_v14 }
 0x190   :  { %v1250_v63 = vadd.f32 %v1242_v20, %v1186_v44  ;;  %v1188_v33 = vadd.f32 %v1180_v42, %v1123_v49  ;;  %v1191_v50 = vadd.f32 %v1183_v62, %v1126_v3  ;;  %v1190_v57 = vadd.f32 %v1182_v40, %v1125_v38  ;;  %v11058_v40 = vld [vmem:[%s14730_s0 + $0xca] sm:$0xff] }
 0x191   :  { %v1272_v43 = vpop.permute.xlu1 %1271  ;;  %v1247_v52 = vmul.f32 %v14886_v7, %v1238_v58  ;;  %v1246_v16 = vmul.f32 %v14886_v7, %v1233_v15  ;;  %v1253_v26 = vadd.f32 %v1245_v55, %v1189_v32  ;;  %v11028_v7 = vld [vmem:[%s14730_s0 + $0xc9] sm:$0xff] }
 0x192   :  { %v1305_v4 = vmul.f32 %v14890_v27, %v1272_v43  ;;  %v1267_v19 = vpop.permute.xlu0 %1266  ;;  %1890 = vperm.xlu1 %9687, %v14891_v24   ;;  %v1252_v14 = vadd.f32 %v1244_v11, %v1188_v33  ;;  %v11084_v33 = vld [vmem:[%s14730_s0 + $0xe0] sm:$0xff] }
 0x193   :  { %v1304_v25 = vmul.f32 %v14890_v27, %v1267_v19  ;;  %1885 = vperm.xlu0 %9686, %v14892_v48   ;;  %v1255_v43 = vadd.f32 %v1247_v52, %v1191_v50  ;;  %v1254_v3 = vadd.f32 %v1246_v16, %v1190_v57 }
 0x194   :  { %v1313_v2 = vadd.f32 %v1305_v4, %v1249_v1 }
 0x195   :  { %v1312_v59 = vadd.f32 %v1304_v25, %v1248_v21  ;;  %v1282_v31 = vpop.permute.xlu1 %1281 }
 0x196   :  { %v1321_v28 = vmul.f32 %v14897_v61, %v1313_v2  ;;  %v1307_v46 = vmul.f32 %v14890_v27, %v1282_v31  ;;  %v1277_v6 = vpop.permute.xlu0 %1276  ;;  %1900 = vperm.xlu1 %9687, %v10850_v10   ;;  %v11064_v31 = vld [vmem:[%s14730_s0 + $0xc2] sm:$0xff] }
 0x197   :  { %v1320_v60 = vmul.f32 %v14897_v61, %v1312_v59  ;;  %v1306_v47 = vmul.f32 %v14890_v27, %v1277_v6  ;;  %1895 = vperm.xlu0 %9686, %v10863_v8  }
 0x198   :  { %v1315_v29 = vadd.f32 %v1307_v46, %v1251_v37  ;;  %v1329_v22 = vadd.f32 %v14898_v53, %v1321_v28 }
 0x199   :  { %v1314_v51 = vadd.f32 %v1306_v47, %v1250_v63  ;;  %v1292_v13 = vpop.permute.xlu1 %1291  ;;  %v1328_v49 = vadd.f32 %v14898_v53, %v1320_v60 }
 0x19a   :  { %v1323_v36 = vmul.f32 %v14897_v61, %v1315_v29  ;;  %v1309_v5 = vmul.f32 %v14890_v27, %v1292_v13  ;;  %v1287_v23 = vpop.permute.xlu0 %1286  ;;  %2252 = vperm.xlu1 %9687, %v10806_v0   ;;  %v11034_v0 = vld [vmem:[%s14730_s0 + $0xc1] sm:$0xff]  ;;  %v11089_v29 = vld [vmem:[%s14730_s0 + $0xd8] sm:$0xff] }
 0x19b   :  { %v1322_v17 = vmul.f32 %v14897_v61, %v1314_v51  ;;  %v1308_v58 = vmul.f32 %v14890_v27, %v1287_v23  ;;  %2247 = vperm.xlu0 %9686, %v10811_v45   ;;  %v1337_v45 = vmax.f32 %v1329_v22, 0.0  ;;  %v1336_v20 = vmax.f32 %v1328_v49, 0.0  ;;  %v8345_v49 = vld [vmem:[%s14730_s0 + $0x21a] sm:$0xff] }
 0x19c   :  { %v1331_v15 = vadd.f32 %v14898_v53, %v1323_v36  ;;  %v1317_v39 = vadd.f32 %v1309_v5, %v1253_v26  ;;  %v11112_v5 = vld [vmem:[%s14730_s0 + $0xd9] sm:$0xff] }
 0x19d   :  { %v1330_v1 = vadd.f32 %v14898_v53, %v1322_v17  ;;  %v1316_v35 = vadd.f32 %v1308_v58, %v1252_v14  ;;  %v1302_v4 = vpop.permute.xlu1 %1301  ;;  %v8344_v17 = vld [vmem:[%s14730_s0 + $0x212] sm:$0xff] }
 0x19e   :  { %v1339_v19 = vmax.f32 %v1331_v15, 0.0  ;;  %v1325_v24 = vmul.f32 %v14897_v61, %v1317_v39  ;;  %v1311_v56 = vmul.f32 %v14890_v27, %v1302_v4  ;;  %v1297_v21 = vpop.permute.xlu0 %1296  ;;  %2262 = vperm.xlu1 %9687, %v11028_v7  }
 0x19f   :  { %v1338_v25 = vmax.f32 %v1330_v1, 0.0  ;;  %v1324_v48 = vmul.f32 %v14897_v61, %v1316_v35  ;;  %v1310_v41 = vmul.f32 %v14890_v27, %v1297_v21  ;;  %2257 = vperm.xlu0 %9686, %v11034_v0   ;;  %v14908_v1 = vld [vmem:[#allocation21_spill] sm:$0xff] }
 0x1a0   :  { %v1345_v54 = vmax.f32 %v1337_v45, %v1339_v19  ;;  %v1319_v34 = vadd.f32 %v1311_v56, %v1255_v43  ;;  %v1333_v2 = vadd.f32 %v14898_v53, %v1325_v24 }
 0x1a1   :  { %v1344_v42 = vmax.f32 %v1336_v20, %v1338_v25  ;;  %v1318_v12 = vadd.f32 %v1310_v41, %v1254_v3  ;;  %v11043_v62 = vpop.permute.xlu1 %1376  ;;  %v1332_v27 = vadd.f32 %v14898_v53, %v1324_v48  ;;  %v14907_v3 = vld [vmem:[#allocation20_spill] sm:$0xff]  ;;  %v8353_v25 = vld [vmem:[%s14730_s0 + $0x230] sm:$0xff]  ;;  %v8352_v48 = vld [vmem:[%s14730_s0 + $0x228] sm:$0xff] }
 0x1a2   :  { %1349 = vst.msk [vmem:[#allocation3 + $0x8] sm:$0xff] %vm34_vm0, %v1345_v54  ;;  %v1327_v38 = vmul.f32 %v14897_v61, %v1319_v34  ;;  %v11048_v44 = vpop.permute.xlu0 %1371  ;;  %2316 = vperm.xlu1 %9687, %v10850_v10   ;;  %v1341_v55 = vmax.f32 %v1333_v2, 0.0  ;;  %v11186_v34 = vld [vmem:[%s14730_s0 + $0x248] sm:$0xff] }
 0x1a3   :  { %1348 = vst.msk [vmem:[#allocation3] sm:$0xff] %vm34_vm0, %v1344_v42  ;;  %v1326_v30 = vmul.f32 %v14897_v61, %v1318_v12  ;;  %2311 = vperm.xlu0 %9686, %v10863_v8   ;;  %v1340_v8 = vmax.f32 %v1332_v27, 0.0  ;;  %v11191_v42 = vld [vmem:[%s14730_s0 + $0x240] sm:$0xff] }
 0x1a4   :  { %v1335_v59 = vadd.f32 %v14898_v53, %v1327_v38 }
 0x1a5   :  { %v1334_v10 = vadd.f32 %v14898_v53, %v1326_v30  ;;  %v11067_v37 = vpop.permute.xlu1 %1386  ;;  %v11107_v53 = vld [vmem:[%s14730_s0 + $0xe1] sm:$0xff] }
 0x1a6   :  { %v1343_v61 = vmax.f32 %v1335_v59, 0.0  ;;  %v11069_v28 = vpop.permute.xlu0 %1381  ;;  %2326 = vperm.xlu1 %9687, %v11058_v40  }
 0x1a7   :  { %v1342_v46 = vmax.f32 %v1334_v10, 0.0  ;;  %2321 = vperm.xlu0 %9686, %v11064_v31  }
 0x1a8   :  { %v1347_v6 = vmax.f32 %v1341_v55, %v1343_v61 }
 0x1a9   :  { %v1346_v63 = vmax.f32 %v1340_v8, %v1342_v46  ;;  %v11073_v11 = vpop.permute.xlu1 %1396  ;;  %v8361_v46 = vld [vmem:[%s14730_s0 + $0x231] sm:$0xff] }
 0x1aa   :  { %14899 = vst [vmem:[#allocation15_spill] sm:$0xff] %v11073_v11  ;;  %v1352_v60 = vld [vmem:[#allocation3] ss:$2 sm:$0xff]  ;;  %v1354_v47 = vld [vmem:[#allocation3 + $0x1] ss:$2 sm:$0xff]  ;;  %1351 = vst.msk [vmem:[#allocation3 + $0x18] sm:$0xff] %vm34_vm0, %v1347_v6  ;;  %v11076_v32 = vpop.permute.xlu0 %1391  ;;  %2614 = vperm.xlu1 %9687, %v10956_v9  }
 0x1ab   :  { %14900 = vst [vmem:[#allocation16_spill] sm:$0xff] %v11076_v32  ;;  %1350 = vst.msk [vmem:[#allocation3 + $0x10] sm:$0xff] %vm34_vm0, %v1346_v63  ;;  %2609 = vperm.xlu0 %9686, %v10969_v18   ;;  %v1356_v50 = vmax.f32 %v1352_v60, %v1354_v47  ;;  %v8360_v6 = vld [vmem:[%s14730_s0 + $0x229] sm:$0xff] }
 0x1ac   :  { %v11246_v47 = vld [vmem:[%s14730_s0 + $0x249] sm:$0xff] }
 0x1ad   :  { %v11091_v57 = vpop.permute.xlu1 %1406  ;;  %1359 = vst.msk [vmem:[#allocation2 + $0x21] sm:$0xff] %vm34_vm0, %v1356_v50  ;;  %v11320_v32 = vld [vmem:[%s14734_s4 + $0x9] ss:$0 sm:$0xff] }
 0x1ae   :  { %14901 = vst [vmem:[#allocation22_spill] sm:$0xff] %v11091_v57  ;;  %v11094_v52 = vpop.permute.xlu0 %1401  ;;  %2624 = vperm.xlu1 %9687, %v11084_v33   ;;  %v11315_v57 = vld [vmem:[%s14730_s0 + $0x24a] sm:$0xff]  ;;  %v1409_v11 = vmul.f32 %v11320_v32, %v11048_v44 }
 0x1af   :  { %14902 = vst [vmem:[#allocation23_spill] sm:$0xff] %v11094_v52  ;;  %2619 = vperm.xlu0 %9686, %v11089_v29  }
 0x1b1   :  { %v11098_v16 = vpop.permute.xlu1 %1440 }
 0x1b2   :  { %v1353_v51 = vld [vmem:[#allocation3 + $0x10] ss:$2 sm:$0xff]  ;;  %v1355_v13 = vld [vmem:[#allocation3 + $0x11] ss:$2 sm:$0xff]  ;;  %v11100_v26 = vpop.permute.xlu0 %1435  ;;  %2678 = vperm.xlu1 %9687, %v11028_v7  }
 0x1b3   :  { %2673 = vperm.xlu0 %9686, %v11034_v0   ;;  %v1357_v22 = vmax.f32 %v1353_v51, %v1355_v13 }
 0x1b4   :  { %v5095_v36 = vld [vmem:[#allocation2 + $0x21] sm:$0xff] }
 0x1b5   :  { %9164 = vmatprep.mubr.msk.f32.mxu1 %vm34_vm0, %v5095_v36  ;;  %9274 = vmatmul.mubr.msk.f32.vlgmr.msra.gmra.mrb[0].mxu0 %vm34_vm0, %v5095_v36  ;;  %v11116_v23 = vpop.permute.xlu1 %1450  ;;  %1360 = vst.msk [vmem:[#allocation2 + $0xc1] sm:$0xff] %vm34_vm0, %v1357_v22 }
 0x1b6   :  { %v11119_v14 = vpop.permute.xlu0 %1445  ;;  %2688 = vperm.xlu1 %9687, %v11107_v53  }
 0x1b7   :  { %2683 = vperm.xlu0 %9686, %v11112_v5  }
 0x1b9   :  { %v11129_v58 = vpop.permute.xlu1 %1460 }
 0x1ba   :  { %14903 = vst [vmem:[#allocation19_spill] sm:$0xff] %v11129_v58  ;;  %v11131_v15 = vpop.permute.xlu0 %1455  ;;  %1524 = vperm.xlu1 %9687, %v8345_v49  }
 0x1bb   :  { %14904 = vst [vmem:[#allocation24_spill] sm:$0xff] %v11131_v15  ;;  %1519 = vperm.xlu0 %9686, %v8344_v17  }
 0x1bd   :  { %v11133_v39 = vpop.permute.xlu1 %1470 }
 0x1be   :  { %14905 = vst [vmem:[#allocation13_spill] sm:$0xff] %v11133_v39  ;;  %v11135_v43 = vpop.permute.xlu0 %1465  ;;  %1534 = vperm.xlu1 %9687, %v14907_v3  }
 0x1bf   :  { %14906 = vst [vmem:[#allocation26_spill] sm:$0xff] %v11135_v43  ;;  %1529 = vperm.xlu0 %9686, %v14908_v1  }
 0x1c1   :  { %v11139_v35 = vpop.permute.xlu1 %1504 }
 0x1c2   :  { %v11141_v4 = vpop.permute.xlu0 %1499  ;;  %2381 = vperm.xlu1 %9687, %v10956_v9   ;;  %v11160_v9 = vld [vmem:[%s14730_s0 + $0xe2] sm:$0xff] }
 0x1c3   :  { %2376 = vperm.xlu0 %9686, %v10969_v18   ;;  %v11165_v18 = vld [vmem:[%s14730_s0 + $0xda] sm:$0xff] }
 0x1c5   :  { %v11145_v45 = vpop.permute.xlu1 %1514 }
 0x1c6   :  { %v11147_v19 = vpop.permute.xlu0 %1509  ;;  %2391 = vperm.xlu1 %9687, %v11084_v33  }
 0x1c7   :  { %2386 = vperm.xlu0 %9686, %v11089_v29  }
 0x1c9   :  { %v11151_v24 = vpop.permute.xlu1 %1569 }
 0x1ca   :  { %v11153_v56 = vpop.permute.xlu0 %1564  ;;  %2742 = vperm.xlu1 %9687, %v11058_v40  }
 0x1cb   :  { %2737 = vperm.xlu0 %9686, %v11064_v31  }
 0x1cd   :  { %v11167_v21 = vpop.permute.xlu1 %1579 }
 0x1ce   :  { %v11169_v20 = vpop.permute.xlu0 %1574  ;;  %2752 = vperm.xlu1 %9687, %v11160_v9  }
 0x1cf   :  { %2747 = vperm.xlu0 %9686, %v11165_v18  }
 0x1d1   :  { %v11179_v41 = vpop.permute.xlu1 %1633 }
 0x1d2   :  { %v11181_v54 = vpop.permute.xlu0 %1628  ;;  %1589 = vperm.xlu1 %9687, %v8353_v25  }
 0x1d3   :  { %1584 = vperm.xlu0 %9686, %v8352_v48   ;;  %v11304_v48 = vld [vmem:[%s14734_s4 + $0xa] ss:$0 sm:$0xff] }
 0x1d4   :  { %14912 = vst [vmem:[#allocation18_spill] sm:$0xff] %v11304_v48  ;;  %v1473_v52 = vmul.f32 %v11304_v48, %v11100_v26  ;;  %v1476_v15 = vmul.f32 %v11304_v48, %v11116_v23  ;;  %v1412_v23 = vmul.f32 %v11320_v32, %v11067_v37 }
 0x1d5   :  { %v11193_v12 = vpop.permute.xlu1 %1643 }
 0x1d6   :  { %v11195_v2 = vpop.permute.xlu0 %1638  ;;  %1599 = vperm.xlu1 %9687, %v11186_v34   ;;  %v1481_v44 = vadd.f32 %v1473_v52, %v1409_v11  ;;  %v1411_v52 = vmul.f32 %v11320_v32, %v11069_v28 }
 0x1d7   :  { %1594 = vperm.xlu0 %9686, %v11191_v42  }
 0x1d9   :  { %v11199_v38 = vpop.permute.xlu1 %1697 }
 0x1da   :  { %v11201_v27 = vpop.permute.xlu0 %1692  ;;  %2445 = vperm.xlu1 %9687, %v11028_v7   ;;  %v11220_v7 = vld [vmem:[%s14730_s0 + $0xf8] sm:$0xff] }
 0x1db   :  { %2440 = vperm.xlu0 %9686, %v11034_v0   ;;  %v11225_v0 = vld [vmem:[%s14730_s0 + $0xf0] sm:$0xff] }
 0x1dd   :  { %v11205_v30 = vpop.permute.xlu1 %1707 }
 0x1de   :  { %v11207_v59 = vpop.permute.xlu0 %1702  ;;  %2455 = vperm.xlu1 %9687, %v11107_v53  }
 0x1df   :  { %2450 = vperm.xlu0 %9686, %v11112_v5  }
 0x1e1   :  { %v11211_v10 = vpop.permute.xlu1 %1995 }
 0x1e2   :  { %v11213_v55 = vpop.permute.xlu0 %1990  ;;  %2807 = vperm.xlu1 %9687, %v11084_v33   ;;  %v11251_v33 = vld [vmem:[%s14730_s0 + $0x241] sm:$0xff] }
 0x1e3   :  { %2802 = vperm.xlu0 %9686, %v11089_v29  }
 0x1e5   :  { %v11227_v61 = vpop.permute.xlu1 %2005 }
 0x1e6   :  { %v11229_v8 = vpop.permute.xlu0 %2000  ;;  %2817 = vperm.xlu1 %9687, %v11220_v7  }
 0x1e7   :  { %14909 = vst [vmem:[#allocation14_spill] sm:$0xff] %v11229_v8  ;;  %2812 = vperm.xlu0 %9686, %v11225_v0   ;;  %v11366_v8 = vld [vmem:[%s14734_s4 + $0xd] ss:$0 sm:$0xff] }
 0x1e8   :  { %v1667_v11 = vmul.f32 %v11366_v8, %v11179_v41  ;;  %v1666_v37 = vmul.f32 %v11366_v8, %v11181_v54  ;;  %v11383_v41 = vld [vmem:[%s14734_s4 + $0xe] ss:$0 sm:$0xff] }
 0x1e9   :  { %v11239_v63 = vpop.permute.xlu1 %2059  ;;  %v1731_v28 = vmul.f32 %v11383_v41, %v11199_v38 }
 0x1ea   :  { %v11241_v60 = vpop.permute.xlu0 %2054  ;;  %1653 = vperm.xlu1 %9687, %v8361_v46   ;;  %v1474_v46 = vmul.f32 %v11304_v48, %v11098_v16  ;;  %v1410_v16 = vmul.f32 %v11320_v32, %v11043_v62 }
 0x1eb   :  { %1648 = vperm.xlu0 %9686, %v8360_v6  }
 0x1ec   :  { %v1482_v39 = vadd.f32 %v1474_v46, %v1410_v16 }
 0x1ed   :  { %v11253_v50 = vpop.permute.xlu1 %2069 }
 0x1ee   :  { %v11255_v29 = vpop.permute.xlu0 %2064  ;;  %1663 = vperm.xlu1 %9687, %v11246_v47  }
 0x1ef   :  { %1658 = vperm.xlu0 %9686, %v11251_v33  }
 0x1f1   :  { %v11259_v51 = vpop.permute.xlu1 %1762 }
 0x1f2   :  { %v11261_v13 = vpop.permute.xlu0 %1757  ;;  %2509 = vperm.xlu1 %9687, %v11058_v40   ;;  %v11280_v40 = vld [vmem:[%s14730_s0 + $0xf9] sm:$0xff] }
 0x1f3   :  { %2504 = vperm.xlu0 %9686, %v11064_v31   ;;  %v11285_v31 = vld [vmem:[%s14730_s0 + $0xf1] sm:$0xff] }
 0x1f5   :  { %v11265_v22 = vpop.permute.xlu1 %1772 }
 0x1f6   :  { %v11267_v36 = vpop.permute.xlu0 %1767  ;;  %2519 = vperm.xlu1 %9687, %v11160_v9  }
 0x1f7   :  { %2514 = vperm.xlu0 %9686, %v11165_v18  }
 0x1f9   :  { %v11271_v49 = vpop.permute.xlu1 %2123 }
 0x1fa   :  { %v11273_v17 = vpop.permute.xlu0 %2118  ;;  %2871 = vperm.xlu1 %9687, %v11107_v53   ;;  %v8369_v53 = vld [vmem:[%s14730_s0 + $0x232] sm:$0xff] }
 0x1fb   :  { %2866 = vperm.xlu0 %9686, %v11112_v5   ;;  %v8368_v5 = vld [vmem:[%s14730_s0 + $0x22a] sm:$0xff] }
 0x1fd   :  { %v11287_v3 = vpop.permute.xlu1 %2133 }
 0x1fe   :  { %14910 = vst [vmem:[#allocation25_spill] sm:$0xff] %v11287_v3  ;;  %v11289_v1 = vpop.permute.xlu0 %2128  ;;  %2881 = vperm.xlu1 %9687, %v11280_v40  }
 0x1ff   :  { %14911 = vst [vmem:[#allocation27_spill] sm:$0xff] %v11289_v1  ;;  %2876 = vperm.xlu0 %9686, %v11285_v31  }
 0x201   :  { %v11299_v25 = vpop.permute.xlu1 %1826 }
 0x202   :  { %v11308_v6 = vpop.permute.xlu0 %1821  ;;  %1717 = vperm.xlu1 %9687, %v8369_v53   ;;  %v11327_v53 = vld [vmem:[%s14734_s4 + $0xb] ss:$0 sm:$0xff] }
 0x203   :  { %1712 = vperm.xlu0 %9686, %v8368_v5   ;;  %v1538_v26 = vmul.f32 %v11327_v53, %v11139_v35  ;;  %v11334_v5 = vld [vmem:[%s14730_s0 + $0x242] sm:$0xff]  ;;  %v1537_v43 = vmul.f32 %v11327_v53, %v11141_v4  ;;  %v11347_v35 = vld [vmem:[%s14734_s4 + $0xc] ss:$0 sm:$0xff]  ;;  %v1475_v4 = vmul.f32 %v11304_v48, %v11119_v14 }
 0x204   :  { %v1603_v58 = vmul.f32 %v11347_v35, %v11151_v24  ;;  %v1602_v46 = vmul.f32 %v11347_v35, %v11153_v56  ;;  %v1540_v24 = vmul.f32 %v11327_v53, %v11145_v45  ;;  %v1539_v56 = vmul.f32 %v11327_v53, %v11147_v19 }
 0x205   :  { %v11340_v62 = vpop.permute.xlu1 %1836  ;;  %v1546_v16 = vadd.f32 %v1538_v26, %v1482_v39  ;;  %v1545_v14 = vadd.f32 %v1537_v43, %v1481_v44  ;;  %v1484_v45 = vadd.f32 %v1476_v15, %v1412_v23  ;;  %v1605_v3 = vmul.f32 %v11347_v35, %v11167_v21  ;;  %v11398_v21 = vld [vmem:[%s14730_s0 + $0x260] sm:$0xff] }
 0x206   :  { %v11351_v1 = vpop.permute.xlu0 %1831  ;;  %1727 = vperm.xlu1 %9687, %v11315_v57   ;;  %v1483_v19 = vadd.f32 %v1475_v4, %v1411_v52  ;;  %v1730_v15 = vmul.f32 %v11383_v41, %v11201_v27  ;;  %v1669_v23 = vmul.f32 %v11366_v8, %v11193_v12  ;;  %v11405_v4 = vld [vmem:[%s14734_s4 + $0xf] ss:$0 sm:$0xff]  ;;  %v11412_v27 = vld [vmem:[%s14730_s0 + $0x258] sm:$0xff] }
 0x207   :  { %1722 = vperm.xlu0 %9686, %v11334_v5   ;;  %v1611_v26 = vadd.f32 %v1603_v58, %v1546_v16  ;;  %v1610_v54 = vadd.f32 %v1602_v46, %v1545_v14  ;;  %v1604_v58 = vmul.f32 %v11347_v35, %v11169_v20  ;;  %v1548_v38 = vadd.f32 %v1540_v24, %v1484_v45  ;;  %v11425_v45 = vld [vmem:[%s14734_s4 + $0x10] ss:$0 sm:$0xff] }
 0x208   :  { %v1796_v20 = vmul.f32 %v11405_v4, %v11259_v51  ;;  %v1547_v46 = vadd.f32 %v1539_v56, %v1483_v19  ;;  %v1668_v24 = vmul.f32 %v11366_v8, %v11195_v2  ;;  %v1795_v12 = vmul.f32 %v11405_v4, %v11261_v13 }
 0x209   :  { %v11376_v39 = vpop.permute.xlu1 %2188  ;;  %v1675_v44 = vadd.f32 %v1667_v11, %v1611_v26  ;;  %v1674_v16 = vadd.f32 %v1666_v37, %v1610_v54  ;;  %v1613_v52 = vadd.f32 %v1605_v3, %v1548_v38  ;;  %v1733_v51 = vmul.f32 %v11383_v41, %v11205_v30 }
 0x20a   :  { %v11387_v43 = vpop.permute.xlu0 %2183  ;;  %2015 = vperm.xlu1 %9687, %v11186_v34   ;;  %v1860_v56 = vmul.f32 %v11425_v45, %v11299_v25  ;;  %v1612_v2 = vadd.f32 %v1604_v58, %v1547_v46  ;;  %v1732_v3 = vmul.f32 %v11383_v41, %v11207_v59  ;;  %v1859_v30 = vmul.f32 %v11425_v45, %v11308_v6  ;;  %v11446_v6 = vld [vmem:[%s14734_s4 + $0x11] ss:$0 sm:$0xff] }
 0x20b   :  { %2010 = vperm.xlu0 %9686, %v11191_v42   ;;  %v1739_v14 = vadd.f32 %v1731_v28, %v1675_v44  ;;  %v1738_v13 = vadd.f32 %v1730_v15, %v1674_v16  ;;  %v1677_v26 = vadd.f32 %v1669_v23, %v1613_v52  ;;  %v1798_v19 = vmul.f32 %v11405_v4, %v11265_v22  ;;  %v11462_v52 = vld [vmem:[%s14730_s0 + $0x259] sm:$0xff] }
 0x20c   :  { %v1676_v25 = vadd.f32 %v1668_v24, %v1612_v2  ;;  %v1797_v38 = vmul.f32 %v11405_v4, %v11267_v36  ;;  %v1862_v59 = vmul.f32 %v11425_v45, %v11340_v62  ;;  %v1861_v36 = vmul.f32 %v11425_v45, %v11351_v1  ;;  %v11457_v62 = vld [vmem:[%s14730_s0 + $0x261] sm:$0xff]  ;;  %v11467_v2 = vld [vmem:[%s14734_s4] ss:$0 sm:$0xff] }
 0x20d   :  { %v11418_v11 = vpop.permute.xlu1 %2198  ;;  %v1804_v28 = vadd.f32 %v1796_v20, %v1739_v14  ;;  %v1803_v54 = vadd.f32 %v1795_v12, %v1738_v13  ;;  %v1741_v15 = vadd.f32 %v1733_v51, %v1677_v26 }
 0x20e   :  { %v11429_v37 = vpop.permute.xlu0 %2193  ;;  %2025 = vperm.xlu1 %9687, %v11398_v21   ;;  %v1740_v22 = vadd.f32 %v1732_v3, %v1676_v25 }
 0x20f   :  { %2020 = vperm.xlu0 %9686, %v11412_v27   ;;  %v1868_v44 = vadd.f32 %v1860_v56, %v1804_v28  ;;  %v1867_v46 = vadd.f32 %v1859_v30, %v1803_v54  ;;  %v1806_v24 = vadd.f32 %v1798_v19, %v1741_v15 }
 0x210   :  { %v1805_v14 = vadd.f32 %v1797_v38, %v1740_v22  ;;  %v11493_v22 = vld [vmem:[%s14730_s0 + $0xfa] sm:$0xff] }
 0x211   :  { %v1891_v58 = vpop.permute.xlu1 %1890  ;;  %v1870_v1 = vadd.f32 %v1862_v59, %v1806_v24 }
 0x212   :  { %v1924_v23 = vmul.f32 %v11446_v6, %v1891_v58  ;;  %v1886_v20 = vpop.permute.xlu0 %1885  ;;  %2079 = vperm.xlu1 %9687, %v11246_v47   ;;  %v1869_v26 = vadd.f32 %v1861_v36, %v1805_v14  ;;  %v11480_v58 = vld [vmem:[%s14734_s4 + $0x1] ss:$0 sm:$0xff]  ;;  %v11499_v36 = vld [vmem:[%s14730_s0 + $0xf2] sm:$0xff] }
 0x213   :  { %v1923_v16 = vmul.f32 %v11446_v6, %v1886_v20  ;;  %2074 = vperm.xlu0 %9686, %v11251_v33  }
 0x214   :  { %v1932_v12 = vadd.f32 %v1924_v23, %v1868_v44 }
 0x215   :  { %v1931_v51 = vadd.f32 %v1923_v16, %v1867_v46  ;;  %v1901_v56 = vpop.permute.xlu1 %1900 }
 0x216   :  { %v1940_v13 = vmul.f32 %v11467_v2, %v1932_v12  ;;  %v1926_v3 = vmul.f32 %v11446_v6, %v1901_v56  ;;  %v1896_v30 = vpop.permute.xlu0 %1895  ;;  %2089 = vperm.xlu1 %9687, %v11457_v62  }
 0x217   :  { %v1939_v28 = vmul.f32 %v11467_v2, %v1931_v51  ;;  %v1925_v19 = vmul.f32 %v11446_v6, %v1896_v30  ;;  %2084 = vperm.xlu0 %9686, %v11462_v52   ;;  %v11519_v30 = vld [vmem:[%s14730_s0 + $0x110] sm:$0xff] }
 0x218   :  { %v1934_v25 = vadd.f32 %v1926_v3, %v1870_v1  ;;  %v1948_v15 = vadd.f32 %v11480_v58, %v1940_v13 }
 0x219   :  { %v1933_v54 = vadd.f32 %v1925_v19, %v1869_v26  ;;  %v11475_v38 = vpop.permute.xlu1 %2252  ;;  %v1947_v23 = vadd.f32 %v11480_v58, %v1939_v28  ;;  %v11524_v26 = vld [vmem:[%s14730_s0 + $0x108] sm:$0xff] }
 0x21a   :  { %v1942_v44 = vmul.f32 %v11467_v2, %v1934_v25  ;;  %v11484_v59 = vpop.permute.xlu0 %2247  ;;  %2935 = vperm.xlu1 %9687, %v11160_v9   ;;  %v1956_v24 = vmax.f32 %v1948_v15, 0.0 }
 0x21b   :  { %v1941_v20 = vmul.f32 %v11467_v2, %v1933_v54  ;;  %2930 = vperm.xlu0 %9686, %v11165_v18   ;;  %v1955_v18 = vmax.f32 %v1947_v23, 0.0  ;;  %v11541_v23 = vld [vmem:[%s14730_s0 + $0x111] sm:$0xff] }
 0x21c   :  { %v1950_v46 = vadd.f32 %v11480_v58, %v1942_v44 }
 0x21d   :  { %v1949_v9 = vadd.f32 %v11480_v58, %v1941_v20  ;;  %v11502_v16 = vpop.permute.xlu1 %2262 }
 0x21e   :  { %v1958_v12 = vmax.f32 %v1950_v46, 0.0  ;;  %v11504_v14 = vpop.permute.xlu0 %2257  ;;  %2945 = vperm.xlu1 %9687, %v11493_v22   ;;  %v11546_v46 = vld [vmem:[%s14730_s0 + $0x109] sm:$0xff] }
 0x21f   :  { %v1957_v51 = vmax.f32 %v1949_v9, 0.0  ;;  %2940 = vperm.xlu0 %9686, %v11499_v36  }
 0x220   :  { %v1964_v56 = vmax.f32 %v1956_v24, %v1958_v12 }
 0x221   :  { %v1963_v1 = vmax.f32 %v1955_v18, %v1957_v51  ;;  %v11508_v13 = vpop.permute.xlu1 %2316 }
 0x222   :  { %1968 = vst.msk [vmem:[#allocation3 + $0x8] sm:$0xff] %vm34_vm0, %v1964_v56  ;;  %v11511_v3 = vpop.permute.xlu0 %2311  ;;  %3233 = vperm.xlu1 %9687, %v11220_v7  }
 0x223   :  { %1967 = vst.msk [vmem:[#allocation3] sm:$0xff] %vm34_vm0, %v1963_v1  ;;  %3228 = vperm.xlu0 %9686, %v11225_v0  }
 0x225   :  { %v11526_v28 = vpop.permute.xlu1 %2326 }
 0x226   :  { %v11528_v19 = vpop.permute.xlu0 %2321  ;;  %3243 = vperm.xlu1 %9687, %v11519_v30  }
 0x227   :  { %3238 = vperm.xlu0 %9686, %v11524_v26  }
 0x229   :  { %v11532_v25 = vpop.permute.xlu1 %2614 }
 0x22a   :  { %14913 = vst [vmem:[#allocation28_spill] sm:$0xff] %v11532_v25  ;;  %v1971_v54 = vld [vmem:[#allocation3] ss:$2 sm:$0xff]  ;;  %v1973_v15 = vld [vmem:[#allocation3 + $0x1] ss:$2 sm:$0xff]  ;;  %v11534_v44 = vpop.permute.xlu0 %2609  ;;  %3297 = vperm.xlu1 %9687, %v11280_v40  }
 0x22b   :  { %14914 = vst [vmem:[#allocation11_spill] sm:$0xff] %v11534_v44  ;;  %3292 = vperm.xlu0 %9686, %v11285_v31   ;;  %v1975_v20 = vmax.f32 %v1971_v54, %v1973_v15 }
 0x22d   :  { %v11548_v9 = vpop.permute.xlu1 %2624  ;;  %1978 = vst.msk [vmem:[#allocation2 + $0x31] sm:$0xff] %vm34_vm0, %v1975_v20 }
 0x22e   :  { %14915 = vst [vmem:[#allocation9_spill] sm:$0xff] %v11548_v9  ;;  %v11551_v24 = vpop.permute.xlu0 %2619  ;;  %3307 = vperm.xlu1 %9687, %v11541_v23  }
 0x22f   :  { %14916 = vst [vmem:[#allocation10_spill] sm:$0xff] %v11551_v24  ;;  %3302 = vperm.xlu0 %9686, %v11546_v46  }
 0x231   :  { %v11555_v12 = vpop.permute.xlu1 %2678 }
 0x232   :  { %14917 = vst [vmem:[#allocation29_spill] sm:$0xff] %v11555_v12  ;;  %v11557_v18 = vpop.permute.xlu0 %2673  ;;  %1782 = vperm.xlu1 %9687, %v11186_v34   ;;  %v11578_v34 = vld [vmem:[%s14730_s0 + $0x262] sm:$0xff]  ;;  %v2157_v12 = vmul.f32 %v11327_v53, %v11271_v49  ;;  %v2221_v49 = vmul.f32 %v11347_v35, %v11387_v43  ;;  %v2285_v43 = vmul.f32 %v11366_v8, %v11484_v59 }
 0x233   :  { %14918 = vst [vmem:[#allocation30_spill] sm:$0xff] %v11557_v18  ;;  %1777 = vperm.xlu0 %9686, %v11191_v42   ;;  %v11583_v42 = vld [vmem:[%s14730_s0 + $0x25a] sm:$0xff]  ;;  %v2029_v18 = vmul.f32 %v11320_v32, %v11211_v10  ;;  %v2349_v59 = vmul.f32 %v11383_v41, %v11511_v3 }
 0x234   :  { %v5096_v51 = vld [vmem:[#allocation2 + $0x31] sm:$0xff] }
 0x235   :  { %9165 = vmatmul.mubr.msk.f32.gmra.mrb[2].mxu1 %vm34_vm0, %v5096_v51  ;;  %9276 = vmatprep.mubr.msk.f32.mxu0 %vm34_vm0, %v5096_v51  ;;  %v11563_v56 = vpop.permute.xlu1 %2688 }
 0x236   :  { %14919 = vst [vmem:[#allocation31_spill] sm:$0xff] %v11563_v56  ;;  %v11565_v1 = vpop.permute.xlu0 %2683  ;;  %1792 = vperm.xlu1 %9687, %v11398_v21  }
 0x237   :  { %14920 = vst [vmem:[#allocation32_spill] sm:$0xff] %v11565_v1  ;;  %1787 = vperm.xlu0 %9686, %v11412_v27  }
 0x239   :  { %v11569_v54 = vpop.permute.xlu1 %1524 }
 0x23a   :  { %14921 = vst [vmem:[#allocation17_spill] sm:$0xff] %v11569_v54  ;;  %v11571_v15 = vpop.permute.xlu0 %1519  ;;  %2143 = vperm.xlu1 %9687, %v11315_v57  }
 0x23b   :  { %14922 = vst [vmem:[#allocation12_spill] sm:$0xff] %v11571_v15  ;;  %2138 = vperm.xlu0 %9686, %v11334_v5  }
 0x23d   :  { %v11585_v20 = vpop.permute.xlu1 %1534 }
 0x23e   :  { %14923 = vst [vmem:[#allocation20_spill] sm:$0xff] %v11585_v20  ;;  %v11587_v51 = vpop.permute.xlu0 %1529  ;;  %2153 = vperm.xlu1 %9687, %v11578_v34  }
 0x23f   :  { %14924 = vst [vmem:[#allocation21_spill] sm:$0xff] %v11587_v51  ;;  %2148 = vperm.xlu0 %9686, %v11583_v42  }
 0x241   :  { %v11591_v24 = vpop.permute.xlu1 %2381 }
 0x242   :  { %v11593_v9 = vpop.permute.xlu0 %2376  ;;  %3000 = vperm.xlu1 %9687, %v11220_v7   ;;  %v11612_v7 = vld [vmem:[%s14730_s0 + $0x112] sm:$0xff] }
 0x243   :  { %2995 = vperm.xlu0 %9686, %v11225_v0   ;;  %v11617_v0 = vld [vmem:[%s14730_s0 + $0x10a] sm:$0xff] }
 0x245   :  { %v11597_v15 = vpop.permute.xlu1 %2391 }
 0x246   :  { %v11599_v1 = vpop.permute.xlu0 %2386  ;;  %3010 = vperm.xlu1 %9687, %v11519_v30  }
 0x247   :  { %3005 = vperm.xlu0 %9686, %v11524_v26  }
 0x249   :  { %v11603_v51 = vpop.permute.xlu1 %2742 }
 0x24a   :  { %14925 = vst [vmem:[#allocation33_spill] sm:$0xff] %v11603_v51  ;;  %v11605_v20 = vpop.permute.xlu0 %2737  ;;  %3361 = vperm.xlu1 %9687, %v11493_v22  }
 0x24b   :  { %14926 = vst [vmem:[#allocation34_spill] sm:$0xff] %v11605_v20  ;;  %3356 = vperm.xlu0 %9686, %v11499_v36  }
 0x24d   :  { %v11619_v44 = vpop.permute.xlu1 %2752 }
 0x24e   :  { %14927 = vst [vmem:[#allocation35_spill] sm:$0xff] %v11619_v44  ;;  %v11621_v25 = vpop.permute.xlu0 %2747  ;;  %3371 = vperm.xlu1 %9687, %v11612_v7  }
 0x24f   :  { %14928 = vst [vmem:[#allocation36_spill] sm:$0xff] %v11621_v25  ;;  %3366 = vperm.xlu0 %9686, %v11617_v0  }
 0x251   :  { %v11625_v20 = vpop.permute.xlu1 %1589 }
 0x252   :  { %14929 = vst [vmem:[#allocation37_spill] sm:$0xff] %v11625_v20  ;;  %v11627_v51 = vpop.permute.xlu0 %1584  ;;  %1846 = vperm.xlu1 %9687, %v11246_v47   ;;  %v11646_v47 = vld [vmem:[%s14730_s0 + $0x278] sm:$0xff]  ;;  %v2092_v20 = vmul.f32 %v11304_v48, %v11241_v60  ;;  %v2095_v60 = vmul.f32 %v11304_v48, %v11253_v50 }
 0x253   :  { %14930 = vst [vmem:[#allocation38_spill] sm:$0xff] %v11627_v51  ;;  %1841 = vperm.xlu0 %9686, %v11251_v33   ;;  %v11651_v33 = vld [vmem:[%s14730_s0 + $0x270] sm:$0xff] }
 0x254   :  { %14933 = vst [vmem:[#allocation41_spill] sm:$0xff] %v11651_v33 }
 0x255   :  { %v11631_v54 = vpop.permute.xlu1 %1599 }
 0x256   :  { %14931 = vst [vmem:[#allocation39_spill] sm:$0xff] %v11631_v54  ;;  %v11633_v56 = vpop.permute.xlu0 %1594  ;;  %1856 = vperm.xlu1 %9687, %v11457_v62  }
 0x257   :  { %14932 = vst [vmem:[#allocation40_spill] sm:$0xff] %v11633_v56  ;;  %1851 = vperm.xlu0 %9686, %v11462_v52  }
 0x259   :  { %v11637_v25 = vpop.permute.xlu1 %2445 }
 0x25a   :  { %v11639_v44 = vpop.permute.xlu0 %2440  ;;  %2208 = vperm.xlu1 %9687, %v11398_v21  }
 0x25b   :  { %2203 = vperm.xlu0 %9686, %v11412_v27   ;;  %v2093_v27 = vmul.f32 %v11304_v48, %v11239_v63  ;;  %v2156_v63 = vmul.f32 %v11327_v53, %v11273_v17  ;;  %v2031_v17 = vmul.f32 %v11320_v32, %v11227_v61 }
 0x25d   :  { %v11653_v56 = vpop.permute.xlu1 %2455  ;;  %v2103_v61 = vadd.f32 %v2095_v60, %v2031_v17 }
 0x25e   :  { %v11655_v54 = vpop.permute.xlu0 %2450  ;;  %2218 = vperm.xlu1 %9687, %v11646_v47  }
 0x25f   :  { %2213 = vperm.xlu0 %9686, %v11651_v33  }
 0x261   :  { %v11659_v21 = vpop.permute.xlu1 %2807 }
 0x262   :  { %14934 = vst [vmem:[#allocation42_spill] sm:$0xff] %v11659_v21  ;;  %v11663_v51 = vpop.permute.xlu0 %2802  ;;  %3064 = vperm.xlu1 %9687, %v11280_v40   ;;  %v2028_v21 = vmul.f32 %v11320_v32, %v11213_v55  ;;  %v2101_v40 = vadd.f32 %v2093_v27, %v2029_v18  ;;  %v2094_v55 = vmul.f32 %v11304_v48, %v11255_v29  ;;  %v14938_v18 = vld [vmem:[#allocation25_spill] sm:$0xff]  ;;  %v14940_v29 = vld [vmem:[#allocation27_spill] sm:$0xff] }
 0x263   :  { %14935 = vst [vmem:[#allocation43_spill] sm:$0xff] %v11663_v51  ;;  %3059 = vperm.xlu0 %9686, %v11285_v31   ;;  %v2222_v31 = vmul.f32 %v11347_v35, %v11376_v39  ;;  %v2159_v39 = vmul.f32 %v11327_v53, %v14938_v18  ;;  %v2286_v27 = vmul.f32 %v11366_v8, %v11475_v38 }
 0x264   :  { %v2100_v10 = vadd.f32 %v2092_v20, %v2028_v21  ;;  %v2165_v50 = vadd.f32 %v2157_v12, %v2101_v40  ;;  %v2224_v40 = vmul.f32 %v11347_v35, %v11418_v11  ;;  %v2350_v38 = vmul.f32 %v11383_v41, %v11508_v13  ;;  %v11720_v11 = vld [vmem:[%s14730_s0 + $0x128] sm:$0xff] }
 0x265   :  { %v11677_v51 = vpop.permute.xlu1 %2817  ;;  %v2167_v13 = vadd.f32 %v2159_v39, %v2103_v61  ;;  %v2479_v39 = vmul.f32 %v11425_v45, %v11637_v25  ;;  %v2416_v61 = vmul.f32 %v11405_v4, %v11599_v1 }
 0x266   :  { %14936 = vst [vmem:[#allocation44_spill] sm:$0xff] %v11677_v51  ;;  %v11683_v33 = vpop.permute.xlu0 %2812  ;;  %3074 = vperm.xlu1 %9687, %v11541_v23   ;;  %v2164_v21 = vadd.f32 %v2156_v63, %v2100_v10  ;;  %v2158_v51 = vmul.f32 %v11327_v53, %v14940_v29  ;;  %v2230_v12 = vadd.f32 %v2222_v31, %v2165_v50 }
 0x267   :  { %14937 = vst [vmem:[#allocation45_spill] sm:$0xff] %v11683_v33  ;;  %3069 = vperm.xlu0 %9686, %v11546_v46   ;;  %v14939_v33 = vld [vmem:[#allocation14_spill] sm:$0xff]  ;;  %v2223_v10 = vmul.f32 %v11347_v35, %v11429_v37  ;;  %v2415_v31 = vmul.f32 %v11405_v4, %v11591_v24  ;;  %v11729_v37 = vld [vmem:[%s14730_s0 + $0x120] sm:$0xff]  ;;  %v2232_v50 = vadd.f32 %v2224_v40, %v2167_v13 }
 0x268   :  { %v2030_v20 = vmul.f32 %v11320_v32, %v14939_v33  ;;  %v2229_v63 = vadd.f32 %v2221_v49, %v2164_v21  ;;  %v2294_v60 = vadd.f32 %v2286_v27, %v2230_v12  ;;  %v2414_v49 = vmul.f32 %v11405_v4, %v11593_v9 }
 0x269   :  { %v11703_v48 = vpop.permute.xlu1 %1653  ;;  %v2352_v24 = vmul.f32 %v11383_v41, %v11526_v28  ;;  %v2478_v9 = vmul.f32 %v11425_v45, %v11639_v44  ;;  %v2417_v28 = vmul.f32 %v11405_v4, %v11597_v15  ;;  %v2480_v15 = vmul.f32 %v11425_v45, %v11655_v54 }
 0x26a   :  { %v11709_v18 = vpop.permute.xlu0 %1648  ;;  %3426 = vperm.xlu1 %9687, %v11519_v30   ;;  %v2102_v33 = vadd.f32 %v2094_v55, %v2030_v20  ;;  %v2288_v30 = vmul.f32 %v11366_v8, %v11502_v16  ;;  %v2287_v55 = vmul.f32 %v11366_v8, %v11504_v14  ;;  %v2358_v16 = vadd.f32 %v2350_v38, %v2294_v60 }
 0x26b   :  { %3421 = vperm.xlu0 %9686, %v11524_v26   ;;  %v2293_v26 = vadd.f32 %v2285_v43, %v2229_v63  ;;  %v2351_v14 = vmul.f32 %v11383_v41, %v11528_v19  ;;  %v2481_v19 = vmul.f32 %v11425_v45, %v11653_v56 }
 0x26c   :  { %v2166_v3 = vadd.f32 %v2158_v51, %v2102_v33  ;;  %v2296_v21 = vadd.f32 %v2288_v30, %v2232_v50  ;;  %v2423_v29 = vadd.f32 %v2415_v31, %v2358_v16 }
 0x26d   :  { %v11735_v17 = vpop.permute.xlu1 %1663  ;;  %v2357_v20 = vadd.f32 %v2349_v59, %v2293_v26 }
 0x26e   :  { %v11741_v27 = vpop.permute.xlu0 %1658  ;;  %3436 = vperm.xlu1 %9687, %v11720_v11   ;;  %v2231_v51 = vadd.f32 %v2223_v10, %v2166_v3  ;;  %v2360_v40 = vadd.f32 %v2352_v24, %v2296_v21  ;;  %v2487_v38 = vadd.f32 %v2479_v39, %v2423_v29  ;;  %v11786_v29 = vld [vmem:[%s14730_s0 + $0x271] sm:$0xff] }
 0x26f   :  { %3431 = vperm.xlu0 %9686, %v11729_v37   ;;  %v2422_v43 = vadd.f32 %v2414_v49, %v2357_v20 }
 0x270   :  { %v2295_v25 = vadd.f32 %v2287_v55, %v2231_v51  ;;  %v2425_v1 = vadd.f32 %v2417_v28, %v2360_v40 }
 0x271   :  { %v2510_v12 = vpop.permute.xlu1 %2509  ;;  %v2486_v10 = vadd.f32 %v2478_v9, %v2422_v43  ;;  %v11780_v9 = vld [vmem:[%s14730_s0 + $0x279] sm:$0xff] }
 0x272   :  { %v2543_v44 = vmul.f32 %v11446_v6, %v2510_v12  ;;  %v2505_v33 = vpop.permute.xlu0 %2504  ;;  %1910 = vperm.xlu1 %9687, %v11315_v57   ;;  %v2359_v63 = vadd.f32 %v2351_v14, %v2295_v25  ;;  %v2489_v56 = vadd.f32 %v2481_v19, %v2425_v1 }
 0x273   :  { %v2542_v59 = vmul.f32 %v11446_v6, %v2505_v33  ;;  %1905 = vperm.xlu0 %9686, %v11334_v5  }
 0x274   :  { %v2551_v13 = vadd.f32 %v2543_v44, %v2487_v38  ;;  %v2424_v60 = vadd.f32 %v2416_v61, %v2359_v63 }
 0x275   :  { %v2550_v30 = vadd.f32 %v2542_v59, %v2486_v10  ;;  %v2520_v31 = vpop.permute.xlu1 %2519 }
 0x276   :  { %v2559_v3 = vmul.f32 %v11467_v2, %v2551_v13  ;;  %v2545_v26 = vmul.f32 %v11446_v6, %v2520_v31  ;;  %v2515_v57 = vpop.permute.xlu0 %2514  ;;  %1920 = vperm.xlu1 %9687, %v11578_v34   ;;  %v2488_v55 = vadd.f32 %v2480_v15, %v2424_v60  ;;  %v11823_v13 = vld [vmem:[%s14730_s0 + $0x121] sm:$0xff] }
 0x277   :  { %v2558_v54 = vmul.f32 %v11467_v2, %v2550_v30  ;;  %v2544_v49 = vmul.f32 %v11446_v6, %v2515_v57  ;;  %1915 = vperm.xlu0 %9686, %v11583_v42   ;;  %v11841_v31 = vld [vmem:[%s14730_s0 + $0x27a] sm:$0xff] }
 0x278   :  { %v2553_v5 = vadd.f32 %v2545_v26, %v2489_v56  ;;  %v2567_v24 = vadd.f32 %v11480_v58, %v2559_v3  ;;  %14949 = vst [vmem:[#allocation51_spill] sm:$0xff] %v11841_v31  ;;  %v11846_v3 = vld [vmem:[%s14730_s0 + $0x272] sm:$0xff] }
 0x279   :  { %v2552_v50 = vadd.f32 %v2544_v49, %v2488_v55  ;;  %v11767_v16 = vpop.permute.xlu1 %2871  ;;  %v2566_v20 = vadd.f32 %v11480_v58, %v2558_v54  ;;  %14950 = vst [vmem:[#allocation52_spill] sm:$0xff] %v11846_v3  ;;  %v14953_v55 = vld [vmem:[#allocation41_spill] sm:$0xff]  ;;  %v11865_v54 = vld [vmem:[%s14730_s0 + $0x290] sm:$0xff] }
 0x27a   :  { %v2561_v39 = vmul.f32 %v11467_v2, %v2553_v5  ;;  %v11771_v51 = vpop.permute.xlu0 %2866  ;;  %2272 = vperm.xlu1 %9687, %v11457_v62   ;;  %v2575_v25 = vmax.f32 %v2567_v24, 0.0  ;;  %v11870_v49 = vld [vmem:[%s14730_s0 + $0x288] sm:$0xff] }
 0x27b   :  { %v2560_v14 = vmul.f32 %v11467_v2, %v2552_v50  ;;  %2267 = vperm.xlu0 %9686, %v11462_v52   ;;  %v2574_v52 = vmax.f32 %v2566_v20, 0.0  ;;  %v11887_v20 = vld [vmem:[%s14730_s0 + $0x291] sm:$0xff] }
 0x27c   :  { %v2569_v21 = vadd.f32 %v11480_v58, %v2561_v39  ;;  %14958 = vst [vmem:[#allocation58_spill] sm:$0xff] %v11887_v20 }
 0x27d   :  { %v2568_v62 = vadd.f32 %v11480_v58, %v2560_v14  ;;  %v11789_v28 = vpop.permute.xlu1 %2881  ;;  %v11892_v14 = vld [vmem:[%s14730_s0 + $0x289] sm:$0xff] }
 0x27e   :  { %14941 = vst [vmem:[#allocation25_spill] sm:$0xff] %v11789_v28  ;;  %v2577_v43 = vmax.f32 %v2569_v21, 0.0  ;;  %v11791_v61 = vpop.permute.xlu0 %2876  ;;  %2282 = vperm.xlu1 %9687, %v11780_v9   ;;  %v15004_v28 = vld [vmem:[#allocation28_spill] sm:$0xff] }
 0x27f   :  { %14942 = vst [vmem:[#allocation14_spill] sm:$0xff] %v11791_v61  ;;  %v2576_v12 = vmax.f32 %v2568_v62, 0.0  ;;  %2277 = vperm.xlu0 %9686, %v11786_v29  }
 0x280   :  { %v2583_v40 = vmax.f32 %v2575_v25, %v2577_v43 }
 0x281   :  { %v2582_v38 = vmax.f32 %v2574_v52, %v2576_v12  ;;  %v11795_v19 = vpop.permute.xlu1 %1717  ;;  %v11909_v52 = vld [vmem:[%s14730_s0 + $0x12a] sm:$0xff]  ;;  %v11914_v12 = vld [vmem:[%s14730_s0 + $0x122] sm:$0xff] }
 0x282   :  { %2587 = vst.msk [vmem:[#allocation3 + $0x8] sm:$0xff] %vm34_vm0, %v2583_v40  ;;  %v11798_v44 = vpop.permute.xlu0 %1712  ;;  %3128 = vperm.xlu1 %9687, %v11493_v22   ;;  %14963 = vst [vmem:[#allocation63_spill] sm:$0xff] %v11909_v52 }
 0x283   :  { %2586 = vst.msk [vmem:[#allocation3] sm:$0xff] %vm34_vm0, %v2582_v38  ;;  %3123 = vperm.xlu0 %9686, %v11499_v36   ;;  %v11818_v36 = vld [vmem:[%s14730_s0 + $0x129] sm:$0xff]  ;;  %14964 = vst [vmem:[#allocation64_spill] sm:$0xff] %v11914_v12 }
 0x285   :  { %v11803_v33 = vpop.permute.xlu1 %1727 }
 0x286   :  { %v11805_v63 = vpop.permute.xlu0 %1722  ;;  %3138 = vperm.xlu1 %9687, %v11612_v7  }
 0x287   :  { %3133 = vperm.xlu0 %9686, %v11617_v0  }
 0x289   :  { %v11809_v10 = vpop.permute.xlu1 %2015 }
 0x28a   :  { %14943 = vst [vmem:[#allocation27_spill] sm:$0xff] %v11809_v10  ;;  %v11811_v15 = vpop.permute.xlu0 %2010  ;;  %3490 = vperm.xlu1 %9687, %v11541_v23   ;;  %v2590_v59 = vld [vmem:[#allocation3] ss:$2 sm:$0xff]  ;;  %v2592_v22 = vld [vmem:[#allocation3 + $0x1] ss:$2 sm:$0xff] }
 0x28b   :  { %14944 = vst [vmem:[#allocation46_spill] sm:$0xff] %v11811_v15  ;;  %3485 = vperm.xlu0 %9686, %v11546_v46   ;;  %v2594_v1 = vmax.f32 %v2590_v59, %v2592_v22  ;;  %v11931_v59 = vld [vmem:[%s14730_s0 + $0x140] sm:$0xff]  ;;  %v11936_v22 = vld [vmem:[%s14730_s0 + $0x138] sm:$0xff] }
 0x28c   :  { %14967 = vst [vmem:[#allocation67_spill] sm:$0xff] %v11931_v59  ;;  %14968 = vst [vmem:[#allocation68_spill] sm:$0xff] %v11936_v22 }
 0x28d   :  { %v11825_v60 = vpop.permute.xlu1 %2025  ;;  %2597 = vst.msk [vmem:[#allocation2 + $0x41] sm:$0xff] %vm34_vm0, %v2594_v1 }
 0x28e   :  { %14945 = vst [vmem:[#allocation47_spill] sm:$0xff] %v11825_v60  ;;  %v11828_v23 = vpop.permute.xlu0 %2020  ;;  %3500 = vperm.xlu1 %9687, %v11818_v36  }
 0x28f   :  { %14946 = vst [vmem:[#allocation48_spill] sm:$0xff] %v11828_v23  ;;  %3495 = vperm.xlu0 %9686, %v11823_v13  }
 0x291   :  { %v11832_v46 = vpop.permute.xlu1 %2079 }
 0x292   :  { %14947 = vst [vmem:[#allocation49_spill] sm:$0xff] %v11832_v46  ;;  %v11834_v30 = vpop.permute.xlu0 %2074  ;;  %2336 = vperm.xlu1 %9687, %v11578_v34   ;;  %v14991_v46 = vld [vmem:[#allocation24_spill] sm:$0xff] }
 0x293   :  { %14948 = vst [vmem:[#allocation50_spill] sm:$0xff] %v11834_v30  ;;  %2331 = vperm.xlu0 %9686, %v11583_v42  }
 0x294   :  { %v5097_v56 = vld [vmem:[#allocation2 + $0x41] sm:$0xff] }
 0x295   :  { %9167 = vmatprep.mubr.msk.f32.mxu1 %vm34_vm0, %v5097_v56  ;;  %9277 = vmatmul.mubr.msk.f32.gmra.mrb[2].mxu0 %vm34_vm0, %v5097_v56  ;;  %v11850_v26 = vpop.permute.xlu1 %2089 }
 0x296   :  { %14951 = vst [vmem:[#allocation53_spill] sm:$0xff] %v11850_v26  ;;  %v11852_v34 = vpop.permute.xlu0 %2084  ;;  %2346 = vperm.xlu1 %9687, %v11841_v31  }
 0x297   :  { %14952 = vst [vmem:[#allocation54_spill] sm:$0xff] %v11852_v34  ;;  %2341 = vperm.xlu0 %9686, %v11846_v3  }
 0x299   :  { %v11856_v42 = vpop.permute.xlu1 %2935 }
 0x29a   :  { %v11858_v57 = vpop.permute.xlu0 %2930  ;;  %2634 = vperm.xlu1 %9687, %v11646_v47  }
 0x29b   :  { %2629 = vperm.xlu0 %9686, %v14953_v55  }
 0x29d   :  { %v11872_v5 = vpop.permute.xlu1 %2945 }
 0x29e   :  { %14954 = vst [vmem:[#allocation41_spill] sm:$0xff] %v11872_v5  ;;  %v11874_v50 = vpop.permute.xlu0 %2940  ;;  %2644 = vperm.xlu1 %9687, %v11865_v54   ;;  %v15000_v5 = vld [vmem:[#allocation29_spill] sm:$0xff] }
 0x29f   :  { %14955 = vst [vmem:[#allocation55_spill] sm:$0xff] %v11874_v50  ;;  %2639 = vperm.xlu0 %9686, %v11870_v49  }
 0x2a1   :  { %v11878_v24 = vpop.permute.xlu1 %3233 }
 0x2a2   :  { %14956 = vst [vmem:[#allocation56_spill] sm:$0xff] %v11878_v24  ;;  %v11880_v39 = vpop.permute.xlu0 %3228  ;;  %2698 = vperm.xlu1 %9687, %v11780_v9  }
 0x2a3   :  { %14957 = vst [vmem:[#allocation57_spill] sm:$0xff] %v11880_v39  ;;  %2693 = vperm.xlu0 %9686, %v11786_v29   ;;  %v11958_v39 = vld [vmem:[%s14730_s0 + $0x139] sm:$0xff] }
 0x2a5   :  { %v11894_v21 = vpop.permute.xlu1 %3243 }
 0x2a6   :  { %14959 = vst [vmem:[#allocation59_spill] sm:$0xff] %v11894_v21  ;;  %v11896_v62 = vpop.permute.xlu0 %3238  ;;  %2708 = vperm.xlu1 %9687, %v11887_v20  }
 0x2a7   :  { %14960 = vst [vmem:[#allocation60_spill] sm:$0xff] %v11896_v62  ;;  %2703 = vperm.xlu0 %9686, %v11892_v14  }
 0x2a9   :  { %v11900_v25 = vpop.permute.xlu1 %3297 }
 0x2aa   :  { %14961 = vst [vmem:[#allocation61_spill] sm:$0xff] %v11900_v25  ;;  %v11902_v43 = vpop.permute.xlu0 %3292  ;;  %3554 = vperm.xlu1 %9687, %v11612_v7  }
 0x2ab   :  { %14962 = vst [vmem:[#allocation62_spill] sm:$0xff] %v11902_v43  ;;  %3549 = vperm.xlu0 %9686, %v11617_v0  }
 0x2ad   :  { %v11916_v40 = vpop.permute.xlu1 %3307 }
 0x2ae   :  { %14965 = vst [vmem:[#allocation65_spill] sm:$0xff] %v11916_v40  ;;  %v11918_v38 = vpop.permute.xlu0 %3302  ;;  %3564 = vperm.xlu1 %9687, %v11909_v52  }
 0x2af   :  { %14966 = vst [vmem:[#allocation66_spill] sm:$0xff] %v11918_v38  ;;  %3559 = vperm.xlu0 %9686, %v11914_v12   ;;  %v11953_v38 = vld [vmem:[%s14730_s0 + $0x141] sm:$0xff] }
 0x2b1   :  { %v11922_v7 = vpop.permute.xlu1 %1782 }
 0x2b2   :  { %v11924_v0 = vpop.permute.xlu0 %1777  ;;  %3852 = vperm.xlu1 %9687, %v11720_v11  }
 0x2b3   :  { %3847 = vperm.xlu0 %9686, %v11729_v37  }
 0x2b5   :  { %v11938_v1 = vpop.permute.xlu1 %1792 }
 0x2b6   :  { %v11940_v56 = vpop.permute.xlu0 %1787  ;;  %3862 = vperm.xlu1 %9687, %v11931_v59  }
 0x2b7   :  { %3857 = vperm.xlu0 %9686, %v11936_v22  }
 0x2b9   :  { %v11944_v62 = vpop.permute.xlu1 %2143 }
 0x2ba   :  { %14969 = vst [vmem:[#allocation69_spill] sm:$0xff] %v11944_v62  ;;  %v11946_v21 = vpop.permute.xlu0 %2138  ;;  %3916 = vperm.xlu1 %9687, %v11818_v36  }
 0x2bb   :  { %14970 = vst [vmem:[#allocation70_spill] sm:$0xff] %v11946_v21  ;;  %3911 = vperm.xlu0 %9686, %v11823_v13  }
 0x2bd   :  { %v11960_v24 = vpop.permute.xlu1 %2153 }
 0x2be   :  { %14971 = vst [vmem:[#allocation71_spill] sm:$0xff] %v11960_v24  ;;  %v11962_v40 = vpop.permute.xlu0 %2148  ;;  %3926 = vperm.xlu1 %9687, %v11953_v38  }
 0x2bf   :  { %14972 = vst [vmem:[#allocation72_spill] sm:$0xff] %v11962_v40  ;;  %3921 = vperm.xlu0 %9686, %v11958_v39  }
 0x2c1   :  { %v11966_v21 = vpop.permute.xlu1 %3000 }
 0x2c2   :  { %14973 = vst [vmem:[#allocation73_spill] sm:$0xff] %v11966_v21  ;;  %v11968_v62 = vpop.permute.xlu0 %2995  ;;  %2401 = vperm.xlu1 %9687, %v11646_v47   ;;  %v11987_v47 = vld [vmem:[%s14730_s0 + $0x292] sm:$0xff] }
 0x2c3   :  { %14974 = vst [vmem:[#allocation74_spill] sm:$0xff] %v11968_v62  ;;  %2396 = vperm.xlu0 %9686, %v14953_v55   ;;  %14979 = vst [vmem:[#allocation79_spill] sm:$0xff] %v11987_v47  ;;  %v11992_v55 = vld [vmem:[%s14730_s0 + $0x28a] sm:$0xff] }
 0x2c4   :  { %14980 = vst [vmem:[#allocation80_spill] sm:$0xff] %v11992_v55  ;;  %v15001_v62 = vld [vmem:[#allocation30_spill] sm:$0xff] }
 0x2c5   :  { %v11972_v43 = vpop.permute.xlu1 %3010 }
 0x2c6   :  { %14975 = vst [vmem:[#allocation75_spill] sm:$0xff] %v11972_v43  ;;  %v11974_v25 = vpop.permute.xlu0 %3005  ;;  %2411 = vperm.xlu1 %9687, %v11865_v54  }
 0x2c7   :  { %14976 = vst [vmem:[#allocation76_spill] sm:$0xff] %v11974_v25  ;;  %2406 = vperm.xlu0 %9686, %v11870_v49  }
 0x2c9   :  { %v11978_v40 = vpop.permute.xlu1 %3361 }
 0x2ca   :  { %14977 = vst [vmem:[#allocation77_spill] sm:$0xff] %v11978_v40  ;;  %v11980_v24 = vpop.permute.xlu0 %3356  ;;  %2762 = vperm.xlu1 %9687, %v11841_v31   ;;  %v14994_v31 = vld [vmem:[#allocation15_spill] sm:$0xff] }
 0x2cb   :  { %14978 = vst [vmem:[#allocation78_spill] sm:$0xff] %v11980_v24  ;;  %2757 = vperm.xlu0 %9686, %v11846_v3  }
 0x2cd   :  { %v11994_v23 = vpop.permute.xlu1 %3371 }
 0x2ce   :  { %14981 = vst [vmem:[#allocation81_spill] sm:$0xff] %v11994_v23  ;;  %v11996_v60 = vpop.permute.xlu0 %3366  ;;  %2772 = vperm.xlu1 %9687, %v11987_v47   ;;  %v14993_v47 = vld [vmem:[#allocation26_spill] sm:$0xff] }
 0x2cf   :  { %14982 = vst [vmem:[#allocation82_spill] sm:$0xff] %v11996_v60  ;;  %2767 = vperm.xlu0 %9686, %v11992_v55  }
 0x2d1   :  { %v12000_v24 = vpop.permute.xlu1 %1846 }
 0x2d2   :  { %v12002_v40 = vpop.permute.xlu0 %1841  ;;  %3619 = vperm.xlu1 %9687, %v11720_v11   ;;  %v12021_v11 = vld [vmem:[%s14730_s0 + $0x142] sm:$0xff] }
 0x2d3   :  { %3614 = vperm.xlu0 %9686, %v11729_v37   ;;  %14985 = vst [vmem:[#allocation85_spill] sm:$0xff] %v12021_v11  ;;  %v12026_v37 = vld [vmem:[%s14730_s0 + $0x13a] sm:$0xff] }
 0x2d4   :  { %14986 = vst [vmem:[#allocation86_spill] sm:$0xff] %v12026_v37 }
 0x2d5   :  { %v12006_v15 = vpop.permute.xlu1 %1856 }
 0x2d6   :  { %v12008_v10 = vpop.permute.xlu0 %1851  ;;  %3629 = vperm.xlu1 %9687, %v11931_v59   ;;  %v15015_v59 = vld [vmem:[#allocation38_spill] sm:$0xff] }
 0x2d7   :  { %3624 = vperm.xlu0 %9686, %v11936_v22  }
 0x2d9   :  { %v12012_v60 = vpop.permute.xlu1 %2208 }
 0x2da   :  { %14983 = vst [vmem:[#allocation83_spill] sm:$0xff] %v12012_v60  ;;  %v12014_v23 = vpop.permute.xlu0 %2203  ;;  %3980 = vperm.xlu1 %9687, %v11909_v52   ;;  %v14990_v60 = vld [vmem:[#allocation18_spill] sm:$0xff]  ;;  %v14992_v52 = vld [vmem:[#allocation13_spill] sm:$0xff] }
 0x2db   :  { %14984 = vst [vmem:[#allocation84_spill] sm:$0xff] %v12014_v23  ;;  %3975 = vperm.xlu0 %9686, %v11914_v12   ;;  %v14989_v23 = vld [vmem:[#allocation19_spill] sm:$0xff]  ;;  %v1477_v12 = vmul.f32 %v14990_v60, %v14991_v46  ;;  %v1480_v55 = vmul.f32 %v14990_v60, %v14992_v52  ;;  %v1479_v3 = vmul.f32 %v14990_v60, %v14993_v47 }
 0x2dc   :  { %v1478_v30 = vmul.f32 %v14990_v60, %v14989_v23  ;;  %v14997_v23 = vld [vmem:[#allocation22_spill] sm:$0xff]  ;;  %v14998_v46 = vld [vmem:[#allocation23_spill] sm:$0xff] }
 0x2dd   :  { %v12028_v34 = vpop.permute.xlu1 %2218  ;;  %v1416_v43 = vmul.f32 %v11320_v32, %v14997_v23  ;;  %v15002_v23 = vld [vmem:[#allocation31_spill] sm:$0xff] }
 0x2de   :  { %14987 = vst [vmem:[#allocation87_spill] sm:$0xff] %v12028_v34  ;;  %v12030_v26 = vpop.permute.xlu0 %2213  ;;  %3990 = vperm.xlu1 %9687, %v12021_v11   ;;  %v1414_v34 = vmul.f32 %v11320_v32, %v14994_v31  ;;  %v2712_v31 = vmul.f32 %v14990_v60, %v15000_v5  ;;  %v2714_v61 = vmul.f32 %v14990_v60, %v15002_v23  ;;  %v15006_v5 = vld [vmem:[#allocation32_spill] sm:$0xff] }
 0x2df   :  { %14988 = vst [vmem:[#allocation88_spill] sm:$0xff] %v12030_v26  ;;  %3985 = vperm.xlu0 %9686, %v12026_v37   ;;  %v14995_v26 = vld [vmem:[#allocation16_spill] sm:$0xff]  ;;  %v1415_v37 = vmul.f32 %v11320_v32, %v14998_v46  ;;  %v15003_v46 = vld [vmem:[#allocation17_spill] sm:$0xff] }
 0x2e0   :  { %v1413_v11 = vmul.f32 %v11320_v32, %v14995_v26  ;;  %v1486_v52 = vadd.f32 %v1478_v30, %v1414_v34  ;;  %v2711_v26 = vmul.f32 %v14990_v60, %v15001_v62  ;;  %v15005_v30 = vld [vmem:[#allocation11_spill] sm:$0xff]  ;;  %v15007_v62 = vld [vmem:[#allocation12_spill] sm:$0xff] }
 0x2e1   :  { %v12046_v25 = vpop.permute.xlu1 %3064  ;;  %v1487_v21 = vadd.f32 %v1479_v3, %v1415_v37  ;;  %v2647_v34 = vmul.f32 %v11320_v32, %v15005_v30  ;;  %v15009_v3 = vld [vmem:[#allocation9_spill] sm:$0xff]  ;;  %v15011_v23 = vld [vmem:[#allocation20_spill] sm:$0xff] }
 0x2e2   :  { %14996 = vst [vmem:[#allocation19_spill] sm:$0xff] %v12046_v25  ;;  %v12052_v50 = vpop.permute.xlu0 %3059  ;;  %2465 = vperm.xlu1 %9687, %v11780_v9   ;;  %v1485_v47 = vadd.f32 %v1477_v12, %v1413_v11  ;;  %v1488_v25 = vadd.f32 %v1480_v55, %v1416_v43  ;;  %v2648_v9 = vmul.f32 %v11320_v32, %v15004_v28  ;;  %v15010_v11 = vld [vmem:[#allocation10_spill] sm:$0xff] }
 0x2e3   :  { %14999 = vst [vmem:[#allocation18_spill] sm:$0xff] %v12052_v50  ;;  %2460 = vperm.xlu0 %9686, %v11786_v29   ;;  %v1542_v50 = vmul.f32 %v11327_v53, %v15003_v46  ;;  %v2713_v12 = vmul.f32 %v14990_v60, %v15006_v5  ;;  %v1541_v29 = vmul.f32 %v11327_v53, %v15007_v62  ;;  %v15012_v46 = vld [vmem:[#allocation37_spill] sm:$0xff] }
 0x2e4   :  { %v2650_v55 = vmul.f32 %v11320_v32, %v15009_v3  ;;  %v2649_v37 = vmul.f32 %v11320_v32, %v15010_v11  ;;  %v1544_v28 = vmul.f32 %v11327_v53, %v15011_v23  ;;  %v1607_v30 = vmul.f32 %v11347_v35, %v15012_v46  ;;  %v15014_v62 = vld [vmem:[#allocation21_spill] sm:$0xff] }
 0x2e5   :  { %v12072_v43 = vpop.permute.xlu1 %3074  ;;  %v2720_v60 = vadd.f32 %v2712_v31, %v2648_v9  ;;  %v2719_v5 = vadd.f32 %v2711_v26, %v2647_v34  ;;  %v1606_v3 = vmul.f32 %v11347_v35, %v15015_v59  ;;  %v1550_v11 = vadd.f32 %v1542_v50, %v1486_v52  ;;  %v15016_v23 = vld [vmem:[#allocation33_spill] sm:$0xff]  ;;  %v15017_v26 = vld [vmem:[#allocation34_spill] sm:$0xff]  ;;  %v15018_v50 = vld [vmem:[#allocation39_spill] sm:$0xff] }
 0x2e6   :  { %15008 = vst [vmem:[#allocation24_spill] sm:$0xff] %v12072_v43  ;;  %v12082_v22 = vpop.permute.xlu0 %3069  ;;  %2475 = vperm.xlu1 %9687, %v11887_v20   ;;  %v1543_v43 = vmul.f32 %v11327_v53, %v15014_v62  ;;  %v12090_v32 = vadd.f32 %v2714_v61, %v2650_v55  ;;  %v2776_v46 = vmul.f32 %v11327_v53, %v15016_v23 }
 0x2e7   :  { %15013 = vst [vmem:[#allocation13_spill] sm:$0xff] %v12082_v22  ;;  %2470 = vperm.xlu0 %9686, %v11892_v14   ;;  %v1671_v22 = vmul.f32 %v11366_v8, %v11703_v48  ;;  %v12096_v20 = vadd.f32 %v2713_v12, %v2649_v37  ;;  %v1549_v31 = vadd.f32 %v1541_v29, %v1485_v47 }
 0x2e8   :  { %v2775_v9 = vmul.f32 %v11327_v53, %v15017_v26  ;;  %v1670_v59 = vmul.f32 %v11366_v8, %v11709_v18  ;;  %v1552_v61 = vadd.f32 %v1544_v28, %v1488_v25  ;;  %v1615_v55 = vadd.f32 %v1607_v30, %v1550_v11  ;;  %v15019_v53 = vld [vmem:[#allocation40_spill] sm:$0xff]  ;;  %v12119_v25 = vld [vmem:[%s14730_s0 + $0x2a8] sm:$0xff] }
 0x2e9   :  { %v12102_v34 = vpop.permute.xlu1 %3426  ;;  %v1609_v52 = vmul.f32 %v11347_v35, %v15018_v50  ;;  %v1735_v62 = vmul.f32 %v11383_v41, %v11795_v19  ;;  %v1551_v47 = vadd.f32 %v1543_v43, %v1487_v21  ;;  %v1614_v12 = vadd.f32 %v1606_v3, %v1549_v31  ;;  %v15021_v26 = vld [vmem:[#allocation36_spill] sm:$0xff] }
 0x2ea   :  { %v12108_v48 = vpop.permute.xlu0 %3421  ;;  %2827 = vperm.xlu1 %9687, %v11865_v54   ;;  %v1608_v29 = vmul.f32 %v11347_v35, %v15019_v53  ;;  %v1734_v18 = vmul.f32 %v11383_v41, %v11798_v44  ;;  %v12121_v19 = vadd.f32 %v2776_v46, %v2720_v60  ;;  %v1679_v37 = vadd.f32 %v1671_v22, %v1615_v55  ;;  %v12130_v35 = vld [vmem:[%s14730_s0 + $0x2a0] sm:$0xff] }
 0x2eb   :  { %2822 = vperm.xlu0 %9686, %v11870_v49   ;;  %v1673_v54 = vmul.f32 %v11366_v8, %v11735_v17  ;;  %v1800_v21 = vmul.f32 %v11405_v4, %v11922_v7  ;;  %v12132_v44 = vadd.f32 %v2775_v9, %v2719_v5  ;;  %v1678_v49 = vadd.f32 %v1670_v59, %v1614_v12 }
 0x2ec   :  { %v1672_v43 = vmul.f32 %v11366_v8, %v11741_v27  ;;  %v1799_v22 = vmul.f32 %v11405_v4, %v11924_v0  ;;  %v1617_v17 = vadd.f32 %v1609_v52, %v1552_v61  ;;  %v1743_v30 = vadd.f32 %v1735_v62, %v1679_v37 }
 0x2ed   :  { %v12138_v28 = vpop.permute.xlu1 %3436  ;;  %v1737_v7 = vmul.f32 %v11383_v41, %v11803_v33  ;;  %v1864_v60 = vmul.f32 %v11425_v45, %v12000_v24  ;;  %v1616_v5 = vadd.f32 %v1608_v29, %v1551_v47  ;;  %v1742_v11 = vadd.f32 %v1734_v18, %v1678_v49  ;;  %v12155_v33 = vld [vmem:[%s14734_s4 + $0xb] ss:$0 sm:$0xff]  ;;  %v15020_v24 = vld [vmem:[#allocation35_spill] sm:$0xff] }
 0x2ee   :  { %v12144_v3 = vpop.permute.xlu0 %3431  ;;  %2837 = vperm.xlu1 %9687, %v12119_v25   ;;  %v1736_v8 = vmul.f32 %v11383_v41, %v11805_v63  ;;  %v1863_v27 = vmul.f32 %v11425_v45, %v12002_v40  ;;  %v2778_v0 = vmul.f32 %v12155_v33, %v15020_v24  ;;  %v1681_v23 = vadd.f32 %v1673_v54, %v1617_v17  ;;  %v15023_v29 = vld [vmem:[#allocation43_spill] sm:$0xff]  ;;  %v15024_v54 = vld [vmem:[#allocation44_spill] sm:$0xff] }
 0x2ef   :  { %2832 = vperm.xlu0 %9686, %v12130_v35   ;;  %v1808_v46 = vadd.f32 %v1800_v21, %v1743_v30  ;;  %v1802_v31 = vmul.f32 %v11405_v4, %v11938_v1  ;;  %v2777_v41 = vmul.f32 %v12155_v33, %v15021_v26  ;;  %v1680_v63 = vadd.f32 %v1672_v43, %v1616_v5 }
 0x2f0   :  { %v1807_v40 = vadd.f32 %v1799_v22, %v1742_v11  ;;  %v1801_v9 = vmul.f32 %v11405_v4, %v11940_v56  ;;  %v1745_v61 = vadd.f32 %v1737_v7, %v1681_v23  ;;  %v1866_v50 = vmul.f32 %v11425_v45, %v12006_v15  ;;  %v12176_v4 = vld [vmem:[%s14734_s4 + $0xc] ss:$0 sm:$0xff]  ;;  %v15022_v15 = vld [vmem:[#allocation42_spill] sm:$0xff]  ;;  %v12189_v22 = vld [vmem:[%s14734_s4 + $0xd] ss:$0 sm:$0xff] }
 0x2f1   :  { %v1911_v59 = vpop.permute.xlu1 %1910  ;;  %v1872_v55 = vadd.f32 %v1864_v60, %v1808_v46  ;;  %v1744_v1 = vadd.f32 %v1736_v8, %v1680_v63  ;;  %v1865_v12 = vmul.f32 %v11425_v45, %v12008_v10  ;;  %v2841_v56 = vmul.f32 %v12176_v4, %v15022_v15  ;;  %v15025_v10 = vld [vmem:[#allocation45_spill] sm:$0xff] }
 0x2f2   :  { %v1928_v52 = vmul.f32 %v11446_v6, %v1911_v59  ;;  %v1906_v62 = vpop.permute.xlu0 %1905  ;;  %3683 = vperm.xlu1 %9687, %v11818_v36   ;;  %v1871_v47 = vadd.f32 %v1863_v27, %v1807_v40  ;;  %v2840_v36 = vmul.f32 %v12176_v4, %v15023_v29  ;;  %v1810_v18 = vadd.f32 %v1802_v31, %v1745_v61 }
 0x2f3   :  { %v1927_v53 = vmul.f32 %v11446_v6, %v1906_v62  ;;  %3678 = vperm.xlu0 %9686, %v11823_v13   ;;  %v2843_v45 = vmul.f32 %v12176_v4, %v15024_v54  ;;  %v2842_v21 = vmul.f32 %v12176_v4, %v15025_v10  ;;  %v1809_v13 = vadd.f32 %v1801_v9, %v1744_v1  ;;  %v15026_v9 = vld [vmem:[#allocation67_spill] sm:$0xff]  ;;  %v15029_v1 = vld [vmem:[#allocation14_spill] sm:$0xff]  ;;  %v15032_v10 = vld [vmem:[#allocation41_spill] sm:$0xff] }
 0x2f4   :  { %v1936_v37 = vadd.f32 %v1928_v52, %v1872_v55  ;;  %v2905_v17 = vmul.f32 %v12189_v22, %v11767_v16  ;;  %v1874_v30 = vadd.f32 %v1866_v50, %v1810_v18  ;;  %v2904_v11 = vmul.f32 %v12189_v22, %v11771_v51  ;;  %v12208_v51 = vld [vmem:[%s14734_s4 + $0xe] ss:$0 sm:$0xff]  ;;  %v12227_v50 = vld [vmem:[%s14730_s0 + $0x158] sm:$0xff]  ;;  %v15028_v52 = vld [vmem:[#allocation25_spill] sm:$0xff] }
 0x2f5   :  { %v1935_v49 = vadd.f32 %v1927_v53, %v1871_v47  ;;  %v1921_v43 = vpop.permute.xlu1 %1920  ;;  %v1873_v8 = vadd.f32 %v1865_v12, %v1809_v13  ;;  %v2786_v16 = vadd.f32 %v2778_v0, %v12090_v32  ;;  %v2785_v23 = vadd.f32 %v2777_v41, %v12096_v20  ;;  %v12236_v12 = vld [vmem:[%s14734_s4 + $0xf] ss:$0 sm:$0xff]  ;;  %v15030_v53 = vld [vmem:[#allocation73_spill] sm:$0xff]  ;;  %v12256_v13 = vld [vmem:[%s14734_s4 + $0x10] ss:$0 sm:$0xff] }
 0x2f6   :  { %v1944_v7 = vmul.f32 %v11467_v2, %v1936_v37  ;;  %v1930_v60 = vmul.f32 %v11446_v6, %v1921_v43  ;;  %v1916_v5 = vpop.permute.xlu0 %1915  ;;  %3693 = vperm.xlu1 %9687, %v11953_v38   ;;  %v2849_v46 = vadd.f32 %v2841_v56, %v12121_v19  ;;  %v2848_v26 = vadd.f32 %v2840_v36, %v12132_v44  ;;  %v12244_v56 = vld [vmem:[%s14730_s0 + $0x150] sm:$0xff] }
 0x2f7   :  { %v1943_v27 = vmul.f32 %v11467_v2, %v1935_v49  ;;  %v1929_v24 = vmul.f32 %v11446_v6, %v1916_v5  ;;  %3688 = vperm.xlu0 %9686, %v11958_v39   ;;  %v2969_v63 = vmul.f32 %v12208_v51, %v11856_v42  ;;  %v2968_v6 = vmul.f32 %v12208_v51, %v11858_v57  ;;  %v15027_v57 = vld [vmem:[#allocation68_spill] sm:$0xff]  ;;  %v15031_v18 = vld [vmem:[#allocation74_spill] sm:$0xff]  ;;  %v15033_v49 = vld [vmem:[#allocation19_spill] sm:$0xff] }
 0x2f8   :  { %v1938_v31 = vadd.f32 %v1930_v60, %v1874_v30  ;;  %v2851_v20 = vadd.f32 %v2843_v45, %v2786_v16  ;;  %v2850_v0 = vadd.f32 %v2842_v21, %v2785_v23  ;;  %v1952_v19 = vadd.f32 %v11480_v58, %v1944_v7  ;;  %v15035_v5 = vld [vmem:[#allocation18_spill] sm:$0xff]  ;;  %v15036_v23 = vld [vmem:[#allocation75_spill] sm:$0xff] }
 0x2f9   :  { %v1937_v40 = vadd.f32 %v1929_v24, %v1873_v8  ;;  %v12214_v32 = vpop.permute.xlu1 %2272  ;;  %v2913_v59 = vadd.f32 %v2905_v17, %v2849_v46  ;;  %v2912_v61 = vadd.f32 %v2904_v11, %v2848_v26  ;;  %v1951_v42 = vadd.f32 %v11480_v58, %v1943_v27 }
 0x2fa   :  { %v1946_v44 = vmul.f32 %v11467_v2, %v1938_v31  ;;  %v12218_v41 = vpop.permute.xlu0 %2267  ;;  %4045 = vperm.xlu1 %9687, %v15026_v9   ;;  %v2907_v62 = vmul.f32 %v12189_v22, %v15028_v52  ;;  %v2906_v47 = vmul.f32 %v12189_v22, %v15029_v1  ;;  %v3033_v37 = vmul.f32 %v12236_v12, %v15031_v18  ;;  %v15040_v1 = vld [vmem:[#allocation13_spill] sm:$0xff] }
 0x2fb   :  { %v1945_v55 = vmul.f32 %v11467_v2, %v1937_v40  ;;  %4040 = vperm.xlu0 %9686, %v15027_v57   ;;  %v3034_v2 = vmul.f32 %v12236_v12, %v15030_v53  ;;  %v2977_v29 = vadd.f32 %v2969_v63, %v2913_v59  ;;  %v2976_v36 = vadd.f32 %v2968_v6, %v2912_v61  ;;  %v15037_v6 = vld [vmem:[#allocation76_spill] sm:$0xff]  ;;  %v15039_v57 = vld [vmem:[#allocation51_spill] sm:$0xff] }
 0x2fc   :  { %v1954_v15 = vadd.f32 %v11480_v58, %v1946_v44  ;;  %v2971_v21 = vmul.f32 %v12208_v51, %v15032_v10  ;;  %v3098_v43 = vmul.f32 %v12256_v13, %v15033_v49  ;;  %v1960_v17 = vmax.f32 %v1952_v19, 0.0  ;;  %v15038_v61 = vld [vmem:[#allocation24_spill] sm:$0xff] }
 0x2fd   :  { %v1953_v54 = vadd.f32 %v11480_v58, %v1945_v55  ;;  %v12249_v45 = vpop.permute.xlu1 %2282  ;;  %v15034_v58 = vld [vmem:[#allocation55_spill] sm:$0xff]  ;;  %v3097_v11 = vmul.f32 %v12256_v13, %v15035_v5  ;;  %v1959_v8 = vmax.f32 %v1951_v42, 0.0  ;;  %v2915_v24 = vadd.f32 %v2907_v62, %v2851_v20  ;;  %v12278_v20 = vld [vmem:[%s14734_s4 + $0x11] ss:$0 sm:$0xff]  ;;  %v12290_v10 = vld [vmem:[%s14734_s4] ss:$0 sm:$0xff] }
 0x2fe   :  { %v1962_v30 = vmax.f32 %v1954_v15, 0.0  ;;  %v12260_v7 = vpop.permute.xlu0 %2277  ;;  %4055 = vperm.xlu1 %9687, %v12227_v50   ;;  %v2970_v60 = vmul.f32 %v12208_v51, %v15034_v58  ;;  %v3042_v16 = vadd.f32 %v3034_v2, %v2977_v29  ;;  %v3036_v46 = vmul.f32 %v12236_v12, %v15036_v23  ;;  %v15041_v2 = vld [vmem:[#allocation52_spill] sm:$0xff] }
 0x2ff   :  { %v1961_v27 = vmax.f32 %v1953_v54, 0.0  ;;  %4050 = vperm.xlu0 %9686, %v12244_v56   ;;  %v2914_v26 = vadd.f32 %v2906_v47, %v2850_v0  ;;  %v3041_v63 = vadd.f32 %v3033_v37, %v2976_v36  ;;  %v3035_v40 = vmul.f32 %v12236_v12, %v15037_v6  ;;  %v15043_v5 = vld [vmem:[#allocation80_spill] sm:$0xff] }
 0x300   :  { %v1966_v31 = vmax.f32 %v1960_v17, %v1962_v30  ;;  %v2979_v9 = vadd.f32 %v2971_v21, %v2915_v24  ;;  %v3106_v59 = vadd.f32 %v3098_v43, %v3042_v16  ;;  %v3100_v42 = vmul.f32 %v12256_v13, %v15038_v61  ;;  %v15042_v17 = vld [vmem:[#allocation79_spill] sm:$0xff]  ;;  %v12303_v23 = vld [vmem:[%s14734_s4 + $0x1] ss:$0 sm:$0xff] }
 0x301   :  { %v1965_v19 = vmax.f32 %v1959_v8, %v1961_v27  ;;  %v3129_v44 = vpop.permute.xlu1 %3128  ;;  %v2978_v52 = vadd.f32 %v2970_v60, %v2914_v26  ;;  %v3105_v62 = vadd.f32 %v3097_v11, %v3041_v63  ;;  %v3099_v47 = vmul.f32 %v12256_v13, %v15040_v1  ;;  %15044 = vst [vmem:[#allocation26_spill] sm:$0xff] %v12303_v23  ;;  %v15045_v63 = vld [vmem:[#allocation58_spill] sm:$0xff] }
 0x302   :  { %1970 = vst.msk [vmem:[#allocation3 + $0x18] sm:$0xff] %vm34_vm0, %v1966_v31  ;;  %v3162_v0 = vmul.f32 %v12278_v20, %v3129_v44  ;;  %v3124_v55 = vpop.permute.xlu0 %3123  ;;  %2529 = vperm.xlu1 %9687, %v15039_v57   ;;  %v3044_v15 = vadd.f32 %v3036_v46, %v2979_v9 }
 0x303   :  { %1969 = vst.msk [vmem:[#allocation3 + $0x10] sm:$0xff] %vm34_vm0, %v1965_v19  ;;  %v3161_v53 = vmul.f32 %v12278_v20, %v3124_v55  ;;  %2524 = vperm.xlu0 %9686, %v15041_v2   ;;  %v3043_v36 = vadd.f32 %v3035_v40, %v2978_v52  ;;  %v12316_v19 = vld [vmem:[%s14730_s0 + $0x2a9] sm:$0xff]  ;;  %v15048_v2 = vld [vmem:[#allocation63_spill] sm:$0xff] }
 0x304   :  { %v3170_v29 = vadd.f32 %v3162_v0, %v3106_v59  ;;  %v3108_v54 = vadd.f32 %v3100_v42, %v3044_v15  ;;  %v12322_v59 = vld [vmem:[%s14730_s0 + $0x2a1] sm:$0xff] }
 0x305   :  { %v3169_v18 = vadd.f32 %v3161_v53, %v3105_v62  ;;  %v3139_v37 = vpop.permute.xlu1 %3138  ;;  %v3107_v30 = vadd.f32 %v3099_v47, %v3043_v36  ;;  %v15049_v15 = vld [vmem:[#allocation64_spill] sm:$0xff] }
 0x306   :  { %v3178_v21 = vmul.f32 %v12290_v10, %v3170_v29  ;;  %v3164_v49 = vmul.f32 %v12278_v20, %v3139_v37  ;;  %v3134_v43 = vpop.permute.xlu0 %3133  ;;  %2539 = vperm.xlu1 %9687, %v15042_v17   ;;  %v15051_v37 = vld [vmem:[#allocation86_spill] sm:$0xff] }
 0x307   :  { %v3177_v58 = vmul.f32 %v12290_v10, %v3169_v18  ;;  %v3163_v60 = vmul.f32 %v12278_v20, %v3134_v43  ;;  %2534 = vperm.xlu0 %9686, %v15043_v5   ;;  %v15050_v18 = vld [vmem:[#allocation85_spill] sm:$0xff] }
 0x308   :  { %v3172_v11 = vadd.f32 %v3164_v49, %v3108_v54  ;;  %v3186_v46 = vadd.f32 %v12303_v23, %v3178_v21 }
 0x309   :  { %v3171_v8 = vadd.f32 %v3163_v60, %v3107_v30  ;;  %v12298_v27 = vpop.permute.xlu1 %3490  ;;  %v3185_v6 = vadd.f32 %v12303_v23, %v3177_v58  ;;  %v12355_v30 = vld [vmem:[%s14730_s0 + $0x159] sm:$0xff]  ;;  %v12360_v60 = vld [vmem:[%s14730_s0 + $0x151] sm:$0xff] }
 0x30a   :  { %v1972_v24 = vld [vmem:[#allocation3 + $0x10] ss:$2 sm:$0xff]  ;;  %v1974_v16 = vld [vmem:[#allocation3 + $0x11] ss:$2 sm:$0xff]  ;;  %v3180_v31 = vmul.f32 %v12290_v10, %v3172_v11  ;;  %v12307_v26 = vpop.permute.xlu0 %3485  ;;  %2891 = vperm.xlu1 %9687, %v15045_v63  }
 0x30b   :  { %v3179_v40 = vmul.f32 %v12290_v10, %v3171_v8  ;;  %2886 = vperm.xlu0 %9686, %v11892_v14   ;;  %v1976_v44 = vmax.f32 %v1972_v24, %v1974_v16  ;;  %v3194_v14 = vmax.f32 %v3186_v46, 0.0  ;;  %v3193_v57 = vmax.f32 %v3185_v6, 0.0  ;;  %v12378_v24 = vld [vmem:[%s14730_s0 + $0x2aa] sm:$0xff]  ;;  %v12383_v46 = vld [vmem:[%s14730_s0 + $0x2a2] sm:$0xff] }
 0x30c   :  { %v3188_v9 = vadd.f32 %v12303_v23, %v3180_v31  ;;  %15058 = vst [vmem:[#allocation28_spill] sm:$0xff] %v12378_v24  ;;  %15059 = vst [vmem:[#allocation11_spill] sm:$0xff] %v12383_v46  ;;  %v12402_v6 = vld [vmem:[%s14730_s0 + $0x2c0] sm:$0xff] }
 0x30d   :  { %v3187_v61 = vadd.f32 %v12303_v23, %v3179_v40  ;;  %v12325_v42 = vpop.permute.xlu1 %3500  ;;  %1979 = vst.msk [vmem:[#allocation2 + $0xd1] sm:$0xff] %vm34_vm0, %v1976_v44  ;;  %v12407_v40 = vld [vmem:[%s14730_s0 + $0x2b8] sm:$0xff] }
 0x30e   :  { %15046 = vst [vmem:[#allocation15_spill] sm:$0xff] %v12325_v42  ;;  %v3196_v0 = vmax.f32 %v3188_v9, 0.0  ;;  %v12328_v55 = vpop.permute.xlu0 %3495  ;;  %2901 = vperm.xlu1 %9687, %v12316_v19   ;;  %v15112_v42 = vld [vmem:[#allocation61_spill] sm:$0xff] }
 0x30f   :  { %15047 = vst [vmem:[#allocation16_spill] sm:$0xff] %v12328_v55  ;;  %v3195_v52 = vmax.f32 %v3187_v61, 0.0  ;;  %2896 = vperm.xlu0 %9686, %v12322_v59  }
 0x310   :  { %v3202_v62 = vmax.f32 %v3194_v14, %v3196_v0  ;;  %v12424_v0 = vld [vmem:[%s14730_s0 + $0x2c1] sm:$0xff] }
 0x311   :  { %v3201_v1 = vmax.f32 %v3193_v57, %v3195_v52  ;;  %v12332_v47 = vpop.permute.xlu1 %2336  ;;  %15068 = vst [vmem:[#allocation33_spill] sm:$0xff] %v12424_v0  ;;  %v12429_v57 = vld [vmem:[%s14730_s0 + $0x2b9] sm:$0xff] }
 0x312   :  { %3206 = vst.msk [vmem:[#allocation3 + $0x8] sm:$0xff] %vm34_vm0, %v3202_v62  ;;  %v12335_v53 = vpop.permute.xlu0 %2331  ;;  %3747 = vperm.xlu1 %9687, %v15048_v2  }
 0x313   :  { %3205 = vst.msk [vmem:[#allocation3] sm:$0xff] %vm34_vm0, %v3201_v1  ;;  %3742 = vperm.xlu0 %9686, %v15049_v15   ;;  %v12446_v15 = vld [vmem:[%s14730_s0 + $0x15a] sm:$0xff] }
 0x314   :  { %15073 = vst [vmem:[#allocation36_spill] sm:$0xff] %v12446_v15 }
 0x315   :  { %v12340_v29 = vpop.permute.xlu1 %2346 }
 0x316   :  { %v12342_v36 = vpop.permute.xlu0 %2341  ;;  %3757 = vperm.xlu1 %9687, %v15050_v18  }
 0x317   :  { %3752 = vperm.xlu0 %9686, %v15051_v37  }
 0x319   :  { %v12346_v54 = vpop.permute.xlu1 %2634 }
 0x31a   :  { %15052 = vst [vmem:[#allocation22_spill] sm:$0xff] %v12346_v54  ;;  %v12348_v21 = vpop.permute.xlu0 %2629  ;;  %4109 = vperm.xlu1 %9687, %v11953_v38   ;;  %v3209_v49 = vld [vmem:[#allocation3] ss:$2 sm:$0xff]  ;;  %v3211_v43 = vld [vmem:[#allocation3 + $0x1] ss:$2 sm:$0xff] }
 0x31b   :  { %15053 = vst [vmem:[#allocation23_spill] sm:$0xff] %v12348_v21  ;;  %4104 = vperm.xlu0 %9686, %v11958_v39   ;;  %v3213_v58 = vmax.f32 %v3209_v49, %v3211_v43  ;;  %v12451_v49 = vld [vmem:[%s14730_s0 + $0x152] sm:$0xff] }
 0x31c   :  { %15074 = vst [vmem:[#allocation42_spill] sm:$0xff] %v12451_v49 }
 0x31d   :  { %v12362_v11 = vpop.permute.xlu1 %2644  ;;  %3216 = vst.msk [vmem:[#allocation2 + $0x51] sm:$0xff] %vm34_vm0, %v3213_v58 }
 0x31e   :  { %15054 = vst [vmem:[#allocation29_spill] sm:$0xff] %v12362_v11  ;;  %v12365_v38 = vpop.permute.xlu0 %2639  ;;  %4119 = vperm.xlu1 %9687, %v12355_v30  }
 0x31f   :  { %15055 = vst [vmem:[#allocation30_spill] sm:$0xff] %v12365_v38  ;;  %4114 = vperm.xlu0 %9686, %v12360_v60  }
 0x321   :  { %v12369_v39 = vpop.permute.xlu1 %2698 }
 0x322   :  { %15056 = vst [vmem:[#allocation31_spill] sm:$0xff] %v12369_v39  ;;  %v12371_v8 = vpop.permute.xlu0 %2693  ;;  %2955 = vperm.xlu1 %9687, %v15042_v17  }
 0x323   :  { %15057 = vst [vmem:[#allocation17_spill] sm:$0xff] %v12371_v8  ;;  %2950 = vperm.xlu0 %9686, %v15043_v5  }
 0x324   :  { %v5098_v16 = vld [vmem:[#allocation2 + $0x51] sm:$0xff] }
 0x325   :  { %9168 = vmatmul.mubr.msk.f32.gmra.mrb[4].mxu1 %vm34_vm0, %v5098_v16  ;;  %9279 = vmatprep.mubr.msk.f32.mxu0 %vm34_vm0, %v5098_v16  ;;  %v12387_v31 = vpop.permute.xlu1 %2708  ;;  %v12468_v16 = vld [vmem:[%s14730_s0 + $0x170] sm:$0xff] }
 0x326   :  { %15060 = vst [vmem:[#allocation32_spill] sm:$0xff] %v12387_v31  ;;  %v12389_v17 = vpop.permute.xlu0 %2703  ;;  %2965 = vperm.xlu1 %9687, %v12378_v24   ;;  %15077 = vst [vmem:[#allocation45_spill] sm:$0xff] %v12468_v16 }
 0x327   :  { %15061 = vst [vmem:[#allocation12_spill] sm:$0xff] %v12389_v17  ;;  %2960 = vperm.xlu0 %9686, %v12383_v46  }
 0x329   :  { %v12393_v5 = vpop.permute.xlu1 %3554 }
 0x32a   :  { %15062 = vst [vmem:[#allocation9_spill] sm:$0xff] %v12393_v5  ;;  %v12395_v63 = vpop.permute.xlu0 %3549  ;;  %3253 = vperm.xlu1 %9687, %v12119_v25  }
 0x32b   :  { %15063 = vst [vmem:[#allocation10_spill] sm:$0xff] %v12395_v63  ;;  %3248 = vperm.xlu0 %9686, %v12130_v35   ;;  %v15116_v63 = vld [vmem:[#allocation56_spill] sm:$0xff] }
 0x32d   :  { %v12409_v44 = vpop.permute.xlu1 %3564 }
 0x32e   :  { %15064 = vst [vmem:[#allocation20_spill] sm:$0xff] %v12409_v44  ;;  %v12411_v9 = vpop.permute.xlu0 %3559  ;;  %3263 = vperm.xlu1 %9687, %v12402_v6  }
 0x32f   :  { %15065 = vst [vmem:[#allocation37_spill] sm:$0xff] %v12411_v9  ;;  %3258 = vperm.xlu0 %9686, %v12407_v40  }
 0x331   :  { %v12415_v61 = vpop.permute.xlu1 %3852 }
 0x332   :  { %15066 = vst [vmem:[#allocation21_spill] sm:$0xff] %v12415_v61  ;;  %v12417_v14 = vpop.permute.xlu0 %3847  ;;  %3317 = vperm.xlu1 %9687, %v12316_v19  }
 0x333   :  { %15067 = vst [vmem:[#allocation38_spill] sm:$0xff] %v12417_v14  ;;  %3312 = vperm.xlu0 %9686, %v12322_v59  }
 0x335   :  { %v12431_v52 = vpop.permute.xlu1 %3862 }
 0x336   :  { %15069 = vst [vmem:[#allocation34_spill] sm:$0xff] %v12431_v52  ;;  %v12433_v62 = vpop.permute.xlu0 %3857  ;;  %3327 = vperm.xlu1 %9687, %v12424_v0  }
 0x337   :  { %15070 = vst [vmem:[#allocation39_spill] sm:$0xff] %v12433_v62  ;;  %3322 = vperm.xlu0 %9686, %v12429_v57   ;;  %v12473_v62 = vld [vmem:[%s14730_s0 + $0x168] sm:$0xff] }
 0x338   :  { %15078 = vst [vmem:[#allocation67_spill] sm:$0xff] %v12473_v62 }
 0x339   :  { %v12437_v1 = vpop.permute.xlu1 %3916 }
 0x33a   :  { %15071 = vst [vmem:[#allocation40_spill] sm:$0xff] %v12437_v1  ;;  %v12439_v2 = vpop.permute.xlu0 %3911  ;;  %4173 = vperm.xlu1 %9687, %v15050_v18  }
 0x33b   :  { %15072 = vst [vmem:[#allocation35_spill] sm:$0xff] %v12439_v2  ;;  %4168 = vperm.xlu0 %9686, %v15051_v37   ;;  %v12495_v2 = vld [vmem:[%s14730_s0 + $0x169] sm:$0xff] }
 0x33c   :  { %15081 = vst [vmem:[#allocation14_spill] sm:$0xff] %v12495_v2 }
 0x33d   :  { %v12453_v43 = vpop.permute.xlu1 %3926 }
 0x33e   :  { %15075 = vst [vmem:[#allocation43_spill] sm:$0xff] %v12453_v43  ;;  %v12455_v58 = vpop.permute.xlu0 %3921  ;;  %4183 = vperm.xlu1 %9687, %v12446_v15   ;;  %v12490_v43 = vld [vmem:[%s14730_s0 + $0x171] sm:$0xff] }
 0x33f   :  { %15076 = vst [vmem:[#allocation44_spill] sm:$0xff] %v12455_v58  ;;  %4178 = vperm.xlu0 %9686, %v12451_v49  }
 0x341   :  { %v12459_v18 = vpop.permute.xlu1 %2401 }
 0x342   :  { %v12461_v37 = vpop.permute.xlu0 %2396  ;;  %4471 = vperm.xlu1 %9687, %v12227_v50  }
 0x343   :  { %4466 = vperm.xlu0 %9686, %v12244_v56  }
 0x345   :  { %v12475_v52 = vpop.permute.xlu1 %2411 }
 0x346   :  { %v12477_v58 = vpop.permute.xlu0 %2406  ;;  %4481 = vperm.xlu1 %9687, %v12468_v16  }
 0x347   :  { %4476 = vperm.xlu0 %9686, %v12473_v62  }
 0x349   :  { %v12481_v14 = vpop.permute.xlu1 %2762 }
 0x34a   :  { %15079 = vst [vmem:[#allocation68_spill] sm:$0xff] %v12481_v14  ;;  %v12483_v61 = vpop.permute.xlu0 %2757  ;;  %4535 = vperm.xlu1 %9687, %v12355_v30  }
 0x34b   :  { %15080 = vst [vmem:[#allocation25_spill] sm:$0xff] %v12483_v61  ;;  %4530 = vperm.xlu0 %9686, %v12360_v60  }
 0x34d   :  { %v12497_v1 = vpop.permute.xlu1 %2772 }
 0x34e   :  { %15082 = vst [vmem:[#allocation73_spill] sm:$0xff] %v12497_v1  ;;  %v12499_v38 = vpop.permute.xlu0 %2767  ;;  %4545 = vperm.xlu1 %9687, %v12490_v43  }
 0x34f   :  { %15083 = vst [vmem:[#allocation74_spill] sm:$0xff] %v12499_v38  ;;  %4540 = vperm.xlu0 %9686, %v12495_v2   ;;  %v15127_v2 = vld [vmem:[#allocation84_spill] sm:$0xff] }
 0x351   :  { %v12503_v61 = vpop.permute.xlu1 %3619 }
 0x352   :  { %15084 = vst [vmem:[#allocation41_spill] sm:$0xff] %v12503_v61  ;;  %v12505_v14 = vpop.permute.xlu0 %3614  ;;  %3020 = vperm.xlu1 %9687, %v12119_v25   ;;  %v12524_v25 = vld [vmem:[%s14730_s0 + $0x2c2] sm:$0xff] }
 0x353   :  { %15085 = vst [vmem:[#allocation19_spill] sm:$0xff] %v12505_v14  ;;  %3015 = vperm.xlu0 %9686, %v12130_v35   ;;  %15090 = vst [vmem:[#allocation24_spill] sm:$0xff] %v12524_v25  ;;  %v12529_v35 = vld [vmem:[%s14730_s0 + $0x2ba] sm:$0xff] }
 0x354   :  { %15091 = vst [vmem:[#allocation51_spill] sm:$0xff] %v12529_v35 }
 0x355   :  { %v12509_v11 = vpop.permute.xlu1 %3629 }
 0x356   :  { %15086 = vst [vmem:[#allocation55_spill] sm:$0xff] %v12509_v11  ;;  %v12511_v21 = vpop.permute.xlu0 %3624  ;;  %3030 = vperm.xlu1 %9687, %v12402_v6  }
 0x357   :  { %15087 = vst [vmem:[#allocation18_spill] sm:$0xff] %v12511_v21  ;;  %3025 = vperm.xlu0 %9686, %v12407_v40   ;;  %v15106_v21 = vld [vmem:[#allocation27_spill] sm:$0xff] }
 0x359   :  { %v12515_v38 = vpop.permute.xlu1 %3980 }
 0x35a   :  { %15088 = vst [vmem:[#allocation75_spill] sm:$0xff] %v12515_v38  ;;  %v12517_v1 = vpop.permute.xlu0 %3975  ;;  %3381 = vperm.xlu1 %9687, %v12378_v24   ;;  %v15104_v24 = vld [vmem:[#allocation54_spill] sm:$0xff] }
 0x35b   :  { %15089 = vst [vmem:[#allocation76_spill] sm:$0xff] %v12517_v1  ;;  %3376 = vperm.xlu0 %9686, %v12383_v46   ;;  %v15103_v46 = vld [vmem:[#allocation53_spill] sm:$0xff] }
 0x35d   :  { %v12531_v54 = vpop.permute.xlu1 %3990 }
 0x35e   :  { %15092 = vst [vmem:[#allocation13_spill] sm:$0xff] %v12531_v54  ;;  %v12533_v17 = vpop.permute.xlu0 %3985  ;;  %3391 = vperm.xlu1 %9687, %v12524_v25  }
 0x35f   :  { %15093 = vst [vmem:[#allocation52_spill] sm:$0xff] %v12533_v17  ;;  %3386 = vperm.xlu0 %9686, %v12529_v35  }
 0x361   :  { %v12537_v1 = vpop.permute.xlu1 %2465 }
 0x362   :  { %v12539_v38 = vpop.permute.xlu0 %2460  ;;  %4238 = vperm.xlu1 %9687, %v12227_v50   ;;  %v12558_v50 = vld [vmem:[%s14730_s0 + $0x172] sm:$0xff] }
 0x363   :  { %4233 = vperm.xlu0 %9686, %v12244_v56   ;;  %15096 = vst [vmem:[#allocation58_spill] sm:$0xff] %v12558_v50  ;;  %v12563_v56 = vld [vmem:[%s14730_s0 + $0x16a] sm:$0xff] }
 0x364   :  { %15097 = vst [vmem:[#allocation63_spill] sm:$0xff] %v12563_v56 }
 0x365   :  { %v12543_v31 = vpop.permute.xlu1 %2475 }
 0x366   :  { %v12545_v8 = vpop.permute.xlu0 %2470  ;;  %4248 = vperm.xlu1 %9687, %v12468_v16  }
 0x367   :  { %4243 = vperm.xlu0 %9686, %v12473_v62   ;;  %v15113_v62 = vld [vmem:[#allocation62_spill] sm:$0xff] }
 0x369   :  { %v12549_v17 = vpop.permute.xlu1 %2827 }
 0x36a   :  { %15094 = vst [vmem:[#allocation79_spill] sm:$0xff] %v12549_v17  ;;  %v12551_v54 = vpop.permute.xlu0 %2822  ;;  %4599 = vperm.xlu1 %9687, %v12446_v15   ;;  %v15101_v17 = vld [vmem:[#allocation49_spill] sm:$0xff]  ;;  %v15102_v15 = vld [vmem:[#allocation50_spill] sm:$0xff] }
 0x36b   :  { %15095 = vst [vmem:[#allocation80_spill] sm:$0xff] %v12551_v54  ;;  %4594 = vperm.xlu0 %9686, %v12451_v49   ;;  %v12573_v54 = vld [vmem:[%s14734_s4 + $0xa] ss:$0 sm:$0xff] }
 0x36c   :  { %15100 = vst [vmem:[#allocation86_spill] sm:$0xff] %v12573_v54  ;;  %v2097_v49 = vmul.f32 %v12573_v54, %v15101_v17  ;;  %v2096_v25 = vmul.f32 %v12573_v54, %v15102_v15  ;;  %v15107_v17 = vld [vmem:[#allocation46_spill] sm:$0xff] }
 0x36d   :  { %v12565_v39 = vpop.permute.xlu1 %2837 }
 0x36e   :  { %15098 = vst [vmem:[#allocation64_spill] sm:$0xff] %v12565_v39  ;;  %v12567_v35 = vpop.permute.xlu0 %2832  ;;  %4609 = vperm.xlu1 %9687, %v12558_v50   ;;  %v2099_v39 = vmul.f32 %v12573_v54, %v15103_v46  ;;  %v12587_v50 = vld [vmem:[%s14734_s4 + $0x9] ss:$0 sm:$0xff]  ;;  %v15110_v46 = vld [vmem:[#allocation48_spill] sm:$0xff] }
 0x36f   :  { %15099 = vst [vmem:[#allocation85_spill] sm:$0xff] %v12567_v35  ;;  %4604 = vperm.xlu0 %9686, %v12563_v56   ;;  %v2098_v35 = vmul.f32 %v12573_v54, %v15104_v24  ;;  %15105 = vst [vmem:[#allocation49_spill] sm:$0xff] %v12587_v50  ;;  %v2033_v11 = vmul.f32 %v12587_v50, %v15106_v21  ;;  %v2032_v9 = vmul.f32 %v12587_v50, %v15107_v17  ;;  %v15109_v56 = vld [vmem:[#allocation47_spill] sm:$0xff] }
 0x370   :  { %v2035_v44 = vmul.f32 %v12587_v50, %v15109_v56  ;;  %v2034_v14 = vmul.f32 %v12587_v50, %v15110_v46  ;;  %v3331_v21 = vmul.f32 %v12573_v54, %v15112_v42  ;;  %v3330_v17 = vmul.f32 %v12573_v54, %v15113_v62  ;;  %v15114_v56 = vld [vmem:[#allocation65_spill] sm:$0xff]  ;;  %v15118_v42 = vld [vmem:[#allocation66_spill] sm:$0xff] }
 0x371   :  { %v12593_v15 = vpop.permute.xlu1 %3683  ;;  %v2105_v61 = vadd.f32 %v2097_v49, %v2033_v11  ;;  %v2104_v55 = vadd.f32 %v2096_v25, %v2032_v9  ;;  %v3333_v23 = vmul.f32 %v12573_v54, %v15114_v56  ;;  %v15115_v46 = vld [vmem:[#allocation69_spill] sm:$0xff]  ;;  %v3332_v49 = vmul.f32 %v12573_v54, %v15118_v42  ;;  %v15119_v62 = vld [vmem:[#allocation70_spill] sm:$0xff]  ;;  %v15122_v25 = vld [vmem:[#allocation60_spill] sm:$0xff] }
 0x372   :  { %15108 = vst [vmem:[#allocation50_spill] sm:$0xff] %v12593_v15  ;;  %v12599_v24 = vpop.permute.xlu0 %3678  ;;  %3084 = vperm.xlu1 %9687, %v12316_v19   ;;  %v2107_v15 = vadd.f32 %v2099_v39, %v2035_v44  ;;  %v2106_v16 = vadd.f32 %v2098_v35, %v2034_v14  ;;  %v3267_v19 = vmul.f32 %v12587_v50, %v15116_v63  ;;  %v15117_v11 = vld [vmem:[#allocation57_spill] sm:$0xff]  ;;  %v15121_v44 = vld [vmem:[#allocation59_spill] sm:$0xff]  ;;  %v15126_v54 = vld [vmem:[#allocation72_spill] sm:$0xff] }
 0x373   :  { %15111 = vst [vmem:[#allocation53_spill] sm:$0xff] %v12599_v24  ;;  %3079 = vperm.xlu0 %9686, %v12322_v59   ;;  %v2161_v24 = vmul.f32 %v12155_v33, %v15115_v46  ;;  %v3266_v9 = vmul.f32 %v12587_v50, %v15117_v11  ;;  %v2160_v59 = vmul.f32 %v12155_v33, %v15119_v62  ;;  %v15123_v56 = vld [vmem:[#allocation71_spill] sm:$0xff] }
 0x374   :  { %v3269_v14 = vmul.f32 %v12587_v50, %v15121_v44  ;;  %v3268_v35 = vmul.f32 %v12587_v50, %v15122_v25  ;;  %v2163_v63 = vmul.f32 %v12155_v33, %v15123_v56  ;;  %v15124_v46 = vld [vmem:[#allocation83_spill] sm:$0xff]  ;;  %v3339_v42 = vadd.f32 %v3331_v21, %v3267_v19  ;;  %v15128_v50 = vld [vmem:[#allocation77_spill] sm:$0xff] }
 0x375   :  { %v12619_v39 = vpop.permute.xlu1 %3693  ;;  %v2226_v11 = vmul.f32 %v12176_v4, %v15124_v46  ;;  %v3338_v62 = vadd.f32 %v3330_v17, %v3266_v9  ;;  %v2225_v44 = vmul.f32 %v12176_v4, %v15127_v2  ;;  %v2169_v56 = vadd.f32 %v2161_v24, %v2105_v61  ;;  %v15129_v17 = vld [vmem:[#allocation78_spill] sm:$0xff]  ;;  %v15130_v61 = vld [vmem:[#allocation87_spill] sm:$0xff] }
 0x376   :  { %15120 = vst [vmem:[#allocation54_spill] sm:$0xff] %v12619_v39  ;;  %v12629_v5 = vpop.permute.xlu0 %3688  ;;  %3094 = vperm.xlu1 %9687, %v12424_v0   ;;  %v2162_v39 = vmul.f32 %v12155_v33, %v15126_v54  ;;  %v12637_v25 = vadd.f32 %v3333_v23, %v3269_v14  ;;  %v3395_v46 = vmul.f32 %v12155_v33, %v15128_v50 }
 0x377   :  { %15125 = vst [vmem:[#allocation27_spill] sm:$0xff] %v12629_v5  ;;  %3089 = vperm.xlu0 %9686, %v12429_v57   ;;  %v2290_v5 = vmul.f32 %v12189_v22, %v12214_v32  ;;  %v12643_v0 = vadd.f32 %v3332_v49, %v3268_v35  ;;  %v2168_v21 = vadd.f32 %v2160_v59, %v2104_v55  ;;  %v15131_v59 = vld [vmem:[#allocation88_spill] sm:$0xff] }
 0x378   :  { %v3394_v54 = vmul.f32 %v12155_v33, %v15129_v17  ;;  %v2289_v2 = vmul.f32 %v12189_v22, %v12218_v41  ;;  %v2171_v23 = vadd.f32 %v2163_v63, %v2107_v15  ;;  %v2234_v9 = vadd.f32 %v2226_v11, %v2169_v56  ;;  %v12666_v15 = vld [vmem:[%s14730_s0 + $0x2d8] sm:$0xff] }
 0x379   :  { %v12649_v19 = vpop.permute.xlu1 %4045  ;;  %v2228_v24 = vmul.f32 %v12176_v4, %v15130_v61  ;;  %v2354_v50 = vmul.f32 %v12208_v51, %v12332_v47  ;;  %v2170_v55 = vadd.f32 %v2162_v39, %v2106_v16  ;;  %v2233_v49 = vadd.f32 %v2225_v44, %v2168_v21  ;;  %v15132_v21 = vld [vmem:[#allocation81_spill] sm:$0xff] }
 0x37a   :  { %v12655_v32 = vpop.permute.xlu0 %4040  ;;  %3446 = vperm.xlu1 %9687, %v12402_v6   ;;  %v2227_v14 = vmul.f32 %v12176_v4, %v15131_v59  ;;  %v2353_v41 = vmul.f32 %v12208_v51, %v12335_v53  ;;  %v12668_v47 = vadd.f32 %v3395_v46, %v3339_v42  ;;  %v2298_v35 = vadd.f32 %v2290_v5, %v2234_v9  ;;  %v12677_v53 = vld [vmem:[%s14730_s0 + $0x2d0] sm:$0xff] }
 0x37b   :  { %3441 = vperm.xlu0 %9686, %v12407_v40   ;;  %v2292_v6 = vmul.f32 %v12189_v22, %v12249_v45  ;;  %v2419_v16 = vmul.f32 %v12236_v12, %v12459_v18  ;;  %v3402_v40 = vadd.f32 %v3394_v54, %v3338_v62  ;;  %v2297_v39 = vadd.f32 %v2289_v2, %v2233_v49  ;;  %v15133_v2 = vld [vmem:[#allocation82_spill] sm:$0xff] }
 0x37c   :  { %v2291_v63 = vmul.f32 %v12189_v22, %v12260_v7  ;;  %v2418_v11 = vmul.f32 %v12236_v12, %v12461_v37  ;;  %v2236_v42 = vadd.f32 %v2228_v24, %v2171_v23  ;;  %v2362_v45 = vadd.f32 %v2354_v50, %v2298_v35 }
 0x37d   :  { %v12683_v5 = vpop.permute.xlu1 %4055  ;;  %v2356_v18 = vmul.f32 %v12208_v51, %v12340_v29  ;;  %v2483_v44 = vmul.f32 %v12256_v13, %v12537_v1  ;;  %v2235_v62 = vadd.f32 %v2227_v14, %v2170_v55  ;;  %v2361_v46 = vadd.f32 %v2353_v41, %v2297_v39 }
 0x37e   :  { %v12689_v56 = vpop.permute.xlu0 %4050  ;;  %3456 = vperm.xlu1 %9687, %v12666_v15   ;;  %v2355_v7 = vmul.f32 %v12208_v51, %v12342_v36  ;;  %v2482_v37 = vmul.f32 %v12256_v13, %v12539_v38  ;;  %v3397_v29 = vmul.f32 %v12155_v33, %v15132_v21  ;;  %v2300_v17 = vadd.f32 %v2292_v6, %v2236_v42 }
 0x37f   :  { %3451 = vperm.xlu0 %9686, %v12677_v53   ;;  %v2427_v54 = vadd.f32 %v2419_v16, %v2362_v45  ;;  %v2421_v1 = vmul.f32 %v12236_v12, %v12475_v52  ;;  %v3396_v23 = vmul.f32 %v12155_v33, %v15133_v2  ;;  %v2299_v9 = vadd.f32 %v2291_v63, %v2235_v62 }
 0x380   :  { %v2426_v61 = vadd.f32 %v2418_v11, %v2361_v46  ;;  %v2420_v36 = vmul.f32 %v12236_v12, %v12477_v58  ;;  %v2364_v38 = vadd.f32 %v2356_v18, %v2300_v17  ;;  %v2485_v55 = vmul.f32 %v12256_v13, %v12543_v31  ;;  %v15134_v18 = vld [vmem:[#allocation14_spill] sm:$0xff] }
 0x381   :  { %v2530_v24 = vpop.permute.xlu1 %2529  ;;  %v2491_v50 = vadd.f32 %v2483_v44, %v2427_v54  ;;  %v2363_v52 = vadd.f32 %v2355_v7, %v2299_v9  ;;  %v2484_v33 = vmul.f32 %v12256_v13, %v12545_v8  ;;  %v3460_v58 = vmul.f32 %v12176_v4, %v12102_v34  ;;  %v15136_v17 = vld [vmem:[#allocation10_spill] sm:$0xff] }
 0x382   :  { %v2547_v49 = vmul.f32 %v12278_v20, %v2530_v24  ;;  %v2525_v59 = vpop.permute.xlu0 %2524  ;;  %4302 = vperm.xlu1 %9687, %v12355_v30   ;;  %v2490_v14 = vadd.f32 %v2482_v37, %v2426_v61  ;;  %v3459_v31 = vmul.f32 %v12176_v4, %v12108_v48  ;;  %v2429_v35 = vadd.f32 %v2421_v1, %v2364_v38  ;;  %v15135_v37 = vld [vmem:[#allocation9_spill] sm:$0xff]  ;;  %v15137_v61 = vld [vmem:[#allocation26_spill] sm:$0xff]  ;;  %v15139_v38 = vld [vmem:[#allocation67_spill] sm:$0xff] }
 0x383   :  { %v2546_v41 = vmul.f32 %v12278_v20, %v2525_v59  ;;  %4297 = vperm.xlu0 %9686, %v12360_v60   ;;  %v3462_v30 = vmul.f32 %v12176_v4, %v12138_v28  ;;  %v3461_v16 = vmul.f32 %v12176_v4, %v12144_v3  ;;  %v2428_v39 = vadd.f32 %v2420_v36, %v2363_v52  ;;  %v15141_v59 = vld [vmem:[#allocation16_spill] sm:$0xff] }
 0x384   :  { %v2555_v6 = vadd.f32 %v2547_v49, %v2491_v50  ;;  %v3524_v60 = vmul.f32 %v12189_v22, %v12298_v27  ;;  %v2493_v11 = vadd.f32 %v2485_v55, %v2429_v35  ;;  %v3523_v28 = vmul.f32 %v12189_v22, %v12307_v26  ;;  %v12751_v50 = vld [vmem:[%s14730_s0 + $0x188] sm:$0xff]  ;;  %v15140_v55 = vld [vmem:[#allocation15_spill] sm:$0xff] }
 0x385   :  { %v2554_v8 = vadd.f32 %v2546_v41, %v2490_v14  ;;  %v2540_v63 = vpop.permute.xlu1 %2539  ;;  %v2492_v45 = vadd.f32 %v2484_v33, %v2428_v39  ;;  %v3405_v27 = vadd.f32 %v3397_v29, %v12637_v25  ;;  %v3404_v44 = vadd.f32 %v3396_v23, %v12643_v0  ;;  %v15142_v14 = vld [vmem:[#allocation41_spill] sm:$0xff] }
 0x386   :  { %v2563_v34 = vmul.f32 %v12290_v10, %v2555_v6  ;;  %v2549_v42 = vmul.f32 %v12278_v20, %v2540_v63  ;;  %v2535_v48 = vpop.permute.xlu0 %2534  ;;  %4312 = vperm.xlu1 %9687, %v12490_v43   ;;  %v3468_v62 = vadd.f32 %v3460_v58, %v12668_v47  ;;  %v3467_v7 = vadd.f32 %v3459_v31, %v3402_v40  ;;  %v15138_v47 = vld [vmem:[#allocation45_spill] sm:$0xff]  ;;  %v15143_v6 = vld [vmem:[#allocation19_spill] sm:$0xff]  ;;  %v15145_v63 = vld [vmem:[#allocation50_spill] sm:$0xff] }
 0x387   :  { %v2562_v3 = vmul.f32 %v12290_v10, %v2554_v8  ;;  %v2548_v4 = vmul.f32 %v12278_v20, %v2535_v48  ;;  %4307 = vperm.xlu0 %9686, %v15134_v18   ;;  %v3588_v21 = vmul.f32 %v12208_v51, %v15135_v37  ;;  %v3587_v26 = vmul.f32 %v12208_v51, %v15136_v17  ;;  %v12763_v58 = vld [vmem:[%s14730_s0 + $0x180] sm:$0xff] }
 0x388   :  { %v2557_v46 = vadd.f32 %v2549_v42, %v2493_v11  ;;  %v3470_v2 = vadd.f32 %v3462_v30, %v3405_v27  ;;  %v3469_v9 = vadd.f32 %v3461_v16, %v3404_v44  ;;  %v2571_v36 = vadd.f32 %v15137_v61, %v2563_v34  ;;  %v15146_v48 = vld [vmem:[#allocation37_spill] sm:$0xff] }
 0x389   :  { %v2556_v54 = vadd.f32 %v2548_v4, %v2492_v45  ;;  %v12738_v1 = vpop.permute.xlu1 %2891  ;;  %v3532_v40 = vadd.f32 %v3524_v60, %v3468_v62  ;;  %v3531_v29 = vadd.f32 %v3523_v28, %v3467_v7  ;;  %v2570_v23 = vadd.f32 %v15137_v61, %v2562_v3  ;;  %v15147_v45 = vld [vmem:[#allocation53_spill] sm:$0xff] }
 0x38a   :  { %v2565_v25 = vmul.f32 %v12290_v10, %v2557_v46  ;;  %v12742_v0 = vpop.permute.xlu0 %2886  ;;  %4664 = vperm.xlu1 %9687, %v15138_v47   ;;  %v3526_v49 = vmul.f32 %v12189_v22, %v15140_v55  ;;  %v3525_v52 = vmul.f32 %v12189_v22, %v15141_v59  ;;  %v3653_v33 = vmul.f32 %v12236_v12, %v15142_v14  ;;  %v15144_v22 = vld [vmem:[#allocation20_spill] sm:$0xff]  ;;  %v15148_v46 = vld [vmem:[#allocation55_spill] sm:$0xff] }
 0x38b   :  { %v2564_v24 = vmul.f32 %v12290_v10, %v2556_v54  ;;  %4659 = vperm.xlu0 %9686, %v15139_v38   ;;  %v3596_v31 = vadd.f32 %v3588_v21, %v3532_v40  ;;  %v3595_v35 = vadd.f32 %v3587_v26, %v3531_v29  ;;  %v3652_v30 = vmul.f32 %v12236_v12, %v15143_v6  ;;  %v15149_v26 = vld [vmem:[#allocation18_spill] sm:$0xff]  ;;  %v15152_v55 = vld [vmem:[#allocation27_spill] sm:$0xff] }
 0x38c   :  { %v2573_v41 = vadd.f32 %v15137_v61, %v2565_v25  ;;  %v3590_v8 = vmul.f32 %v12208_v51, %v15144_v22  ;;  %v3717_v60 = vmul.f32 %v12256_v13, %v15145_v63  ;;  %v2579_v11 = vmax.f32 %v2571_v36, 0.0  ;;  %v15150_v40 = vld [vmem:[#allocation54_spill] sm:$0xff]  ;;  %v15153_v59 = vld [vmem:[#allocation11_spill] sm:$0xff]  ;;  %v15154_v22 = vld [vmem:[#allocation24_spill] sm:$0xff] }
 0x38d   :  { %v2572_v16 = vadd.f32 %v15137_v61, %v2564_v24  ;;  %v12768_v39 = vpop.permute.xlu1 %2901  ;;  %v3589_v28 = vmul.f32 %v12208_v51, %v15146_v48  ;;  %v3716_v3 = vmul.f32 %v12256_v13, %v15147_v45  ;;  %v2578_v4 = vmax.f32 %v2570_v23, 0.0  ;;  %v15151_v24 = vld [vmem:[#allocation28_spill] sm:$0xff] }
 0x38e   :  { %v2581_v34 = vmax.f32 %v2573_v41, 0.0  ;;  %v12774_v42 = vpop.permute.xlu0 %2896  ;;  %4674 = vperm.xlu1 %9687, %v12751_v50   ;;  %v3534_v44 = vadd.f32 %v3526_v49, %v3470_v2  ;;  %v3661_v62 = vadd.f32 %v3653_v33, %v3596_v31  ;;  %v3655_v7 = vmul.f32 %v12236_v12, %v15148_v46  ;;  %v12815_v46 = vld [vmem:[%s14730_s0 + $0x2d9] sm:$0xff] }
 0x38f   :  { %v2580_v27 = vmax.f32 %v2572_v16, 0.0  ;;  %4669 = vperm.xlu0 %9686, %v12763_v58   ;;  %v3533_v21 = vadd.f32 %v3525_v52, %v3469_v9  ;;  %v3660_v17 = vadd.f32 %v3652_v30, %v3595_v35  ;;  %v3654_v54 = vmul.f32 %v12236_v12, %v15149_v26 }
 0x390   :  { %v2585_v37 = vmax.f32 %v2579_v11, %v2581_v34  ;;  %v3598_v25 = vadd.f32 %v3590_v8, %v3534_v44  ;;  %v3725_v47 = vadd.f32 %v3717_v60, %v3661_v62  ;;  %v3719_v29 = vmul.f32 %v12256_v13, %v15150_v40  ;;  %v15155_v60 = vld [vmem:[#allocation51_spill] sm:$0xff] }
 0x391   :  { %v2584_v36 = vmax.f32 %v2578_v4, %v2580_v27  ;;  %v3748_v51 = vpop.permute.xlu1 %3747  ;;  %v3597_v38 = vadd.f32 %v3589_v28, %v3533_v21  ;;  %v3724_v9 = vadd.f32 %v3716_v3, %v3660_v17  ;;  %v3718_v49 = vmul.f32 %v12256_v13, %v15152_v55  ;;  %v15156_v4 = vld [vmem:[#allocation33_spill] sm:$0xff]  ;;  %v12821_v21 = vld [vmem:[%s14730_s0 + $0x2d1] sm:$0xff] }
 0x392   :  { %2589 = vst.msk [vmem:[#allocation3 + $0x18] sm:$0xff] %vm34_vm0, %v2585_v37  ;;  %v3781_v2 = vmul.f32 %v12278_v20, %v3748_v51  ;;  %v3743_v23 = vpop.permute.xlu0 %3742  ;;  %3148 = vperm.xlu1 %9687, %v15151_v24   ;;  %v3663_v52 = vadd.f32 %v3655_v7, %v3598_v25 }
 0x393   :  { %2588 = vst.msk [vmem:[#allocation3 + $0x10] sm:$0xff] %vm34_vm0, %v2584_v36  ;;  %v3780_v12 = vmul.f32 %v12278_v20, %v3743_v23  ;;  %3143 = vperm.xlu0 %9686, %v15153_v59   ;;  %v3662_v33 = vadd.f32 %v3654_v54, %v3597_v38  ;;  %v15159_v38 = vld [vmem:[#allocation58_spill] sm:$0xff] }
 0x394   :  { %v3789_v14 = vadd.f32 %v3781_v2, %v3725_v47  ;;  %v3727_v35 = vadd.f32 %v3719_v29, %v3663_v52  ;;  %v15157_v29 = vld [vmem:[#allocation36_spill] sm:$0xff]  ;;  %v15158_v2 = vld [vmem:[#allocation42_spill] sm:$0xff] }
 0x395   :  { %v3788_v41 = vadd.f32 %v3780_v12, %v3724_v9  ;;  %v3758_v31 = vpop.permute.xlu1 %3757  ;;  %v3726_v13 = vadd.f32 %v3718_v49, %v3662_v33  ;;  %v15160_v9 = vld [vmem:[#allocation63_spill] sm:$0xff]  ;;  %v12854_v52 = vld [vmem:[%s14730_s0 + $0x189] sm:$0xff]  ;;  %v12859_v33 = vld [vmem:[%s14730_s0 + $0x181] sm:$0xff] }
 0x396   :  { %v3797_v6 = vmul.f32 %v12290_v10, %v3789_v14  ;;  %v3783_v30 = vmul.f32 %v12278_v20, %v3758_v31  ;;  %v3753_v16 = vpop.permute.xlu0 %3752  ;;  %3158 = vperm.xlu1 %9687, %v15154_v22  }
 0x397   :  { %v3796_v8 = vmul.f32 %v12290_v10, %v3788_v41  ;;  %v3782_v63 = vmul.f32 %v12278_v20, %v3753_v16  ;;  %3153 = vperm.xlu0 %9686, %v15155_v60  }
 0x398   :  { %v3791_v11 = vadd.f32 %v3783_v30, %v3727_v35  ;;  %v3805_v28 = vadd.f32 %v15137_v61, %v3797_v6  ;;  %v12877_v35 = vld [vmem:[%s14730_s0 + $0x2da] sm:$0xff]  ;;  %v12882_v30 = vld [vmem:[%s14730_s0 + $0x2d2] sm:$0xff] }
 0x399   :  { %v3790_v34 = vadd.f32 %v3782_v63, %v3726_v13  ;;  %v12802_v48 = vpop.permute.xlu1 %4109  ;;  %v3804_v62 = vadd.f32 %v15137_v61, %v3796_v8  ;;  %v12901_v63 = vld [vmem:[%s14730_s0 + $0x2f0] sm:$0xff] }
 0x39a   :  { %v3799_v45 = vmul.f32 %v12290_v10, %v3791_v11  ;;  %v12806_v3 = vpop.permute.xlu0 %4104  ;;  %3510 = vperm.xlu1 %9687, %v15156_v4   ;;  %v2591_v27 = vld [vmem:[#allocation3 + $0x10] ss:$2 sm:$0xff]  ;;  %v2593_v44 = vld [vmem:[#allocation3 + $0x11] ss:$2 sm:$0xff] }
 0x39b   :  { %v3798_v20 = vmul.f32 %v12290_v10, %v3790_v34  ;;  %3505 = vperm.xlu0 %9686, %v12429_v57   ;;  %v2595_v7 = vmax.f32 %v2591_v27, %v2593_v44  ;;  %v3813_v10 = vmax.f32 %v3805_v28, 0.0  ;;  %v3812_v36 = vmax.f32 %v3804_v62, 0.0  ;;  %v12923_v4 = vld [vmem:[%s14730_s0 + $0x2f1] sm:$0xff]  ;;  %v12928_v27 = vld [vmem:[%s14730_s0 + $0x2e9] sm:$0xff] }
 0x39c   :  { %v3807_v37 = vadd.f32 %v15137_v61, %v3799_v45 }
 0x39d   :  { %v3806_v17 = vadd.f32 %v15137_v61, %v3798_v20  ;;  %v12824_v26 = vpop.permute.xlu1 %4119  ;;  %2598 = vst.msk [vmem:[#allocation2 + $0xe1] sm:$0xff] %vm34_vm0, %v2595_v7 }
 0x39e   :  { %v3815_v57 = vmax.f32 %v3807_v37, 0.0  ;;  %v12827_v54 = vpop.permute.xlu0 %4114  ;;  %3520 = vperm.xlu1 %9687, %v12815_v46   ;;  %v12945_v37 = vld [vmem:[%s14730_s0 + $0x18a] sm:$0xff] }
 0x39f   :  { %v3814_v51 = vmax.f32 %v3806_v17, 0.0  ;;  %3515 = vperm.xlu0 %9686, %v12821_v21   ;;  %v12950_v17 = vld [vmem:[%s14730_s0 + $0x182] sm:$0xff] }
 0x3a0   :  { %v3821_v25 = vmax.f32 %v3813_v10, %v3815_v57 }
 0x3a1   :  { %v3820_v47 = vmax.f32 %v3812_v36, %v3814_v51  ;;  %v12831_v40 = vpop.permute.xlu1 %2955 }
 0x3a2   :  { %3825 = vst.msk [vmem:[#allocation3 + $0x8] sm:$0xff] %vm34_vm0, %v3821_v25  ;;  %v12834_v61 = vpop.permute.xlu0 %2950  ;;  %4366 = vperm.xlu1 %9687, %v15157_v29  }
 0x3a3   :  { %3824 = vst.msk [vmem:[#allocation3] sm:$0xff] %vm34_vm0, %v3820_v47  ;;  %4361 = vperm.xlu0 %9686, %v15158_v2  }
 0x3a5   :  { %v12839_v23 = vpop.permute.xlu1 %2965 }
 0x3a6   :  { %v12841_v24 = vpop.permute.xlu0 %2960  ;;  %4376 = vperm.xlu1 %9687, %v15159_v38  }
 0x3a7   :  { %4371 = vperm.xlu0 %9686, %v15160_v9  }
 0x3a9   :  { %v12845_v55 = vpop.permute.xlu1 %3253 }
 0x3aa   :  { %15161 = vst [vmem:[#allocation46_spill] sm:$0xff] %v12845_v55  ;;  %v12847_v49 = vpop.permute.xlu0 %3248  ;;  %4728 = vperm.xlu1 %9687, %v12490_v43   ;;  %v3828_v12 = vld [vmem:[#allocation3] ss:$2 sm:$0xff]  ;;  %v3830_v59 = vld [vmem:[#allocation3 + $0x1] ss:$2 sm:$0xff]  ;;  %v15207_v55 = vld [vmem:[#allocation35_spill] sm:$0xff] }
 0x3ab   :  { %15162 = vst [vmem:[#allocation47_spill] sm:$0xff] %v12847_v49  ;;  %4723 = vperm.xlu0 %9686, %v15134_v18   ;;  %v3832_v14 = vmax.f32 %v3828_v12, %v3830_v59  ;;  %v15204_v49 = vld [vmem:[#allocation30_spill] sm:$0xff] }
 0x3ad   :  { %v12861_v41 = vpop.permute.xlu1 %3263  ;;  %3835 = vst.msk [vmem:[#allocation2 + $0x61] sm:$0xff] %vm34_vm0, %v3832_v14  ;;  %v8735_v14 = vld [vmem:[%s14730_s0 + $0x1a0] sm:$0xff] }
 0x3ae   :  { %15163 = vst [vmem:[#allocation48_spill] sm:$0xff] %v12861_v41  ;;  %v12864_v43 = vpop.permute.xlu0 %3258  ;;  %4738 = vperm.xlu1 %9687, %v12854_v52   ;;  %v15203_v41 = vld [vmem:[#allocation29_spill] sm:$0xff] }
 0x3af   :  { %15164 = vst [vmem:[#allocation61_spill] sm:$0xff] %v12864_v43  ;;  %4733 = vperm.xlu0 %9686, %v12859_v33  }
 0x3b1   :  { %v12868_v18 = vpop.permute.xlu1 %3317 }
 0x3b2   :  { %15165 = vst [vmem:[#allocation62_spill] sm:$0xff] %v12868_v18  ;;  %v12870_v31 = vpop.permute.xlu0 %3312  ;;  %3574 = vperm.xlu1 %9687, %v15154_v22  }
 0x3b3   :  { %15166 = vst [vmem:[#allocation65_spill] sm:$0xff] %v12870_v31  ;;  %3569 = vperm.xlu0 %9686, %v15155_v60   ;;  %v12906_v60 = vld [vmem:[%s14730_s0 + $0x2e8] sm:$0xff] }
 0x3b4   :  { %v5099_v6 = vld [vmem:[#allocation2 + $0x61] sm:$0xff] }
 0x3b5   :  { %9170 = vmatprep.mubr.msk.f32.mxu1 %vm34_vm0, %v5099_v6  ;;  %9280 = vmatmul.mubr.msk.f32.gmra.mrb[4].mxu0 %vm34_vm0, %v5099_v6  ;;  %v12886_v16 = vpop.permute.xlu1 %3327  ;;  %v8734_v6 = vld [vmem:[%s14730_s0 + $0x198] sm:$0xff] }
 0x3b6   :  { %15167 = vst [vmem:[#allocation69_spill] sm:$0xff] %v12886_v16  ;;  %v12888_v22 = vpop.permute.xlu0 %3322  ;;  %3584 = vperm.xlu1 %9687, %v12877_v35   ;;  %v15206_v16 = vld [vmem:[#allocation40_spill] sm:$0xff] }
 0x3b7   :  { %15168 = vst [vmem:[#allocation56_spill] sm:$0xff] %v12888_v22  ;;  %3579 = vperm.xlu0 %9686, %v12882_v30   ;;  %v15200_v22 = vld [vmem:[#allocation49_spill] sm:$0xff] }
 0x3b9   :  { %v12892_v13 = vpop.permute.xlu1 %4173 }
 0x3ba   :  { %v12894_v8 = vpop.permute.xlu0 %4168  ;;  %3872 = vperm.xlu1 %9687, %v12666_v15  }
 0x3bb   :  { %3867 = vperm.xlu0 %9686, %v12677_v53  }
 0x3bd   :  { %v12908_v11 = vpop.permute.xlu1 %4183 }
 0x3be   :  { %v12910_v34 = vpop.permute.xlu0 %4178  ;;  %3882 = vperm.xlu1 %9687, %v12901_v63  }
 0x3bf   :  { %15169 = vst [vmem:[#allocation57_spill] sm:$0xff] %v12910_v34  ;;  %3877 = vperm.xlu0 %9686, %v12906_v60  }
 0x3c1   :  { %v12914_v28 = vpop.permute.xlu1 %4471 }
 0x3c2   :  { %15170 = vst [vmem:[#allocation66_spill] sm:$0xff] %v12914_v28  ;;  %v12916_v45 = vpop.permute.xlu0 %4466  ;;  %3936 = vperm.xlu1 %9687, %v12815_v46  }
 0x3c3   :  { %15171 = vst [vmem:[#allocation70_spill] sm:$0xff] %v12916_v45  ;;  %3931 = vperm.xlu0 %9686, %v12821_v21  }
 0x3c5   :  { %v12930_v44 = vpop.permute.xlu1 %4481 }
 0x3c6   :  { %15172 = vst [vmem:[#allocation59_spill] sm:$0xff] %v12930_v44  ;;  %v12932_v62 = vpop.permute.xlu0 %4476  ;;  %3946 = vperm.xlu1 %9687, %v12923_v4  }
 0x3c7   :  { %15173 = vst [vmem:[#allocation60_spill] sm:$0xff] %v12932_v62  ;;  %3941 = vperm.xlu0 %9686, %v12928_v27  }
 0x3c9   :  { %v12936_v20 = vpop.permute.xlu1 %4535 }
 0x3ca   :  { %15174 = vst [vmem:[#allocation71_spill] sm:$0xff] %v12936_v20  ;;  %v12938_v7 = vpop.permute.xlu0 %4530  ;;  %4792 = vperm.xlu1 %9687, %v15159_v38   ;;  %v15199_v20 = vld [vmem:[#allocation22_spill] sm:$0xff] }
 0x3cb   :  { %15175 = vst [vmem:[#allocation83_spill] sm:$0xff] %v12938_v7  ;;  %4787 = vperm.xlu0 %9686, %v15160_v9   ;;  %v2652_v43 = vmul.f32 %v15200_v22, %v15199_v20 }
 0x3cd   :  { %v12952_v10 = vpop.permute.xlu1 %4545 }
 0x3ce   :  { %15176 = vst [vmem:[#allocation72_spill] sm:$0xff] %v12952_v10  ;;  %v12954_v57 = vpop.permute.xlu0 %4540  ;;  %4802 = vperm.xlu1 %9687, %v12945_v37   ;;  %v15198_v10 = vld [vmem:[#allocation12_spill] sm:$0xff] }
 0x3cf   :  { %15177 = vst [vmem:[#allocation84_spill] sm:$0xff] %v12954_v57  ;;  %4797 = vperm.xlu0 %9686, %v12950_v17   ;;  %v15196_v57 = vld [vmem:[#allocation17_spill] sm:$0xff] }
 0x3d1   :  { %v12958_v36 = vpop.permute.xlu1 %3020 }
 0x3d2   :  { %v12960_v51 = vpop.permute.xlu0 %3015  ;;  %3639 = vperm.xlu1 %9687, %v12666_v15   ;;  %v12979_v15 = vld [vmem:[%s14730_s0 + $0x2f2] sm:$0xff] }
 0x3d3   :  { %3634 = vperm.xlu0 %9686, %v12677_v53   ;;  %v12984_v53 = vld [vmem:[%s14730_s0 + $0x2ea] sm:$0xff] }
 0x3d5   :  { %v12964_v25 = vpop.permute.xlu1 %3030 }
 0x3d6   :  { %v12966_v47 = vpop.permute.xlu0 %3025  ;;  %3649 = vperm.xlu1 %9687, %v12901_v63  }
 0x3d7   :  { %3644 = vperm.xlu0 %9686, %v12906_v60  }
 0x3d9   :  { %v12970_v29 = vpop.permute.xlu1 %3381 }
 0x3da   :  { %15178 = vst [vmem:[#allocation77_spill] sm:$0xff] %v12970_v29  ;;  %v12972_v2 = vpop.permute.xlu0 %3376  ;;  %4000 = vperm.xlu1 %9687, %v12877_v35   ;;  %v15195_v29 = vld [vmem:[#allocation86_spill] sm:$0xff] }
 0x3db   :  { %15179 = vst [vmem:[#allocation78_spill] sm:$0xff] %v12972_v2  ;;  %3995 = vperm.xlu0 %9686, %v12882_v30   ;;  %v2717_v7 = vmul.f32 %v15195_v29, %v15198_v10  ;;  %v3950_v20 = vmul.f32 %v15195_v29, %v15206_v16 }
 0x3dd   :  { %v12986_v38 = vpop.permute.xlu1 %3391 }
 0x3de   :  { %15180 = vst [vmem:[#allocation87_spill] sm:$0xff] %v12986_v38  ;;  %v12988_v9 = vpop.permute.xlu0 %3386  ;;  %4010 = vperm.xlu1 %9687, %v12979_v15  }
 0x3df   :  { %15181 = vst [vmem:[#allocation88_spill] sm:$0xff] %v12988_v9  ;;  %4005 = vperm.xlu0 %9686, %v12984_v53  }
 0x3e1   :  { %v12992_v12 = vpop.permute.xlu1 %4238 }
 0x3e2   :  { %v12994_v59 = vpop.permute.xlu0 %4233  ;;  %4857 = vperm.xlu1 %9687, %v12751_v50  }
 0x3e3   :  { %4852 = vperm.xlu0 %9686, %v12763_v58  }
 0x3e5   :  { %v13004_v9 = vpop.permute.xlu1 %4248 }
 0x3e6   :  { %15182 = vst [vmem:[#allocation81_spill] sm:$0xff] %v13004_v9  ;;  %v13006_v62 = vpop.permute.xlu0 %4243  ;;  %4867 = vperm.xlu1 %9687, %v8735_v14   ;;  %v15220_v9 = vld [vmem:[#allocation74_spill] sm:$0xff] }
 0x3e7   :  { %15183 = vst [vmem:[#allocation82_spill] sm:$0xff] %v13006_v62  ;;  %4862 = vperm.xlu0 %9686, %v8734_v6   ;;  %v15217_v62 = vld [vmem:[#allocation73_spill] sm:$0xff] }
 0x3e9   :  { %v13008_v38 = vpop.permute.xlu1 %4599 }
 0x3ea   :  { %15184 = vst [vmem:[#allocation14_spill] sm:$0xff] %v13008_v38  ;;  %v13010_v2 = vpop.permute.xlu0 %4594  ;;  %3703 = vperm.xlu1 %9687, %v12815_v46   ;;  %v13029_v46 = vld [vmem:[%s14730_s0 + $0x308] sm:$0xff] }
 0x3eb   :  { %15185 = vst [vmem:[#allocation9_spill] sm:$0xff] %v13010_v2  ;;  %3698 = vperm.xlu0 %9686, %v12821_v21   ;;  %15188 = vst [vmem:[#allocation45_spill] sm:$0xff] %v13029_v46  ;;  %v13034_v21 = vld [vmem:[%s14730_s0 + $0x300] sm:$0xff] }
 0x3ec   :  { %15189 = vst [vmem:[#allocation67_spill] sm:$0xff] %v13034_v21  ;;  %v8742_v2 = vld [vmem:[%s14730_s0 + $0x199] sm:$0xff] }
 0x3ed   :  { %v13014_v50 = vpop.permute.xlu1 %4609 }
 0x3ee   :  { %15186 = vst [vmem:[#allocation10_spill] sm:$0xff] %v13014_v50  ;;  %v13016_v58 = vpop.permute.xlu0 %4604  ;;  %3713 = vperm.xlu1 %9687, %v12923_v4   ;;  %v8743_v50 = vld [vmem:[%s14730_s0 + $0x1a1] sm:$0xff] }
 0x3ef   :  { %15187 = vst [vmem:[#allocation26_spill] sm:$0xff] %v13016_v58  ;;  %3708 = vperm.xlu0 %9686, %v12928_v27  }
 0x3f1   :  { %v13020_v44 = vpop.permute.xlu1 %3084 }
 0x3f2   :  { %v13022_v14 = vpop.permute.xlu0 %3079  ;;  %4065 = vperm.xlu1 %9687, %v12901_v63  }
 0x3f3   :  { %4060 = vperm.xlu0 %9686, %v12906_v60  }
 0x3f5   :  { %v13036_v6 = vpop.permute.xlu1 %3094 }
 0x3f6   :  { %v13038_v58 = vpop.permute.xlu0 %3089  ;;  %4075 = vperm.xlu1 %9687, %v13029_v46   ;;  %v15216_v46 = vld [vmem:[#allocation39_spill] sm:$0xff] }
 0x3f7   :  { %4070 = vperm.xlu0 %9686, %v13034_v21  }
 0x3f9   :  { %v13042_v63 = vpop.permute.xlu1 %3446 }
 0x3fa   :  { %15190 = vst [vmem:[#allocation15_spill] sm:$0xff] %v13042_v63  ;;  %v13044_v60 = vpop.permute.xlu0 %3441  ;;  %4921 = vperm.xlu1 %9687, %v12854_v52   ;;  %v15194_v63 = vld [vmem:[#allocation31_spill] sm:$0xff]  ;;  %v2715_v52 = vmul.f32 %v15195_v29, %v15196_v57  ;;  %v2653_v57 = vmul.f32 %v15200_v22, %v15204_v49  ;;  %v13089_v49 = vld [vmem:[%s14734_s4 + $0xb] ss:$0 sm:$0xff] }
 0x3fb   :  { %15191 = vst [vmem:[#allocation16_spill] sm:$0xff] %v13044_v60  ;;  %4916 = vperm.xlu0 %9686, %v12859_v33   ;;  %v2716_v60 = vmul.f32 %v15195_v29, %v15194_v63  ;;  %v15197_v33 = vld [vmem:[#allocation32_spill] sm:$0xff]  ;;  %v2654_v63 = vmul.f32 %v15200_v22, %v15203_v41  ;;  %v15208_v41 = vld [vmem:[#allocation43_spill] sm:$0xff] }
 0x3fc   :  { %v2718_v28 = vmul.f32 %v15195_v29, %v15197_v33  ;;  %v2725_v18 = vadd.f32 %v2717_v7, %v2653_v57  ;;  %v3952_v21 = vmul.f32 %v15195_v29, %v15208_v41  ;;  %v15213_v7 = vld [vmem:[#allocation25_spill] sm:$0xff]  ;;  %v15215_v57 = vld [vmem:[#allocation34_spill] sm:$0xff] }
 0x3fd   :  { %v13054_v38 = vpop.permute.xlu1 %3456  ;;  %v2724_v33 = vadd.f32 %v2716_v60, %v2652_v43  ;;  %v15209_v43 = vld [vmem:[#allocation68_spill] sm:$0xff]  ;;  %v15211_v60 = vld [vmem:[#allocation38_spill] sm:$0xff]  ;;  %v3888_v41 = vmul.f32 %v15200_v22, %v15215_v57 }
 0x3fe   :  { %15192 = vst [vmem:[#allocation41_spill] sm:$0xff] %v13054_v38  ;;  %v13056_v45 = vpop.permute.xlu0 %3451  ;;  %4931 = vperm.xlu1 %9687, %v8743_v50   ;;  %v15201_v38 = vld [vmem:[#allocation23_spill] sm:$0xff]  ;;  %v2726_v31 = vadd.f32 %v2718_v28, %v2654_v63 }
 0x3ff   :  { %15193 = vst [vmem:[#allocation19_spill] sm:$0xff] %v13056_v45  ;;  %4926 = vperm.xlu0 %9686, %v8742_v2   ;;  %v2651_v45 = vmul.f32 %v15200_v22, %v15201_v38  ;;  %v3949_v38 = vmul.f32 %v15195_v29, %v15207_v55  ;;  %v3885_v55 = vmul.f32 %v15200_v22, %v15211_v60  ;;  %v13112_v60 = vld [vmem:[%s14734_s4 + $0xc] ss:$0 sm:$0xff] }
 0x401   :  { %v13070_v50 = vpop.permute.xlu1 %4302  ;;  %v2723_v10 = vadd.f32 %v2715_v52, %v2651_v45  ;;  %v15210_v45 = vld [vmem:[#allocation21_spill] sm:$0xff]  ;;  %v2779_v52 = vmul.f32 %v13089_v49, %v15213_v7  ;;  %v3957_v57 = vadd.f32 %v3949_v38, %v3885_v55 }
 0x402   :  { %15202 = vst [vmem:[#allocation20_spill] sm:$0xff] %v13070_v50  ;;  %v13076_v2 = vpop.permute.xlu0 %4297  ;;  %3767 = vperm.xlu1 %9687, %v12877_v35   ;;  %v2780_v35 = vmul.f32 %v13089_v49, %v15209_v43  ;;  %v3886_v16 = vmul.f32 %v15200_v22, %v15210_v45  ;;  %v3887_v43 = vmul.f32 %v15200_v22, %v15216_v46  ;;  %v15221_v46 = vld [vmem:[#allocation80_spill] sm:$0xff]  ;;  %v15222_v50 = vld [vmem:[#allocation75_spill] sm:$0xff] }
 0x403   :  { %15205 = vst [vmem:[#allocation50_spill] sm:$0xff] %v13076_v2  ;;  %3762 = vperm.xlu0 %9686, %v12882_v30   ;;  %v15212_v30 = vld [vmem:[#allocation44_spill] sm:$0xff]  ;;  %v2782_v45 = vmul.f32 %v13089_v49, %v15217_v62  ;;  %v2781_v22 = vmul.f32 %v13089_v49, %v15220_v9  ;;  %v2844_v62 = vmul.f32 %v13112_v60, %v15221_v46 }
 0x404   :  { %v3951_v28 = vmul.f32 %v15195_v29, %v15212_v30  ;;  %v15218_v29 = vld [vmem:[#allocation79_spill] sm:$0xff]  ;;  %v13124_v2 = vadd.f32 %v3952_v21, %v3888_v41  ;;  %v2788_v34 = vadd.f32 %v2780_v35, %v2724_v33  ;;  %v2787_v38 = vadd.f32 %v2779_v52, %v2723_v10  ;;  %v15224_v41 = vld [vmem:[#allocation64_spill] sm:$0xff] }
 0x405   :  { %v13101_v63 = vpop.permute.xlu1 %4312  ;;  %v2845_v30 = vmul.f32 %v13112_v60, %v15218_v29  ;;  %v4014_v29 = vmul.f32 %v13089_v49, %v15222_v50  ;;  %v2790_v50 = vadd.f32 %v2782_v45, %v2726_v31  ;;  %v2847_v46 = vmul.f32 %v13112_v60, %v15224_v41  ;;  %v13163_v45 = vld [vmem:[%s14730_s0 + $0x309] sm:$0xff] }
 0x406   :  { %15214 = vst [vmem:[#allocation37_spill] sm:$0xff] %v13101_v63  ;;  %v13116_v7 = vpop.permute.xlu0 %4307  ;;  %3777 = vperm.xlu1 %9687, %v12979_v15   ;;  %v3958_v63 = vadd.f32 %v3950_v20, %v3886_v16  ;;  %v13135_v9 = vadd.f32 %v3951_v28, %v3887_v43  ;;  %v15223_v16 = vld [vmem:[#allocation76_spill] sm:$0xff]  ;;  %v2852_v52 = vadd.f32 %v2844_v62, %v2787_v38  ;;  %v15225_v43 = vld [vmem:[#allocation85_spill] sm:$0xff] }
 0x407   :  { %15219 = vst [vmem:[#allocation53_spill] sm:$0xff] %v13116_v7  ;;  %3772 = vperm.xlu0 %9686, %v12984_v53   ;;  %v13131_v7 = vld [vmem:[%s14734_s4 + $0xd] ss:$0 sm:$0xff]  ;;  %v4013_v55 = vmul.f32 %v13089_v49, %v15223_v16  ;;  %v2853_v35 = vadd.f32 %v2845_v30, %v2788_v34  ;;  %v2846_v31 = vmul.f32 %v13112_v60, %v15225_v43  ;;  %v13194_v16 = vld [vmem:[%s14734_s4 + $0x10] ss:$0 sm:$0xff] }
 0x408   :  { %v2909_v20 = vmul.f32 %v13131_v7, %v12738_v1  ;;  %v2908_v21 = vmul.f32 %v13131_v7, %v12742_v0  ;;  %v13148_v1 = vld [vmem:[%s14734_s4 + $0xe] ss:$0 sm:$0xff]  ;;  %v2789_v0 = vadd.f32 %v2781_v22, %v2725_v18  ;;  %v2911_v18 = vmul.f32 %v13131_v7, %v12768_v39  ;;  %15226 = vst [vmem:[#allocation55_spill] sm:$0xff] %v13194_v16 }
 0x409   :  { %v13141_v33 = vpop.permute.xlu1 %4664  ;;  %v2973_v10 = vmul.f32 %v13148_v1, %v12831_v40  ;;  %v2972_v34 = vmul.f32 %v13148_v1, %v12834_v61  ;;  %v13165_v40 = vadd.f32 %v4014_v29, %v3958_v63  ;;  %v13181_v22 = vadd.f32 %v4013_v55, %v3957_v57 }
 0x40a   :  { %v13152_v28 = vpop.permute.xlu0 %4659  ;;  %4129 = vperm.xlu1 %9687, %v12923_v4   ;;  %v2917_v30 = vadd.f32 %v2909_v20, %v2853_v35  ;;  %v13172_v4 = vld [vmem:[%s14734_s4 + $0xf] ss:$0 sm:$0xff]  ;;  %v2916_v63 = vadd.f32 %v2908_v21, %v2852_v52  ;;  %v2910_v62 = vmul.f32 %v13131_v7, %v12774_v42  ;;  %v2855_v20 = vadd.f32 %v2847_v46, %v2790_v50  ;;  %v15227_v50 = vld [vmem:[#allocation13_spill] sm:$0xff] }
 0x40b   :  { %4124 = vperm.xlu0 %9686, %v12928_v27   ;;  %v3038_v61 = vmul.f32 %v13172_v4, %v12958_v36  ;;  %v13179_v27 = vld [vmem:[%s14730_s0 + $0x301] sm:$0xff]  ;;  %v3037_v39 = vmul.f32 %v13172_v4, %v12960_v51  ;;  %v2975_v36 = vmul.f32 %v13148_v1, %v12839_v23  ;;  %v3102_v57 = vmul.f32 %v13194_v16, %v13020_v44 }
 0x40c   :  { %v2981_v38 = vadd.f32 %v2973_v10, %v2917_v30  ;;  %v2854_v42 = vadd.f32 %v2846_v31, %v2789_v0  ;;  %v2980_v51 = vadd.f32 %v2972_v34, %v2916_v63  ;;  %v2974_v21 = vmul.f32 %v13148_v1, %v12841_v24  ;;  %v15228_v10 = vld [vmem:[#allocation52_spill] sm:$0xff] }
 0x40d   :  { %v13187_v29 = vpop.permute.xlu1 %4674  ;;  %v3101_v23 = vmul.f32 %v13194_v16, %v13022_v14  ;;  %v4016_v35 = vmul.f32 %v13089_v49, %v15227_v50  ;;  %v2919_v41 = vadd.f32 %v2911_v18, %v2855_v20  ;;  %v3040_v44 = vmul.f32 %v13172_v4, %v12964_v25  ;;  %v13219_v18 = vld [vmem:[%s14734_s4 + $0x11] ss:$0 sm:$0xff] }
 0x40e   :  { %v13198_v55 = vpop.permute.xlu0 %4669  ;;  %4139 = vperm.xlu1 %9687, %v13163_v45   ;;  %v3046_v46 = vadd.f32 %v3038_v61, %v2981_v38  ;;  %v4015_v0 = vmul.f32 %v13089_v49, %v15228_v10  ;;  %v2918_v52 = vadd.f32 %v2910_v62, %v2854_v42  ;;  %v3045_v43 = vadd.f32 %v3037_v39, %v2980_v51 }
 0x40f   :  { %4134 = vperm.xlu0 %9686, %v13179_v27   ;;  %v3039_v24 = vmul.f32 %v13172_v4, %v12966_v47  ;;  %v2983_v14 = vadd.f32 %v2975_v36, %v2919_v41  ;;  %v3104_v30 = vmul.f32 %v13194_v16, %v13036_v6  ;;  %15229 = vst [vmem:[#allocation18_spill] sm:$0xff] %v13219_v18  ;;  %v8751_v6 = vld [vmem:[%s14730_s0 + $0x1a2] sm:$0xff] }
 0x410   :  { %v3110_v34 = vadd.f32 %v3102_v57, %v3046_v46  ;;  %v2982_v63 = vadd.f32 %v2974_v21, %v2918_v52  ;;  %v3109_v62 = vadd.f32 %v3101_v23, %v3045_v43  ;;  %v3103_v47 = vmul.f32 %v13194_v16, %v13038_v58  ;;  %v8750_v58 = vld [vmem:[%s14730_s0 + $0x19a] sm:$0xff] }
 0x411   :  { %v3149_v31 = vpop.permute.xlu1 %3148  ;;  %v4079_v20 = vmul.f32 %v13112_v60, %v12649_v19  ;;  %v4078_v38 = vmul.f32 %v13112_v60, %v12655_v32  ;;  %v4081_v57 = vmul.f32 %v13112_v60, %v12683_v5  ;;  %v4143_v19 = vmul.f32 %v13131_v7, %v12802_v48  ;;  %v13246_v32 = vld [vmem:[%s14734_s4] ss:$0 sm:$0xff] }
 0x412   :  { %v3166_v25 = vmul.f32 %v13219_v18, %v3149_v31  ;;  %v3144_v61 = vpop.permute.xlu0 %3143  ;;  %4985 = vperm.xlu1 %9687, %v12945_v37   ;;  %v3048_v37 = vadd.f32 %v3040_v44, %v2983_v14  ;;  %v3047_v42 = vadd.f32 %v3039_v24, %v2982_v63  ;;  %15230 = vst [vmem:[#allocation54_spill] sm:$0xff] %v13246_v32  ;;  %v13280_v63 = vld [vmem:[%s14730_s0 + $0x30a] sm:$0xff] }
 0x413   :  { %v3165_v39 = vmul.f32 %v13219_v18, %v3144_v61  ;;  %4980 = vperm.xlu0 %9686, %v12950_v17   ;;  %v4080_v17 = vmul.f32 %v13112_v60, %v12689_v56  ;;  %v4142_v56 = vmul.f32 %v13131_v7, %v12806_v3  ;;  %v4024_v10 = vadd.f32 %v4016_v35, %v13124_v2  ;;  %v13267_v2 = vld [vmem:[%s14734_s4 + $0x1] ss:$0 sm:$0xff] }
 0x414   :  { %v3174_v36 = vadd.f32 %v3166_v25, %v3110_v34  ;;  %v3112_v23 = vadd.f32 %v3104_v30, %v3048_v37  ;;  %v3111_v46 = vadd.f32 %v3103_v47, %v3047_v42  ;;  %v4023_v52 = vadd.f32 %v4015_v0, %v13135_v9  ;;  %15231 = vst [vmem:[#allocation28_spill] sm:$0xff] %v13267_v2  ;;  %v15233_v42 = vld [vmem:[#allocation57_spill] sm:$0xff] }
 0x415   :  { %v3173_v51 = vadd.f32 %v3165_v39, %v3109_v62  ;;  %v3159_v21 = vpop.permute.xlu1 %3158  ;;  %v4087_v43 = vadd.f32 %v4079_v20, %v13165_v40  ;;  %v4086_v31 = vadd.f32 %v4078_v38, %v13181_v22  ;;  %v4207_v14 = vmul.f32 %v13148_v1, %v12892_v13 }
 0x416   :  { %v3182_v50 = vmul.f32 %v13246_v32, %v3174_v36  ;;  %v3168_v41 = vmul.f32 %v13219_v18, %v3159_v21  ;;  %v3154_v5 = vpop.permute.xlu0 %3153  ;;  %4995 = vperm.xlu1 %9687, %v8751_v6   ;;  %v4206_v3 = vmul.f32 %v13148_v1, %v12894_v8  ;;  %v4089_v25 = vadd.f32 %v4081_v57, %v4024_v10 }
 0x417   :  { %v3181_v44 = vmul.f32 %v13246_v32, %v3173_v51  ;;  %v3167_v48 = vmul.f32 %v13219_v18, %v3154_v5  ;;  %4990 = vperm.xlu0 %9686, %v8750_v58   ;;  %v4088_v61 = vadd.f32 %v4080_v17, %v4023_v52  ;;  %v4151_v13 = vadd.f32 %v4143_v19, %v4087_v43 }
 0x418   :  { %v3176_v24 = vadd.f32 %v3168_v41, %v3112_v23  ;;  %v3190_v9 = vadd.f32 %v13267_v2, %v3182_v50  ;;  %v4150_v8 = vadd.f32 %v4142_v56, %v4086_v31  ;;  %v4145_v62 = vmul.f32 %v13131_v7, %v12824_v26  ;;  %v15235_v41 = vld [vmem:[#allocation81_spill] sm:$0xff] }
 0x419   :  { %v3175_v34 = vadd.f32 %v3167_v48, %v3111_v46  ;;  %v13262_v30 = vpop.permute.xlu1 %3510  ;;  %v3189_v35 = vadd.f32 %v13267_v2, %v3181_v44  ;;  %v4144_v47 = vmul.f32 %v13131_v7, %v12827_v54  ;;  %v4215_v6 = vadd.f32 %v4207_v14, %v4151_v13  ;;  %v15236_v48 = vld [vmem:[#allocation82_spill] sm:$0xff]  ;;  %v15237_v14 = vld [vmem:[#allocation37_spill] sm:$0xff] }
 0x41a   :  { %v3184_v40 = vmul.f32 %v13246_v32, %v3176_v24  ;;  %v13271_v22 = vpop.permute.xlu0 %3505  ;;  %4193 = vperm.xlu1 %9687, %v12979_v15   ;;  %v4272_v15 = vmul.f32 %v13172_v4, %v12992_v12  ;;  %v4214_v20 = vadd.f32 %v4206_v3, %v4150_v8  ;;  %v4271_v38 = vmul.f32 %v13172_v4, %v12994_v59  ;;  %v15232_v12 = vld [vmem:[#allocation20_spill] sm:$0xff]  ;;  %v15234_v59 = vld [vmem:[#allocation50_spill] sm:$0xff]  ;;  %v15239_v13 = vld [vmem:[#allocation53_spill] sm:$0xff] }
 0x41b   :  { %v3183_v0 = vmul.f32 %v13246_v32, %v3175_v34  ;;  %4188 = vperm.xlu0 %9686, %v12984_v53   ;;  %v13292_v53 = vld [vmem:[%s14730_s0 + $0x302] sm:$0xff]  ;;  %v4209_v54 = vmul.f32 %v13148_v1, %v12908_v11  ;;  %v4336_v36 = vmul.f32 %v13194_v16, %v15232_v12  ;;  %v3198_v58 = vmax.f32 %v3190_v9, 0.0 }
 0x41c   :  { %v3192_v39 = vadd.f32 %v13267_v2, %v3184_v40  ;;  %v4208_v51 = vmul.f32 %v13148_v1, %v15233_v42  ;;  %v4335_v21 = vmul.f32 %v13194_v16, %v15234_v59  ;;  %v3197_v19 = vmax.f32 %v3189_v35, 0.0  ;;  %v15238_v9 = vld [vmem:[#allocation45_spill] sm:$0xff] }
 0x41d   :  { %v3191_v26 = vadd.f32 %v13267_v2, %v3183_v0  ;;  %v13297_v37 = vpop.permute.xlu1 %3520  ;;  %v4153_v11 = vadd.f32 %v4145_v62, %v4089_v25  ;;  %v4280_v50 = vadd.f32 %v4272_v15, %v4215_v6  ;;  %v4274_v5 = vmul.f32 %v13172_v4, %v15235_v41  ;;  %v15240_v0 = vld [vmem:[#allocation67_spill] sm:$0xff]  ;;  %v13327_v62 = vld [vmem:[%s14730_s0 + $0x320] sm:$0xff] }
 0x41e   :  { %v3200_v57 = vmax.f32 %v3192_v39, 0.0  ;;  %v13303_v17 = vpop.permute.xlu0 %3515  ;;  %4203 = vperm.xlu1 %9687, %v13280_v63   ;;  %v4152_v46 = vadd.f32 %v4144_v47, %v4088_v61  ;;  %v4279_v44 = vadd.f32 %v4271_v38, %v4214_v20  ;;  %v4273_v10 = vmul.f32 %v13172_v4, %v15236_v48  ;;  %v13333_v39 = vld [vmem:[%s14730_s0 + $0x318] sm:$0xff] }
 0x41f   :  { %v3199_v23 = vmax.f32 %v3191_v26, 0.0  ;;  %4198 = vperm.xlu0 %9686, %v13292_v53   ;;  %v4217_v24 = vadd.f32 %v4209_v54, %v4153_v11  ;;  %v4344_v31 = vadd.f32 %v4336_v36, %v4280_v50  ;;  %v4338_v3 = vmul.f32 %v13194_v16, %v15237_v14 }
 0x420   :  { %v3204_v56 = vmax.f32 %v3198_v58, %v3200_v57  ;;  %v4216_v40 = vadd.f32 %v4208_v51, %v4152_v46  ;;  %v4343_v61 = vadd.f32 %v4335_v21, %v4279_v44  ;;  %v4337_v8 = vmul.f32 %v13194_v16, %v15239_v13  ;;  %v13354_v46 = vld [vmem:[%s14730_s0 + $0x321] sm:$0xff] }
 0x421   :  { %v3203_v52 = vmax.f32 %v3197_v19, %v3199_v23  ;;  %v4367_v43 = vpop.permute.xlu1 %4366  ;;  %v4282_v47 = vadd.f32 %v4274_v5, %v4217_v24 }
 0x422   :  { %v4400_v34 = vmul.f32 %v13219_v18, %v4367_v43  ;;  %v4362_v25 = vpop.permute.xlu0 %4361  ;;  %4491 = vperm.xlu1 %9687, %v15238_v9   ;;  %3208 = vst.msk [vmem:[#allocation3 + $0x18] sm:$0xff] %vm34_vm0, %v3204_v56  ;;  %v4281_v6 = vadd.f32 %v4273_v10, %v4216_v40  ;;  %v13360_v10 = vld [vmem:[%s14730_s0 + $0x319] sm:$0xff] }
 0x423   :  { %v4399_v35 = vmul.f32 %v13219_v18, %v4362_v25  ;;  %4486 = vperm.xlu0 %9686, %v15240_v0   ;;  %3207 = vst.msk [vmem:[#allocation3 + $0x10] sm:$0xff] %vm34_vm0, %v3203_v52  ;;  %v4346_v26 = vadd.f32 %v4338_v3, %v4282_v47 }
 0x424   :  { %v4408_v15 = vadd.f32 %v4400_v34, %v4344_v31  ;;  %v4345_v58 = vadd.f32 %v4337_v8, %v4281_v6 }
 0x425   :  { %v4407_v20 = vadd.f32 %v4399_v35, %v4343_v61  ;;  %v4377_v38 = vpop.permute.xlu1 %4376 }
 0x426   :  { %v4416_v54 = vmul.f32 %v13246_v32, %v4408_v15  ;;  %v4402_v12 = vmul.f32 %v13219_v18, %v4377_v38  ;;  %v4372_v36 = vpop.permute.xlu0 %4371  ;;  %4501 = vperm.xlu1 %9687, %v13327_v62   ;;  %v8706_v38 = vld [vmem:[%s14730_s0 + $0x31a] sm:$0xff] }
 0x427   :  { %v4415_v57 = vmul.f32 %v13246_v32, %v4407_v20  ;;  %v4401_v42 = vmul.f32 %v13219_v18, %v4372_v36  ;;  %4496 = vperm.xlu0 %9686, %v13333_v39   ;;  %v15274_v18 = vld [vmem:[#allocation66_spill] sm:$0xff] }
 0x428   :  { %v4410_v51 = vadd.f32 %v4402_v12, %v4346_v26  ;;  %v4424_v19 = vadd.f32 %v13267_v2, %v4416_v54 }
 0x429   :  { %v4409_v59 = vadd.f32 %v4401_v42, %v4345_v58  ;;  %v13341_v21 = vpop.permute.xlu1 %4728  ;;  %v4423_v5 = vadd.f32 %v13267_v2, %v4415_v57  ;;  %v5101_v58 = vld [vmem:[#allocation2 + $0xa1] sm:$0xff] }
 0x42a   :  { %15241 = vst [vmem:[#allocation27_spill] sm:$0xff] %v13341_v21  ;;  %v4418_v23 = vmul.f32 %v13246_v32, %v4410_v51  ;;  %v13345_v11 = vpop.permute.xlu0 %4723  ;;  %4555 = vperm.xlu1 %9687, %v13163_v45   ;;  %v3210_v50 = vld [vmem:[#allocation3 + $0x10] ss:$2 sm:$0xff]  ;;  %v3212_v41 = vld [vmem:[#allocation3 + $0x11] ss:$2 sm:$0xff]  ;;  %v4432_v24 = vmax.f32 %v4424_v19, 0.0 }
 0x42b   :  { %15242 = vst [vmem:[#allocation11_spill] sm:$0xff] %v13345_v11  ;;  %v4417_v56 = vmul.f32 %v13246_v32, %v4409_v59  ;;  %4550 = vperm.xlu0 %9686, %v13179_v27   ;;  %v3214_v44 = vmax.f32 %v3210_v50, %v3212_v41  ;;  %v4431_v3 = vmax.f32 %v4423_v5, 0.0  ;;  %v13416_v59 = vld [vmem:[#allocation2 + $0xb1] sm:$0xff] }
 0x42c   :  { %v4426_v48 = vadd.f32 %v13267_v2, %v4418_v23  ;;  %15247 = vst [vmem:[#allocation42_spill] sm:$0xff] %v13416_v59  ;;  %v8715_v23 = vld [vmem:[%s14730_s0 + $0x338] sm:$0xff]  ;;  %v13438_v41 = vld [vmem:[%s14730_s0 + $0x330] sm:$0xff] }
 0x42d   :  { %v4425_v52 = vadd.f32 %v13267_v2, %v4417_v56  ;;  %v13363_v43 = vpop.permute.xlu1 %4738  ;;  %3217 = vst.msk [vmem:[#allocation2 + $0xf1] sm:$0xff] %vm34_vm0, %v3214_v44  ;;  %v13433_v50 = vld [vmem:[#allocation2 + $0xd1] sm:$0xff]  ;;  %v13444_v56 = vld [vmem:[#allocation2 + $0xe1] sm:$0xff] }
 0x42e   :  { %15243 = vst [vmem:[#allocation24_spill] sm:$0xff] %v13363_v43  ;;  %v4434_v31 = vmax.f32 %v4426_v48, 0.0  ;;  %v13366_v14 = vpop.permute.xlu0 %4733  ;;  %4565 = vperm.xlu1 %9687, %v13354_v46   ;;  %15251 = vst [vmem:[#allocation86_spill] sm:$0xff] %v13433_v50  ;;  %v15280_v21 = vld [vmem:[#allocation78_spill] sm:$0xff] }
 0x42f   :  { %15244 = vst [vmem:[#allocation51_spill] sm:$0xff] %v13366_v14  ;;  %v4433_v34 = vmax.f32 %v4425_v52, 0.0  ;;  %4560 = vperm.xlu0 %9686, %v13360_v10   ;;  %15253 = vst [vmem:[#allocation32_spill] sm:$0xff] %v13444_v56 }
 0x430   :  { %v4440_v25 = vmax.f32 %v4432_v24, %v4434_v31 }
 0x431   :  { %v4439_v40 = vmax.f32 %v4431_v3, %v4433_v34  ;;  %v13370_v61 = vpop.permute.xlu1 %3574  ;;  %v13472_v34 = vld [vmem:[%s14730_s0 + $0x339] sm:$0xff] }
 0x432   :  { %4444 = vst.msk [vmem:[#allocation3 + $0x8] sm:$0xff] %vm34_vm0, %v4440_v25  ;;  %v13373_v13 = vpop.permute.xlu0 %3569  ;;  %4258 = vperm.xlu1 %9687, %v15238_v9  }
 0x433   :  { %4443 = vst.msk [vmem:[#allocation3] sm:$0xff] %vm34_vm0, %v4439_v40  ;;  %4253 = vperm.xlu0 %9686, %v15240_v0   ;;  %v8707_v0 = vld [vmem:[%s14730_s0 + $0x322] sm:$0xff]  ;;  %v13492_v40 = vld [vmem:[%s14730_s0 + $0x33a] sm:$0xff] }
 0x435   :  { %v13378_v8 = vpop.permute.xlu1 %3584 }
 0x436   :  { %15245 = vst [vmem:[#allocation33_spill] sm:$0xff] %v13378_v8  ;;  %v13380_v35 = vpop.permute.xlu0 %3579  ;;  %4268 = vperm.xlu1 %9687, %v13327_v62  }
 0x437   :  { %15246 = vst [vmem:[#allocation36_spill] sm:$0xff] %v13380_v35  ;;  %4263 = vperm.xlu0 %9686, %v13333_v39  }
 0x439   :  { %v13384_v47 = vpop.permute.xlu1 %3872 }
 0x43a   :  { %v13386_v15 = vpop.permute.xlu0 %3867  ;;  %4619 = vperm.xlu1 %9687, %v13280_v63   ;;  %v4447_v6 = vld [vmem:[#allocation3] ss:$2 sm:$0xff]  ;;  %v4449_v9 = vld [vmem:[#allocation3 + $0x1] ss:$2 sm:$0xff] }
 0x43b   :  { %4614 = vperm.xlu0 %9686, %v13292_v53   ;;  %v4451_v20 = vmax.f32 %v4447_v6, %v4449_v9  ;;  %v13497_v6 = vld [vmem:[%s14734_s4 + $0xa] ss:$0 sm:$0xff]  ;;  %v15260_v9 = vld [vmem:[#allocation62_spill] sm:$0xff] }
 0x43d   :  { %v13396_v26 = vpop.permute.xlu1 %3882  ;;  %4454 = vst.msk [vmem:[#allocation2 + $0x71] sm:$0xff] %vm34_vm0, %v4451_v20  ;;  %v3335_v20 = vmul.f32 %v13497_v6, %v15260_v9 }
 0x43e   :  { %v13399_v54 = vpop.permute.xlu0 %3877  ;;  %4629 = vperm.xlu1 %9687, %v8707_v0  }
 0x43f   :  { %4624 = vperm.xlu0 %9686, %v8706_v38  }
 0x441   :  { %v13401_v12 = vpop.permute.xlu1 %3936 }
 0x442   :  { %v13403_v36 = vpop.permute.xlu0 %3931  ;;  %4322 = vperm.xlu1 %9687, %v13163_v45  }
 0x443   :  { %4317 = vperm.xlu0 %9686, %v13179_v27   ;;  %v13422_v27 = vld [vmem:[#allocation2 + $0xc1] sm:$0xff]  ;;  %v3953_v16 = vmul.f32 %v13497_v6, %v13403_v36 }
 0x444   :  { %v5100_v57 = vld [vmem:[#allocation2 + $0x71] sm:$0xff]  ;;  %15249 = vst [vmem:[#allocation63_spill] sm:$0xff] %v13422_v27 }
 0x445   :  { %9171 = vmatmul.mubr.msk.f32.gmra.mrb[6].mxu1 %vm34_vm0, %v5100_v57  ;;  %9282 = vmatprep.mubr.msk.f32.mxu0 %vm34_vm0, %v5100_v57  ;;  %v13409_v42 = vpop.permute.xlu1 %3946 }
 0x446   :  { %v13411_v51 = vpop.permute.xlu0 %3941  ;;  %4332 = vperm.xlu1 %9687, %v13354_v46   ;;  %9173 = vmatprep.mubr.msk.f32.mxu1 %vm34_vm0, %v5101_v58  ;;  %v13504_v58 = vld [vmem:[%s14730_s0 + $0x332] sm:$0xff] }
 0x447   :  { %4327 = vperm.xlu0 %9686, %v13360_v10  }
 0x449   :  { %9174 = vmatmul.mubr.msk.f32.gmra.mrb[8].mxu1 %vm34_vm0, %v13416_v59  ;;  %v13420_v45 = vpop.permute.xlu1 %4792 }
 0x44a   :  { %15248 = vst [vmem:[#allocation58_spill] sm:$0xff] %v13420_v45  ;;  %v13424_v19 = vpop.permute.xlu0 %4787  ;;  %9176 = vmatprep.mubr.msk.f32.mxu1 %vm34_vm0, %v13422_v27  ;;  %4684 = vperm.xlu1 %9687, %v13327_v62   ;;  %v15264_v27 = vld [vmem:[#allocation69_spill] sm:$0xff]  ;;  %v15271_v45 = vld [vmem:[#allocation83_spill] sm:$0xff] }
 0x44b   :  { %15250 = vst [vmem:[#allocation31_spill] sm:$0xff] %v13424_v19  ;;  %4679 = vperm.xlu0 %9686, %v13333_v39   ;;  %v13451_v39 = vld [vmem:[#allocation2 + $0xf1] sm:$0xff]  ;;  %v3337_v9 = vmul.f32 %v13497_v6, %v15264_v27  ;;  %v4568_v14 = vmul.f32 %v13497_v6, %v15271_v45 }
 0x44c   :  { %15255 = vst [vmem:[#allocation22_spill] sm:$0xff] %v13451_v39  ;;  %v15270_v19 = vld [vmem:[#allocation71_spill] sm:$0xff] }
 0x44d   :  { %9177 = vmatmul.mubr.msk.f32.gmra.mrb[10].mxu1 %vm34_vm0, %v13433_v50  ;;  %v13442_v5 = vpop.permute.xlu1 %4802 }
 0x44e   :  { %15252 = vst [vmem:[#allocation17_spill] sm:$0xff] %v13442_v5  ;;  %v13446_v62 = vpop.permute.xlu0 %4797  ;;  %9179 = vmatprep.mubr.msk.f32.mxu1 %vm34_vm0, %v13444_v56  ;;  %4694 = vperm.xlu1 %9687, %v8715_v23   ;;  %v15263_v56 = vld [vmem:[#allocation46_spill] sm:$0xff] }
 0x44f   :  { %15254 = vst [vmem:[#allocation12_spill] sm:$0xff] %v13446_v62  ;;  %4689 = vperm.xlu0 %9686, %v13438_v41   ;;  %v15268_v62 = vld [vmem:[#allocation61_spill] sm:$0xff] }
 0x451   :  { %9180 = vmatmul.mubr.msk.f32.gmra.mrb[12].mxu1 %vm34_vm0, %v13451_v39  ;;  %v13455_v44 = vpop.permute.xlu1 %3639  ;;  %v13513_v39 = vld [vmem:[%s14734_s4 + $0x9] ss:$0 sm:$0xff] }
 0x452   :  { %v13457_v48 = vpop.permute.xlu0 %3634  ;;  %4386 = vperm.xlu1 %9687, %v13280_v63   ;;  %v13477_v63 = vld [vmem:[%s14730_s0 + $0x331] sm:$0xff]  ;;  %v3271_v50 = vmul.f32 %v13513_v39, %v15263_v56  ;;  %v3272_v2 = vmul.f32 %v13513_v39, %v15268_v62  ;;  %v15269_v56 = vld [vmem:[#allocation56_spill] sm:$0xff]  ;;  %v4505_v62 = vmul.f32 %v13513_v39, %v15274_v18 }
 0x453   :  { %4381 = vperm.xlu0 %9686, %v13292_v53   ;;  %v3336_v32 = vmul.f32 %v13497_v6, %v15269_v56  ;;  %v15276_v56 = vld [vmem:[#allocation77_spill] sm:$0xff] }
 0x454   :  { %v3343_v5 = vadd.f32 %v3335_v20, %v3271_v50  ;;  %v15275_v50 = vld [vmem:[#allocation84_spill] sm:$0xff] }
 0x455   :  { %v13461_v52 = vpop.permute.xlu1 %3649  ;;  %v4570_v20 = vmul.f32 %v13497_v6, %v15275_v50  ;;  %v8739_v50 = vld [vmem:[%s14730_s0 + $0x350] sm:$0xff] }
 0x456   :  { %15256 = vst [vmem:[#allocation49_spill] sm:$0xff] %v13461_v52  ;;  %v13463_v24 = vpop.permute.xlu0 %3644  ;;  %4396 = vperm.xlu1 %9687, %v8707_v0  }
 0x457   :  { %15257 = vst [vmem:[#allocation23_spill] sm:$0xff] %v13463_v24  ;;  %4391 = vperm.xlu0 %9686, %v8706_v38   ;;  %v15279_v24 = vld [vmem:[#allocation59_spill] sm:$0xff] }
 0x459   :  { %v4001_v31 = vpop.permute.xlu1 %4000 }
 0x45a   :  { %v13465_v3 = vpop.permute.xlu0 %3995  ;;  %4748 = vperm.xlu1 %9687, %v13354_v46  }
 0x45b   :  { %4743 = vperm.xlu0 %9686, %v13360_v10  }
 0x45d   :  { %v13479_v53 = vpop.permute.xlu1 %4010 }
 0x45e   :  { %v13481_v25 = vpop.permute.xlu0 %4005  ;;  %4758 = vperm.xlu1 %9687, %v13472_v34  }
 0x45f   :  { %4753 = vperm.xlu0 %9686, %v13477_v63  }
 0x461   :  { %v13485_v46 = vpop.permute.xlu1 %4857 }
 0x462   :  { %15258 = vst [vmem:[#allocation29_spill] sm:$0xff] %v13485_v46  ;;  %v13487_v10 = vpop.permute.xlu0 %4852  ;;  %4812 = vperm.xlu1 %9687, %v8707_v0   ;;  %v15261_v0 = vld [vmem:[#allocation65_spill] sm:$0xff] }
 0x463   :  { %15259 = vst [vmem:[#allocation30_spill] sm:$0xff] %v13487_v10  ;;  %4807 = vperm.xlu0 %9686, %v8706_v38   ;;  %v3334_v38 = vmul.f32 %v13497_v6, %v15261_v0  ;;  %v15266_v10 = vld [vmem:[#allocation47_spill] sm:$0xff] }
 0x464   :  { %v3270_v0 = vmul.f32 %v13513_v39, %v15266_v10  ;;  %v15272_v10 = vld [vmem:[#allocation72_spill] sm:$0xff] }
 0x465   :  { %v13508_v57 = vpop.permute.xlu1 %4867  ;;  %v4571_v43 = vmul.f32 %v13497_v6, %v15272_v10  ;;  %v4507_v10 = vmul.f32 %v13513_v39, %v15279_v24  ;;  %v3954_v24 = vmul.f32 %v13497_v6, %v13401_v12  ;;  %v4018_v12 = vmul.f32 %v13089_v49, %v4001_v31 }
 0x466   :  { %15262 = vst [vmem:[#allocation40_spill] sm:$0xff] %v13508_v57  ;;  %v13519_v59 = vpop.permute.xlu0 %4862  ;;  %4822 = vperm.xlu1 %9687, %v13492_v40   ;;  %v15267_v57 = vld [vmem:[#allocation48_spill] sm:$0xff]  ;;  %v3342_v27 = vadd.f32 %v3334_v38, %v3270_v0  ;;  %v3399_v38 = vmul.f32 %v13089_v49, %v15276_v56  ;;  %v3344_v56 = vadd.f32 %v3336_v32, %v3272_v2 }
 0x467   :  { %15265 = vst [vmem:[#allocation35_spill] sm:$0xff] %v13519_v59  ;;  %4817 = vperm.xlu0 %9686, %v13504_v58   ;;  %v3273_v46 = vmul.f32 %v13513_v39, %v15267_v57  ;;  %v4569_v59 = vmul.f32 %v13497_v6, %v15270_v19  ;;  %v15278_v19 = vld [vmem:[#allocation70_spill] sm:$0xff]  ;;  %v4579_v35 = vadd.f32 %v4571_v43, %v4507_v10 }
 0x468   :  { %v4504_v45 = vmul.f32 %v13513_v39, %v15278_v19  ;;  %v15283_v19 = vld [vmem:[#allocation88_spill] sm:$0xff]  ;;  %v3889_v43 = vmul.f32 %v13513_v39, %v13386_v15  ;;  %v3956_v31 = vmul.f32 %v13497_v6, %v13409_v42  ;;  %v3955_v15 = vmul.f32 %v13497_v6, %v13411_v51 }
 0x469   :  { %v13537_v11 = vpop.permute.xlu1 %3703  ;;  %v3345_v57 = vadd.f32 %v3337_v9, %v3273_v46  ;;  %v3398_v46 = vmul.f32 %v13089_v49, %v15280_v21  ;;  %v15281_v9 = vld [vmem:[#allocation87_spill] sm:$0xff]  ;;  %v8738_v21 = vld [vmem:[%s14730_s0 + $0x348] sm:$0xff] }
 0x46a   :  { %15273 = vst [vmem:[#allocation43_spill] sm:$0xff] %v13537_v11  ;;  %v13545_v0 = vpop.permute.xlu0 %3698  ;;  %4877 = vperm.xlu1 %9687, %v8715_v23   ;;  %v3401_v18 = vmul.f32 %v13089_v49, %v15281_v9  ;;  %v15282_v23 = vld [vmem:[#allocation60_spill] sm:$0xff]  ;;  %v4577_v9 = vadd.f32 %v4569_v59, %v4505_v62  ;;  %v15285_v62 = vld [vmem:[#allocation9_spill] sm:$0xff] }
 0x46b   :  { %15277 = vst [vmem:[#allocation68_spill] sm:$0xff] %v13545_v0  ;;  %4872 = vperm.xlu0 %9686, %v13438_v41   ;;  %v4506_v52 = vmul.f32 %v13513_v39, %v15282_v23  ;;  %v3400_v0 = vmul.f32 %v13089_v49, %v15283_v19  ;;  %v4576_v41 = vadd.f32 %v4568_v14, %v4504_v45 }
 0x46c   :  { %v13572_v23 = vadd.f32 %v3399_v38, %v3343_v5  ;;  %v3890_v19 = vmul.f32 %v13513_v39, %v13384_v47  ;;  %v3406_v8 = vadd.f32 %v3398_v46, %v3342_v27  ;;  %v13579_v59 = vadd.f32 %v3401_v18, %v3345_v57  ;;  %v15284_v5 = vld [vmem:[#allocation14_spill] sm:$0xff] }
 0x46d   :  { %v13570_v32 = vpop.permute.xlu1 %3713  ;;  %v4578_v2 = vadd.f32 %v4570_v20, %v4506_v52  ;;  %v4017_v14 = vmul.f32 %v13089_v49, %v13465_v3  ;;  %v3408_v36 = vadd.f32 %v3400_v0, %v3344_v56  ;;  %v4633_v52 = vmul.f32 %v13089_v49, %v15284_v5 }
 0x46e   :  { %v13577_v11 = vpop.permute.xlu0 %3708  ;;  %4887 = vperm.xlu1 %9687, %v8739_v50   ;;  %v3962_v47 = vadd.f32 %v3954_v24, %v3890_v19  ;;  %v4632_v27 = vmul.f32 %v13089_v49, %v15285_v62  ;;  %v3892_v57 = vmul.f32 %v13513_v39, %v13396_v26  ;;  %v3961_v20 = vadd.f32 %v3953_v16, %v3889_v43  ;;  %v5091_v16 = vld [vmem:[%s14731_s1] sm:$0xff]  ;;  %v5092_v26 = vld [vmem:[%s14731_s1 + $0x8] sm:$0xff] }
 0x46f   :  { %4882 = vperm.xlu0 %9686, %v8738_v21   ;;  %v3891_v38 = vmul.f32 %v13513_v39, %v13399_v54  ;;  %v4020_v45 = vmul.f32 %v13089_v49, %v13479_v53  ;;  %v4019_v54 = vmul.f32 %v13089_v49, %v13481_v25  ;;  %v9457_v53 = vpack.c.bf16 %v5092_v26, %v5091_v16  ;;  %v15286_v50 = vld [vmem:[#allocation10_spill] sm:$0xff] }
 0x470   :  { %v4026_v0 = vadd.f32 %v4018_v12, %v3962_v47  ;;  %v4025_v51 = vadd.f32 %v4017_v14, %v3961_v20  ;;  %v4641_v18 = vadd.f32 %v4633_v52, %v4577_v9  ;;  %v4635_v56 = vmul.f32 %v13089_v49, %v15286_v50  ;;  %v8746_v25 = vld [vmem:[%s14730_s0 + $0x349] sm:$0xff]  ;;  %v15289_v52 = vld [vmem:[#allocation16_spill] sm:$0xff] }
 0x471   :  { %v4066_v3 = vpop.permute.xlu1 %4065  ;;  %v3964_v24 = vadd.f32 %v3956_v31, %v3892_v57  ;;  %v15287_v19 = vld [vmem:[#allocation26_spill] sm:$0xff]  ;;  %v3963_v14 = vadd.f32 %v3955_v15, %v3891_v38  ;;  %9458 = vmatprep.subr.bf16.mxu1 %v9457_v53  ;;  %v3463_v47 = vmul.f32 %v13112_v60, %v15289_v52  ;;  %v15290_v20 = vld [vmem:[#allocation41_spill] sm:$0xff]  ;;  %v3656_v50 = vmul.f32 %v13172_v4, %v13457_v48 }
 0x472   :  { %v4083_v42 = vmul.f32 %v13112_v60, %v4066_v3  ;;  %v4061_v10 = vpop.permute.xlu0 %4060  ;;  %4941 = vperm.xlu1 %9687, %v13472_v34   ;;  %v8747_v34 = vld [vmem:[%s14730_s0 + $0x351] sm:$0xff]  ;;  %v4634_v12 = vmul.f32 %v13089_v49, %v15287_v19  ;;  %9460 = vmatpush3.bf16.msra.mxu1 %v9457_v53  ;;  %v3466_v49 = vmul.f32 %v13112_v60, %v15290_v20 }
 0x473   :  { %v4082_v46 = vmul.f32 %v13112_v60, %v4061_v10  ;;  %4936 = vperm.xlu0 %9686, %v13477_v63   ;;  %v15288_v63 = vld [vmem:[#allocation15_spill] sm:$0xff]  ;;  %v4028_v31 = vadd.f32 %v4020_v45, %v3964_v24  ;;  %v4027_v15 = vadd.f32 %v4019_v54, %v3963_v14  ;;  %v4643_v10 = vadd.f32 %v4635_v56, %v4579_v35  ;;  %v15296_v14 = vld [vmem:[#allocation68_spill] sm:$0xff] }
 0x474   :  { %v13616_v21 = vadd.f32 %v4083_v42, %v4026_v0  ;;  %v3464_v43 = vmul.f32 %v13112_v60, %v15288_v63  ;;  %v15291_v3 = vld [vmem:[#allocation19_spill] sm:$0xff]  ;;  %v4640_v42 = vadd.f32 %v4632_v27, %v4576_v41  ;;  %v3528_v45 = vmul.f32 %v13131_v7, %v13262_v30 }
 0x475   :  { %v13625_v5 = vadd.f32 %v4082_v46, %v4025_v51  ;;  %v4076_v9 = vpop.permute.xlu1 %4075  ;;  %v3465_v0 = vmul.f32 %v13112_v60, %v15291_v3  ;;  %v4642_v26 = vadd.f32 %v4634_v12, %v4578_v2  ;;  %v4698_v51 = vmul.f32 %v13112_v60, %v13141_v33  ;;  %v15298_v20 = vld [vmem:[#allocation27_spill] sm:$0xff] }
 0x476   :  { %v4085_v62 = vmul.f32 %v13112_v60, %v4076_v9  ;;  %v4071_v57 = vpop.permute.xlu0 %4070  ;;  %4951 = vperm.xlu1 %9687, %v8747_v34   ;;  %v3527_v46 = vmul.f32 %v13131_v7, %v13271_v22  ;;  %v3472_v53 = vadd.f32 %v3464_v43, %v13572_v23  ;;  %v3471_v41 = vadd.f32 %v3463_v47, %v3406_v8  ;;  %v15295_v43 = vld [vmem:[#allocation36_spill] sm:$0xff] }
 0x477   :  { %v4084_v38 = vmul.f32 %v13112_v60, %v4071_v57  ;;  %4946 = vperm.xlu0 %9686, %v8746_v25   ;;  %v4697_v35 = vmul.f32 %v13112_v60, %v13152_v28  ;;  %v3592_v30 = vmul.f32 %v13148_v1, %v13370_v61  ;;  %v3474_v33 = vadd.f32 %v3466_v49, %v13579_v59  ;;  %v8755_v28 = vld [vmem:[%s14730_s0 + $0x352] sm:$0xff] }
 0x478   :  { %v13637_v16 = vadd.f32 %v4085_v62, %v4028_v31  ;;  %v3473_v22 = vadd.f32 %v3465_v0, %v3408_v36  ;;  %v4700_v27 = vmul.f32 %v13112_v60, %v13187_v29  ;;  %v3591_v23 = vmul.f32 %v13148_v1, %v13373_v13  ;;  %v8754_v29 = vld [vmem:[%s14730_s0 + $0x34a] sm:$0xff]  ;;  %v15294_v25 = vld [vmem:[#allocation55_spill] sm:$0xff] }
 0x479   :  { %v13643_v34 = vadd.f32 %v4084_v38, %v4027_v15  ;;  %v13645_v54 = vpop.permute.xlu1 %4921  ;;  %v4699_v61 = vmul.f32 %v13112_v60, %v13198_v55  ;;  %v3536_v8 = vadd.f32 %v3528_v45, %v3472_v53  ;;  %v3657_v59 = vmul.f32 %v13172_v4, %v13455_v44  ;;  %v15293_v44 = vld [vmem:[#allocation43_spill] sm:$0xff]  ;;  %v15297_v31 = vld [vmem:[#allocation49_spill] sm:$0xff] }
 0x47a   :  { %v13652_v2 = vpop.permute.xlu0 %4916  ;;  %5005 = vperm.xlu1 %9687, %v13492_v40   ;;  %v3530_v40 = vmul.f32 %v13131_v7, %v13297_v37  ;;  %v4706_v13 = vadd.f32 %v4698_v51, %v4641_v18  ;;  %v3529_v36 = vmul.f32 %v13131_v7, %v13303_v17  ;;  %v4705_v55 = vadd.f32 %v4697_v35, %v4640_v42  ;;  %v15292_v37 = vld [vmem:[#allocation33_spill] sm:$0xff]  ;;  %v15299_v0 = vld [vmem:[#allocation23_spill] sm:$0xff] }
 0x47b   :  { %5000 = vperm.xlu0 %9686, %v13504_v58   ;;  %v3535_v58 = vadd.f32 %v3527_v46, %v3471_v41  ;;  %v3600_v56 = vadd.f32 %v3592_v30, %v3536_v8  ;;  %v3594_v24 = vmul.f32 %v13148_v1, %v15292_v37  ;;  %v3721_v19 = vmul.f32 %v15294_v25, %v15293_v44  ;;  %v15303_v8 = vld [vmem:[#allocation51_spill] sm:$0xff]  ;;  %v15306_v37 = vld [vmem:[#allocation54_spill] sm:$0xff] }
 0x47c   :  { %v4708_v18 = vadd.f32 %v4700_v27, %v4643_v10  ;;  %v3593_v17 = vmul.f32 %v13148_v1, %v15295_v43  ;;  %v3720_v48 = vmul.f32 %v15294_v25, %v15296_v14  ;;  %v4707_v9 = vadd.f32 %v4699_v61, %v4642_v26  ;;  %v15300_v26 = vld [vmem:[#allocation18_spill] sm:$0xff]  ;;  %v15302_v27 = vld [vmem:[#allocation24_spill] sm:$0xff] }
 0x47d   :  { %v13677_v60 = vpop.permute.xlu1 %4931  ;;  %v3599_v63 = vadd.f32 %v3591_v23, %v3535_v58  ;;  %v3538_v52 = vadd.f32 %v3530_v40, %v3474_v33  ;;  %v3665_v47 = vadd.f32 %v3657_v59, %v3600_v56  ;;  %v3659_v62 = vmul.f32 %v13172_v4, %v15297_v31  ;;  %v15301_v33 = vld [vmem:[#allocation11_spill] sm:$0xff]  ;;  %v15304_v40 = vld [vmem:[#allocation58_spill] sm:$0xff] }
 0x47e   :  { %v13683_v12 = vpop.permute.xlu0 %4926  ;;  %5015 = vperm.xlu1 %9687, %v8755_v28   ;;  %v3537_v57 = vadd.f32 %v3529_v36, %v3473_v22  ;;  %v4762_v49 = vmul.f32 %v13131_v7, %v15298_v20  ;;  %v3658_v15 = vmul.f32 %v13172_v4, %v15299_v0  ;;  %v3723_v45 = vmul.f32 %v15294_v25, %v13570_v32 }
 0x47f   :  { %5010 = vperm.xlu0 %9686, %v8754_v29   ;;  %v3664_v3 = vadd.f32 %v3656_v50, %v3599_v63  ;;  %v3602_v42 = vadd.f32 %v3594_v24, %v3538_v52  ;;  %v3729_v10 = vadd.f32 %v3721_v19, %v3665_v47  ;;  %v3722_v35 = vmul.f32 %v15294_v25, %v13577_v11  ;;  %v15305_v11 = vld [vmem:[#allocation31_spill] sm:$0xff] }
 0x480   :  { %v3601_v53 = vadd.f32 %v3593_v17, %v3537_v57  ;;  %v4761_v22 = vmul.f32 %v13131_v7, %v15301_v33  ;;  %v4764_v23 = vmul.f32 %v13131_v7, %v15302_v27  ;;  %v4763_v32 = vmul.f32 %v13131_v7, %v15303_v8  ;;  %v15307_v57 = vld [vmem:[#allocation17_spill] sm:$0xff]  ;;  %v15311_v27 = vld [vmem:[#allocation30_spill] sm:$0xff] }
 0x481   :  { %v3768_v38 = vpop.permute.xlu1 %3767  ;;  %v3728_v41 = vadd.f32 %v3720_v48, %v3664_v3  ;;  %v3667_v28 = vadd.f32 %v3659_v62, %v3602_v42  ;;  %v4826_v59 = vmul.f32 %v13148_v1, %v15304_v40  ;;  %v4825_v50 = vmul.f32 %v13148_v1, %v15305_v11 }
 0x482   :  { %v3785_v51 = vmul.f32 %v15300_v26, %v3768_v38  ;;  %v3763_v46 = vpop.permute.xlu0 %3762  ;;  %v3666_v29 = vadd.f32 %v3658_v15, %v3601_v53  ;;  %v4770_v63 = vadd.f32 %v4762_v49, %v4706_v13  ;;  %v4769_v48 = vadd.f32 %v4761_v22, %v4705_v55  ;;  %v15308_v38 = vld [vmem:[#allocation28_spill] sm:$0xff] }
 0x483   :  { %v3784_v30 = vmul.f32 %v15300_v26, %v3763_v46  ;;  %v3731_v56 = vadd.f32 %v3723_v45, %v3667_v28  ;;  %v4772_v52 = vadd.f32 %v4764_v23, %v4708_v18  ;;  %v4771_v31 = vadd.f32 %v4763_v32, %v4707_v9  ;;  %v15309_v45 = vld [vmem:[#allocation12_spill] sm:$0xff]  ;;  %v8844_v46 = vld [vmem:[%s14731_s1 + $0x50] sm:$0xff] }
 0x484   :  { %v3793_v61 = vadd.f32 %v3785_v51, %v3729_v10  ;;  %v3730_v43 = vadd.f32 %v3722_v35, %v3666_v29  ;;  %v4834_v62 = vadd.f32 %v4826_v59, %v4770_v63  ;;  %v4828_v20 = vmul.f32 %v13148_v1, %v15307_v57  ;;  %v8845_v53 = vld [vmem:[%s14731_s1 + $0x58] sm:$0xff] }
 0x485   :  { %v3792_v58 = vadd.f32 %v3784_v30, %v3728_v41  ;;  %v3778_v36 = vpop.permute.xlu1 %3777  ;;  %v4833_v15 = vadd.f32 %v4825_v50, %v4769_v48  ;;  %v4827_v55 = vmul.f32 %v13148_v1, %v15309_v45  ;;  %v15310_v41 = vld [vmem:[#allocation29_spill] sm:$0xff]  ;;  %v9473_v33 = vpack.c.bf16 %v8845_v53, %v8844_v46  ;;  %v15313_v63 = vld [vmem:[#allocation35_spill] sm:$0xff] }
 0x486   :  { %v3801_v24 = vmul.f32 %v15306_v37, %v3793_v61  ;;  %v3787_v44 = vmul.f32 %v15300_v26, %v3778_v36  ;;  %v3773_v19 = vpop.permute.xlu0 %3772  ;;  %v4891_v35 = vmul.f32 %v13172_v4, %v15310_v41  ;;  %v4836_v22 = vadd.f32 %v4828_v20, %v4772_v52 }
 0x487   :  { %v3800_v17 = vmul.f32 %v15306_v37, %v3792_v58  ;;  %v3786_v14 = vmul.f32 %v15300_v26, %v3773_v19  ;;  %v4890_v23 = vmul.f32 %v13172_v4, %v15311_v27  ;;  %v4955_v32 = vmul.f32 %v15294_v25, %v13645_v54  ;;  %9474 = vmatprep.subr.bf16.mxu0 %v9473_v33 }
 0x488   :  { %v3795_v47 = vadd.f32 %v3787_v44, %v3731_v56  ;;  %v3809_v42 = vadd.f32 %v15308_v38, %v3801_v24  ;;  %v4954_v58 = vmul.f32 %v15294_v25, %v13652_v2  ;;  %9476 = vmatpush3.bf16.msra.mxu0 %v9473_v33  ;;  %v15312_v56 = vld [vmem:[#allocation40_spill] sm:$0xff]  ;;  %v4835_v48 = vadd.f32 %v4827_v55, %v4771_v31 }
 0x489   :  { %v3794_v3 = vadd.f32 %v3786_v14, %v3730_v43  ;;  %v4130_v0 = vpop.permute.xlu1 %4129  ;;  %v3808_v18 = vadd.f32 %v15308_v38, %v3800_v17  ;;  %v4893_v24 = vmul.f32 %v13172_v4, %v15312_v56  ;;  %v4898_v19 = vadd.f32 %v4890_v23, %v4833_v15 }
 0x48a   :  { %v3803_v13 = vmul.f32 %v15306_v37, %v3795_v47  ;;  %v4147_v49 = vmul.f32 %v13131_v7, %v4130_v0  ;;  %v4125_v10 = vpop.permute.xlu0 %4124  ;;  %v3817_v40 = vmax.f32 %v3809_v42, 0.0  ;;  %v4892_v43 = vmul.f32 %v13172_v4, %v15313_v63  ;;  %v8791_v4 = vld [vmem:[%s14731_s1 + $0x28] sm:$0xff] }
 0x48b   :  { %v3802_v9 = vmul.f32 %v15306_v37, %v3794_v3  ;;  %v4146_v51 = vmul.f32 %v13131_v7, %v4125_v10  ;;  %v3816_v36 = vmax.f32 %v3808_v18, 0.0  ;;  %v4957_v52 = vmul.f32 %v15294_v25, %v13677_v60 }
 0x48c   :  { %v3811_v30 = vadd.f32 %v15308_v38, %v3803_v13  ;;  %v13735_v1 = vadd.f32 %v4147_v49, %v13616_v21  ;;  %v4956_v31 = vmul.f32 %v15294_v25, %v13683_v12  ;;  %v4901_v20 = vadd.f32 %v4893_v24, %v4836_v22 }
 0x48d   :  { %v3810_v28 = vadd.f32 %v15308_v38, %v3802_v9  ;;  %v13741_v61 = vadd.f32 %v4146_v51, %v13625_v5  ;;  %v4140_v8 = vpop.permute.xlu1 %4139  ;;  %v4899_v5 = vadd.f32 %v4891_v35, %v4834_v62  ;;  %v8790_v62 = vld [vmem:[%s14731_s1 + $0x20] sm:$0xff]  ;;  %v4900_v0 = vadd.f32 %v4892_v43, %v4835_v48 }
 0x48e   :  { %v3819_v59 = vmax.f32 %v3811_v30, 0.0  ;;  %v4149_v29 = vmul.f32 %v13131_v7, %v4140_v8  ;;  %v4135_v21 = vpop.permute.xlu0 %4134  ;;  %v13773_v57 = vpack.c.bf16 %v8791_v4, %v8790_v62  ;;  %v4965_v13 = vadd.f32 %v4957_v52, %v4901_v20 }
 0x48f   :  { %v3818_v11 = vmax.f32 %v3810_v28, 0.0  ;;  %v4148_v50 = vmul.f32 %v13131_v7, %v4135_v21  ;;  %v4963_v7 = vadd.f32 %v4955_v32, %v4899_v5  ;;  %v4964_v25 = vadd.f32 %v4956_v31, %v4900_v0 }
 0x490   :  { %v3823_v44 = vmax.f32 %v3817_v40, %v3819_v59  ;;  %v13752_v54 = vadd.f32 %v4149_v29, %v13637_v16  ;;  %9462 = vmatprep.subr.bf16.mxu1 %v13773_v57  ;;  %v8862_v59 = vld [vmem:[%s14731_s1 + $0x60] sm:$0xff] }
 0x491   :  { %v3822_v17 = vmax.f32 %v3816_v36, %v3818_v11  ;;  %v13757_v2 = vadd.f32 %v4148_v50, %v13643_v34  ;;  %v4986_v14 = vpop.permute.xlu1 %4985  ;;  %v4962_v34 = vadd.f32 %v4954_v58, %v4898_v19 }
 0x492   :  { %3827 = vst.msk [vmem:[#allocation3 + $0x18] sm:$0xff] %vm34_vm0, %v3823_v44  ;;  %v5019_v47 = vmul.f32 %v15300_v26, %v4986_v14  ;;  %v4981_v16 = vpop.permute.xlu0 %4980 }
 0x493   :  { %3826 = vst.msk [vmem:[#allocation3 + $0x10] sm:$0xff] %vm34_vm0, %v3822_v17  ;;  %v5018_v60 = vmul.f32 %v15300_v26, %v4981_v16 }
 0x494   :  { %v5027_v3 = vadd.f32 %v5019_v47, %v4963_v7 }
 0x495   :  { %v5026_v15 = vadd.f32 %v5018_v60, %v4962_v34  ;;  %v4996_v42 = vpop.permute.xlu1 %4995 }
 0x496   :  { %v5035_v49 = vmul.f32 %v15306_v37, %v5027_v3  ;;  %v5021_v10 = vmul.f32 %v15300_v26, %v4996_v42  ;;  %v4991_v45 = vpop.permute.xlu0 %4990 }
 0x497   :  { %v5034_v12 = vmul.f32 %v15306_v37, %v5026_v15  ;;  %v5020_v55 = vmul.f32 %v15300_v26, %v4991_v45  ;;  %v15314_v45 = vld [vmem:[#allocation42_spill] sm:$0xff] }
 0x498   :  { %v5029_v18 = vadd.f32 %v5021_v10, %v4965_v13  ;;  %v5043_v46 = vadd.f32 %v15308_v38, %v5035_v49 }
 0x499   :  { %v5028_v9 = vadd.f32 %v5020_v55, %v4964_v25  ;;  %v13780_v51 = vpop.permute.xlu1 %4193  ;;  %v5042_v33 = vadd.f32 %v15308_v38, %v5034_v12  ;;  %v15315_v25 = vld [vmem:[#allocation63_spill] sm:$0xff]  ;;  %v15316_v12 = vld [vmem:[#allocation86_spill] sm:$0xff]  ;;  %v15317_v55 = vld [vmem:[#allocation32_spill] sm:$0xff] }
 0x49a   :  { %v5037_v53 = vmul.f32 %v15306_v37, %v5029_v18  ;;  %v13784_v41 = vpop.permute.xlu0 %4188  ;;  %v3829_v35 = vld [vmem:[#allocation3 + $0x10] ss:$2 sm:$0xff]  ;;  %v3831_v30 = vld [vmem:[#allocation3 + $0x11] ss:$2 sm:$0xff]  ;;  %v5051_v8 = vmax.f32 %v5043_v46, 0.0 }
 0x49b   :  { %v5036_v22 = vmul.f32 %v15306_v37, %v5028_v9  ;;  %v3833_v27 = vmax.f32 %v3829_v35, %v3831_v30  ;;  %v8863_v37 = vld [vmem:[%s14731_s1 + $0x68] sm:$0xff]  ;;  %v5050_v29 = vmax.f32 %v5042_v33, 0.0 }
 0x49c   :  { %v5045_v23 = vadd.f32 %v15308_v38, %v5037_v53  ;;  %v13801_v58 = vpack.c.bf16 %v8863_v37, %v8862_v59  ;;  %v15318_v46 = vld [vmem:[#allocation22_spill] sm:$0xff] }
 0x49d   :  { %v5044_v26 = vadd.f32 %v15308_v38, %v5036_v22  ;;  %v13790_v28 = vpop.permute.xlu1 %4203  ;;  %3836 = vst.msk [vmem:[#allocation2 + $0x101] sm:$0xff] %vm34_vm0, %v3833_v27  ;;  %v13856_v27 = vld [vmem:[%s14734_s4 + $0xe] ss:$0 sm:$0xff] }
 0x49e   :  { %v5053_v32 = vmax.f32 %v5045_v23, 0.0  ;;  %v13793_v40 = vpop.permute.xlu0 %4198  ;;  %9478 = vmatprep.subr.bf16.mxu0 %v13801_v58  ;;  %v4211_v23 = vmul.f32 %v13856_v27, %v13780_v51  ;;  %v4213_v51 = vmul.f32 %v13856_v27, %v13790_v28 }
 0x49f   :  { %v5052_v21 = vmax.f32 %v5044_v26, 0.0 }
 0x4a0   :  { %v5059_v38 = vmax.f32 %v5051_v8, %v5053_v32  ;;  %v4210_v8 = vmul.f32 %v13856_v27, %v13784_v41  ;;  %v13867_v32 = vld [vmem:[%s14734_s4 + $0xf] ss:$0 sm:$0xff]  ;;  %v13879_v41 = vld [vmem:[%s14734_s4 + $0x10] ss:$0 sm:$0xff] }
 0x4a1   :  { %v5058_v36 = vmax.f32 %v5050_v29, %v5052_v21  ;;  %v4492_v11 = vpop.permute.xlu1 %4491  ;;  %v4219_v21 = vadd.f32 %v4211_v23, %v13735_v1 }
 0x4a2   :  { %5063 = vst.msk [vmem:[#allocation3 + $0x8] sm:$0xff] %vm34_vm0, %v5059_v38  ;;  %v4487_v50 = vpop.permute.xlu0 %4486  ;;  %v4509_v19 = vmul.f32 %v13513_v39, %v4492_v11  ;;  %v4218_v11 = vadd.f32 %v4210_v8, %v13741_v61  ;;  %v13895_v61 = vld [vmem:[%s14734_s4 + $0x11] ss:$0 sm:$0xff] }
 0x4a3   :  { %5062 = vst.msk [vmem:[#allocation3] sm:$0xff] %vm34_vm0, %v5058_v36  ;;  %v4508_v48 = vmul.f32 %v13513_v39, %v4487_v50  ;;  %v4212_v50 = vmul.f32 %v13856_v27, %v13793_v40 }
 0x4a4   :  { %v13806_v5 = vld [vmem:[#allocation2 + $0x101] sm:$0xff] }
 0x4a5   :  { %9182 = vmatprep.mubr.msk.f32.mxu1 %vm34_vm0, %v13806_v5  ;;  %v4502_v56 = vpop.permute.xlu1 %4501 }
 0x4a6   :  { %v4497_v24 = vpop.permute.xlu0 %4496  ;;  %v4511_v4 = vmul.f32 %v13513_v39, %v4502_v56 }
 0x4a7   :  { %v4510_v60 = vmul.f32 %v13513_v39, %v4497_v24 }
 0x4a9   :  { %v4556_v44 = vpop.permute.xlu1 %4555 }
 0x4aa   :  { %v4573_v63 = vmul.f32 %v13497_v6, %v4556_v44  ;;  %v4551_v43 = vpop.permute.xlu0 %4550  ;;  %v5066_v17 = vld [vmem:[#allocation3] ss:$2 sm:$0xff]  ;;  %v5068_v14 = vld [vmem:[#allocation3 + $0x1] ss:$2 sm:$0xff] }
 0x4ab   :  { %v4572_v7 = vmul.f32 %v13497_v6, %v4551_v43  ;;  %v5070_v52 = vmax.f32 %v5066_v17, %v5068_v14 }
 0x4ac   :  { %v13814_v47 = vadd.f32 %v4573_v63, %v4509_v19  ;;  %v4221_v63 = vadd.f32 %v4213_v51, %v13752_v54 }
 0x4ad   :  { %v13816_v16 = vadd.f32 %v4572_v7, %v4508_v48  ;;  %v4566_v62 = vpop.permute.xlu1 %4565  ;;  %5073 = vst.msk [vmem:[#allocation2 + $0x81] sm:$0xff] %vm34_vm0, %v5070_v52  ;;  %v4220_v48 = vadd.f32 %v4212_v50, %v13757_v2 }
 0x4ae   :  { %v4575_v34 = vmul.f32 %v13497_v6, %v4566_v62  ;;  %v4561_v31 = vpop.permute.xlu0 %4560 }
 0x4af   :  { %v4574_v20 = vmul.f32 %v13497_v6, %v4561_v31 }
 0x4b0   :  { %v13823_v3 = vadd.f32 %v4575_v34, %v4511_v4 }
 0x4b1   :  { %v13825_v0 = vadd.f32 %v4574_v20, %v4510_v60  ;;  %v4259_v15 = vpop.permute.xlu1 %4258 }
 0x4b2   :  { %v4254_v42 = vpop.permute.xlu0 %4253  ;;  %v4276_v59 = vmul.f32 %v13867_v32, %v4259_v15  ;;  %v13904_v15 = vld [vmem:[%s14734_s4] ss:$0 sm:$0xff] }
 0x4b3   :  { %v4275_v37 = vmul.f32 %v13867_v32, %v4254_v42 }
 0x4b4   :  { %v13827_v13 = vld [vmem:[#allocation2 + $0x81] sm:$0xff]  ;;  %v4284_v1 = vadd.f32 %v4276_v59, %v4219_v21 }
 0x4b5   :  { %9283 = vmatmul.mubr.msk.f32.gmra.mrb[6].mxu0 %vm34_vm0, %v13827_v13  ;;  %v4269_v49 = vpop.permute.xlu1 %4268  ;;  %v4283_v28 = vadd.f32 %v4275_v37, %v4218_v11 }
 0x4b6   :  { %v4264_v10 = vpop.permute.xlu0 %4263  ;;  %9285 = vmatprep.mubr.msk.f32.mxu0 %vm34_vm0, %v15314_v45  ;;  %v4278_v24 = vmul.f32 %v13867_v32, %v4269_v49 }
 0x4b7   :  { %v4277_v44 = vmul.f32 %v13867_v32, %v4264_v10 }
 0x4b8   :  { %v4286_v4 = vadd.f32 %v4278_v24, %v4221_v63 }
 0x4b9   :  { %9286 = vmatmul.mubr.msk.f32.gmra.mrb[8].mxu0 %vm34_vm0, %v15315_v25  ;;  %v13835_v39 = vpop.permute.xlu1 %4619  ;;  %v4285_v34 = vadd.f32 %v4277_v44, %v4220_v48  ;;  %v9727_v48 = vld [vmem:[%s14734_s4 + $0xb] ss:$0 sm:$0xff] }
 0x4ba   :  { %v13837_v6 = vpop.permute.xlu0 %4614  ;;  %9288 = vmatprep.mubr.msk.f32.mxu0 %vm34_vm0, %v15316_v12 }
 0x4bd   :  { %9289 = vmatmul.mubr.msk.f32.gmra.mrb[10].mxu0 %vm34_vm0, %v15317_v55  ;;  %v13843_v18 = vpop.permute.xlu1 %4629 }
 0x4be   :  { %v13845_v9 = vpop.permute.xlu0 %4624  ;;  %9291 = vmatprep.mubr.msk.f32.mxu0 %vm34_vm0, %v15318_v46 }
 0x4c1   :  { %9292 = vmatmul.mubr.msk.f32.gmra.mrb[12].mxu0 %vm34_vm0, %v13806_v5  ;;  %v4323_v53 = vpop.permute.xlu1 %4322 }
 0x4c2   :  { %v4318_v35 = vpop.permute.xlu0 %4317  ;;  %v4340_v38 = vmul.f32 %v13879_v41, %v4323_v53  ;;  %v13913_v53 = vld [vmem:[%s14734_s4 + $0x1] ss:$0 sm:$0xff] }
 0x4c3   :  { %v4339_v56 = vmul.f32 %v13879_v41, %v4318_v35 }
 0x4c4   :  { %v4348_v43 = vadd.f32 %v4340_v38, %v4284_v1 }
 0x4c5   :  { %v4333_v30 = vpop.permute.xlu1 %4332  ;;  %v4347_v7 = vadd.f32 %v4339_v56, %v4283_v28 }
 0x4c6   :  { %v4328_v33 = vpop.permute.xlu0 %4327  ;;  %v4342_v17 = vmul.f32 %v13879_v41, %v4333_v30 }
 0x4c7   :  { %v4341_v52 = vmul.f32 %v13879_v41, %v4328_v33 }
 0x4c8   :  { %v4350_v20 = vadd.f32 %v4342_v17, %v4286_v4  ;;  %v4639_v4 = vmul.f32 %v9727_v48, %v13843_v18 }
 0x4c9   :  { %v13851_v22 = vpop.permute.xlu1 %4684  ;;  %v4349_v10 = vadd.f32 %v4341_v52, %v4285_v34  ;;  %v9728_v34 = vld [vmem:[%s14734_s4 + $0xc] ss:$0 sm:$0xff] }
 0x4ca   :  { %v13860_v26 = vpop.permute.xlu0 %4679 }
 0x4cd   :  { %v13871_v29 = vpop.permute.xlu1 %4694 }
 0x4ce   :  { %v13882_v36 = vpop.permute.xlu0 %4689  ;;  %v4704_v18 = vmul.f32 %v9728_v34, %v13871_v29 }
 0x4d1   :  { %v4387_v19 = vpop.permute.xlu1 %4386 }
 0x4d2   :  { %v4404_v40 = vmul.f32 %v13895_v61, %v4387_v19  ;;  %v4382_v14 = vpop.permute.xlu0 %4381 }
 0x4d3   :  { %v4403_v62 = vmul.f32 %v13895_v61, %v4382_v14 }
 0x4d4   :  { %v4412_v54 = vadd.f32 %v4404_v40, %v4348_v43 }
 0x4d5   :  { %v4411_v31 = vadd.f32 %v4403_v62, %v4347_v7  ;;  %v4397_v60 = vpop.permute.xlu1 %4396  ;;  %v4637_v7 = vmul.f32 %v9727_v48, %v13835_v39  ;;  %v4636_v62 = vmul.f32 %v9727_v48, %v13837_v6  ;;  %v4638_v39 = vmul.f32 %v9727_v48, %v13845_v9 }
 0x4d6   :  { %v4420_v42 = vmul.f32 %v13904_v15, %v4412_v54  ;;  %v4406_v2 = vmul.f32 %v13895_v61, %v4397_v60  ;;  %v4392_v49 = vpop.permute.xlu0 %4391  ;;  %v4701_v60 = vmul.f32 %v9728_v34, %v13860_v26 }
 0x4d7   :  { %v4419_v45 = vmul.f32 %v13904_v15, %v4411_v31  ;;  %v4405_v25 = vmul.f32 %v13895_v61, %v4392_v49  ;;  %v4702_v31 = vmul.f32 %v9728_v34, %v13851_v22  ;;  %v4644_v6 = vadd.f32 %v4636_v62, %v13816_v16  ;;  %v13974_v62 = vld [vmem:[#allocation2 + $0x20] sm:$0xff] }
 0x4d8   :  { %v4414_v12 = vadd.f32 %v4406_v2, %v4350_v20  ;;  %v4428_v35 = vadd.f32 %v13913_v53, %v4420_v42  ;;  %v4645_v42 = vadd.f32 %v4637_v7, %v13814_v47  ;;  %v9729_v2 = vld [vmem:[%s14734_s4 + $0xd] ss:$0 sm:$0xff]  ;;  %v4646_v16 = vadd.f32 %v4638_v39, %v13825_v0  ;;  %v13984_v39 = vld [vmem:[#allocation2 + $0x30] sm:$0xff] }
 0x4d9   :  { %v4413_v55 = vadd.f32 %v4405_v25, %v4349_v10  ;;  %v4749_v46 = vpop.permute.xlu1 %4748  ;;  %v4427_v23 = vadd.f32 %v13913_v53, %v4419_v45  ;;  %v4647_v45 = vadd.f32 %v4639_v4, %v13823_v3  ;;  %v4709_v26 = vadd.f32 %v4701_v60, %v4644_v6  ;;  %v8809_v3 = vld [vmem:[%s14731_s1 + $0x38] sm:$0xff] }
 0x4da   :  { %v4422_v30 = vmul.f32 %v13904_v15, %v4414_v12  ;;  %v4744_v33 = vpop.permute.xlu0 %4743  ;;  %v4436_v51 = vmax.f32 %v4428_v35, 0.0  ;;  %v4766_v49 = vmul.f32 %v9729_v2, %v4749_v46  ;;  %v4710_v25 = vadd.f32 %v4702_v31, %v4645_v42  ;;  %v5075_v35 = vld [vmem:[#allocation2] sm:$0xff]  ;;  %v8808_v46 = vld [vmem:[%s14731_s1 + $0x30] sm:$0xff] }
 0x4db   :  { %v4421_v8 = vmul.f32 %v13904_v15, %v4413_v55  ;;  %v4435_v50 = vmax.f32 %v4427_v23, 0.0  ;;  %v4765_v10 = vmul.f32 %v9729_v2, %v4744_v33  ;;  %v4703_v12 = vmul.f32 %v9728_v34, %v13882_v36 }
 0x4dc   :  { %v4430_v59 = vadd.f32 %v13913_v53, %v4422_v30  ;;  %v4712_v30 = vadd.f32 %v4704_v18, %v4647_v45  ;;  %v4774_v33 = vadd.f32 %v4766_v49, %v4710_v25  ;;  %v13988_v49 = vld [vmem:[#allocation2 + $0x40] sm:$0xff] }
 0x4dd   :  { %v4429_v37 = vadd.f32 %v13913_v53, %v4421_v8  ;;  %v4759_v21 = vpop.permute.xlu1 %4758  ;;  %v4773_v36 = vadd.f32 %v4765_v10, %v4709_v26 }
 0x4de   :  { %v4438_v38 = vmax.f32 %v4430_v59, 0.0  ;;  %v4754_v11 = vpop.permute.xlu0 %4753  ;;  %v4768_v55 = vmul.f32 %v9729_v2, %v4759_v21 }
 0x4df   :  { %v4437_v56 = vmax.f32 %v4429_v37, 0.0  ;;  %v4767_v0 = vmul.f32 %v9729_v2, %v4754_v11 }
 0x4e0   :  { %v4442_v1 = vmax.f32 %v4436_v51, %v4438_v38  ;;  %v4711_v51 = vadd.f32 %v4703_v12, %v4646_v16  ;;  %v4776_v11 = vadd.f32 %v4768_v55, %v4712_v30  ;;  %v14000_v16 = vld [vmem:[#allocation2 + $0x60] sm:$0xff]  ;;  %v14009_v30 = vld [vmem:[#allocation2 + $0x70] sm:$0xff] }
 0x4e1   :  { %v4441_v24 = vmax.f32 %v4435_v50, %v4437_v56  ;;  %v4813_v28 = vpop.permute.xlu1 %4812 }
 0x4e2   :  { %4446 = vst.msk [vmem:[#allocation3 + $0x18] sm:$0xff] %vm34_vm0, %v4442_v1  ;;  %v4808_v44 = vpop.permute.xlu0 %4807  ;;  %v4830_v47 = vmul.f32 %v13856_v27, %v4813_v28  ;;  %v13964_v1 = vpack.c.bf16 %v8809_v3, %v8808_v46  ;;  %v5083_v46 = vld [vmem:[#allocation2 + $0xa0] sm:$0xff] }
 0x4e3   :  { %4445 = vst.msk [vmem:[#allocation3 + $0x10] sm:$0xff] %vm34_vm0, %v4441_v24  ;;  %v4829_v29 = vmul.f32 %v13856_v27, %v4808_v44 }
 0x4e4   :  { %v4838_v38 = vadd.f32 %v4830_v47, %v4774_v33  ;;  %v13996_v47 = vld [vmem:[#allocation2 + $0x50] sm:$0xff] }
 0x4e5   :  { %v4823_v19 = vpop.permute.xlu1 %4822  ;;  %v4837_v24 = vadd.f32 %v4829_v29, %v4773_v36 }
 0x4e6   :  { %v4818_v63 = vpop.permute.xlu0 %4817  ;;  %v4832_v59 = vmul.f32 %v13856_v27, %v4823_v19 }
 0x4e7   :  { %v4831_v28 = vmul.f32 %v13856_v27, %v4818_v63 }
 0x4e9   :  { %v4878_v43 = vpop.permute.xlu1 %4877 }
 0x4ea   :  { %v4873_v17 = vpop.permute.xlu0 %4872  ;;  %v4448_v40 = vld [vmem:[#allocation3 + $0x10] ss:$2 sm:$0xff]  ;;  %v4450_v14 = vld [vmem:[#allocation3 + $0x11] ss:$2 sm:$0xff]  ;;  %v4895_v23 = vmul.f32 %v13867_v32, %v4878_v43 }
 0x4eb   :  { %v4452_v52 = vmax.f32 %v4448_v40, %v4450_v14  ;;  %v4894_v37 = vmul.f32 %v13867_v32, %v4873_v17  ;;  %v13969_v17 = vld [vmem:[#allocation2 + $0x10] sm:$0xff]  ;;  %v4775_v40 = vadd.f32 %v4767_v0, %v4711_v51  ;;  %v4840_v14 = vadd.f32 %v4832_v59, %v4776_v11  ;;  %v14019_v51 = vld [vmem:[#allocation2 + $0xc0] sm:$0xff] }
 0x4ec   :  { %v4903_v19 = vadd.f32 %v4895_v23, %v4838_v38  ;;  %v14029_v38 = vld [vmem:[#allocation2 + $0xe0] sm:$0xff] }
 0x4ed   :  { %v4888_v54 = vpop.permute.xlu1 %4887  ;;  %4455 = vst.msk [vmem:[#allocation2 + $0x111] sm:$0xff] %vm34_vm0, %v4452_v52  ;;  %v4902_v48 = vadd.f32 %v4894_v37, %v4837_v24 }
 0x4ee   :  { %v4883_v20 = vpop.permute.xlu0 %4882  ;;  %v4897_v43 = vmul.f32 %v13867_v32, %v4888_v54  ;;  %v4839_v54 = vadd.f32 %v4831_v28, %v4775_v40  ;;  %v5498_v28 = vld [vmem:[#allocation2 + $0x2] sm:$0xff] }
 0x4ef   :  { %v4896_v7 = vmul.f32 %v13867_v32, %v4883_v20  ;;  %v14048_v40 = vld [vmem:[#allocation2 + $0x22] sm:$0xff] }
 0x4f0   :  { %v4905_v20 = vadd.f32 %v4897_v43, %v4840_v14  ;;  %v5499_v43 = vld [vmem:[#allocation2 + $0x12] sm:$0xff] }
 0x4f1   :  { %v4942_v22 = vpop.permute.xlu1 %4941  ;;  %v4904_v6 = vadd.f32 %v4896_v7, %v4839_v54  ;;  %v14053_v14 = vld [vmem:[#allocation2 + $0x32] sm:$0xff] }
 0x4f2   :  { %v4937_v9 = vpop.permute.xlu0 %4936  ;;  %v4959_v50 = vmul.f32 %v13879_v41, %v4942_v22  ;;  %v8880_v7 = vld [vmem:[%s14731_s1 + $0x70] sm:$0xff] }
 0x4f3   :  { %v4958_v44 = vmul.f32 %v13879_v41, %v4937_v9  ;;  %v14085_v54 = vld [vmem:[#allocation2 + $0x72] sm:$0xff] }
 0x4f4   :  { %v13954_v8 = vld [vmem:[#allocation2 + $0x111] sm:$0xff]  ;;  %v4967_v4 = vadd.f32 %v4959_v50, %v4903_v19 }
 0x4f5   :  { %9183 = vmatmul.mubr.msk.f32.gmra.mrb[14].mxu1 %vm34_vm0, %v13954_v8  ;;  %9294 = vmatprep.mubr.msk.f32.mxu0 %vm34_vm0, %v13954_v8  ;;  %v4952_v21 = vpop.permute.xlu1 %4951  ;;  %v4966_v31 = vadd.f32 %v4958_v44, %v4902_v48  ;;  %v14033_v50 = vld [vmem:[#allocation2 + $0xf0] sm:$0xff] }
 0x4f6   :  { %v4947_v56 = vpop.permute.xlu0 %4946  ;;  %9189 = vmatprep.mubr.msk.f32.mxu1 %vm34_vm0, %v5075_v35  ;;  %v4961_v27 = vmul.f32 %v13879_v41, %v4952_v21  ;;  %v14015_v21 = vld [vmem:[#allocation2 + $0xb0] sm:$0xff] }
 0x4f7   :  { %v4960_v32 = vmul.f32 %v13879_v41, %v4947_v56  ;;  %v14037_v56 = vld [vmem:[#allocation2 + $0x100] sm:$0xff]  ;;  %v14041_v19 = vld [vmem:[#allocation2 + $0x110] sm:$0xff] }
 0x4f9   :  { %9190 = vmatmul.mubr.msk.f32.vlgmr.msra.gmra.mrb[0].mxu1 %vm34_vm0, %v13969_v17  ;;  %v5006_v52 = vpop.permute.xlu1 %5005  ;;  %v4968_v22 = vadd.f32 %v4960_v32, %v4904_v6  ;;  %v14103_v32 = vld [vmem:[#allocation2 + $0xd2] sm:$0xff]  ;;  %v14122_v6 = vld [vmem:[#allocation2 + $0x102] sm:$0xff] }
 0x4fa   :  { %v5023_v63 = vmul.f32 %v13895_v61, %v5006_v52  ;;  %v5001_v34 = vpop.permute.xlu0 %5000  ;;  %9192 = vmatprep.mubr.msk.f32.mxu1 %vm34_vm0, %v13974_v62  ;;  %9464 = vmatpush3.bf16.msra.mxu1 %v13773_v57  ;;  %v4969_v57 = vadd.f32 %v4961_v27, %v4905_v20  ;;  %v8881_v52 = vld [vmem:[%s14731_s1 + $0x78] sm:$0xff]  ;;  %v14111_v20 = vld [vmem:[#allocation2 + $0xe2] sm:$0xff] }
 0x4fb   :  { %v5022_v60 = vmul.f32 %v13895_v61, %v5001_v34  ;;  %9466 = vmatprep.subr.bf16.mxu1 %v13964_v1  ;;  %v14072_v27 = vld [vmem:[#allocation2 + $0x52] sm:$0xff]  ;;  %v5506_v34 = vld [vmem:[#allocation2 + $0xa2] sm:$0xff] }
 0x4fc   :  { %v5031_v42 = vadd.f32 %v5023_v63, %v4967_v4  ;;  %v14067_v4 = vld [vmem:[#allocation2 + $0x42] sm:$0xff] }
 0x4fd   :  { %v5030_v18 = vadd.f32 %v5022_v60, %v4966_v31  ;;  %9193 = vmatmul.mubr.msk.f32.gmra.mrb[2].mxu1 %vm34_vm0, %v13984_v39  ;;  %v5016_v2 = vpop.permute.xlu1 %5015  ;;  %v14078_v63 = vld [vmem:[#allocation2 + $0x62] sm:$0xff] }
 0x4fe   :  { %v5039_v10 = vmul.f32 %v13904_v15, %v5031_v42  ;;  %v5025_v41 = vmul.f32 %v13895_v61, %v5016_v2  ;;  %v5011_v45 = vpop.permute.xlu0 %5010  ;;  %9195 = vmatprep.mubr.msk.f32.mxu1 %vm34_vm0, %v13988_v49  ;;  %v14097_v31 = vld [vmem:[#allocation2 + $0xc2] sm:$0xff]  ;;  %v14116_v42 = vld [vmem:[#allocation2 + $0xf2] sm:$0xff] }
 0x4ff   :  { %v5038_v25 = vmul.f32 %v13904_v15, %v5030_v18  ;;  %v5024_v26 = vmul.f32 %v13895_v61, %v5011_v45  ;;  %v14105_v60 = vld [vmem:[#allocation2 + $0x82] sm:$0xff]  ;;  %v14128_v18 = vld [vmem:[#allocation2 + $0x112] sm:$0xff] }
 0x500   :  { %v5033_v12 = vadd.f32 %v5025_v41, %v4969_v57  ;;  %v5047_v55 = vadd.f32 %v13913_v53, %v5039_v10  ;;  %v8899_v57 = vld [vmem:[%s14731_s1 + $0x88] sm:$0xff]  ;;  %v5733_v41 = vld [vmem:[#allocation2 + $0x80] sm:$0xff] }
 0x501   :  { %v5032_v9 = vadd.f32 %v5024_v26, %v4968_v22  ;;  %9196 = vmatmul.mubr.msk.f32.gmra.mrb[4].mxu1 %vm34_vm0, %v13996_v47  ;;  %v5046_v35 = vadd.f32 %v13913_v53, %v5038_v25  ;;  %v6638_v45 = vld [vmem:[#allocation2 + $0x21] sm:$0xff]  ;;  %v6639_v22 = vld [vmem:[#allocation2 + $0x31] sm:$0xff] }
 0x502   :  { %v5041_v29 = vmul.f32 %v13904_v15, %v5033_v12  ;;  %9198 = vmatprep.mubr.msk.f32.mxu1 %vm34_vm0, %v14000_v16  ;;  %v5055_v36 = vmax.f32 %v5047_v55, 0.0  ;;  %v6640_v25 = vld [vmem:[#allocation2 + $0x41] sm:$0xff]  ;;  %v6641_v26 = vld [vmem:[#allocation2 + $0x51] sm:$0xff] }
 0x503   :  { %v5040_v61 = vmul.f32 %v13904_v15, %v5032_v9  ;;  %v5054_v0 = vmax.f32 %v5046_v35, 0.0  ;;  %v6642_v12 = vld [vmem:[#allocation2 + $0x61] sm:$0xff]  ;;  %v6645_v9 = vld [vmem:[#allocation2 + $0x91] sm:$0xff] }
 0x504   :  { %v5049_v3 = vadd.f32 %v13913_v53, %v5041_v29  ;;  %v6647_v55 = vld [vmem:[#allocation2 + $0xd1] sm:$0xff]  ;;  %v6648_v29 = vld [vmem:[#allocation2 + $0xe1] sm:$0xff] }
 0x505   :  { %v5048_v33 = vadd.f32 %v13913_v53, %v5040_v61  ;;  %9199 = vmatmul.mubr.msk.f32.gmra.mrb[6].mxu1 %vm34_vm0, %v14009_v30  ;;  %v14025_v53 = vld [vmem:[#allocation2 + $0xd0] sm:$0xff] }
 0x506   :  { %v5057_v23 = vmax.f32 %v5049_v3, 0.0  ;;  %9201 = vmatprep.mubr.msk.f32.mxu1 %vm34_vm0, %v5083_v46  ;;  %v6649_v35 = vld [vmem:[#allocation2 + $0xf1] sm:$0xff] }
 0x507   :  { %v5056_v59 = vmax.f32 %v5048_v33, 0.0 }
 0x508   :  { %v5061_v37 = vmax.f32 %v5055_v36, %v5057_v23 }
 0x509   :  { %v5060_v15 = vmax.f32 %v5054_v0, %v5056_v59  ;;  %9202 = vmatmul.mubr.msk.f32.gmra.mrb[8].mxu1 %vm34_vm0, %v14015_v21 }
 0x50a   :  { %5065 = vst.msk [vmem:[#allocation3 + $0x18] sm:$0xff] %vm34_vm0, %v5061_v37  ;;  %9204 = vmatprep.mubr.msk.f32.mxu1 %vm34_vm0, %v14019_v51 }
 0x50b   :  { %5064 = vst.msk [vmem:[#allocation3 + $0x10] sm:$0xff] %vm34_vm0, %v5060_v15 }
 0x50d   :  { %9205 = vmatmul.mubr.msk.f32.gmra.mrb[10].mxu1 %vm34_vm0, %v14025_v53 }
 0x50e   :  { %9207 = vmatprep.mubr.msk.f32.mxu1 %vm34_vm0, %v14029_v38 }
 0x511   :  { %9208 = vmatmul.mubr.msk.f32.gmra.mrb[12].mxu1 %vm34_vm0, %v14033_v50 }
 0x512   :  { %9210 = vmatprep.mubr.msk.f32.mxu1 %vm34_vm0, %v14037_v56  ;;  %v5067_v11 = vld [vmem:[#allocation3 + $0x10] ss:$2 sm:$0xff]  ;;  %v5069_v24 = vld [vmem:[#allocation3 + $0x11] ss:$2 sm:$0xff] }
 0x513   :  { %v5071_v44 = vmax.f32 %v5067_v11, %v5069_v24 }
 0x515   :  { %9211 = vmatmul.mubr.msk.f32.gmra.mrb[14].mxu1 %vm34_vm0, %v14041_v19  ;;  %5074 = vst.msk [vmem:[#allocation2 + $0x121] sm:$0xff] %vm34_vm0, %v5071_v44  ;;  %v14278_v44 = vld [vmem:[%s14734_s4 + $0x3] ss:$0 sm:$0xff] }
 0x516   :  { %9217 = vmatprep.mubr.msk.f32.mxu1 %vm34_vm0, %v5498_v28 }
 0x519   :  { %9218 = vmatmul.mubr.msk.f32.vlgmr.msra.gmra.mrb[0].mxu1 %vm34_vm0, %v5499_v43 }
 0x51a   :  { %9220 = vmatprep.mubr.msk.f32.mxu1 %vm34_vm0, %v14048_v40  ;;  %9468 = vmatpush3.bf16.msra.mxu1 %v13964_v1  ;;  %v9481_v1 = vpack.c.bf16 %v8881_v52, %v8880_v7 }
 0x51c   :  { %v14055_v48 = vld [vmem:[#allocation2 + $0x121] sm:$0xff] }
 0x51d   :  { %9221 = vmatmul.mubr.msk.f32.gmra.mrb[2].mxu1 %vm34_vm0, %v14053_v14  ;;  %9295 = vmatmul.mubr.msk.f32.gmra.mrb[14].mxu0 %vm34_vm0, %v14055_v48  ;;  %v14146_v2 = vld [vmem:[#allocation2 + $0x122] sm:$0xff] }
 0x51e   :  { %9223 = vmatprep.mubr.msk.f32.mxu1 %vm34_vm0, %v14067_v4  ;;  %9301 = vmatprep.mubr.msk.f32.mxu0 %vm34_vm0, %v5499_v43 }
 0x521   :  { %9224 = vmatmul.mubr.msk.f32.gmra.mrb[4].mxu1 %vm34_vm0, %v14072_v27  ;;  %9302 = vmatmul.mubr.msk.f32.vlgmr.msra.gmra.mrb[0].mxu0 %vm34_vm0, %v14048_v40 }
 0x522   :  { %9480 = vmatpush3.bf16.msra.mxu0 %v13801_v58  ;;  %9226 = vmatprep.mubr.msk.f32.mxu1 %vm34_vm0, %v14078_v63  ;;  %v5507_v58 = vld [vmem:[#allocation2 + $0xb2] sm:$0xff] }
 0x523   :  { %9304 = vmatprep.mubr.msk.f32.mxu0 %vm34_vm0, %v14053_v14  ;;  %9482 = vmatprep.subr.bf16.mxu0 %v9481_v1 }
 0x525   :  { %9227 = vmatmul.mubr.msk.f32.gmra.mrb[6].mxu1 %vm34_vm0, %v14085_v54  ;;  %9305 = vmatmul.mubr.msk.f32.gmra.mrb[2].mxu0 %vm34_vm0, %v14067_v4 }
 0x526   :  { %9307 = vmatprep.mubr.msk.f32.mxu0 %vm34_vm0, %v14072_v27  ;;  %9229 = vmatprep.mubr.msk.f32.mxu1 %vm34_vm0, %v5506_v34 }
 0x529   :  { %9230 = vmatmul.mubr.msk.f32.gmra.mrb[8].mxu1 %vm34_vm0, %v5507_v58  ;;  %9308 = vmatmul.mubr.msk.f32.gmra.mrb[4].mxu0 %vm34_vm0, %v14078_v63 }
 0x52a   :  { %9232 = vmatprep.mubr.msk.f32.mxu1 %vm34_vm0, %v14097_v31  ;;  %9310 = vmatprep.mubr.msk.f32.mxu0 %vm34_vm0, %v14085_v54 }
 0x52d   :  { %9233 = vmatmul.mubr.msk.f32.gmra.mrb[10].mxu1 %vm34_vm0, %v14103_v32  ;;  %9311 = vmatmul.mubr.msk.f32.gmra.mrb[6].mxu0 %vm34_vm0, %v14105_v60 }
 0x52e   :  { %9235 = vmatprep.mubr.msk.f32.mxu1 %vm34_vm0, %v14111_v20  ;;  %9313 = vmatprep.mubr.msk.f32.mxu0 %vm34_vm0, %v5507_v58 }
 0x531   :  { %9236 = vmatmul.mubr.msk.f32.gmra.mrb[12].mxu1 %vm34_vm0, %v14116_v42  ;;  %9314 = vmatmul.mubr.msk.f32.gmra.mrb[8].mxu0 %vm34_vm0, %v14097_v31 }
 0x532   :  { %9238 = vmatprep.mubr.msk.f32.mxu1 %vm34_vm0, %v14122_v6  ;;  %9316 = vmatprep.mubr.msk.f32.mxu0 %vm34_vm0, %v14103_v32 }
 0x535   :  { %9239 = vmatmul.mubr.msk.f32.gmra.mrb[14].mxu1 %vm34_vm0, %v14128_v18  ;;  %9317 = vmatmul.mubr.msk.f32.gmra.mrb[10].mxu0 %vm34_vm0, %v14111_v20 }
 0x536   :  { %9245 = vmatprep.mubr.msk.f32.mxu1 %vm34_vm0, %v13969_v17  ;;  %9319 = vmatprep.mubr.msk.f32.mxu0 %vm34_vm0, %v14116_v42  ;;  %v8898_v17 = vld [vmem:[%s14731_s1 + $0x80] sm:$0xff] }
 0x537   :  { %v9485_v10 = vpack.c.bf16 %v8899_v57, %v8898_v17 }
 0x539   :  { %9246 = vmatmul.mubr.msk.f32.vlgmr.msra.gmra.mrb[0].mxu1 %vm34_vm0, %v13974_v62  ;;  %9320 = vmatmul.mubr.msk.f32.gmra.mrb[12].mxu0 %vm34_vm0, %v14122_v6 }
 0x53a   :  { %9248 = vmatprep.mubr.msk.f32.mxu1 %vm34_vm0, %v13984_v39  ;;  %9322 = vmatprep.mubr.msk.f32.mxu0 %vm34_vm0, %v14128_v18 }
 0x53d   :  { %9249 = vmatmul.mubr.msk.f32.gmra.mrb[2].mxu1 %vm34_vm0, %v13988_v49  ;;  %9323 = vmatmul.mubr.msk.f32.gmra.mrb[14].mxu0 %vm34_vm0, %v14146_v2 }
 0x53e   :  { %9251 = vmatprep.mubr.msk.f32.mxu1 %vm34_vm0, %v13996_v47  ;;  %9329 = vmatprep.mubr.msk.f32.mxu0 %vm34_vm0, %v13974_v62  ;;  %v6417_v62 = vld [vmem:[#allocation2 + $0x90] sm:$0xff] }
 0x541   :  { %9252 = vmatmul.mubr.msk.f32.gmra.mrb[4].mxu1 %vm34_vm0, %v14000_v16  ;;  %9330 = vmatmul.mubr.msk.f32.vlgmr.msra.gmra.mrb[0].mxu0 %vm34_vm0, %v13984_v39  ;;  %v5741_v39 = vld [vmem:[#allocation2 + $0x120] sm:$0xff] }
 0x542   :  { %9484 = vmatpush3.bf16.msra.mxu0 %v9481_v1  ;;  %9254 = vmatprep.mubr.msk.f32.mxu1 %vm34_vm0, %v14009_v30 }
 0x543   :  { %9332 = vmatprep.mubr.msk.f32.mxu0 %vm34_vm0, %v13988_v49  ;;  %9486 = vmatprep.subr.bf16.mxu0 %v9485_v10  ;;  %v6425_v49 = vld [vmem:[#allocation2 + $0x130] sm:$0xff] }
 0x545   :  { %9255 = vmatmul.mubr.msk.f32.gmra.mrb[6].mxu1 %vm34_vm0, %v5733_v41  ;;  %9333 = vmatmul.mubr.msk.f32.gmra.mrb[2].mxu0 %vm34_vm0, %v13996_v47  ;;  %v6643_v47 = vld [vmem:[#allocation2 + $0x71] sm:$0xff] }
 0x546   :  { %9257 = vmatprep.mubr.msk.f32.mxu1 %vm34_vm0, %v14015_v21  ;;  %9335 = vmatprep.mubr.msk.f32.mxu0 %vm34_vm0, %v14000_v16  ;;  %v6646_v16 = vld [vmem:[#allocation2 + $0xc1] sm:$0xff] }
 0x549   :  { %9258 = vmatmul.mubr.msk.f32.gmra.mrb[8].mxu1 %vm34_vm0, %v14019_v51  ;;  %9336 = vmatmul.mubr.msk.f32.gmra.mrb[4].mxu0 %vm34_vm0, %v14009_v30 }
 0x54a   :  { %9260 = vmatprep.mubr.msk.f32.mxu1 %vm34_vm0, %v14025_v53  ;;  %9338 = vmatprep.mubr.msk.f32.mxu0 %vm34_vm0, %v5733_v41 }
 0x54d   :  { %9261 = vmatmul.mubr.msk.f32.gmra.mrb[10].mxu1 %vm34_vm0, %v14029_v38  ;;  %9339 = vmatmul.mubr.msk.f32.gmra.mrb[6].mxu0 %vm34_vm0, %v6417_v62 }
 0x54e   :  { %9263 = vmatprep.mubr.msk.f32.mxu1 %vm34_vm0, %v14033_v50  ;;  %9341 = vmatprep.mubr.msk.f32.mxu0 %vm34_vm0, %v14019_v51 }
 0x551   :  { %9264 = vmatmul.mubr.msk.f32.gmra.mrb[12].mxu1 %vm34_vm0, %v14037_v56  ;;  %9342 = vmatmul.mubr.msk.f32.gmra.mrb[8].mxu0 %vm34_vm0, %v14025_v53 }
 0x552   :  { %9266 = vmatprep.mubr.msk.f32.mxu1 %vm34_vm0, %v14041_v19  ;;  %9344 = vmatprep.mubr.msk.f32.mxu0 %vm34_vm0, %v14029_v38 }
 0x555   :  { %9267 = vmatmul.mubr.msk.f32.gmra.mrb[14].mxu1 %vm34_vm0, %v5741_v39  ;;  %9345 = vmatmul.mubr.msk.f32.gmra.mrb[10].mxu0 %vm34_vm0, %v14033_v50 }
 0x556   :  { %9347 = vmatprep.mubr.msk.f32.mxu0 %vm34_vm0, %v14037_v56  ;;  %v14273_v56 = vld [vmem:[%s14734_s4 + $0x2] ss:$0 sm:$0xff] }
 0x559   :  { %9348 = vmatmul.mubr.msk.f32.gmra.mrb[12].mxu0 %vm34_vm0, %v14041_v19 }
 0x55a   :  { %9350 = vmatprep.mubr.msk.f32.mxu0 %vm34_vm0, %v5741_v39 }
 0x55d   :  { %9351 = vmatmul.mubr.msk.f32.gmra.mrb[14].mxu0 %vm34_vm0, %v6425_v49 }
 0x55e   :  { %9357 = vmatprep.mubr.msk.f32.mxu0 %vm34_vm0, %v6638_v45 }
 0x561   :  { %9358 = vmatmul.mubr.msk.f32.vlgmr.msra.gmra.mrb[0].mxu0 %vm34_vm0, %v6639_v22 }
 0x562   :  { %9488 = vmatpush3.bf16.msra.mxu0 %v9485_v10  ;;  %9360 = vmatprep.mubr.msk.f32.mxu0 %vm34_vm0, %v6640_v25 }
 0x565   :  { %9361 = vmatmul.mubr.msk.f32.gmra.mrb[2].mxu0 %vm34_vm0, %v6641_v26 }
 0x566   :  { %9363 = vmatprep.mubr.msk.f32.mxu0 %vm34_vm0, %v6642_v12 }
 0x569   :  { %9364 = vmatmul.mubr.msk.f32.gmra.mrb[4].mxu0 %vm34_vm0, %v6643_v47 }
 0x56a   :  { %9366 = vmatprep.mubr.msk.f32.mxu0 %vm34_vm0, %v13827_v13  ;;  %v6653_v13 = vld [vmem:[#allocation2 + $0x131] sm:$0xff] }
 0x56d   :  { %9367 = vmatmul.mubr.msk.f32.gmra.mrb[6].mxu0 %vm34_vm0, %v6645_v9 }
 0x56e   :  { %9369 = vmatprep.mubr.msk.f32.mxu0 %vm34_vm0, %v6646_v16 }
 0x571   :  { %9370 = vmatmul.mubr.msk.f32.gmra.mrb[8].mxu0 %vm34_vm0, %v6647_v55 }
 0x572   :  { %9372 = vmatprep.mubr.msk.f32.mxu0 %vm34_vm0, %v6648_v29 }
 0x575   :  { %9373 = vmatmul.mubr.msk.f32.gmra.mrb[10].mxu0 %vm34_vm0, %v6649_v35 }
 0x576   :  { %9375 = vmatprep.mubr.msk.f32.mxu0 %vm34_vm0, %v13806_v5  ;;  %v6873_v5 = vld [vmem:[#allocation2 + $0x92] sm:$0xff] }
 0x579   :  { %9376 = vmatmul.mubr.msk.f32.gmra.mrb[12].mxu0 %vm34_vm0, %v13954_v8  ;;  %v6881_v8 = vld [vmem:[#allocation2 + $0x132] sm:$0xff] }
 0x57a   :  { %9378 = vmatprep.mubr.msk.f32.mxu0 %vm34_vm0, %v14055_v48 }
 0x57d   :  { %9379 = vmatmul.mubr.msk.f32.gmra.mrb[14].mxu0 %vm34_vm0, %v6653_v13 }
 0x57e   :  { %9385 = vmatprep.mubr.msk.f32.mxu0 %vm34_vm0, %v14048_v40 }
 0x581   :  { %9386 = vmatmul.mubr.msk.f32.vlgmr.msra.gmra.mrb[0].mxu0 %vm34_vm0, %v14053_v14 }
 0x582   :  { %9388 = vmatprep.mubr.msk.f32.mxu0 %vm34_vm0, %v14067_v4 }
 0x585   :  { %9389 = vmatmul.mubr.msk.f32.gmra.mrb[2].mxu0 %vm34_vm0, %v14072_v27 }
 0x586   :  { %9391 = vmatprep.mubr.msk.f32.mxu0 %vm34_vm0, %v14078_v63 }
 0x589   :  { %9392 = vmatmul.mubr.msk.f32.gmra.mrb[4].mxu0 %vm34_vm0, %v14085_v54 }
 0x58a   :  { %9394 = vmatprep.mubr.msk.f32.mxu0 %vm34_vm0, %v14105_v60 }
 0x58d   :  { %9395 = vmatmul.mubr.msk.f32.gmra.mrb[6].mxu0 %vm34_vm0, %v6873_v5 }
 0x58e   :  { %9397 = vmatprep.mubr.msk.f32.mxu0 %vm34_vm0, %v14097_v31 }
 0x591   :  { %9398 = vmatmul.mubr.msk.f32.gmra.mrb[8].mxu0 %vm34_vm0, %v14103_v32 }
 0x592   :  { %9400 = vmatprep.mubr.msk.f32.mxu0 %vm34_vm0, %v14111_v20 }
 0x595   :  { %9401 = vmatmul.mubr.msk.f32.gmra.mrb[10].mxu0 %vm34_vm0, %v14116_v42 }
 0x596   :  { %9403 = vmatprep.mubr.msk.f32.mxu0 %vm34_vm0, %v14122_v6 }
 0x599   :  { %9404 = vmatmul.mubr.msk.f32.gmra.mrb[12].mxu0 %vm34_vm0, %v14128_v18 }
 0x59a   :  { %9406 = vmatprep.mubr.msk.f32.mxu0 %vm34_vm0, %v14146_v2 }
 0x59d   :  { %9407 = vmatmul.mubr.msk.f32.gmra.mrb[14].mxu0 %vm34_vm0, %v6881_v8 }
 0x60c   :  { %v9247_v61 = vpop.f32.mrb[0].mxu1 }
 0x60d   :  { %v5859_v46 = vpop.f32.mrb[1].mxu1 }
 0x610   :  { %v9250_v3 = vpop.f32.mrb[2].mxu1 }
 0x611   :  { %v5869_v30 = vpop.f32.mrb[3].mxu1 }
 0x614   :  { %v9253_v33 = vpop.f32.mrb[4].mxu1 }
 0x615   :  { %v5879_v36 = vpop.f32.mrb[5].mxu1 }
 0x618   :  { %v9256_v23 = vpop.f32.mrb[6].mxu1 }
 0x619   :  { %v5889_v0 = vpop.f32.mrb[7].mxu1 }
 0x61c   :  { %v9259_v59 = vpop.f32.mrb[8].mxu1 }
 0x61d   :  { %v5899_v37 = vpop.f32.mrb[9].mxu1 }
 0x620   :  { %v14258_v21 = vpop.f32.mrb[10].mxu1 }
 0x621   :  { %v14260_v15 = vpop.f32.mrb[11].mxu1 }
 0x624   :  { %v14262_v51 = vpop.f32.mrb[12].mxu1 }
 0x625   :  { %v14264_v53 = vpop.f32.mrb[13].mxu1 }
 0x628   :  { %v14266_v38 = vpop.f32.mrb[14].mxu1 }
 0x629   :  { %v14268_v50 = vpop.f32.mrb[15].mxu1 }
 0x654   :  { %v9387_v11 = vpop.f32.mrb[0].mxu0 }
 0x655   :  { %v9545_v24 = vadd.f32 %v9387_v11, %v9247_v61  ;;  %v6999_v28 = vpop.f32.mrb[1].mxu0 }
 0x656   :  { %v9546_v19 = vadd.f32 %v6999_v28, %v5859_v46  ;;  %v9756_v28 = vmov 1983009808  }
 0x657   :  { %v7099_v43 = vmul.f32 %v9545_v24, %v14273_v56 }
 0x658   :  { %v7098_v40 = vmul.f32 %v9546_v19, %v14273_v56  ;;  %v9390_v14 = vpop.f32.mrb[2].mxu0  ;;  %v7191_v19 = vunpack.c.l.s4 %v9756_v28 }
 0x659   :  { %v7119_v48 = vadd.f32 %v14278_v44, %v7099_v43  ;;  %v9547_v7 = vadd.f32 %v9390_v14, %v9250_v3  ;;  %v7009_v52 = vpop.f32.mrb[3].mxu0  ;;  %v7193_v43 = vlaneseq }
 0x65a   :  { %v7118_v4 = vadd.f32 %v14278_v44, %v7098_v40  ;;  %v9548_v1 = vadd.f32 %v7009_v52, %v5869_v30 }
 0x65b   :  { %v7135_v27 = vmax.f32 %v7119_v48, 0.0  ;;  %v7101_v63 = vmul.f32 %v9547_v7, %v14273_v56 }
 0x65c   :  { %v7134_v34 = vmax.f32 %v7118_v4, 0.0  ;;  %v7100_v54 = vmul.f32 %v9548_v1, %v14273_v56  ;;  %v9393_v58 = vpop.f32.mrb[4].mxu0 }
 0x65d   :  { %v7151_v31 = vsel %vm34_vm0, %v7135_v27, -inf  ;;  %v7121_v32 = vadd.f32 %v14278_v44, %v7101_v63  ;;  %v9549_v60 = vadd.f32 %v9393_v58, %v9253_v33  ;;  %v7019_v20 = vpop.f32.mrb[5].mxu0  ;;  %v7192_v58 = vunpack.c.0.s8 %v7191_v19 }
 0x65e   :  { %v7150_v42 = vsel %vm34_vm0, %v7134_v34, -inf  ;;  %v7120_v6 = vadd.f32 %v14278_v44, %v7100_v54  ;;  %v9550_v18 = vadd.f32 %v7019_v20, %v5879_v36 }
 0x65f   :  { %v7152_v2 = vmax.f32 %v7150_v42, %v7151_v31  ;;  %v7137_v17 = vmax.f32 %v7121_v32, 0.0  ;;  %v7103_v57 = vmul.f32 %v9549_v60, %v14273_v56  ;;  %v7194_v31 = vshrl.u32 %v7193_v43, 7 }
 0x660   :  { %v7136_v10 = vmax.f32 %v7120_v6, 0.0  ;;  %v7102_v41 = vmul.f32 %v9550_v18, %v14273_v56  ;;  %v9396_v62 = vpop.f32.mrb[6].mxu0 }
 0x661   :  { %7174 = vst.msk [vmem:[#allocation4] sm:$0xff] %vm34_vm0, %v7152_v2  ;;  %v7154_v39 = vsel %vm34_vm0, %v7137_v17, -inf  ;;  %v7123_v49 = vadd.f32 %v14278_v44, %v7103_v57  ;;  %v9551_v45 = vadd.f32 %v9396_v62, %v9256_v23  ;;  %v7029_v22 = vpop.f32.mrb[7].mxu0 }
 0x662   :  { %v7153_v25 = vsel %vm34_vm0, %v7136_v10, -inf  ;;  %v7122_v26 = vadd.f32 %v14278_v44, %v7102_v41  ;;  %v9552_v12 = vadd.f32 %v7029_v22, %v5889_v0 }
 0x663   :  { %v7155_v47 = vmax.f32 %v7153_v25, %v7154_v39  ;;  %v7139_v9 = vmax.f32 %v7123_v49, 0.0  ;;  %v7105_v16 = vmul.f32 %v9551_v45, %v14273_v56  ;;  %v14324_v25 = vsub.s32 %v7192_v58, %v7194_v31 }
 0x664   :  { %v7138_v55 = vmax.f32 %v7122_v26, 0.0  ;;  %v7104_v29 = vmul.f32 %v9552_v12, %v14273_v56  ;;  %v9399_v35 = vpop.f32.mrb[8].mxu0 }
 0x665   :  { %7175 = vst.msk [vmem:[#allocation4 + $0x8] sm:$0xff] %vm34_vm0, %v7155_v47  ;;  %v7157_v13 = vsel %vm34_vm0, %v7139_v9, -inf  ;;  %v7125_v5 = vadd.f32 %v14278_v44, %v7105_v16  ;;  %v9553_v8 = vadd.f32 %v9399_v35, %v9259_v59  ;;  %v7039_v61 = vpop.f32.mrb[9].mxu0 }
 0x666   :  { %v7156_v46 = vsel %vm34_vm0, %v7138_v55, -inf  ;;  %v7124_v3 = vadd.f32 %v14278_v44, %v7104_v29  ;;  %v9554_v30 = vadd.f32 %v7039_v61, %v5899_v37 }
 0x667   :  { %v7158_v33 = vmax.f32 %v7156_v46, %v7157_v13  ;;  %v7141_v36 = vmax.f32 %v7125_v5, 0.0  ;;  %v7107_v23 = vmul.f32 %v9553_v8, %v14273_v56 }
 0x668   :  { %v7140_v0 = vmax.f32 %v7124_v3, 0.0  ;;  %v7106_v11 = vmul.f32 %v9554_v30, %v14273_v56  ;;  %v9402_v24 = vpop.f32.mrb[10].mxu0  ;;  %v7221_v42 = vld [vmem:[#allocation4 + $0x3] sm:$0x1]  ;;  %v7253_v17 = vld [vmem:[#allocation4 + $0x4] sm:$0x1] }
 0x669   :  { %7176 = vst.msk [vmem:[#allocation4 + $0x10] sm:$0xff] %vm34_vm0, %v7158_v33  ;;  %v7160_v59 = vsel %vm34_vm0, %v7141_v36, -inf  ;;  %v7127_v40 = vadd.f32 %v14278_v44, %v7107_v23  ;;  %v9555_v14 = vadd.f32 %v9402_v24, %v14258_v21  ;;  %v7049_v37 = vpop.f32.mrb[11].mxu0  ;;  %v7255_v57 = vld [vmem:[#allocation4 + $0x5] sm:$0x1] }
 0x66a   :  { %v7159_v48 = vsel %vm34_vm0, %v7140_v0, -inf  ;;  %v7126_v7 = vadd.f32 %v14278_v44, %v7106_v11  ;;  %v9556_v52 = vadd.f32 %v7049_v37, %v14260_v15  ;;  %v7219_v15 = vld [vmem:[#allocation4 + $0x2] sm:$0x1]  ;;  %v7287_v39 = vld [vmem:[#allocation4 + $0x6] sm:$0x1]  ;;  %v7257_v29 = vmax.f32 %v7253_v17, %v7255_v57 }
 0x66b   :  { %v7161_v4 = vmax.f32 %v7159_v48, %v7160_v59  ;;  %v7143_v1 = vmax.f32 %v7127_v40, 0.0  ;;  %v7109_v27 = vmul.f32 %v9555_v14, %v14273_v56  ;;  %v7289_v49 = vld [vmem:[#allocation4 + $0x7] sm:$0x1]  ;;  %v7223_v26 = vmax.f32 %v7219_v15, %v7221_v42 }
 0x66c   :  { %v7142_v63 = vmax.f32 %v7126_v7, 0.0  ;;  %v7108_v34 = vmul.f32 %v9556_v52, %v14273_v56  ;;  %v9405_v54 = vpop.f32.mrb[12].mxu0  ;;  %v7322_v12 = vld [vmem:[#allocation4 + $0x8] sm:$0x1]  ;;  %v7324_v47 = vld [vmem:[#allocation4 + $0x9] sm:$0x1]  ;;  %v7291_v8 = vmax.f32 %v7287_v39, %v7289_v49  ;;  %v14344_v48 = vrot.slane %v7257_v29, %v14324_v25 }
 0x66d   :  { %7177 = vst.msk [vmem:[#allocation4 + $0x18] sm:$0xff] %vm34_vm0, %v7161_v4  ;;  %v7163_v21 = vsel %vm34_vm0, %v7143_v1, -inf  ;;  %v7129_v32 = vadd.f32 %v14278_v44, %v7109_v27  ;;  %v9557_v60 = vadd.f32 %v9405_v54, %v14262_v51  ;;  %v7059_v20 = vpop.f32.mrb[13].mxu0  ;;  %v7356_v3 = vld [vmem:[#allocation4 + $0xa] sm:$0x1]  ;;  %v7326_v0 = vmax.f32 %v7322_v12, %v7324_v47 }
 0x66e   :  { %v7162_v6 = vsel %vm34_vm0, %v7142_v63, -inf  ;;  %v7128_v18 = vadd.f32 %v14278_v44, %v7108_v34  ;;  %v9558_v2 = vadd.f32 %v7059_v20, %v14264_v53  ;;  %v7358_v30 = vld [vmem:[#allocation4 + $0xb] sm:$0x1]  ;;  %v14334_v24 = vld [vmem:[#allocation4 + $0xc] sm:$0x1]  ;;  %v14349_v27 = vrot.slane %v7291_v8, %v14324_v25 }
 0x66f   :  { %v7164_v10 = vmax.f32 %v7162_v6, %v7163_v21  ;;  %v7145_v41 = vmax.f32 %v7129_v32, 0.0  ;;  %v7111_v62 = vmul.f32 %v9557_v60, %v14273_v56  ;;  %v7392_v28 = vld [vmem:[#allocation4 + $0xd] sm:$0x1]  ;;  %v7424_v34 = vld [vmem:[#allocation4 + $0xe] sm:$0x1]  ;;  %v14352_v21 = vrot.slane %v7326_v0, %v14324_v25 }
 0x670   :  { %v7144_v45 = vmax.f32 %v7128_v18, 0.0  ;;  %v7110_v51 = vmul.f32 %v9558_v2, %v14273_v56  ;;  %v9408_v22 = vpop.f32.mrb[14].mxu0  ;;  %v7490_v61 = vld [vmem:[#allocation4 + $0x12] sm:$0x1]  ;;  %v7492_v46 = vld [vmem:[#allocation4 + $0x13] sm:$0x1]  ;;  %v7360_v32 = vmax.f32 %v7356_v3, %v7358_v30  ;;  %v7394_v18 = vmax.f32 %v14334_v24, %v7392_v28 }
 0x671   :  { %7178 = vst.msk [vmem:[#allocation4 + $0x20] sm:$0xff] %vm34_vm0, %v7164_v10  ;;  %v7166_v53 = vsel %vm34_vm0, %v7145_v41, -inf  ;;  %v7131_v9 = vadd.f32 %v14278_v44, %v7111_v62  ;;  %v9559_v16 = vadd.f32 %v9408_v22, %v14266_v38  ;;  %v7069_v55 = vpop.f32.mrb[15].mxu0  ;;  %v7523_v11 = vld [vmem:[#allocation4 + $0x14] sm:$0x1]  ;;  %v7494_v7 = vmax.f32 %v7490_v61, %v7492_v46 }
 0x672   :  { %v7165_v35 = vsel %vm34_vm0, %v7144_v45, -inf  ;;  %v7130_v13 = vadd.f32 %v14278_v44, %v7110_v51  ;;  %v9560_v5 = vadd.f32 %v7069_v55, %v14268_v50  ;;  %v7525_v38 = vld [vmem:[#allocation4 + $0x15] sm:$0x1]  ;;  %v14338_v50 = vrot.slane %v7223_v26, %v14324_v25  ;;  %v7556_v59 = vld [vmem:[#allocation4 + $0x16] sm:$0x1] }
 0x673   :  { %v7167_v33 = vmax.f32 %v7165_v35, %v7166_v53  ;;  %v7147_v36 = vmax.f32 %v7131_v9, 0.0  ;;  %v7113_v23 = vmul.f32 %v9559_v16, %v14273_v56  ;;  %v7558_v40 = vld [vmem:[#allocation4 + $0x17] sm:$0x1]  ;;  %v7527_v63 = vmax.f32 %v7523_v11, %v7525_v38  ;;  %v7426_v54 = vld [vmem:[#allocation4 + $0xf] sm:$0x1] }
 0x674   :  { %v7146_v19 = vmax.f32 %v7130_v13, 0.0  ;;  %v7112_v43 = vmul.f32 %v9560_v5, %v14273_v56  ;;  %v7590_v52 = vld [vmem:[#allocation4 + $0x18] sm:$0x1]  ;;  %v7592_v4 = vld [vmem:[#allocation4 + $0x19] sm:$0x1]  ;;  %v14358_v62 = vrot.slane %v7494_v7, %v14324_v25  ;;  %v7428_v39 = vmax.f32 %v7424_v34, %v7426_v54 }
 0x675   :  { %7179 = vst.msk [vmem:[#allocation4 + $0x28] sm:$0xff] %vm34_vm0, %v7167_v33  ;;  %v7169_v14 = vsel %vm34_vm0, %v7147_v36, -inf  ;;  %v7133_v37 = vadd.f32 %v14278_v44, %v7113_v23  ;;  %v7623_v60 = vld [vmem:[#allocation4 + $0x1a] sm:$0x1]  ;;  %v7625_v20 = vld [vmem:[#allocation4 + $0x1b] sm:$0x1]  ;;  %v7594_v2 = vmax.f32 %v7590_v52, %v7592_v4  ;;  %v14362_v12 = vrot.slane %v7527_v63, %v14324_v25 }
 0x676   :  { %v7168_v56 = vsel %vm34_vm0, %v7146_v19, -inf  ;;  %v7132_v1 = vadd.f32 %v14278_v44, %v7112_v43  ;;  %v7560_v44 = vmax.f32 %v7556_v59, %v7558_v40  ;;  %v7656_v49 = vld [vmem:[#allocation4 + $0x1c] sm:$0x1]  ;;  %v7627_v47 = vmax.f32 %v7623_v60, %v7625_v20  ;;  %v7658_v29 = vld [vmem:[#allocation4 + $0x1d] sm:$0x1] }
 0x677   :  { %v7170_v58 = vmax.f32 %v7168_v56, %v7169_v14  ;;  %v7149_v31 = vmax.f32 %v7133_v37, 0.0  ;;  %v14366_v55 = vrot.slane %v7360_v32, %v14324_v25  ;;  %v14368_v35 = vld [vmem:[#allocation4 + $0x1e] sm:$0x1]  ;;  %v14370_v13 = vld [vmem:[#allocation4 + $0x1f] sm:$0x1]  ;;  %v14377_v30 = vrot.slane %v7394_v18, %v14324_v25 }
 0x678   :  { %v7148_v15 = vmax.f32 %v7132_v1, 0.0  ;;  %v7220_v42 = vld [vmem:[#allocation4 + $0x22] sm:$0x1]  ;;  %v7222_v6 = vld [vmem:[#allocation4 + $0x23] sm:$0x1]  ;;  %v14374_v3 = vrot.slane %v7560_v44, %v14324_v25  ;;  %v14380_v33 = vrot.slane %v7594_v2, %v14324_v25  ;;  %v14385_v24 = vrot.slane %v7428_v39, %v14324_v25 }
 0x679   :  { %7180 = vst.msk [vmem:[#allocation4 + $0x30] sm:$0xff] %vm34_vm0, %v7170_v58  ;;  %v7172_v17 = vsel %vm34_vm0, %v7149_v31, -inf  ;;  %v7224_v57 = vmax.f32 %v7220_v42, %v7222_v6  ;;  %v7254_v10 = vld [vmem:[#allocation4 + $0x24] sm:$0x1]  ;;  %v7256_v41 = vld [vmem:[#allocation4 + $0x25] sm:$0x1]  ;;  %v14388_v59 = vrot.slane %v7627_v47, %v14324_v25  ;;  %v7660_v40 = vmax.f32 %v7656_v49, %v7658_v29 }
 0x67a   :  { %v7171_v45 = vsel %vm34_vm0, %v7148_v15, -inf  ;;  %v7258_v51 = vmax.f32 %v7254_v10, %v7256_v41  ;;  %v7288_v22 = vld [vmem:[#allocation4 + $0x26] sm:$0x1]  ;;  %v7290_v26 = vld [vmem:[#allocation4 + $0x27] sm:$0x1]  ;;  %v7693_v56 = vmax.f32 %v14368_v35, %v14370_v13 }
 0x67b   :  { %v7173_v53 = vmax.f32 %v7171_v45, %v7172_v17  ;;  %v7240_v9 = vrot.slane %v7224_v57, %v14324_v25  ;;  %v7292_v16 = vmax.f32 %v7288_v22, %v7290_v26  ;;  %v14390_v14 = vld [vmem:[#allocation4] sm:$0x1]  ;;  %v14392_v37 = vld [vmem:[#allocation4 + $0x1] sm:$0x1]  ;;  %v14414_v10 = vrot.slane %v7660_v40, %v14324_v25 }
 0x67c   :  { %v7274_v5 = vrot.slane %v7258_v51, %v14324_v25  ;;  %v7323_v8 = vld [vmem:[#allocation4 + $0x28] sm:$0x1]  ;;  %v7325_v61 = vld [vmem:[#allocation4 + $0x29] sm:$0x1]  ;;  %v7357_v46 = vld [vmem:[#allocation4 + $0x2a] sm:$0x1]  ;;  %v7186_v51 = vmax.f32 %v14390_v14, %v14392_v37 }
 0x67d   :  { %7181 = vst.msk [vmem:[#allocation4 + $0x38] sm:$0xff] %vm34_vm0, %v7173_v53  ;;  %v7243_v36 = vrot.slane %v7240_v9, 7  ;;  %v7308_v23 = vrot.slane %v7292_v16, %v14324_v25  ;;  %v7327_v0 = vmax.f32 %v7323_v8, %v7325_v61  ;;  %v7359_v11 = vld [vmem:[#allocation4 + $0x2b] sm:$0x1]  ;;  %v7391_v38 = vld [vmem:[#allocation4 + $0x2c] sm:$0x1] }
 0x67e   :  { %v7277_v28 = vrot.slane %v7274_v5, 7  ;;  %v7361_v19 = vmax.f32 %v7357_v46, %v7359_v11  ;;  %v7393_v43 = vld [vmem:[#allocation4 + $0x2d] sm:$0x1]  ;;  %v14399_v1 = vld [vmem:[#allocation4 + $0x20] sm:$0x1] }
 0x67f   :  { %v7244_v7 = vsel %vm7209_vm2, %v7243_v36, %v14338_v50  ;;  %v7311_v52 = vrot.slane %v7308_v23, 7  ;;  %v7343_v4 = vrot.slane %v7327_v0, %v14324_v25  ;;  %v14401_v63 = vld [vmem:[#allocation4 + $0x21] sm:$0x1]  ;;  %v7395_v60 = vmax.f32 %v7391_v38, %v7393_v43  ;;  %v7425_v49 = vld [vmem:[#allocation4 + $0x2e] sm:$0x1] }
 0x680   :  { %v7245_v34 = vsel %vm7211_vm3, %v7243_v36, %v7244_v7  ;;  %v7278_v54 = vsel %vm7209_vm2, %v7277_v28, %v14344_v48  ;;  %v7491_v58 = vld [vmem:[#allocation4 + $0x32] sm:$0x1]  ;;  %v7493_v31 = vld [vmem:[#allocation4 + $0x33] sm:$0x1]  ;;  %v7524_v32 = vld [vmem:[#allocation4 + $0x34] sm:$0x1]  ;;  %v7377_v50 = vrot.slane %v7361_v19, %v14324_v25  ;;  %v7187_v16 = vmax.f32 %v14399_v1, %v14401_v63 }
 0x681   :  { %v7246_v20 = vsel %vm7213_vm4, %v7243_v36, %v7245_v34  ;;  %v7279_v15 = vsel %vm7211_vm3, %v7277_v28, %v7278_v54  ;;  %v7312_v42 = vsel %vm7209_vm2, %v7311_v52, %v14349_v27  ;;  %v7495_v6 = vmax.f32 %v7491_v58, %v7493_v31  ;;  %v7526_v44 = vld [vmem:[#allocation4 + $0x35] sm:$0x1]  ;;  %v7557_v18 = vld [vmem:[#allocation4 + $0x36] sm:$0x1]  ;;  %v7559_v2 = vld [vmem:[#allocation4 + $0x37] sm:$0x1] }
 0x682   :  { %v7247_v17 = vsel %vm7215_vm5, %v7243_v36, %v7246_v20  ;;  %v7313_v48 = vsel %vm7211_vm3, %v7311_v52, %v7312_v42  ;;  %v7346_v57 = vrot.slane %v7343_v4, 7  ;;  %v7280_v41 = vsel %vm7213_vm4, %v7277_v28, %v7279_v15  ;;  %v7427_v45 = vld [vmem:[#allocation4 + $0x2f] sm:$0x1]  ;;  %v14448_v63 = vld [vmem:[#allocation4 + $0x10] sm:$0x1] }
 0x683   :  { %7248 = vrot.lane.b32.xlu0 %v7247_v17, %s9757_s9  ;;  %v7511_v39 = vrot.slane %v7495_v6, %v14324_v25  ;;  %v7528_v27 = vmax.f32 %v7524_v32, %v7526_v44  ;;  %v14423_v26 = vrot.slane %v7377_v50, 7  ;;  %v7561_v47 = vmax.f32 %v7557_v18, %v7559_v2 }
 0x684   :  { %v7347_v22 = vsel %vm7209_vm2, %v7346_v57, %v14352_v21  ;;  %v7591_v53 = vld [vmem:[#allocation4 + $0x38] sm:$0x1]  ;;  %v7593_v9 = vld [vmem:[#allocation4 + $0x39] sm:$0x1]  ;;  %v7314_v29 = vsel %vm7213_vm4, %v7311_v52, %v7313_v48  ;;  %v7411_v61 = vrot.slane %v7395_v60, %v14324_v25  ;;  %v7281_v46 = vsel %vm7215_vm5, %v7277_v28, %v7280_v41  ;;  %v7624_v1 = vld [vmem:[#allocation4 + $0x3a] sm:$0x1] }
 0x685   :  { %v7514_v5 = vrot.slane %v7511_v39, 7  ;;  %v7544_v8 = vrot.slane %v7528_v27, %v14324_v25  ;;  %v7348_v36 = vsel %vm7211_vm3, %v7346_v57, %v7347_v22  ;;  %v7577_v21 = vrot.slane %v7561_v47, %v14324_v25  ;;  %v7626_v31 = vld [vmem:[#allocation4 + $0x3b] sm:$0x1]  ;;  %v7657_v32 = vld [vmem:[#allocation4 + $0x3c] sm:$0x1] }
 0x686   :  { %v7595_v23 = vmax.f32 %v7591_v53, %v7593_v9  ;;  %v7381_v38 = vsel %vm7209_vm2, %v14423_v26, %v14366_v55  ;;  %v7429_v19 = vmax.f32 %v7425_v49, %v7427_v45  ;;  %v7315_v43 = vsel %vm7215_vm5, %v7311_v52, %v7314_v29  ;;  %v14450_v55 = vld [vmem:[#allocation4 + $0x11] sm:$0x1]  ;;  %v7690_v20 = vld [vmem:[#allocation4 + $0x3e] sm:$0x1]  ;;  %v7692_v15 = vld [vmem:[#allocation4 + $0x3f] sm:$0x1] }
 0x687   :  { %7282 = vrot.lane.b32.xlu0 %v7281_v46, %s9758_s10  ;;  %v7515_v0 = vsel %vm7209_vm2, %v7514_v5, %v14358_v62  ;;  %v7547_v11 = vrot.slane %v7544_v8, 7  ;;  %v7580_v40 = vrot.slane %v7577_v21, 7  ;;  %v14441_v14 = vrot.slane %v7411_v61, 7  ;;  %v7462_v22 = vld [vmem:[#allocation4 + $0x31] sm:$0x1] }
 0x688   :  { %v7516_v28 = vsel %vm7211_vm3, %v7514_v5, %v7515_v0  ;;  %v7349_v7 = vsel %vm7213_vm4, %v7346_v57, %v7348_v36  ;;  %v7611_v4 = vrot.slane %v7595_v23, %v14324_v25  ;;  %v7382_v54 = vsel %vm7211_vm3, %v14423_v26, %v7381_v38 }
 0x689   :  { %v7517_v37 = vsel %vm7213_vm4, %v7514_v5, %v7516_v28  ;;  %v7548_v62 = vsel %vm7209_vm2, %v7547_v11, %v14362_v12  ;;  %v7581_v58 = vsel %vm7209_vm2, %v7580_v40, %v14374_v3  ;;  %v7659_v12 = vld [vmem:[#allocation4 + $0x3d] sm:$0x1]  ;;  %v7196_v42 = vrot.slane %v7186_v51, %v14324_v25  ;;  %v7460_v51 = vld [vmem:[#allocation4 + $0x30] sm:$0x1] }
 0x68a   :  { %v7518_v52 = vsel %vm7215_vm5, %v7514_v5, %v7517_v37  ;;  %v7549_v34 = vsel %vm7211_vm3, %v7547_v11, %v7548_v62  ;;  %v7614_v60 = vrot.slane %v7611_v4, 7  ;;  %v7203_v6 = vrot.slane %v7187_v16, %v14324_v25 }
 0x68b   :  { %7316 = vrot.lane.b32.xlu0 %v7315_v43, %s9759_s11  ;;  %7519 = vrot.lane.b32.xlu1 %v7518_v52, %s9757_s9  ;;  %v7550_v50 = vsel %vm7213_vm4, %v7547_v11, %v7549_v34  ;;  %v7582_v44 = vsel %vm7211_vm3, %v7580_v40, %v7581_v58  ;;  %v7415_v3 = vsel %vm7209_vm2, %v14441_v14, %v14377_v30  ;;  %v7740_v43 = vld [vmem:[%s14732_s2 + $0x88] sm:$0xff]  ;;  %v7742_v52 = vld [vmem:[%s14732_s2 + $0x98] sm:$0xff] }
 0x68c   :  { %v7445_v18 = vrot.slane %v7429_v19, %v14324_v25  ;;  %v7463_v2 = vmax.f32 %v14448_v63, %v14450_v55  ;;  %v7350_v17 = vsel %vm7215_vm5, %v7346_v57, %v7349_v7  ;;  %v7383_v48 = vsel %vm7213_vm4, %v14423_v26, %v7382_v54  ;;  %v7739_v19 = vld [vmem:[%s14732_s2 + $0x80] sm:$0xff]  ;;  %v7724_v7 = vld [vmem:[%s14732_s2 + $0x8] sm:$0xff]  ;;  %v7741_v55 = vld [vmem:[%s14732_s2 + $0x90] sm:$0xff] }
 0x68d   :  { %v7615_v41 = vsel %vm7209_vm2, %v7614_v60, %v14380_v33  ;;  %v7628_v39 = vmax.f32 %v7624_v1, %v7626_v31  ;;  %v7551_v27 = vsel %vm7215_vm5, %v7547_v11, %v7550_v50  ;;  %v7661_v45 = vmax.f32 %v7657_v32, %v7659_v12  ;;  %v7726_v54 = vld [vmem:[%s14732_s2 + $0x18] sm:$0xff]  ;;  %v7743_v32 = vld [vmem:[%s14732_s2 + $0xa0] sm:$0xff]  ;;  %v7744_v12 = vld [vmem:[%s14732_s2 + $0xa8] sm:$0xff] }
 0x68e   :  { %v14476_v49 = vrot.slane %v7445_v18, 7  ;;  %v7694_v30 = vmax.f32 %v7690_v20, %v7692_v15  ;;  %v7583_v57 = vsel %vm7213_vm4, %v7580_v40, %v7582_v44  ;;  %v7416_v47 = vsel %vm7211_vm3, %v14441_v14, %v7415_v3 }
 0x68f   :  { %7351 = vrot.lane.b32.xlu0 %v7350_v17, %s9760_s12  ;;  %7552 = vrot.lane.b32.xlu1 %v7551_v27, %s9758_s10  ;;  %v7644_v33 = vrot.slane %v7628_v39, %v14324_v25  ;;  %v7208_v53 = vrot.slane %v7203_v6, 7  ;;  %v7384_v9 = vsel %vm7215_vm5, %v14423_v26, %v7383_v48  ;;  %v7616_v16 = vsel %vm7211_vm3, %v7614_v60, %v7615_v41  ;;  %v7728_v17 = vld [vmem:[%s14732_s2 + $0x28] sm:$0xff]  ;;  %v7745_v39 = vld [vmem:[%s14732_s2 + $0xb0] sm:$0xff] }
 0x690   :  { %v7449_v29 = vsel %vm7209_vm2, %v14476_v49, %v14385_v24  ;;  %v7677_v5 = vrot.slane %v7661_v45, %v14324_v25  ;;  %v7710_v61 = vrot.slane %v7694_v30, %v14324_v25  ;;  %v7464_v36 = vmax.f32 %v7460_v51, %v7462_v22  ;;  %v7746_v27 = vld [vmem:[%s14732_s2 + $0xb8] sm:$0xff] }
 0x691   :  { %v7647_v8 = vrot.slane %v7644_v33, 7  ;;  %v7210_v46 = vsel %vm7209_vm2, %v7208_v53, %v7196_v42  ;;  %v7584_v21 = vsel %vm7215_vm5, %v7580_v40, %v7583_v57  ;;  %v7417_v23 = vsel %vm7213_vm4, %v14441_v14, %v7416_v47  ;;  %v7729_v57 = vld [vmem:[%s14732_s2 + $0x30] sm:$0xff]  ;;  %v7730_v47 = vld [vmem:[%s14732_s2 + $0x38] sm:$0xff] }
 0x692   :  { %v14496_v26 = vrot.slane %v7677_v5, 7  ;;  %v7212_v0 = vsel %vm7211_vm3, %v7208_v53, %v7210_v46  ;;  %v7617_v24 = vsel %vm7213_vm4, %v7614_v60, %v7616_v16  ;;  %v7450_v28 = vsel %vm7211_vm3, %v14476_v49, %v7449_v29  ;;  %v7749_v46 = vld [vmem:[%s14732_s2 + $0xd0] sm:$0xff] }
 0x693   :  { %7385 = vrot.lane.b32.xlu0 %v7384_v9, %s9761_s13  ;;  %7585 = vrot.lane.b32.xlu1 %v7584_v21, %s9759_s11  ;;  %v7648_v11 = vsel %vm7209_vm2, %v7647_v8, %v14388_v59  ;;  %v7214_v38 = vsel %vm7213_vm4, %v7208_v53, %v7212_v0  ;;  %v7723_v59 = vld [vmem:[%s14732_s2] sm:$0xff]  ;;  %v7703_v4 = vrot.slane %v7693_v56, %v14324_v25  ;;  %v7713_v1 = vrot.slane %v7710_v61, 7  ;;  %v7725_v56 = vld [vmem:[%s14732_s2 + $0x10] sm:$0xff] }
 0x694   :  { %v7649_v40 = vsel %vm7211_vm3, %v7647_v8, %v7648_v11  ;;  %v7216_v37 = vsel %vm7215_vm5, %v7208_v53, %v7214_v38  ;;  %v7681_v62 = vsel %vm7209_vm2, %v14496_v26, %v14414_v10  ;;  %v7480_v63 = vrot.slane %v7464_v36, %v14324_v25  ;;  %v7747_v53 = vld [vmem:[%s14732_s2 + $0xc0] sm:$0xff]  ;;  %v7748_v9 = vld [vmem:[%s14732_s2 + $0xc8] sm:$0xff]  ;;  %v7750_v36 = vld [vmem:[%s14732_s2 + $0xd8] sm:$0xff] }
 0x695   :  { %7218 = vst.msk [vmem:[#allocation5] sm:$0x3] %vm36_vm1, %v7216_v37  ;;  %v7418_v10 = vsel %vm7215_vm5, %v14441_v14, %v7417_v23  ;;  %v7618_v34 = vsel %vm7215_vm5, %v7614_v60, %v7617_v24  ;;  %v7473_v35 = vrot.slane %v7463_v2, %v14324_v25  ;;  %v9489_v13 = vpack.c.bf16 %v7740_v43, %v7739_v19  ;;  %v7727_v2 = vld [vmem:[%s14732_s2 + $0x20] sm:$0xff]  ;;  %v7732_v61 = vld [vmem:[%s14732_s2 + $0x48] sm:$0xff]  ;;  %v7734_v0 = vld [vmem:[%s14732_s2 + $0x58] sm:$0xff] }
 0x696   :  { %v7451_v14 = vsel %vm7213_vm4, %v14476_v49, %v7450_v28  ;;  %v7650_v58 = vsel %vm7213_vm4, %v7647_v8, %v7649_v40  ;;  %v7483_v25 = vrot.slane %v7480_v63, 7  ;;  %v9491_v31 = vpack.c.bf16 %v7724_v7, %v7723_v59  ;;  %v7751_v24 = vld [vmem:[%s14732_s2 + $0xe0] sm:$0xff]  ;;  %v7752_v11 = vld [vmem:[%s14732_s2 + $0xe8] sm:$0xff]  ;;  %v7753_v40 = vld [vmem:[%s14732_s2 + $0xf0] sm:$0xff] }
 0x697   :  { %7419 = vrot.lane.b32.xlu0 %v7418_v10, %s9762_s29  ;;  %7619 = vrot.lane.b32.xlu1 %v7618_v34, %s9760_s12  ;;  %v7682_v50 = vsel %vm7211_vm3, %v14496_v26, %v7681_v62  ;;  %v9493_v60 = vpack.c.bf16 %v7742_v52, %v7741_v55  ;;  %v7714_v20 = vsel %vm7209_vm2, %v7713_v1, %v7703_v4  ;;  %s9763_s12 = smov 112   ;;  %v7735_v43 = vld [vmem:[%s14732_s2 + $0x60] sm:$0xff]  ;;  %v7736_v28 = vld [vmem:[%s14732_s2 + $0x68] sm:$0xff] }
 0x698   :  { %9490 = vmatprep.subr.bf16.mxu1 %v9489_v13  ;;  %v7484_v15 = vsel %vm7209_vm2, %v7483_v25, %v7473_v35  ;;  %v9495_v42 = vpack.c.bf16 %v7726_v54, %v7725_v56  ;;  %v7452_v6 = vsel %vm7215_vm5, %v14476_v49, %v7451_v14  ;;  %v7651_v44 = vsel %vm7215_vm5, %v7647_v8, %v7650_v58  ;;  %v7731_v8 = vld [vmem:[%s14732_s2 + $0x40] sm:$0xff]  ;;  %v7754_v37 = vld [vmem:[%s14732_s2 + $0xf8] sm:$0xff]  ;;  %v7737_v62 = vld [vmem:[%s14732_s2 + $0x70] sm:$0xff] }
 0x699   :  { %9492 = vmatpush3.bf16.msra.mxu1 %v9491_v31  ;;  %v7485_v3 = vsel %vm7211_vm3, %v7483_v25, %v7484_v15  ;;  %v9497_v18 = vpack.c.bf16 %v7744_v12, %v7743_v32  ;;  %v7683_v48 = vsel %vm7213_vm4, %v14496_v26, %v7682_v50  ;;  %v7715_v49 = vsel %vm7211_vm3, %v7713_v1, %v7714_v20  ;;  %v7738_v4 = vld [vmem:[%s14732_s2 + $0x78] sm:$0xff]  ;;  %v7842_v20 = vld [vmem:[%s14733_s3] sm:$0xff]  ;;  %v7843_v15 = vld [vmem:[%s14733_s3 + $0x8] sm:$0xff] }
 0x69a   :  { %9494 = vmatprep.subr.bf16.mxu1 %v9493_v60  ;;  %v7486_v41 = vsel %vm7213_vm4, %v7483_v25, %v7485_v3  ;;  %v9499_v30 = vpack.c.bf16 %v7728_v17, %v7727_v2  ;;  %v7684_v51 = vsel %vm7215_vm5, %v14496_v26, %v7683_v48  ;;  %v9501_v22 = vpack.c.bf16 %v7746_v27, %v7745_v39  ;;  %v7733_v26 = vld [vmem:[%s14732_s2 + $0x50] sm:$0xff]  ;;  %v8918_v17 = vld [vmem:[%s14734_s4 + $0x4] ss:$0 sm:$0xff]  ;;  %v8923_v27 = vld [vmem:[%s14733_s3 + $0x28] sm:$0xff] }
 0x69b   :  { %7453 = vrot.lane.b32.xlu0 %v7452_v6, %s9763_s12  ;;  %7652 = vrot.lane.b32.xlu1 %v7651_v44, %s9761_s13  ;;  %v7487_v45 = vsel %vm7215_vm5, %v7483_v25, %v7486_v41  ;;  %v7716_v33 = vsel %vm7213_vm4, %v7713_v1, %v7715_v49  ;;  %v9503_v16 = vpack.c.bf16 %v7730_v47, %v7729_v57  ;;  %v9764_v60 = vmov 0.0|0.0   ;;  %v7845_v44 = vld [vmem:[%s14733_s3 + $0x18] sm:$0xff]  ;;  %v8922_v39 = vld [vmem:[%s14733_s3 + $0x20] sm:$0xff] }
 0x69c   :  { %7489 = vst.msk [vmem:[#allocation5 + $0x2] sm:$0x3] %vm36_vm1, %v7487_v45  ;;  %v7717_v29 = vsel %vm7215_vm5, %v7713_v1, %v7716_v33  ;;  %v9505_v5 = vpack.c.bf16 %v7748_v9, %v7747_v53  ;;  %v9507_v21 = vpack.c.bf16 %v7732_v61, %v7731_v8  ;;  %v9509_v23 = vpack.c.bf16 %v7750_v36, %v7749_v46  ;;  %v8920_v47 = vld [vmem:[%s14734_s4 + $0x5] ss:$0 sm:$0xff]  ;;  %v8929_v53 = vld [vmem:[%s14733_s3 + $0x48] sm:$0xff]  ;;  %v8930_v61 = vld [vmem:[%s14733_s3 + $0x50] sm:$0xff] }
 0x69d   :  { %9496 = vmatpush3.bf16.msra.mxu1 %v9495_v42  ;;  %v9511_v38 = vpack.c.bf16 %v7734_v0, %v7733_v26  ;;  %v9513_v19 = vpack.c.bf16 %v7752_v11, %v7751_v24  ;;  %v9515_v59 = vpack.c.bf16 %v7736_v28, %v7735_v43  ;;  %v9517_v7 = vpack.c.bf16 %v7754_v37, %v7753_v40  ;;  %v7844_v42 = vld [vmem:[%s14733_s3 + $0x10] sm:$0xff]  ;;  %v8928_v33 = vld [vmem:[%s14733_s3 + $0x40] sm:$0xff]  ;;  %v8931_v46 = vld [vmem:[%s14733_s3 + $0x58] sm:$0xff] }
 0x69e   :  { %9498 = vmatprep.subr.bf16.mxu1 %v9497_v18  ;;  %v9519_v1 = vpack.c.bf16 %v7738_v4, %v7737_v62  ;;  %v9522_v6 = vpack.c.bf16 %v7843_v15, %v7842_v20  ;;  %v15319_v3 = vmov 0.0   ;;  %v9525_v18 = vpack.c.bf16 %v7845_v44, %v7844_v42  ;;  %v8935_v26 = vld [vmem:[%s14733_s3 + $0x68] sm:$0xff]  ;;  %v8936_v43 = vld [vmem:[%s14733_s3 + $0x70] sm:$0xff]  ;;  %v8937_v28 = vld [vmem:[%s14733_s3 + $0x78] sm:$0xff] }
 0x69f   :  { %7685 = vrot.lane.b32.xlu1 %v7684_v51, %s9762_s29  ;;  %v9528_v45 = vpack.c.bf16 %v8923_v27, %v8922_v39  ;;  %v8924_v51 = vld [vmem:[%s14733_s3 + $0x30] sm:$0xff]  ;;  %v9537_v36 = vpack.c.bf16 %v8931_v46, %v8930_v61  ;;  %v9543_v40 = vpack.c.bf16 %v8937_v28, %v8936_v43  ;;  %v8932_v37 = vld [vmem:[%s14734_s4 + $0x7] ss:$0 sm:$0xff] }
 0x6a1   :  { %9500 = vmatpush3.bf16.msra.mxu1 %v9499_v30 }
 0x6a2   :  { %9502 = vmatprep.subr.bf16.mxu1 %v9501_v22  ;;  %v8925_v22 = vld [vmem:[%s14733_s3 + $0x38] sm:$0xff] }
 0x6a3   :  { %7718 = vrot.lane.b32.xlu1 %v7717_v29, %s9763_s12  ;;  %v9531_v57 = vpack.c.bf16 %v8925_v22, %v8924_v51  ;;  %s9766_s12 = smov [#allocation6]  }
 0x6a4   :  { %s8185_s14 = sshll.u32 %s9766_s12, 4  ;;  %s8186_s14 = int_to_ptr.vmem [resolvable:$true] %s8185_s14 }
 0x6a5   :  { %9504 = vmatpush3.bf16.msra.mxu1 %v9503_v16  ;;  %p9735_p1 = scmp.lt.s32.totalorder %s8186_s14, %s8186_s14 }
 0x6a6   :  { %9506 = vmatprep.subr.bf16.mxu1 %v9505_v5  ;;  %v9534_v5 = vpack.c.bf16 %v8929_v53, %v8928_v33 }
 0x6a9   :  { %9508 = vmatpush3.bf16.msra.mxu1 %v9507_v21  ;;  %v8926_v21 = vld [vmem:[%s14734_s4 + $0x6] ss:$0 sm:$0xff] }
 0x6aa   :  { %9510 = vmatprep.subr.bf16.mxu1 %v9509_v23  ;;  %v8934_v23 = vld [vmem:[%s14733_s3 + $0x60] sm:$0xff]  ;;  %s9730_s3 = scalar_lea.vmem %s8186_s14, 32 }
 0x6ab   :  { %p9731_p0 = scmp.ne.s32.totalorder %s8186_s14, %s9730_s3  ;;  %p9736_p2 = scmp.lt.s32.totalorder %s9730_s3, %s9730_s3 }
 0x6ad   :  { %9512 = vmatpush3.bf16.msra.mxu1 %v9511_v38  ;;  %v9540_v38 = vpack.c.bf16 %v8935_v26, %v8934_v23  ;;  %p9737_p3 = por %p9736_p2, %p9735_p1 }
 0x6ae   :  { %9514 = vmatprep.subr.bf16.mxu1 %v9513_v19 }
 0x6af   :  { %p9738_p4 = pnand %p9737_p3, %p9731_p0 }
 0x6b1   :  { %9516 = vmatpush3.bf16.msra.mxu1 %v9515_v59 }
 0x6b2   :  { %9518 = vmatprep.subr.bf16.mxu1 %v9517_v7 }
 0x6b5   :  { %9520 = vmatpush3.bf16.msra.mxu1 %v9519_v1  ;;  %v8938_v1 = vld [vmem:[%s14734_s4 + $0x8] ss:$0 sm:$0xff] }
 0x6b6   :  { %9521 = vmatprep.subr.bf16.mxu1 %v9764_v60 }
 0x6f5   :  { %v7249_v63 = vpop.permute.xlu0 %7248 }
 0x6f6   :  { %7252 = vst.msk [vmem:[#allocation5] sm:$0x3] %vm7251_vm6, %v7249_v63 }
 0x6f9   :  { %v7283_v55 = vpop.permute.xlu0 %7282 }
 0x6fa   :  { %7286 = vst.msk [vmem:[#allocation5] sm:$0x3] %vm7285_vm7, %v7283_v55 }
 0x6fd   :  { %v7317_v52 = vpop.permute.xlu0 %7316  ;;  %v7520_v10 = vpop.permute.xlu1 %7519 }
 0x6fe   :  { %7320 = vst.msk [vmem:[#allocation5] sm:$0x3] %vm7319_vm8, %v7317_v52 }
 0x6ff   :  { %7522 = vst.msk [vmem:[#allocation5 + $0x2] sm:$0x3] %vm7251_vm6, %v7520_v10 }
 0x701   :  { %v7352_v34 = vpop.permute.xlu0 %7351  ;;  %v7553_v35 = vpop.permute.xlu1 %7552 }
 0x702   :  { %7355 = vst.msk [vmem:[#allocation5] sm:$0x3] %vm7354_vm9, %v7352_v34 }
 0x703   :  { %7555 = vst.msk [vmem:[#allocation5 + $0x2] sm:$0x3] %vm7285_vm7, %v7553_v35 }
 0x705   :  { %v7386_v13 = vpop.permute.xlu0 %7385  ;;  %v7586_v56 = vpop.permute.xlu1 %7585 }
 0x706   :  { %7389 = vst.msk [vmem:[#allocation5] sm:$0x3] %vm7388_vm10, %v7386_v13 }
 0x707   :  { %7588 = vst.msk [vmem:[#allocation5 + $0x2] sm:$0x3] %vm7319_vm8, %v7586_v56 }
 0x709   :  { %v7420_v54 = vpop.permute.xlu0 %7419  ;;  %v7620_v14 = vpop.permute.xlu1 %7619 }
 0x70a   :  { %7423 = vst.msk [vmem:[#allocation5] sm:$0x3] %vm7422_vm11, %v7420_v54 }
 0x70b   :  { %7622 = vst.msk [vmem:[#allocation5 + $0x2] sm:$0x3] %vm7354_vm9, %v7620_v14 }
 0x70d   :  { %v7454_v58 = vpop.permute.xlu0 %7453  ;;  %v7653_v25 = vpop.permute.xlu1 %7652 }
 0x70e   :  { %7457 = vst.msk [vmem:[#allocation5] sm:$0x3] %vm7456_vm12, %v7454_v58 }
 0x70f   :  { %7655 = vst.msk [vmem:[#allocation5 + $0x2] sm:$0x3] %vm7388_vm10, %v7653_v25 }
 0x711   :  { %v7686_v31 = vpop.permute.xlu1 %7685 }
 0x712   :  { %7688 = vst.msk [vmem:[#allocation5 + $0x2] sm:$0x3] %vm7422_vm11, %v7686_v31 }
 0x715   :  { %v7719_v32 = vpop.permute.xlu1 %7718 }
 0x716   :  { %7721 = vst.msk [vmem:[#allocation5 + $0x2] sm:$0x3] %vm7456_vm12, %v7719_v32 }
 0x71d   :  { %v8919_v12 = vld.sshfl [vmem:[#allocation5] sm:$0x33 pattern:$0x76325410] }
 0x71e   :  { %v7768_v50 = vcombine.high %v8919_v12, %v8919_v12 }
 0x720   :  { %7835 = vmatprep.mubr.f32.mxu1 %v7768_v50 }
 0x721   :  { %7836 = vmatmul.mubr.f32.vlgmr.msra.gmra.mrb[16].mxu1 %v8919_v12 }
 0x722   :  { %9417 = vmatprep.mubr.msk.f32.mxu1 %vm9765_vm13, %v15319_v3  ;;  %9523 = vmatpush3.bf16.msra.mxu1 %v9522_v6 }
 0x723   :  { %9524 = vmatprep.subr.bf16.mxu1 %v9764_v60 }
 0x726   :  { %9526 = vmatpush3.bf16.msra.mxu1 %v9525_v18 }
 0x727   :  { %9527 = vmatprep.subr.bf16.mxu1 %v9764_v60 }
 0x7f4   :  { %v9134_v2 = vpop.f32.mrb[16].mxu1 }
 0x7f5   :  { %v9135_v48 = vpop.f32.mrb[17].mxu1 }
 0x7f6   :  { %v9136_v41 = vadd.f32 %v9135_v48, %v9134_v2 }
 0x7f8   :  { %v7838_v49 = vadd.f32 %v9136_v41, %v8918_v17 }
 0x7fa   :  { %v7841_v30 = vmax.f32 %v7838_v49, 0.0 }
 0x7fc   :  { %9418 = vmatmul.mubr.msk.f32.vlgmr.msra.gmra.mrb[18].mxu1 %vm7851_vm14, %v7841_v30 }
 0x7fd   :  { %9529 = vmatpush3.bf16.msra.mxu1 %v9528_v45  ;;  %9428 = vmatprep.mubr.msk.f32.mxu1 %vm9765_vm13, %v15319_v3 }
 0x7fe   :  { %9530 = vmatprep.subr.bf16.mxu1 %v9764_v60 }
 0x801   :  { %9532 = vmatpush3.bf16.msra.mxu1 %v9531_v57 }
 0x802   :  { %9533 = vmatprep.subr.bf16.mxu1 %v9764_v60 }
 0x8cf   :  { %v7921_v9 = vpop.f32.mrb[18].mxu1 }
 0x8d0   :  { %v7922_v16 = vadd.f32 %v8920_v47, %v7921_v9  ;;  %v9419_v29 = vpop.f32.mrb[19].mxu1 }
 0x8d2   :  { %v7925_v8 = vmax.f32 %v7922_v16, 0.0 }
 0x8d4   :  { %9429 = vmatmul.mubr.msk.f32.vlgmr.msra.gmra.mrb[20].mxu1 %vm7851_vm14, %v7925_v8 }
 0x8d5   :  { %9535 = vmatpush3.bf16.msra.mxu1 %v9534_v5  ;;  %9439 = vmatprep.mubr.msk.f32.mxu1 %vm9765_vm13, %v15319_v3 }
 0x8d6   :  { %9536 = vmatprep.subr.bf16.mxu1 %v9764_v60 }
 0x8d9   :  { %9538 = vmatpush3.bf16.msra.mxu1 %v9537_v36 }
 0x8da   :  { %9539 = vmatprep.subr.bf16.mxu1 %v9764_v60 }
 0x9a7   :  { %v8005_v0 = vpop.f32.mrb[20].mxu1 }
 0x9a8   :  { %v8006_v24 = vadd.f32 %v8926_v21, %v8005_v0  ;;  %v9430_v11 = vpop.f32.mrb[21].mxu1 }
 0x9aa   :  { %v8009_v19 = vmax.f32 %v8006_v24, 0.0 }
 0x9ac   :  { %9440 = vmatmul.mubr.msk.f32.vlgmr.msra.gmra.mrb[22].mxu1 %vm7851_vm14, %v8009_v19 }
 0x9ad   :  { %9541 = vmatpush3.bf16.msra.mxu1 %v9540_v38  ;;  %9450 = vmatprep.mubr.msk.f32.mxu1 %vm9765_vm13, %v15319_v3 }
 0x9ae   :  { %9542 = vmatprep.subr.bf16.mxu1 %v9764_v60 }
 0x9b1   :  { %9544 = vmatpush3.bf16.msra.mxu1 %v9543_v40 }
 0xa7f   :  { %v8089_v59 = vpop.f32.mrb[22].mxu1 }
 0xa80   :  { %v8090_v7 = vadd.f32 %v8932_v37, %v8089_v59  ;;  %v9441_v62 = vpop.f32.mrb[23].mxu1 }
 0xa82   :  { %v8093_v4 = vmax.f32 %v8090_v7, 0.0 }
 0xa84   :  { %9451 = vmatmul.mubr.msk.f32.vlgmr.msra.gmra.mrb[24].mxu1 %vm7851_vm14, %v8093_v4 }
 0xb57   :  { %v8173_v63 = vpop.f32.mrb[24].mxu1 }
 0xb58   :  { %v8174_v55 = vadd.f32 %v8938_v1, %v8173_v63  ;;  %v9452_v52 = vpop.f32.mrb[25].mxu1 }
 0xb5a   :  { %8178 = vst.msk [vmem:[#allocation6] sm:$0x3] %vm8177_vm15, %v8174_v55 }
 0xb5b   :  { %9741 = shalt.err (!%p9738_p4)
}
 0xb5c   :  { %s9742_s16 = scalar_lea.hbm %s14735_s5, 32 }
 0xb5d   :  { %p9743_p5 = scmp.ne.s32.totalorder %s14735_s5, %s9742_s16  ;;  %p9746_p6 = scmp.lt.u32.totalorder %s9742_s16, %s14735_s5 }
 0xb5f   :  { %p9748_p7 = pnand %p9746_p6, %p9743_p5 }
 0xb61   :  { %9751 = shalt.err (!%p9748_p7)
}
 0xb62   :  { %8188 = dma.vmem_to_hbm [thread:$0]  %s8186_s14, 32, %s14735_s5, [#allocation7]  }
 0xb63   :  { %9752 = dma.done.wait [#allocation7], 32  }
 0xb64   :  { %9753 = vsyncadd [#allocation7], 4294967264 }
 0xb65   :  { %8192 = vsyncpa [#allocation7], 1 }

</bundles_post_ra>
